<compile_context>
chip_gen: v7x
topology: tpu7x:2x2x1
jax: 0.10.0
libtpu: 0.0.40
codegen_flags: <defaults>
</compile_context>

<pallas_src>
import functools
import math

import jax
import jax.numpy as jnp
import numpy as np
from jax.experimental import pallas as pl
from jax.experimental.pallas import tpu as pltpu


MARGIN = 128  # lane margin around the flat padded activation (>= 2*Wp + 2 for all stages)


# ----------------------------------------------------------------------------
# In-kernel helpers
# ----------------------------------------------------------------------------
def _elu(x):
    # ELU(alpha=1).  exp(min(x,0)) avoids overflow on the positive branch and keeps the
    # exp on the otherwise-idle EUP slot.
    # TODO(synk): switch to jnp.expm1 once its Mosaic lowering is confirmed.
    return jnp.where(x > 0.0, x, jnp.exp(jnp.minimum(x, 0.0)) - 1.0)


def _conv_dil2(src_ref, cols_ref, w, b, *, wp, m_pad, cin):
    """One dilated 3x3 conv (pad=2, dil=2) + bias + ELU on a flat padded activation.

    src_ref : (cin, MARGIN + m_pad + MARGIN) ref; lanes [MARGIN, MARGIN+m_pad) hold the
              zero-padded activation flattened as (n, hp, wp).  Margins only need to be
              finite (they only feed output positions that are discarded/masked).
    cols_ref: (9*cin, m_pad) VMEM scratch for the im2col column matrix.
    w, b    : (cout, 9*cin) bf16 packed weights, (cout, 1) f32 bias.
    Returns (cout, m_pad) f32 on the same padded grid (values at pad positions are
    garbage and must be masked or discarded by the caller).
    """
    t = 0
    for ki in range(3):
        for kj in range(3):
            off = MARGIN + (2 * ki - 2) * wp + (2 * kj - 2)   # static lane offset
            cols_ref[pl.ds(t * cin, cin), :] = src_ref[:, pl.ds(off, m_pad)]
            t += 1
    acc = jnp.dot(w, cols_ref[...], preferred_element_type=jnp.float32)
    acc = acc + b
    return _elu(acc)


def _conv_kernel(x_ref, w_ref, b_ref, o_ref, cols_ref, *, wp, m_pad, cin):
    """Single dilated conv stage (conv3 / conv4 / conv5)."""
    h = _conv_dil2(x_ref, cols_ref, w_ref[...], b_ref[...], wp=wp, m_pad=m_pad, cin=cin)
    o_ref[...] = h.astype(o_ref.dtype)


def _double_conv_kernel(x_ref, mask_ref, w1_ref, b1_ref, w2_ref, b2_ref,
                        o_ref, cols_ref, h_ref, *, wp, m_pad, cin):
    """conv1 + ELU + conv2 + ELU fused; the intermediate stays in VMEM scratch."""
    h1 = _conv_dil2(x_ref, cols_ref, w1_ref[...], b1_ref[...],
                    wp=wp, m_pad=m_pad, cin=cin)
    # Zero the in-image padding ring so it acts as conv2's zero padding.
    h1 = h1 * mask_ref[...]
    h_ref[...] = jnp.zeros_like(h_ref)                     # finite margins
    h_ref[:, pl.ds(MARGIN, m_pad)] = h1.astype(h_ref.dtype)
    h2 = _conv_dil2(h_ref, cols_ref, w2_ref[...], b2_ref[...],
                    wp=wp, m_pad=m_pad, cin=cin)
    o_ref[...] = h2.astype(o_ref.dtype)


# ----------------------------------------------------------------------------
# Plain-JAX glue (tiny XLA ops between the pallas stages)
# ----------------------------------------------------------------------------
def _avg_pool_2x2_nchw(x):
    n, c, h, w = x.shape
    return x.reshape(n, c, h // 2, 2, w // 2, 2).mean(axis=(3, 5))


def _max_pool_2x2_cf(x):                                   # x: (C, N, H, W)
    c, n, h, w = x.shape
    return x.reshape(c, n, h // 2, 2, w // 2, 2).max(axis=(3, 5))


def _to_ext_flat(x_cf):
    """(C, N, H, W) -> (C, MARGIN + N*(H+4)*(W+4) + MARGIN) zero-padded flat."""
    c, n, h, w = x_cf.shape
    hp, wp = h + 4, w + 4
    assert MARGIN >= 2 * wp + 2
    xp = jnp.pad(x_cf, ((0, 0), (0, 0), (2, 2), (2, 2)))
    return jnp.pad(xp.reshape(c, n * hp * wp), ((0, 0), (MARGIN, MARGIN)))


def _from_flat(y, n, h, w):
    """(C, N*(H+4)*(W+4)) padded-grid output -> interior (C, N, H, W)."""
    c = y.shape[0]
    hp, wp = h + 4, w + 4
    return y.reshape(c, n, hp, wp)[:, :, 2:2 + h, 2:2 + w]


def _interior_mask(n, h, w):
    """(1, N*(H+4)*(W+4)) f32 constant: 1 at interior pixels, 0 on the padding ring."""
    hp, wp = h + 4, w + 4
    m = np.zeros((hp, wp), np.float32)
    m[2:2 + h, 2:2 + w] = 1.0
    return jnp.asarray(np.tile(m[None], (n, 1, 1)).reshape(1, n * hp * wp))


def _full_spec(shape):
    return pl.BlockSpec(shape, lambda i, _s=len(shape): (0,) * _s)


# ----------------------------------------------------------------------------
# Pallas stage wrappers (grid=(1,) -> single full block per call)
# ----------------------------------------------------------------------------
def conv_stage(x_cf, w, b, *, out_dtype):
    """x_cf: (Cin, N, H, W) bf16 -> (Cout, N, H, W) out_dtype."""
    cin, n, hh, ww = x_cf.shape
    cout = w.shape[0]
    hp, wp = hh + 4, ww + 4
    m_pad = n * hp * wp
    x_ext = _to_ext_flat(x_cf)
    kern = functools.partial(_conv_kernel, wp=wp, m_pad=m_pad, cin=cin)
    y = pl.pallas_call(
        kern,
        out_shape=jax.ShapeDtypeStruct((cout, m_pad), out_dtype),
        grid_spec=pltpu.PrefetchScalarGridSpec(
            num_scalar_prefetch=0,
            grid=(1,),
            in_specs=[_full_spec((cin, m_pad + 2 * MARGIN)),
                      _full_spec((cout, 9 * cin)),
                      _full_spec((cout, 1))],
            out_specs=_full_spec((cout, m_pad)),
            scratch_shapes=[pltpu.VMEM((9 * cin, m_pad), jnp.bfloat16)]),
        compiler_params=pltpu.CompilerParams(dimension_semantics=("arbitrary",)),
    )(x_ext, w, b)
    return _from_flat(y, n, hh, ww)


def conv_stage_double(x_cf, w1, b1, w2, b2, *, out_dtype):
    """Fused conv1+conv2 (both Cin->Cin at the same spatial resolution)."""
    cin, n, hh, ww = x_cf.shape
    cmid, cout = w1.shape[0], w2.shape[0]
    assert cmid == cin                                     # scratch layout reuse
    hp, wp = hh + 4, ww + 4
    m_pad = n * hp * wp
    x_ext = _to_ext_flat(x_cf)
    mask = _interior_mask(n, hh, ww)
    kern = functools.partial(_double_conv_kernel, wp=wp, m_pad=m_pad, cin=cin)
    y = pl.pallas_call(
        kern,
        out_shape=jax.ShapeDtypeStruct((cout, m_pad), out_dtype),
        grid_spec=pltpu.PrefetchScalarGridSpec(
            num_scalar_prefetch=0,
            grid=(1,),
            in_specs=[_full_spec((cin, m_pad + 2 * MARGIN)),
                      _full_spec((1, m_pad)),
                      _full_spec((cmid, 9 * cin)),
                      _full_spec((cmid, 1)),
                      _full_spec((cout, 9 * cmid)),
                      _full_spec((cout, 1))],
            out_specs=_full_spec((cout, m_pad)),
            scratch_shapes=[pltpu.VMEM((9 * cin, m_pad), jnp.bfloat16),
                            pltpu.VMEM((cin, m_pad + 2 * MARGIN), jnp.bfloat16)]),
        compiler_params=pltpu.CompilerParams(dimension_semantics=("arbitrary",)),
    )(x_ext, mask, w1, b1, w2, b2)
    return _from_flat(y, n, hh, ww)


# ----------------------------------------------------------------------------
# Net / Net_final forward
# ----------------------------------------------------------------------------
def net_forward(x_nchw, pp):
    """Per-instance Net forward: (Ninst, 16, H, W) -> (64, Ninst) features."""
    n, c, h, w = x_nchw.shape
    assert c == 16 and h % 16 == 0 and w % 16 == 0
    # TODO(synk): `block_shared` is an external module passed into Net(...) and is not
    # defined in the spec; modeled as identity producing the 16-channel map.
    x = _avg_pool_2x2_nchw(x_nchw)                              # (N,16,H/2,W/2) f32
    x = jnp.transpose(x, (1, 0, 2, 3)).astype(jnp.bfloat16)     # channels-first-of-all
    x = conv_stage_double(x, pp['conv1_w'], pp['conv1_b'],
                          pp['conv2_w'], pp['conv2_b'], out_dtype=jnp.bfloat16)
    x = _max_pool_2x2_cf(x)
    x = conv_stage(x, pp['conv3_w'], pp['conv3_b'], out_dtype=jnp.bfloat16)
    x = _max_pool_2x2_cf(x)
    x = conv_stage(x, pp['conv4_w'], pp['conv4_b'], out_dtype=jnp.bfloat16)
    x = _max_pool_2x2_cf(x)
    x = conv_stage(x, pp['conv5_w'], pp['conv5_b'], out_dtype=jnp.float32)
    # conv5_drop is defined in the PyTorch module but never applied in forward().
    feats = x.mean(axis=(2, 3))                                 # adaptive_avg_pool2d(1)
    return jax.nn.elu(feats)                                    # (64, Ninst) f32


def net_final_forward(y, pp):
    """y: (B_bags, n_inst, 16, H, W) -> logits (B_bags, 2).

    The PyTorch per-bag loop is batched: Net is per-instance, so running all B*n_inst
    instances at once and max-reducing per bag is exactly equivalent."""
    b, i, c, h, w = y.shape
    feats = net_forward(y.reshape(b * i, c, h, w), pp)          # (64, B*I)
    feats = feats.reshape(64, b, i).max(axis=2)                 # per-bag max -> (64, B)
    # fc1/fc2 tail (lane width = B = 2) in plain jnp; a pallas_call here is pure
    # launch overhead.  fc1_drop is defined but never applied in forward().
    hfc = jax.nn.elu(pp['fc1_w'] @ feats + pp['fc1_b'][:, None])    # (20, B)
    out = pp['fc2_w'] @ hfc + pp['fc2_b'][:, None]                  # (2, B)
    return out.T                                                    # (B, 2)


# ----------------------------------------------------------------------------
# Deterministic synthetic init (xavier_uniform(gain=relu), bias = 0.1) + one-time pack
# ----------------------------------------------------------------------------
def init_params(key):
    gain = math.sqrt(2.0)

    def conv_w(k, cout, cin):
        bound = gain * math.sqrt(6.0 / (cin * 9 + cout * 9))
        return jax.random.uniform(k, (cout, cin, 3, 3), jnp.float32, -bound, bound)

    def fc_w(k, cout, cin):
        bound = gain * math.sqrt(6.0 / (cin + cout))
        return jax.random.uniform(k, (cout, cin), jnp.float32, -bound, bound)

    ks = jax.random.split(key, 7)
    bias = lambda n: jnp.full((n,), 0.1, jnp.float32)
    return {
        'conv1_w': conv_w(ks[0], 16, 16), 'conv1_b': bias(16),
        'conv2_w': conv_w(ks[1], 16, 16), 'conv2_b': bias(16),
        'conv3_w': conv_w(ks[2], 32, 16), 'conv3_b': bias(32),
        'conv4_w': conv_w(ks[3], 32, 32), 'conv4_b': bias(32),
        'conv5_w': conv_w(ks[4], 64, 32), 'conv5_b': bias(64),
        'fc1_w': fc_w(ks[5], 20, 64), 'fc1_b': bias(20),
        'fc2_w': fc_w(ks[6], 2, 20), 'fc2_b': bias(2),
    }


def pack_params(p):
    """One-time packing (outside the per-step forward): conv weights -> (Cout, 9*Cin)
    bf16 with column order (ki, kj, ci) matching the in-kernel im2col row order;
    biases -> (Cout, 1) f32.  FC params stay f32."""
    def pk_w(w):
        return jnp.transpose(w, (0, 2, 3, 1)).reshape(w.shape[0], -1).astype(jnp.bfloat16)

    def pk_b(b):
        return b.reshape(-1, 1).astype(jnp.float32)

    out = dict(p)
    for name in ('conv1', 'conv2', 'conv3', 'conv4', 'conv5'):
        out[name + '_w'] = pk_w(p[name + '_w'])
        out[name + '_b'] = pk_b(p[name + '_b'])
    return out


if __name__ == "__main__":
    key = jax.random.PRNGKey(0)
    kx, kp = jax.random.split(key)

    # y: (bags, instances per bag, channels, H, W); 32x32 survives the 4 halvings.
    B, I, C, H, W = 2, 3, 16, 32, 32
    y = jax.random.normal(kx, (B, I, C, H, W), jnp.float32)
    params = pack_params(init_params(kp))      # weights pre-packed once (review item)

    fwd = jax.jit(net_final_forward)
    out = jax.block_until_ready(fwd(y, params))

    assert out.shape == (B, 2)
    assert bool(jnp.all(jnp.isfinite(out)))
    print("KERNEL_OK")
</pallas_src>

<mosaic_0001>
module attributes {stable_mosaic.version = 11 : i64} {
  func.func @_double_conv_kernel(%arg0: i32, %arg1: memref<16x2656xbf16, #tpu.memory_space<vmem>>, %arg2: memref<1x2400xf32, #tpu.memory_space<vmem>>, %arg3: memref<16x144xbf16, #tpu.memory_space<vmem>>, %arg4: memref<16x1xf32, #tpu.memory_space<vmem>>, %arg5: memref<16x144xbf16, #tpu.memory_space<vmem>>, %arg6: memref<16x1xf32, #tpu.memory_space<vmem>>, %arg7: memref<16x2400xbf16, #tpu.memory_space<vmem>>, %arg8: memref<144x2400xbf16, #tpu.memory_space<vmem>>, %arg9: memref<16x2656xbf16, #tpu.memory_space<vmem>>) attributes {dimension_semantics = [#tpu.dimension_semantics<arbitrary>], iteration_bounds = array<i64: 1>, scalar_prefetch = 0 : i64, scratch_operands = 2 : i64, tpu.core_type = #tpu.core_type<tc>, window_params = [{pipeline_mode = #tpu.pipeline_mode<synchronous>, transform_indices = @transform_0, window_bounds = array<i64: 16, 2656>}, {pipeline_mode = #tpu.pipeline_mode<synchronous>, transform_indices = @transform_1, window_bounds = array<i64: 1, 2400>}, {pipeline_mode = #tpu.pipeline_mode<synchronous>, transform_indices = @transform_2, window_bounds = array<i64: 16, 144>}, {pipeline_mode = #tpu.pipeline_mode<synchronous>, transform_indices = @transform_3, window_bounds = array<i64: 16, 1>}, {pipeline_mode = #tpu.pipeline_mode<synchronous>, transform_indices = @transform_4, window_bounds = array<i64: 16, 144>}, {pipeline_mode = #tpu.pipeline_mode<synchronous>, transform_indices = @transform_5, window_bounds = array<i64: 16, 1>}, {pipeline_mode = #tpu.pipeline_mode<synchronous>, transform_indices = @transform_6, window_bounds = array<i64: 16, 2400>}]} {
    %c0 = arith.constant 0 : index
    %c0_0 = arith.constant 0 : index
    %0 = vector.load %arg3[%c0, %c0_0] : memref<16x144xbf16, #tpu.memory_space<vmem>>, vector<16x144xbf16>
    %c0_1 = arith.constant 0 : index
    %c0_2 = arith.constant 0 : index
    %1 = vector.load %arg4[%c0_1, %c0_2] : memref<16x1xf32, #tpu.memory_space<vmem>>, vector<16x1xf32>
    %c0_3 = arith.constant 0 : index
    %c86 = arith.constant 86 : index
    %2 = vector.load %arg1[%c0_3, %c86] : memref<16x2656xbf16, #tpu.memory_space<vmem>>, vector<16x2400xbf16>
    %c0_4 = arith.constant 0 : index
    %c0_5 = arith.constant 0 : index
    %3 = vector.load %arg8[%c0_4, %c0_5] : memref<144x2400xbf16, #tpu.memory_space<vmem>>, vector<16x2400xbf16>
    tpu.vector_store %arg8[%c0_4, %c0_5], %2 {strides = array<i32>} : memref<144x2400xbf16, #tpu.memory_space<vmem>>, vector<16x2400xbf16>,
    %c0_6 = arith.constant 0 : index
    %c88 = arith.constant 88 : index
    %4 = vector.load %arg1[%c0_6, %c88] : memref<16x2656xbf16, #tpu.memory_space<vmem>>, vector<16x2400xbf16>
    %c16 = arith.constant 16 : index
    %c0_7 = arith.constant 0 : index
    %5 = vector.load %arg8[%c16, %c0_7] : memref<144x2400xbf16, #tpu.memory_space<vmem>>, vector<16x2400xbf16>
    tpu.vector_store %arg8[%c16, %c0_7], %4 {strides = array<i32>} : memref<144x2400xbf16, #tpu.memory_space<vmem>>, vector<16x2400xbf16>,
    %c0_8 = arith.constant 0 : index
    %c90 = arith.constant 90 : index
    %6 = vector.load %arg1[%c0_8, %c90] : memref<16x2656xbf16, #tpu.memory_space<vmem>>, vector<16x2400xbf16>
    %c32 = arith.constant 32 : index
    %c0_9 = arith.constant 0 : index
    %7 = vector.load %arg8[%c32, %c0_9] : memref<144x2400xbf16, #tpu.memory_space<vmem>>, vector<16x2400xbf16>
    tpu.vector_store %arg8[%c32, %c0_9], %6 {strides = array<i32>} : memref<144x2400xbf16, #tpu.memory_space<vmem>>, vector<16x2400xbf16>,
    %c0_10 = arith.constant 0 : index
    %c126 = arith.constant 126 : index
    %8 = vector.load %arg1[%c0_10, %c126] : memref<16x2656xbf16, #tpu.memory_space<vmem>>, vector<16x2400xbf16>
    %c48 = arith.constant 48 : index
    %c0_11 = arith.constant 0 : index
    %9 = vector.load %arg8[%c48, %c0_11] : memref<144x2400xbf16, #tpu.memory_space<vmem>>, vector<16x2400xbf16>
    tpu.vector_store %arg8[%c48, %c0_11], %8 {strides = array<i32>} : memref<144x2400xbf16, #tpu.memory_space<vmem>>, vector<16x2400xbf16>,
    %c0_12 = arith.constant 0 : index
    %c128 = arith.constant 128 : index
    %10 = vector.load %arg1[%c0_12, %c128] : memref<16x2656xbf16, #tpu.memory_space<vmem>>, vector<16x2400xbf16>
    %c64 = arith.constant 64 : index
    %c0_13 = arith.constant 0 : index
    %11 = vector.load %arg8[%c64, %c0_13] : memref<144x2400xbf16, #tpu.memory_space<vmem>>, vector<16x2400xbf16>
    tpu.vector_store %arg8[%c64, %c0_13], %10 {strides = array<i32>} : memref<144x2400xbf16, #tpu.memory_space<vmem>>, vector<16x2400xbf16>,
    %c0_14 = arith.constant 0 : index
    %c130 = arith.constant 130 : index
    %12 = vector.load %arg1[%c0_14, %c130] : memref<16x2656xbf16, #tpu.memory_space<vmem>>, vector<16x2400xbf16>
    %c80 = arith.constant 80 : index
    %c0_15 = arith.constant 0 : index
    %13 = vector.load %arg8[%c80, %c0_15] : memref<144x2400xbf16, #tpu.memory_space<vmem>>, vector<16x2400xbf16>
    tpu.vector_store %arg8[%c80, %c0_15], %12 {strides = array<i32>} : memref<144x2400xbf16, #tpu.memory_space<vmem>>, vector<16x2400xbf16>,
    %c0_16 = arith.constant 0 : index
    %c166 = arith.constant 166 : index
    %14 = vector.load %arg1[%c0_16, %c166] : memref<16x2656xbf16, #tpu.memory_space<vmem>>, vector<16x2400xbf16>
    %c96 = arith.constant 96 : index
    %c0_17 = arith.constant 0 : index
    %15 = vector.load %arg8[%c96, %c0_17] : memref<144x2400xbf16, #tpu.memory_space<vmem>>, vector<16x2400xbf16>
    tpu.vector_store %arg8[%c96, %c0_17], %14 {strides = array<i32>} : memref<144x2400xbf16, #tpu.memory_space<vmem>>, vector<16x2400xbf16>,
    %c0_18 = arith.constant 0 : index
    %c168 = arith.constant 168 : index
    %16 = vector.load %arg1[%c0_18, %c168] : memref<16x2656xbf16, #tpu.memory_space<vmem>>, vector<16x2400xbf16>
    %c112 = arith.constant 112 : index
    %c0_19 = arith.constant 0 : index
    %17 = vector.load %arg8[%c112, %c0_19] : memref<144x2400xbf16, #tpu.memory_space<vmem>>, vector<16x2400xbf16>
    tpu.vector_store %arg8[%c112, %c0_19], %16 {strides = array<i32>} : memref<144x2400xbf16, #tpu.memory_space<vmem>>, vector<16x2400xbf16>,
    %c0_20 = arith.constant 0 : index
    %c170 = arith.constant 170 : index
    %18 = vector.load %arg1[%c0_20, %c170] : memref<16x2656xbf16, #tpu.memory_space<vmem>>, vector<16x2400xbf16>
    %c128_21 = arith.constant 128 : index
    %c0_22 = arith.constant 0 : index
    %19 = vector.load %arg8[%c128_21, %c0_22] : memref<144x2400xbf16, #tpu.memory_space<vmem>>, vector<16x2400xbf16>
    tpu.vector_store %arg8[%c128_21, %c0_22], %18 {strides = array<i32>} : memref<144x2400xbf16, #tpu.memory_space<vmem>>, vector<16x2400xbf16>,
    %c0_23 = arith.constant 0 : index
    %c0_24 = arith.constant 0 : index
    %20 = vector.load %arg8[%c0_23, %c0_24] : memref<144x2400xbf16, #tpu.memory_space<vmem>>, vector<144x2400xbf16>
    %cst = arith.constant dense<0.000000e+00> : vector<16x2400xf32>
    %21 = tpu.matmul %0, %20, %cst {dimension_numbers = #tpu.dot_dimension_numbers<[1], [0], [0], [1], [0, 0, 1, 1], [], []>} : vector<16x144xbf16>, vector<144x2400xbf16>, vector<16x2400xf32> -> vector<16x2400xf32>
    %22 = vector.broadcast %1 : vector<16x1xf32> to vector<16x2400xf32>
    %23 = arith.addf %21, %22 : vector<16x2400xf32>
    %cst_25 = arith.constant 0.000000e+00 : f32
    %24 = vector.broadcast %cst_25 : f32 to vector<16x2400xf32>
    %25 = arith.cmpf ogt, %23, %24 : vector<16x2400xf32>
    %cst_26 = arith.constant 0.000000e+00 : f32
    %26 = vector.broadcast %cst_26 : f32 to vector<16x2400xf32>
    %27 = arith.minimumf %23, %26 : vector<16x2400xf32>
    %28 = math.exp %27 : vector<16x2400xf32>
    %cst_27 = arith.constant 1.000000e+00 : f32
    %29 = vector.broadcast %cst_27 : f32 to vector<16x2400xf32>
    %30 = arith.subf %28, %29 : vector<16x2400xf32>
    %31 = arith.select %25, %23, %30 : vector<16x2400xi1>, vector<16x2400xf32>
    %c0_28 = arith.constant 0 : index
    %c0_29 = arith.constant 0 : index
    %32 = vector.load %arg2[%c0_28, %c0_29] : memref<1x2400xf32, #tpu.memory_space<vmem>>, vector<1x2400xf32>
    %33 = vector.broadcast %32 : vector<1x2400xf32> to vector<16x2400xf32>
    %34 = arith.mulf %31, %33 : vector<16x2400xf32>
    %cst_30 = arith.constant 0.000000e+00 : bf16
    %35 = vector.broadcast %cst_30 : bf16 to vector<16x2656xbf16>
    %c0_31 = arith.constant 0 : index
    %c0_32 = arith.constant 0 : index
    %36 = vector.load %arg9[%c0_31, %c0_32] : memref<16x2656xbf16, #tpu.memory_space<vmem>>, vector<16x2656xbf16>
    tpu.vector_store %arg9[%c0_31, %c0_32], %35 {strides = array<i32>} : memref<16x2656xbf16, #tpu.memory_space<vmem>>, vector<16x2656xbf16>,
    %37 = arith.truncf %34 : vector<16x2400xf32> to vector<16x2400xbf16>
    %c0_33 = arith.constant 0 : index
    %c128_34 = arith.constant 128 : index
    %38 = vector.load %arg9[%c0_33, %c128_34] : memref<16x2656xbf16, #tpu.memory_space<vmem>>, vector<16x2400xbf16>
    tpu.vector_store %arg9[%c0_33, %c128_34], %37 {strides = array<i32>} : memref<16x2656xbf16, #tpu.memory_space<vmem>>, vector<16x2400xbf16>,
    %c0_35 = arith.constant 0 : index
    %c0_36 = arith.constant 0 : index
    %39 = vector.load %arg5[%c0_35, %c0_36] : memref<16x144xbf16, #tpu.memory_space<vmem>>, vector<16x144xbf16>
    %c0_37 = arith.constant 0 : index
    %c0_38 = arith.constant 0 : index
    %40 = vector.load %arg6[%c0_37, %c0_38] : memref<16x1xf32, #tpu.memory_space<vmem>>, vector<16x1xf32>
    %c0_39 = arith.constant 0 : index
    %c86_40 = arith.constant 86 : index
    %41 = vector.load %arg9[%c0_39, %c86_40] : memref<16x2656xbf16, #tpu.memory_space<vmem>>, vector<16x2400xbf16>
    %c0_41 = arith.constant 0 : index
    %c0_42 = arith.constant 0 : index
    %42 = vector.load %arg8[%c0_41, %c0_42] : memref<144x2400xbf16, #tpu.memory_space<vmem>>, vector<16x2400xbf16>
    tpu.vector_store %arg8[%c0_41, %c0_42], %41 {strides = array<i32>} : memref<144x2400xbf16, #tpu.memory_space<vmem>>, vector<16x2400xbf16>,
    %c0_43 = arith.constant 0 : index
    %c88_44 = arith.constant 88 : index
    %43 = vector.load %arg9[%c0_43, %c88_44] : memref<16x2656xbf16, #tpu.memory_space<vmem>>, vector<16x2400xbf16>
    %c16_45 = arith.constant 16 : index
    %c0_46 = arith.constant 0 : index
    %44 = vector.load %arg8[%c16_45, %c0_46] : memref<144x2400xbf16, #tpu.memory_space<vmem>>, vector<16x2400xbf16>
    tpu.vector_store %arg8[%c16_45, %c0_46], %43 {strides = array<i32>} : memref<144x2400xbf16, #tpu.memory_space<vmem>>, vector<16x2400xbf16>,
    %c0_47 = arith.constant 0 : index
    %c90_48 = arith.constant 90 : index
    %45 = vector.load %arg9[%c0_47, %c90_48] : memref<16x2656xbf16, #tpu.memory_space<vmem>>, vector<16x2400xbf16>
    %c32_49 = arith.constant 32 : index
    %c0_50 = arith.constant 0 : index
    %46 = vector.load %arg8[%c32_49, %c0_50] : memref<144x2400xbf16, #tpu.memory_space<vmem>>, vector<16x2400xbf16>
    tpu.vector_store %arg8[%c32_49, %c0_50], %45 {strides = array<i32>} : memref<144x2400xbf16, #tpu.memory_space<vmem>>, vector<16x2400xbf16>,
    %c0_51 = arith.constant 0 : index
    %c126_52 = arith.constant 126 : index
    %47 = vector.load %arg9[%c0_51, %c126_52] : memref<16x2656xbf16, #tpu.memory_space<vmem>>, vector<16x2400xbf16>
    %c48_53 = arith.constant 48 : index
    %c0_54 = arith.constant 0 : index
    %48 = vector.load %arg8[%c48_53, %c0_54] : memref<144x2400xbf16, #tpu.memory_space<vmem>>, vector<16x2400xbf16>
    tpu.vector_store %arg8[%c48_53, %c0_54], %47 {strides = array<i32>} : memref<144x2400xbf16, #tpu.memory_space<vmem>>, vector<16x2400xbf16>,
    %c0_55 = arith.constant 0 : index
    %c128_56 = arith.constant 128 : index
    %49 = vector.load %arg9[%c0_55, %c128_56] : memref<16x2656xbf16, #tpu.memory_space<vmem>>, vector<16x2400xbf16>
    %c64_57 = arith.constant 64 : index
    %c0_58 = arith.constant 0 : index
    %50 = vector.load %arg8[%c64_57, %c0_58] : memref<144x2400xbf16, #tpu.memory_space<vmem>>, vector<16x2400xbf16>
    tpu.vector_store %arg8[%c64_57, %c0_58], %49 {strides = array<i32>} : memref<144x2400xbf16, #tpu.memory_space<vmem>>, vector<16x2400xbf16>,
    %c0_59 = arith.constant 0 : index
    %c130_60 = arith.constant 130 : index
    %51 = vector.load %arg9[%c0_59, %c130_60] : memref<16x2656xbf16, #tpu.memory_space<vmem>>, vector<16x2400xbf16>
    %c80_61 = arith.constant 80 : index
    %c0_62 = arith.constant 0 : index
    %52 = vector.load %arg8[%c80_61, %c0_62] : memref<144x2400xbf16, #tpu.memory_space<vmem>>, vector<16x2400xbf16>
    tpu.vector_store %arg8[%c80_61, %c0_62], %51 {strides = array<i32>} : memref<144x2400xbf16, #tpu.memory_space<vmem>>, vector<16x2400xbf16>,
    %c0_63 = arith.constant 0 : index
    %c166_64 = arith.constant 166 : index
    %53 = vector.load %arg9[%c0_63, %c166_64] : memref<16x2656xbf16, #tpu.memory_space<vmem>>, vector<16x2400xbf16>
    %c96_65 = arith.constant 96 : index
    %c0_66 = arith.constant 0 : index
    %54 = vector.load %arg8[%c96_65, %c0_66] : memref<144x2400xbf16, #tpu.memory_space<vmem>>, vector<16x2400xbf16>
    tpu.vector_store %arg8[%c96_65, %c0_66], %53 {strides = array<i32>} : memref<144x2400xbf16, #tpu.memory_space<vmem>>, vector<16x2400xbf16>,
    %c0_67 = arith.constant 0 : index
    %c168_68 = arith.constant 168 : index
    %55 = vector.load %arg9[%c0_67, %c168_68] : memref<16x2656xbf16, #tpu.memory_space<vmem>>, vector<16x2400xbf16>
    %c112_69 = arith.constant 112 : index
    %c0_70 = arith.constant 0 : index
    %56 = vector.load %arg8[%c112_69, %c0_70] : memref<144x2400xbf16, #tpu.memory_space<vmem>>, vector<16x2400xbf16>
    tpu.vector_store %arg8[%c112_69, %c0_70], %55 {strides = array<i32>} : memref<144x2400xbf16, #tpu.memory_space<vmem>>, vector<16x2400xbf16>,
    %c0_71 = arith.constant 0 : index
    %c170_72 = arith.constant 170 : index
    %57 = vector.load %arg9[%c0_71, %c170_72] : memref<16x2656xbf16, #tpu.memory_space<vmem>>, vector<16x2400xbf16>
    %c128_73 = arith.constant 128 : index
    %c0_74 = arith.constant 0 : index
    %58 = vector.load %arg8[%c128_73, %c0_74] : memref<144x2400xbf16, #tpu.memory_space<vmem>>, vector<16x2400xbf16>
    tpu.vector_store %arg8[%c128_73, %c0_74], %57 {strides = array<i32>} : memref<144x2400xbf16, #tpu.memory_space<vmem>>, vector<16x2400xbf16>,
    %c0_75 = arith.constant 0 : index
    %c0_76 = arith.constant 0 : index
    %59 = vector.load %arg8[%c0_75, %c0_76] : memref<144x2400xbf16, #tpu.memory_space<vmem>>, vector<144x2400xbf16>
    %cst_77 = arith.constant dense<0.000000e+00> : vector<16x2400xf32>
    %60 = tpu.matmul %39, %59, %cst_77 {dimension_numbers = #tpu.dot_dimension_numbers<[1], [0], [0], [1], [0, 0, 1, 1], [], []>} : vector<16x144xbf16>, vector<144x2400xbf16>, vector<16x2400xf32> -> vector<16x2400xf32>
    %61 = vector.broadcast %40 : vector<16x1xf32> to vector<16x2400xf32>
    %62 = arith.addf %60, %61 : vector<16x2400xf32>
    %cst_78 = arith.constant 0.000000e+00 : f32
    %63 = vector.broadcast %cst_78 : f32 to vector<16x2400xf32>
    %64 = arith.cmpf ogt, %62, %63 : vector<16x2400xf32>
    %cst_79 = arith.constant 0.000000e+00 : f32
    %65 = vector.broadcast %cst_79 : f32 to vector<16x2400xf32>
    %66 = arith.minimumf %62, %65 : vector<16x2400xf32>
    %67 = math.exp %66 : vector<16x2400xf32>
    %cst_80 = arith.constant 1.000000e+00 : f32
    %68 = vector.broadcast %cst_80 : f32 to vector<16x2400xf32>
    %69 = arith.subf %67, %68 : vector<16x2400xf32>
    %70 = arith.select %64, %62, %69 : vector<16x2400xi1>, vector<16x2400xf32>
    %71 = arith.truncf %70 : vector<16x2400xf32> to vector<16x2400xbf16>
    %c0_81 = arith.constant 0 : index
    %c0_82 = arith.constant 0 : index
    %72 = vector.load %arg7[%c0_81, %c0_82] : memref<16x2400xbf16, #tpu.memory_space<vmem>>, vector<16x2400xbf16>
    tpu.vector_store %arg7[%c0_81, %c0_82], %71 {strides = array<i32>} : memref<16x2400xbf16, #tpu.memory_space<vmem>>, vector<16x2400xbf16>,
    return
  }
  func.func @transform_0(%arg0: i32) -> (i32, i32) {
    %c0_i32 = arith.constant 0 : i32
    %c0_i32_0 = arith.constant 0 : i32
    %c0_i32_1 = arith.constant 0 : i32
    return %c0_i32, %c0_i32_0 : i32, i32
  }
  func.func @transform_1(%arg0: i32) -> (i32, i32) {
    %c0_i32 = arith.constant 0 : i32
    %c0_i32_0 = arith.constant 0 : i32
    %c0_i32_1 = arith.constant 0 : i32
    return %c0_i32, %c0_i32_0 : i32, i32
  }
  func.func @transform_2(%arg0: i32) -> (i32, i32) {
    %c0_i32 = arith.constant 0 : i32
    %c0_i32_0 = arith.constant 0 : i32
    %c0_i32_1 = arith.constant 0 : i32
    return %c0_i32, %c0_i32_0 : i32, i32
  }
  func.func @transform_3(%arg0: i32) -> (i32, i32) {
    %c0_i32 = arith.constant 0 : i32
    %c0_i32_0 = arith.constant 0 : i32
    %c0_i32_1 = arith.constant 0 : i32
    return %c0_i32, %c0_i32_0 : i32, i32
  }
  func.func @transform_4(%arg0: i32) -> (i32, i32) {
    %c0_i32 = arith.constant 0 : i32
    %c0_i32_0 = arith.constant 0 : i32
    %c0_i32_1 = arith.constant 0 : i32
    return %c0_i32, %c0_i32_0 : i32, i32
  }
  func.func @transform_5(%arg0: i32) -> (i32, i32) {
    %c0_i32 = arith.constant 0 : i32
    %c0_i32_0 = arith.constant 0 : i32
    %c0_i32_1 = arith.constant 0 : i32
    return %c0_i32, %c0_i32_0 : i32, i32
  }
  func.func @transform_6(%arg0: i32) -> (i32, i32) {
    %c0_i32 = arith.constant 0 : i32
    %c0_i32_0 = arith.constant 0 : i32
    %c0_i32_1 = arith.constant 0 : i32
    return %c0_i32, %c0_i32_0 : i32, i32
  }
}

module attributes {stable_mosaic.version = 11 : i64} {
  func.func @_conv_kernel(%arg0: i32, %arg1: memref<16x1120xbf16, #tpu.memory_space<vmem>>, %arg2: memref<32x144xbf16, #tpu.memory_space<vmem>>, %arg3: memref<32x1xf32, #tpu.memory_space<vmem>>, %arg4: memref<32x864xbf16, #tpu.memory_space<vmem>>, %arg5: memref<144x864xbf16, #tpu.memory_space<vmem>>) attributes {dimension_semantics = [#tpu.dimension_semantics<arbitrary>], iteration_bounds = array<i64: 1>, scalar_prefetch = 0 : i64, scratch_operands = 1 : i64, tpu.core_type = #tpu.core_type<tc>, window_params = [{pipeline_mode = #tpu.pipeline_mode<synchronous>, transform_indices = @transform_0, window_bounds = array<i64: 16, 1120>}, {pipeline_mode = #tpu.pipeline_mode<synchronous>, transform_indices = @transform_1, window_bounds = array<i64: 32, 144>}, {pipeline_mode = #tpu.pipeline_mode<synchronous>, transform_indices = @transform_2, window_bounds = array<i64: 32, 1>}, {pipeline_mode = #tpu.pipeline_mode<synchronous>, transform_indices = @transform_3, window_bounds = array<i64: 32, 864>}]} {
    %c0 = arith.constant 0 : index
    %c0_0 = arith.constant 0 : index
    %0 = vector.load %arg2[%c0, %c0_0] : memref<32x144xbf16, #tpu.memory_space<vmem>>, vector<32x144xbf16>
    %c0_1 = arith.constant 0 : index
    %c0_2 = arith.constant 0 : index
    %1 = vector.load %arg3[%c0_1, %c0_2] : memref<32x1xf32, #tpu.memory_space<vmem>>, vector<32x1xf32>
    %c0_3 = arith.constant 0 : index
    %c102 = arith.constant 102 : index
    %2 = vector.load %arg1[%c0_3, %c102] : memref<16x1120xbf16, #tpu.memory_space<vmem>>, vector<16x864xbf16>
    %c0_4 = arith.constant 0 : index
    %c0_5 = arith.constant 0 : index
    %3 = vector.load %arg5[%c0_4, %c0_5] : memref<144x864xbf16, #tpu.memory_space<vmem>>, vector<16x864xbf16>
    tpu.vector_store %arg5[%c0_4, %c0_5], %2 {strides = array<i32>} : memref<144x864xbf16, #tpu.memory_space<vmem>>, vector<16x864xbf16>,
    %c0_6 = arith.constant 0 : index
    %c104 = arith.constant 104 : index
    %4 = vector.load %arg1[%c0_6, %c104] : memref<16x1120xbf16, #tpu.memory_space<vmem>>, vector<16x864xbf16>
    %c16 = arith.constant 16 : index
    %c0_7 = arith.constant 0 : index
    %5 = vector.load %arg5[%c16, %c0_7] : memref<144x864xbf16, #tpu.memory_space<vmem>>, vector<16x864xbf16>
    tpu.vector_store %arg5[%c16, %c0_7], %4 {strides = array<i32>} : memref<144x864xbf16, #tpu.memory_space<vmem>>, vector<16x864xbf16>,
    %c0_8 = arith.constant 0 : index
    %c106 = arith.constant 106 : index
    %6 = vector.load %arg1[%c0_8, %c106] : memref<16x1120xbf16, #tpu.memory_space<vmem>>, vector<16x864xbf16>
    %c32 = arith.constant 32 : index
    %c0_9 = arith.constant 0 : index
    %7 = vector.load %arg5[%c32, %c0_9] : memref<144x864xbf16, #tpu.memory_space<vmem>>, vector<16x864xbf16>
    tpu.vector_store %arg5[%c32, %c0_9], %6 {strides = array<i32>} : memref<144x864xbf16, #tpu.memory_space<vmem>>, vector<16x864xbf16>,
    %c0_10 = arith.constant 0 : index
    %c126 = arith.constant 126 : index
    %8 = vector.load %arg1[%c0_10, %c126] : memref<16x1120xbf16, #tpu.memory_space<vmem>>, vector<16x864xbf16>
    %c48 = arith.constant 48 : index
    %c0_11 = arith.constant 0 : index
    %9 = vector.load %arg5[%c48, %c0_11] : memref<144x864xbf16, #tpu.memory_space<vmem>>, vector<16x864xbf16>
    tpu.vector_store %arg5[%c48, %c0_11], %8 {strides = array<i32>} : memref<144x864xbf16, #tpu.memory_space<vmem>>, vector<16x864xbf16>,
    %c0_12 = arith.constant 0 : index
    %c128 = arith.constant 128 : index
    %10 = vector.load %arg1[%c0_12, %c128] : memref<16x1120xbf16, #tpu.memory_space<vmem>>, vector<16x864xbf16>
    %c64 = arith.constant 64 : index
    %c0_13 = arith.constant 0 : index
    %11 = vector.load %arg5[%c64, %c0_13] : memref<144x864xbf16, #tpu.memory_space<vmem>>, vector<16x864xbf16>
    tpu.vector_store %arg5[%c64, %c0_13], %10 {strides = array<i32>} : memref<144x864xbf16, #tpu.memory_space<vmem>>, vector<16x864xbf16>,
    %c0_14 = arith.constant 0 : index
    %c130 = arith.constant 130 : index
    %12 = vector.load %arg1[%c0_14, %c130] : memref<16x1120xbf16, #tpu.memory_space<vmem>>, vector<16x864xbf16>
    %c80 = arith.constant 80 : index
    %c0_15 = arith.constant 0 : index
    %13 = vector.load %arg5[%c80, %c0_15] : memref<144x864xbf16, #tpu.memory_space<vmem>>, vector<16x864xbf16>
    tpu.vector_store %arg5[%c80, %c0_15], %12 {strides = array<i32>} : memref<144x864xbf16, #tpu.memory_space<vmem>>, vector<16x864xbf16>,
    %c0_16 = arith.constant 0 : index
    %c150 = arith.constant 150 : index
    %14 = vector.load %arg1[%c0_16, %c150] : memref<16x1120xbf16, #tpu.memory_space<vmem>>, vector<16x864xbf16>
    %c96 = arith.constant 96 : index
    %c0_17 = arith.constant 0 : index
    %15 = vector.load %arg5[%c96, %c0_17] : memref<144x864xbf16, #tpu.memory_space<vmem>>, vector<16x864xbf16>
    tpu.vector_store %arg5[%c96, %c0_17], %14 {strides = array<i32>} : memref<144x864xbf16, #tpu.memory_space<vmem>>, vector<16x864xbf16>,
    %c0_18 = arith.constant 0 : index
    %c152 = arith.constant 152 : index
    %16 = vector.load %arg1[%c0_18, %c152] : memref<16x1120xbf16, #tpu.memory_space<vmem>>, vector<16x864xbf16>
    %c112 = arith.constant 112 : index
    %c0_19 = arith.constant 0 : index
    %17 = vector.load %arg5[%c112, %c0_19] : memref<144x864xbf16, #tpu.memory_space<vmem>>, vector<16x864xbf16>
    tpu.vector_store %arg5[%c112, %c0_19], %16 {strides = array<i32>} : memref<144x864xbf16, #tpu.memory_space<vmem>>, vector<16x864xbf16>,
    %c0_20 = arith.constant 0 : index
    %c154 = arith.constant 154 : index
    %18 = vector.load %arg1[%c0_20, %c154] : memref<16x1120xbf16, #tpu.memory_space<vmem>>, vector<16x864xbf16>
    %c128_21 = arith.constant 128 : index
    %c0_22 = arith.constant 0 : index
    %19 = vector.load %arg5[%c128_21, %c0_22] : memref<144x864xbf16, #tpu.memory_space<vmem>>, vector<16x864xbf16>
    tpu.vector_store %arg5[%c128_21, %c0_22], %18 {strides = array<i32>} : memref<144x864xbf16, #tpu.memory_space<vmem>>, vector<16x864xbf16>,
    %c0_23 = arith.constant 0 : index
    %c0_24 = arith.constant 0 : index
    %20 = vector.load %arg5[%c0_23, %c0_24] : memref<144x864xbf16, #tpu.memory_space<vmem>>, vector<144x864xbf16>
    %cst = arith.constant dense<0.000000e+00> : vector<32x864xf32>
    %21 = tpu.matmul %0, %20, %cst {dimension_numbers = #tpu.dot_dimension_numbers<[1], [0], [0], [1], [0, 0, 1, 1], [], []>} : vector<32x144xbf16>, vector<144x864xbf16>, vector<32x864xf32> -> vector<32x864xf32>
    %22 = vector.broadcast %1 : vector<32x1xf32> to vector<32x864xf32>
    %23 = arith.addf %21, %22 : vector<32x864xf32>
    %cst_25 = arith.constant 0.000000e+00 : f32
    %24 = vector.broadcast %cst_25 : f32 to vector<32x864xf32>
    %25 = arith.cmpf ogt, %23, %24 : vector<32x864xf32>
    %cst_26 = arith.constant 0.000000e+00 : f32
    %26 = vector.broadcast %cst_26 : f32 to vector<32x864xf32>
    %27 = arith.minimumf %23, %26 : vector<32x864xf32>
    %28 = math.exp %27 : vector<32x864xf32>
    %cst_27 = arith.constant 1.000000e+00 : f32
    %29 = vector.broadcast %cst_27 : f32 to vector<32x864xf32>
    %30 = arith.subf %28, %29 : vector<32x864xf32>
    %31 = arith.select %25, %23, %30 : vector<32x864xi1>, vector<32x864xf32>
    %32 = arith.truncf %31 : vector<32x864xf32> to vector<32x864xbf16>
    %c0_28 = arith.constant 0 : index
    %c0_29 = arith.constant 0 : index
    %33 = vector.load %arg4[%c0_28, %c0_29] : memref<32x864xbf16, #tpu.memory_space<vmem>>, vector<32x864xbf16>
    tpu.vector_store %arg4[%c0_28, %c0_29], %32 {strides = array<i32>} : memref<32x864xbf16, #tpu.memory_space<vmem>>, vector<32x864xbf16>,
    return
  }
  func.func @transform_0(%arg0: i32) -> (i32, i32) {
    %c0_i32 = arith.constant 0 : i32
    %c0_i32_0 = arith.constant 0 : i32
    %c0_i32_1 = arith.constant 0 : i32
    return %c0_i32, %c0_i32_0 : i32, i32
  }
  func.func @transform_1(%arg0: i32) -> (i32, i32) {
    %c0_i32 = arith.constant 0 : i32
    %c0_i32_0 = arith.constant 0 : i32
    %c0_i32_1 = arith.constant 0 : i32
    return %c0_i32, %c0_i32_0 : i32, i32
  }
  func.func @transform_2(%arg0: i32) -> (i32, i32) {
    %c0_i32 = arith.constant 0 : i32
    %c0_i32_0 = arith.constant 0 : i32
    %c0_i32_1 = arith.constant 0 : i32
    return %c0_i32, %c0_i32_0 : i32, i32
  }
  func.func @transform_3(%arg0: i32) -> (i32, i32) {
    %c0_i32 = arith.constant 0 : i32
    %c0_i32_0 = arith.constant 0 : i32
    %c0_i32_1 = arith.constant 0 : i32
    return %c0_i32, %c0_i32_0 : i32, i32
  }
}

module attributes {stable_mosaic.version = 11 : i64} {
  func.func @_conv_kernel(%arg0: i32, %arg1: memref<32x640xbf16, #tpu.memory_space<vmem>>, %arg2: memref<32x288xbf16, #tpu.memory_space<vmem>>, %arg3: memref<32x1xf32, #tpu.memory_space<vmem>>, %arg4: memref<32x384xbf16, #tpu.memory_space<vmem>>, %arg5: memref<288x384xbf16, #tpu.memory_space<vmem>>) attributes {dimension_semantics = [#tpu.dimension_semantics<arbitrary>], iteration_bounds = array<i64: 1>, scalar_prefetch = 0 : i64, scratch_operands = 1 : i64, tpu.core_type = #tpu.core_type<tc>, window_params = [{pipeline_mode = #tpu.pipeline_mode<synchronous>, transform_indices = @transform_0, window_bounds = array<i64: 32, 640>}, {pipeline_mode = #tpu.pipeline_mode<synchronous>, transform_indices = @transform_1, window_bounds = array<i64: 32, 288>}, {pipeline_mode = #tpu.pipeline_mode<synchronous>, transform_indices = @transform_2, window_bounds = array<i64: 32, 1>}, {pipeline_mode = #tpu.pipeline_mode<synchronous>, transform_indices = @transform_3, window_bounds = array<i64: 32, 384>}]} {
    %c0 = arith.constant 0 : index
    %c0_0 = arith.constant 0 : index
    %0 = vector.load %arg2[%c0, %c0_0] : memref<32x288xbf16, #tpu.memory_space<vmem>>, vector<32x288xbf16>
    %c0_1 = arith.constant 0 : index
    %c0_2 = arith.constant 0 : index
    %1 = vector.load %arg3[%c0_1, %c0_2] : memref<32x1xf32, #tpu.memory_space<vmem>>, vector<32x1xf32>
    %c0_3 = arith.constant 0 : index
    %c110 = arith.constant 110 : index
    %2 = vector.load %arg1[%c0_3, %c110] : memref<32x640xbf16, #tpu.memory_space<vmem>>, vector<32x384xbf16>
    %c0_4 = arith.constant 0 : index
    %c0_5 = arith.constant 0 : index
    %3 = vector.load %arg5[%c0_4, %c0_5] : memref<288x384xbf16, #tpu.memory_space<vmem>>, vector<32x384xbf16>
    tpu.vector_store %arg5[%c0_4, %c0_5], %2 {strides = array<i32>} : memref<288x384xbf16, #tpu.memory_space<vmem>>, vector<32x384xbf16>,
    %c0_6 = arith.constant 0 : index
    %c112 = arith.constant 112 : index
    %4 = vector.load %arg1[%c0_6, %c112] : memref<32x640xbf16, #tpu.memory_space<vmem>>, vector<32x384xbf16>
    %c32 = arith.constant 32 : index
    %c0_7 = arith.constant 0 : index
    %5 = vector.load %arg5[%c32, %c0_7] : memref<288x384xbf16, #tpu.memory_space<vmem>>, vector<32x384xbf16>
    tpu.vector_store %arg5[%c32, %c0_7], %4 {strides = array<i32>} : memref<288x384xbf16, #tpu.memory_space<vmem>>, vector<32x384xbf16>,
    %c0_8 = arith.constant 0 : index
    %c114 = arith.constant 114 : index
    %6 = vector.load %arg1[%c0_8, %c114] : memref<32x640xbf16, #tpu.memory_space<vmem>>, vector<32x384xbf16>
    %c64 = arith.constant 64 : index
    %c0_9 = arith.constant 0 : index
    %7 = vector.load %arg5[%c64, %c0_9] : memref<288x384xbf16, #tpu.memory_space<vmem>>, vector<32x384xbf16>
    tpu.vector_store %arg5[%c64, %c0_9], %6 {strides = array<i32>} : memref<288x384xbf16, #tpu.memory_space<vmem>>, vector<32x384xbf16>,
    %c0_10 = arith.constant 0 : index
    %c126 = arith.constant 126 : index
    %8 = vector.load %arg1[%c0_10, %c126] : memref<32x640xbf16, #tpu.memory_space<vmem>>, vector<32x384xbf16>
    %c96 = arith.constant 96 : index
    %c0_11 = arith.constant 0 : index
    %9 = vector.load %arg5[%c96, %c0_11] : memref<288x384xbf16, #tpu.memory_space<vmem>>, vector<32x384xbf16>
    tpu.vector_store %arg5[%c96, %c0_11], %8 {strides = array<i32>} : memref<288x384xbf16, #tpu.memory_space<vmem>>, vector<32x384xbf16>,
    %c0_12 = arith.constant 0 : index
    %c128 = arith.constant 128 : index
    %10 = vector.load %arg1[%c0_12, %c128] : memref<32x640xbf16, #tpu.memory_space<vmem>>, vector<32x384xbf16>
    %c128_13 = arith.constant 128 : index
    %c0_14 = arith.constant 0 : index
    %11 = vector.load %arg5[%c128_13, %c0_14] : memref<288x384xbf16, #tpu.memory_space<vmem>>, vector<32x384xbf16>
    tpu.vector_store %arg5[%c128_13, %c0_14], %10 {strides = array<i32>} : memref<288x384xbf16, #tpu.memory_space<vmem>>, vector<32x384xbf16>,
    %c0_15 = arith.constant 0 : index
    %c130 = arith.constant 130 : index
    %12 = vector.load %arg1[%c0_15, %c130] : memref<32x640xbf16, #tpu.memory_space<vmem>>, vector<32x384xbf16>
    %c160 = arith.constant 160 : index
    %c0_16 = arith.constant 0 : index
    %13 = vector.load %arg5[%c160, %c0_16] : memref<288x384xbf16, #tpu.memory_space<vmem>>, vector<32x384xbf16>
    tpu.vector_store %arg5[%c160, %c0_16], %12 {strides = array<i32>} : memref<288x384xbf16, #tpu.memory_space<vmem>>, vector<32x384xbf16>,
    %c0_17 = arith.constant 0 : index
    %c142 = arith.constant 142 : index
    %14 = vector.load %arg1[%c0_17, %c142] : memref<32x640xbf16, #tpu.memory_space<vmem>>, vector<32x384xbf16>
    %c192 = arith.constant 192 : index
    %c0_18 = arith.constant 0 : index
    %15 = vector.load %arg5[%c192, %c0_18] : memref<288x384xbf16, #tpu.memory_space<vmem>>, vector<32x384xbf16>
    tpu.vector_store %arg5[%c192, %c0_18], %14 {strides = array<i32>} : memref<288x384xbf16, #tpu.memory_space<vmem>>, vector<32x384xbf16>,
    %c0_19 = arith.constant 0 : index
    %c144 = arith.constant 144 : index
    %16 = vector.load %arg1[%c0_19, %c144] : memref<32x640xbf16, #tpu.memory_space<vmem>>, vector<32x384xbf16>
    %c224 = arith.constant 224 : index
    %c0_20 = arith.constant 0 : index
    %17 = vector.load %arg5[%c224, %c0_20] : memref<288x384xbf16, #tpu.memory_space<vmem>>, vector<32x384xbf16>
    tpu.vector_store %arg5[%c224, %c0_20], %16 {strides = array<i32>} : memref<288x384xbf16, #tpu.memory_space<vmem>>, vector<32x384xbf16>,
    %c0_21 = arith.constant 0 : index
    %c146 = arith.constant 146 : index
    %18 = vector.load %arg1[%c0_21, %c146] : memref<32x640xbf16, #tpu.memory_space<vmem>>, vector<32x384xbf16>
    %c256 = arith.constant 256 : index
    %c0_22 = arith.constant 0 : index
    %19 = vector.load %arg5[%c256, %c0_22] : memref<288x384xbf16, #tpu.memory_space<vmem>>, vector<32x384xbf16>
    tpu.vector_store %arg5[%c256, %c0_22], %18 {strides = array<i32>} : memref<288x384xbf16, #tpu.memory_space<vmem>>, vector<32x384xbf16>,
    %c0_23 = arith.constant 0 : index
    %c0_24 = arith.constant 0 : index
    %20 = vector.load %arg5[%c0_23, %c0_24] : memref<288x384xbf16, #tpu.memory_space<vmem>>, vector<288x384xbf16>
    %cst = arith.constant dense<0.000000e+00> : vector<32x384xf32>
    %21 = tpu.matmul %0, %20, %cst {dimension_numbers = #tpu.dot_dimension_numbers<[1], [0], [0], [1], [0, 0, 1, 1], [], []>} : vector<32x288xbf16>, vector<288x384xbf16>, vector<32x384xf32> -> vector<32x384xf32>
    %22 = vector.broadcast %1 : vector<32x1xf32> to vector<32x384xf32>
    %23 = arith.addf %21, %22 : vector<32x384xf32>
    %cst_25 = arith.constant 0.000000e+00 : f32
    %24 = vector.broadcast %cst_25 : f32 to vector<32x384xf32>
    %25 = arith.cmpf ogt, %23, %24 : vector<32x384xf32>
    %cst_26 = arith.constant 0.000000e+00 : f32
    %26 = vector.broadcast %cst_26 : f32 to vector<32x384xf32>
    %27 = arith.minimumf %23, %26 : vector<32x384xf32>
    %28 = math.exp %27 : vector<32x384xf32>
    %cst_27 = arith.constant 1.000000e+00 : f32
    %29 = vector.broadcast %cst_27 : f32 to vector<32x384xf32>
    %30 = arith.subf %28, %29 : vector<32x384xf32>
    %31 = arith.select %25, %23, %30 : vector<32x384xi1>, vector<32x384xf32>
    %32 = arith.truncf %31 : vector<32x384xf32> to vector<32x384xbf16>
    %c0_28 = arith.constant 0 : index
    %c0_29 = arith.constant 0 : index
    %33 = vector.load %arg4[%c0_28, %c0_29] : memref<32x384xbf16, #tpu.memory_space<vmem>>, vector<32x384xbf16>
    tpu.vector_store %arg4[%c0_28, %c0_29], %32 {strides = array<i32>} : memref<32x384xbf16, #tpu.memory_space<vmem>>, vector<32x384xbf16>,
    return
  }
  func.func @transform_0(%arg0: i32) -> (i32, i32) {
    %c0_i32 = arith.constant 0 : i32
    %c0_i32_0 = arith.constant 0 : i32
    %c0_i32_1 = arith.constant 0 : i32
    return %c0_i32, %c0_i32_0 : i32, i32
  }
  func.func @transform_1(%arg0: i32) -> (i32, i32) {
    %c0_i32 = arith.constant 0 : i32
    %c0_i32_0 = arith.constant 0 : i32
    %c0_i32_1 = arith.constant 0 : i32
    return %c0_i32, %c0_i32_0 : i32, i32
  }
  func.func @transform_2(%arg0: i32) -> (i32, i32) {
    %c0_i32 = arith.constant 0 : i32
    %c0_i32_0 = arith.constant 0 : i32
    %c0_i32_1 = arith.constant 0 : i32
    return %c0_i32, %c0_i32_0 : i32, i32
  }
  func.func @transform_3(%arg0: i32) -> (i32, i32) {
    %c0_i32 = arith.constant 0 : i32
    %c0_i32_0 = arith.constant 0 : i32
    %c0_i32_1 = arith.constant 0 : i32
    return %c0_i32, %c0_i32_0 : i32, i32
  }
}

module attributes {stable_mosaic.version = 11 : i64} {
  func.func @_conv_kernel(%arg0: i32, %arg1: memref<32x472xbf16, #tpu.memory_space<vmem>>, %arg2: memref<64x288xbf16, #tpu.memory_space<vmem>>, %arg3: memref<64x1xf32, #tpu.memory_space<vmem>>, %arg4: memref<64x216xf32, #tpu.memory_space<vmem>>, %arg5: memref<288x216xbf16, #tpu.memory_space<vmem>>) attributes {dimension_semantics = [#tpu.dimension_semantics<arbitrary>], iteration_bounds = array<i64: 1>, scalar_prefetch = 0 : i64, scratch_operands = 1 : i64, tpu.core_type = #tpu.core_type<tc>, window_params = [{pipeline_mode = #tpu.pipeline_mode<synchronous>, transform_indices = @transform_0, window_bounds = array<i64: 32, 472>}, {pipeline_mode = #tpu.pipeline_mode<synchronous>, transform_indices = @transform_1, window_bounds = array<i64: 64, 288>}, {pipeline_mode = #tpu.pipeline_mode<synchronous>, transform_indices = @transform_2, window_bounds = array<i64: 64, 1>}, {pipeline_mode = #tpu.pipeline_mode<synchronous>, transform_indices = @transform_3, window_bounds = array<i64: 64, 216>}]} {
    %c0 = arith.constant 0 : index
    %c0_0 = arith.constant 0 : index
    %0 = vector.load %arg2[%c0, %c0_0] : memref<64x288xbf16, #tpu.memory_space<vmem>>, vector<64x288xbf16>
    %c0_1 = arith.constant 0 : index
    %c0_2 = arith.constant 0 : index
    %1 = vector.load %arg3[%c0_1, %c0_2] : memref<64x1xf32, #tpu.memory_space<vmem>>, vector<64x1xf32>
    %c0_3 = arith.constant 0 : index
    %c114 = arith.constant 114 : index
    %2 = vector.load %arg1[%c0_3, %c114] : memref<32x472xbf16, #tpu.memory_space<vmem>>, vector<32x216xbf16>
    %c0_4 = arith.constant 0 : index
    %c0_5 = arith.constant 0 : index
    %3 = vector.load %arg5[%c0_4, %c0_5] : memref<288x216xbf16, #tpu.memory_space<vmem>>, vector<32x216xbf16>
    tpu.vector_store %arg5[%c0_4, %c0_5], %2 {strides = array<i32>} : memref<288x216xbf16, #tpu.memory_space<vmem>>, vector<32x216xbf16>,
    %c0_6 = arith.constant 0 : index
    %c116 = arith.constant 116 : index
    %4 = vector.load %arg1[%c0_6, %c116] : memref<32x472xbf16, #tpu.memory_space<vmem>>, vector<32x216xbf16>
    %c32 = arith.constant 32 : index
    %c0_7 = arith.constant 0 : index
    %5 = vector.load %arg5[%c32, %c0_7] : memref<288x216xbf16, #tpu.memory_space<vmem>>, vector<32x216xbf16>
    tpu.vector_store %arg5[%c32, %c0_7], %4 {strides = array<i32>} : memref<288x216xbf16, #tpu.memory_space<vmem>>, vector<32x216xbf16>,
    %c0_8 = arith.constant 0 : index
    %c118 = arith.constant 118 : index
    %6 = vector.load %arg1[%c0_8, %c118] : memref<32x472xbf16, #tpu.memory_space<vmem>>, vector<32x216xbf16>
    %c64 = arith.constant 64 : index
    %c0_9 = arith.constant 0 : index
    %7 = vector.load %arg5[%c64, %c0_9] : memref<288x216xbf16, #tpu.memory_space<vmem>>, vector<32x216xbf16>
    tpu.vector_store %arg5[%c64, %c0_9], %6 {strides = array<i32>} : memref<288x216xbf16, #tpu.memory_space<vmem>>, vector<32x216xbf16>,
    %c0_10 = arith.constant 0 : index
    %c126 = arith.constant 126 : index
    %8 = vector.load %arg1[%c0_10, %c126] : memref<32x472xbf16, #tpu.memory_space<vmem>>, vector<32x216xbf16>
    %c96 = arith.constant 96 : index
    %c0_11 = arith.constant 0 : index
    %9 = vector.load %arg5[%c96, %c0_11] : memref<288x216xbf16, #tpu.memory_space<vmem>>, vector<32x216xbf16>
    tpu.vector_store %arg5[%c96, %c0_11], %8 {strides = array<i32>} : memref<288x216xbf16, #tpu.memory_space<vmem>>, vector<32x216xbf16>,
    %c0_12 = arith.constant 0 : index
    %c128 = arith.constant 128 : index
    %10 = vector.load %arg1[%c0_12, %c128] : memref<32x472xbf16, #tpu.memory_space<vmem>>, vector<32x216xbf16>
    %c128_13 = arith.constant 128 : index
    %c0_14 = arith.constant 0 : index
    %11 = vector.load %arg5[%c128_13, %c0_14] : memref<288x216xbf16, #tpu.memory_space<vmem>>, vector<32x216xbf16>
    tpu.vector_store %arg5[%c128_13, %c0_14], %10 {strides = array<i32>} : memref<288x216xbf16, #tpu.memory_space<vmem>>, vector<32x216xbf16>,
    %c0_15 = arith.constant 0 : index
    %c130 = arith.constant 130 : index
    %12 = vector.load %arg1[%c0_15, %c130] : memref<32x472xbf16, #tpu.memory_space<vmem>>, vector<32x216xbf16>
    %c160 = arith.constant 160 : index
    %c0_16 = arith.constant 0 : index
    %13 = vector.load %arg5[%c160, %c0_16] : memref<288x216xbf16, #tpu.memory_space<vmem>>, vector<32x216xbf16>
    tpu.vector_store %arg5[%c160, %c0_16], %12 {strides = array<i32>} : memref<288x216xbf16, #tpu.memory_space<vmem>>, vector<32x216xbf16>,
    %c0_17 = arith.constant 0 : index
    %c138 = arith.constant 138 : index
    %14 = vector.load %arg1[%c0_17, %c138] : memref<32x472xbf16, #tpu.memory_space<vmem>>, vector<32x216xbf16>
    %c192 = arith.constant 192 : index
    %c0_18 = arith.constant 0 : index
    %15 = vector.load %arg5[%c192, %c0_18] : memref<288x216xbf16, #tpu.memory_space<vmem>>, vector<32x216xbf16>
    tpu.vector_store %arg5[%c192, %c0_18], %14 {strides = array<i32>} : memref<288x216xbf16, #tpu.memory_space<vmem>>, vector<32x216xbf16>,
    %c0_19 = arith.constant 0 : index
    %c140 = arith.constant 140 : index
    %16 = vector.load %arg1[%c0_19, %c140] : memref<32x472xbf16, #tpu.memory_space<vmem>>, vector<32x216xbf16>
    %c224 = arith.constant 224 : index
    %c0_20 = arith.constant 0 : index
    %17 = vector.load %arg5[%c224, %c0_20] : memref<288x216xbf16, #tpu.memory_space<vmem>>, vector<32x216xbf16>
    tpu.vector_store %arg5[%c224, %c0_20], %16 {strides = array<i32>} : memref<288x216xbf16, #tpu.memory_space<vmem>>, vector<32x216xbf16>,
    %c0_21 = arith.constant 0 : index
    %c142 = arith.constant 142 : index
    %18 = vector.load %arg1[%c0_21, %c142] : memref<32x472xbf16, #tpu.memory_space<vmem>>, vector<32x216xbf16>
    %c256 = arith.constant 256 : index
    %c0_22 = arith.constant 0 : index
    %19 = vector.load %arg5[%c256, %c0_22] : memref<288x216xbf16, #tpu.memory_space<vmem>>, vector<32x216xbf16>
    tpu.vector_store %arg5[%c256, %c0_22], %18 {strides = array<i32>} : memref<288x216xbf16, #tpu.memory_space<vmem>>, vector<32x216xbf16>,
    %c0_23 = arith.constant 0 : index
    %c0_24 = arith.constant 0 : index
    %20 = vector.load %arg5[%c0_23, %c0_24] : memref<288x216xbf16, #tpu.memory_space<vmem>>, vector<288x216xbf16>
    %cst = arith.constant dense<0.000000e+00> : vector<64x216xf32>
    %21 = tpu.matmul %0, %20, %cst {dimension_numbers = #tpu.dot_dimension_numbers<[1], [0], [0], [1], [0, 0, 1, 1], [], []>} : vector<64x288xbf16>, vector<288x216xbf16>, vector<64x216xf32> -> vector<64x216xf32>
    %22 = vector.broadcast %1 : vector<64x1xf32> to vector<64x216xf32>
    %23 = arith.addf %21, %22 : vector<64x216xf32>
    %cst_25 = arith.constant 0.000000e+00 : f32
    %24 = vector.broadcast %cst_25 : f32 to vector<64x216xf32>
    %25 = arith.cmpf ogt, %23, %24 : vector<64x216xf32>
    %cst_26 = arith.constant 0.000000e+00 : f32
    %26 = vector.broadcast %cst_26 : f32 to vector<64x216xf32>
    %27 = arith.minimumf %23, %26 : vector<64x216xf32>
    %28 = math.exp %27 : vector<64x216xf32>
    %cst_27 = arith.constant 1.000000e+00 : f32
    %29 = vector.broadcast %cst_27 : f32 to vector<64x216xf32>
    %30 = arith.subf %28, %29 : vector<64x216xf32>
    %31 = arith.select %25, %23, %30 : vector<64x216xi1>, vector<64x216xf32>
    %c0_28 = arith.constant 0 : index
    %c0_29 = arith.constant 0 : index
    %32 = vector.load %arg4[%c0_28, %c0_29] : memref<64x216xf32, #tpu.memory_space<vmem>>, vector<64x216xf32>
    tpu.vector_store %arg4[%c0_28, %c0_29], %31 {strides = array<i32>} : memref<64x216xf32, #tpu.memory_space<vmem>>, vector<64x216xf32>,
    return
  }
  func.func @transform_0(%arg0: i32) -> (i32, i32) {
    %c0_i32 = arith.constant 0 : i32
    %c0_i32_0 = arith.constant 0 : i32
    %c0_i32_1 = arith.constant 0 : i32
    return %c0_i32, %c0_i32_0 : i32, i32
  }
  func.func @transform_1(%arg0: i32) -> (i32, i32) {
    %c0_i32 = arith.constant 0 : i32
    %c0_i32_0 = arith.constant 0 : i32
    %c0_i32_1 = arith.constant 0 : i32
    return %c0_i32, %c0_i32_0 : i32, i32
  }
  func.func @transform_2(%arg0: i32) -> (i32, i32) {
    %c0_i32 = arith.constant 0 : i32
    %c0_i32_0 = arith.constant 0 : i32
    %c0_i32_1 = arith.constant 0 : i32
    return %c0_i32, %c0_i32_0 : i32, i32
  }
  func.func @transform_3(%arg0: i32) -> (i32, i32) {
    %c0_i32 = arith.constant 0 : i32
    %c0_i32_0 = arith.constant 0 : i32
    %c0_i32_1 = arith.constant 0 : i32
    return %c0_i32, %c0_i32_0 : i32, i32
  }
}

</mosaic_0001>

<bundles_post_ra>
// kernel: net_final_forward.4
= control target key start
LH: loop header
LB: loop body
LE: loop exit
PB: predicated region body
PF: predicated region fallthrough
CT: control target
= control target key end

     0   :  { %s5503_s25 = smov 42   ;;  %s5504_s28 = smov 40   ;;  %vm1932_vm0 = vcmask 130048   ;;  %vm168_vm1 = vcmask 343040   ;;  %vm367_vm2 = vcmask 326656   ;;  %vm565_vm3 = vcmask 310272   ;;  %s7536_s0 = inlined_call_operand.vmem [shape: bf16[16,2656], index: 0, kind: input, shape index: {}]   ;;  %s7537_s2 = inlined_call_operand.vmem [shape: bf16[16,144], index: 2, kind: input, shape index: {}]   ;;  %s7538_s3 = inlined_call_operand.vmem [shape: f32[16,1], index: 3, kind: input, shape index: {}]   ;;  %s7539_s1 = inlined_call_operand.vmem [shape: f32[1,2400], index: 1, kind: input, shape index: {}]   ;;  %s7540_s4 = inlined_call_operand.vmem [shape: bf16[16,144], index: 4, kind: input, shape index: {}]   ;;  %s7541_s5 = inlined_call_operand.vmem [shape: f32[16,1], index: 5, kind: input, shape index: {}]   ;;  %s7542_s6 = inlined_call_operand.vmem [shape: bf16[16,2400], index: 6, kind: output, shape index: {}]  }
   0x1   :  { %v5242_v0 = vld [vmem:[%s7536_s0 + $0x4] ss:$84 sps:$4 sm:$0xff]   ;;  %v5244_v1 = vld [vmem:[%s7536_s0] ss:$84 sps:$4 sm:$0xff]   ;;  %v5245_v2 = vld [vmem:[%s7536_s0 + $0x8] ss:$84 sps:$4 sm:$0xff]  }
   0x2   :  { %130 = vrot.lane.b32.xlu0 %v5242_v0, %s5503_s25  ;;  %128 = vrot.lane.b32.xlu1 %v5244_v1, %s5503_s25  ;;  %s5505_s29 = smov 38   ;;  %s5506_s30 = smov 2   ;;  %v5247_v3 = vld [vmem:[%s7536_s0 + $0xc] ss:$84 sps:$4 sm:$0xff]   ;;  %v5248_v4 = vld [vmem:[%s7536_s0 + $0x10] ss:$84 sps:$4 sm:$0xff]  }
   0x3   :  { %v5580_v5 = vld [vmem:[%s7536_s0 + $0x8] ss:$84 sps:$4 sm:$0xff]   ;;  %v5586_v6 = vld [vmem:[%s7536_s0 + $0xc] ss:$84 sps:$4 sm:$0xff]   ;;  %s5507_s15 = smov 126   ;;  %s5508_s18 = smov 90  }
   0x4   :  { %v5593_v7 = vld [vmem:[%s7536_s0 + $0x4] ss:$84 sps:$4 sm:$0xff]   ;;  %s5509_s19 = smov 88   ;;  %s5510_s22 = smov 86   ;;  %v5256_v10 = vld [vmem:[%s7536_s0 + $0x14] ss:$84 sps:$4 sm:$0xff]  }
   0x5   :  { %v5616_v8 = vld [vmem:[%s7537_s2 + $0x4] ss:$8 sps:$4 sm:$0xff]   ;;  %v5258_v11 = vld [vmem:[%s7536_s0 + $0x14] ss:$84 sps:$4 sm:$0xff]   ;;  %v5261_v13 = vld [vmem:[%s7536_s0 + $0x1c] ss:$84 sps:$4 sm:$0xff]  }
   0x6   :  { %132 = vrot.lane.b32.xlu0 %v5245_v2, %s5503_s25  ;;  %329 = vrot.lane.b32.xlu1 %v5242_v0, %s5504_s28  ;;  %v5631_v9 = vld [vmem:[%s7536_s0 + $0x10] ss:$84 sps:$4 sm:$0xff]   ;;  %v5259_v12 = vld [vmem:[%s7536_s0 + $0x18] ss:$84 sps:$4 sm:$0xff]   ;;  %vm763_vm4 = vcmask 15360   ;;  %vm1091_vm5 = vcmask 1031168  }
   0x7   :  { %5093 = vmatprep.mubr.msk.bf16.mxu0 %vm1932_vm0, %v5616_v8  ;;  %5094 = vmatprep.mubr.msk.bf16.mxu1 %vm1932_vm0, %v5616_v8  ;;  %v5262_v14 = vld [vmem:[%s7536_s0 + $0x20] ss:$84 sps:$4 sm:$0xff]   ;;  %v5264_v15 = vld [vmem:[%s7536_s0 + $0x18] ss:$84 sps:$4 sm:$0xff]   ;;  %v5265_v16 = vld [vmem:[%s7536_s0 + $0x1c] ss:$84 sps:$4 sm:$0xff]  }
   0x8   :  { %v5267_v27 = vld [vmem:[%s7536_s0 + $0x20] ss:$84 sps:$4 sm:$0xff]   ;;  %v5268_v28 = vld [vmem:[%s7536_s0 + $0x24] ss:$84 sps:$4 sm:$0xff]   ;;  %v5271_v33 = vld [vmem:[%s7536_s0 + $0x28] ss:$84 sps:$4 sm:$0xff]  }
   0x9   :  { %v5270_v32 = vld [vmem:[%s7536_s0 + $0x24] ss:$84 sps:$4 sm:$0xff]   ;;  %vm1288_vm6 = vcmask 736256   ;;  %v5273_v59 = vld [vmem:[%s7536_s0 + $0x2c] ss:$84 sps:$4 sm:$0xff]   ;;  %vm1486_vm7 = vcmask 719872  }
   0xa   :  { %331 = vrot.lane.b32.xlu0 %v5245_v2, %s5504_s28  ;;  %327 = vrot.lane.b32.xlu1 %v5244_v1, %s5504_s28  ;;  %v5274_v60 = vld [vmem:[%s7536_s0 + $0x30] ss:$84 sps:$4 sm:$0xff]   ;;  %vm1684_vm8 = vcmask 703488   ;;  %vm7543_vm9 = vcmask 785408  }
   0xe   :  { %527 = vrot.lane.b32.xlu0 %v5242_v0, %s5505_s29  ;;  %529 = vrot.lane.b32.xlu1 %v5245_v2, %s5505_s29 }
  0x12   :  { %525 = vrot.lane.b32.xlu0 %v5244_v1, %s5505_s29  ;;  %725 = vrot.lane.b32.xlu1 %v5242_v0, %s5506_s30 }
  0x16   :  { %727 = vrot.lane.b32.xlu0 %v5245_v2, %s5506_s30  ;;  %723 = vrot.lane.b32.xlu1 %v5244_v1, %s5506_s30 }
  0x1a   :  { %134 = vrot.lane.b32.xlu0 %v5247_v3, %s5503_s25  ;;  %136 = vrot.lane.b32.xlu1 %v5248_v4, %s5503_s25 }
  0x1e   :  { %333 = vrot.lane.b32.xlu0 %v5247_v3, %s5504_s28  ;;  %335 = vrot.lane.b32.xlu1 %v5248_v4, %s5504_s28 }
  0x22   :  { %1055 = vrot.lane.b32.xlu0 %v5580_v5, %s5507_s15  ;;  %1057 = vrot.lane.b32.xlu1 %v5586_v6, %s5507_s15 }
  0x26   :  { %1053 = vrot.lane.b32.xlu0 %v5593_v7, %s5507_s15  ;;  %531 = vrot.lane.b32.xlu1 %v5247_v3, %s5505_s29 }
  0x2a   :  { %533 = vrot.lane.b32.xlu0 %v5248_v4, %s5505_s29  ;;  %1250 = vrot.lane.b32.xlu1 %v5580_v5, %s5508_s18 }
  0x2e   :  { %1252 = vrot.lane.b32.xlu0 %v5586_v6, %s5508_s18  ;;  %1248 = vrot.lane.b32.xlu1 %v5593_v7, %s5508_s18 }
  0x32   :  { %729 = vrot.lane.b32.xlu0 %v5247_v3, %s5506_s30  ;;  %731 = vrot.lane.b32.xlu1 %v5248_v4, %s5506_s30 }
  0x36   :  { %1448 = vrot.lane.b32.xlu0 %v5580_v5, %s5509_s19  ;;  %1450 = vrot.lane.b32.xlu1 %v5586_v6, %s5509_s19 }
  0x3a   :  { %1446 = vrot.lane.b32.xlu0 %v5593_v7, %s5509_s19  ;;  %1646 = vrot.lane.b32.xlu1 %v5580_v5, %s5510_s22 }
  0x3e   :  { %1648 = vrot.lane.b32.xlu0 %v5586_v6, %s5510_s22  ;;  %1644 = vrot.lane.b32.xlu1 %v5593_v7, %s5510_s22 }
  0x42   :  { %1059 = vrot.lane.b32.xlu0 %v5631_v9, %s5507_s15  ;;  %1061 = vrot.lane.b32.xlu1 %v5256_v10, %s5507_s15 }
  0x46   :  { %138 = vrot.lane.b32.xlu0 %v5258_v11, %s5503_s25  ;;  %140 = vrot.lane.b32.xlu1 %v5259_v12, %s5503_s25 }
  0x4a   :  { %1254 = vrot.lane.b32.xlu0 %v5631_v9, %s5508_s18  ;;  %1256 = vrot.lane.b32.xlu1 %v5256_v10, %s5508_s18 }
  0x4e   :  { %337 = vrot.lane.b32.xlu0 %v5258_v11, %s5504_s28  ;;  %339 = vrot.lane.b32.xlu1 %v5259_v12, %s5504_s28 }
  0x52   :  { %1452 = vrot.lane.b32.xlu0 %v5631_v9, %s5509_s19  ;;  %1454 = vrot.lane.b32.xlu1 %v5256_v10, %s5509_s19 }
  0x56   :  { %535 = vrot.lane.b32.xlu0 %v5258_v11, %s5505_s29  ;;  %537 = vrot.lane.b32.xlu1 %v5259_v12, %s5505_s29 }
  0x5a   :  { %1650 = vrot.lane.b32.xlu0 %v5631_v9, %s5510_s22  ;;  %1652 = vrot.lane.b32.xlu1 %v5256_v10, %s5510_s22 }
  0x5e   :  { %733 = vrot.lane.b32.xlu0 %v5258_v11, %s5506_s30  ;;  %735 = vrot.lane.b32.xlu1 %v5259_v12, %s5506_s30 }
  0x62   :  { %142 = vrot.lane.b32.xlu0 %v5261_v13, %s5503_s25  ;;  %144 = vrot.lane.b32.xlu1 %v5262_v14, %s5503_s25 }
  0x66   :  { %341 = vrot.lane.b32.xlu0 %v5261_v13, %s5504_s28  ;;  %343 = vrot.lane.b32.xlu1 %v5262_v14, %s5504_s28 }
  0x6a   :  { %1063 = vrot.lane.b32.xlu0 %v5264_v15, %s5507_s15  ;;  %1065 = vrot.lane.b32.xlu1 %v5265_v16, %s5507_s15 }
  0x6e   :  { %539 = vrot.lane.b32.xlu0 %v5261_v13, %s5505_s29  ;;  %541 = vrot.lane.b32.xlu1 %v5262_v14, %s5505_s29 }
  0x72   :  { %1258 = vrot.lane.b32.xlu0 %v5264_v15, %s5508_s18  ;;  %1260 = vrot.lane.b32.xlu1 %v5265_v16, %s5508_s18 }
  0x74   :  { %v131_v17 = vpop.permute.xlu0 %130  ;;  %v129_v18 = vpop.permute.xlu1 %128 }
  0x75   :  { %v169_v22 = vsel %vm168_vm1, %v129_v18, %v131_v17 }
  0x76   :  { %737 = vrot.lane.b32.xlu0 %v5261_v13, %s5506_s30  ;;  %739 = vrot.lane.b32.xlu1 %v5262_v14, %s5506_s30 }
  0x78   :  { %v133_v19 = vpop.permute.xlu0 %132  ;;  %v330_v21 = vpop.permute.xlu1 %329 }
  0x79   :  { %v170_v20 = vsel %vm168_vm1, %v131_v17, %v133_v19 }
  0x7a   :  { %1456 = vrot.lane.b32.xlu0 %v5264_v15, %s5509_s19  ;;  %1936 = vmatprep.subr.bf16.mxu0 %v170_v20 }
  0x7b   :  { %1458 = vrot.lane.b32.xlu1 %v5265_v16, %s5509_s19  ;;  %1937 = vmatpush1.bf16.msra.mxu0 %v169_v22 }
  0x7c   :  { %v332_v23 = vpop.permute.xlu0 %331  ;;  %v328_v25 = vpop.permute.xlu1 %327 }
  0x7d   :  { %v369_v24 = vsel %vm367_vm2, %v330_v21, %v332_v23  ;;  %v368_v26 = vsel %vm367_vm2, %v328_v25, %v330_v21 }
  0x7e   :  { %1654 = vrot.lane.b32.xlu0 %v5264_v15, %s5510_s22  ;;  %1938 = vmatprep.subr.bf16.mxu0 %v369_v24 }
  0x7f   :  { %1656 = vrot.lane.b32.xlu1 %v5265_v16, %s5510_s22  ;;  %1939 = vmatpush1.bf16.msra.mxu0 %v368_v26 }
  0x80   :  { %v528_v29 = vpop.permute.xlu0 %527  ;;  %v530_v30 = vpop.permute.xlu1 %529 }
  0x81   :  { %v567_v31 = vsel %vm565_vm3, %v528_v29, %v530_v30 }
  0x82   :  { %1067 = vrot.lane.b32.xlu0 %v5267_v27, %s5507_s15  ;;  %1940 = vmatprep.subr.bf16.mxu0 %v567_v31 }
  0x83   :  { %1069 = vrot.lane.b32.xlu1 %v5268_v28, %s5507_s15 }
  0x84   :  { %v526_v34 = vpop.permute.xlu0 %525  ;;  %v726_v36 = vpop.permute.xlu1 %725 }
  0x85   :  { %v566_v35 = vsel %vm565_vm3, %v526_v34, %v528_v29 }
  0x86   :  { %146 = vrot.lane.b32.xlu0 %v5270_v32, %s5503_s25  ;;  %1941 = vmatpush1.bf16.msra.mxu0 %v566_v35 }
  0x87   :  { %148 = vrot.lane.b32.xlu1 %v5271_v33, %s5503_s25 }
  0x88   :  { %v728_v37 = vpop.permute.xlu0 %727  ;;  %v724_v39 = vpop.permute.xlu1 %723 }
  0x89   :  { %v765_v38 = vsel %vm763_vm4, %v726_v36, %v728_v37  ;;  %v764_v40 = vsel %vm763_vm4, %v724_v39, %v726_v36  ;;  %v5287_v39 = vld [vmem:[%s7536_s0 + $0x38] ss:$84 sps:$4 sm:$0xff]  }
  0x8a   :  { %1262 = vrot.lane.b32.xlu0 %v5267_v27, %s5508_s18  ;;  %1942 = vmatprep.subr.bf16.mxu0 %v765_v38 }
  0x8b   :  { %1264 = vrot.lane.b32.xlu1 %v5268_v28, %s5508_s18  ;;  %1943 = vmatpush1.bf16.msra.mxu0 %v764_v40 }
  0x8c   :  { %v135_v41 = vpop.permute.xlu0 %134  ;;  %1944 = vmatprep.subr.bf16.mxu0 %v5580_v5  ;;  %v5720_v43 = vpop.permute.xlu1 %136  ;;  %v5277_v5 = vld [vmem:[%s7536_s0 + $0x28] ss:$84 sps:$4 sm:$0xff]  }
  0x8d   :  { %v171_v42 = vsel %vm168_vm1, %v133_v19, %v135_v41  ;;  %v172_v44 = vsel %vm168_vm1, %v135_v41, %v5720_v43 }
  0x8e   :  { %345 = vrot.lane.b32.xlu0 %v5270_v32, %s5504_s28  ;;  %1979 = vmatprep.subr.bf16.mxu1 %v172_v44 }
  0x8f   :  { %347 = vrot.lane.b32.xlu1 %v5271_v33, %s5504_s28  ;;  %1980 = vmatpush1.bf16.msra.mxu1 %v171_v42 }
  0x90   :  { %v334_v45 = vpop.permute.xlu0 %333  ;;  %1945 = vmatpush1.bf16.msra.mxu0 %v5593_v7  ;;  %v5728_v47 = vpop.permute.xlu1 %335  ;;  %v5278_v7 = vld [vmem:[%s7536_s0 + $0x2c] ss:$84 sps:$4 sm:$0xff]  }
  0x91   :  { %v370_v46 = vsel %vm367_vm2, %v332_v23, %v334_v45  ;;  %v371_v48 = vsel %vm367_vm2, %v334_v45, %v5728_v47 }
  0x92   :  { %1460 = vrot.lane.b32.xlu0 %v5267_v27, %s5509_s19  ;;  %1981 = vmatprep.subr.bf16.mxu1 %v371_v48 }
  0x93   :  { %1462 = vrot.lane.b32.xlu1 %v5268_v28, %s5509_s19  ;;  %1982 = vmatpush1.bf16.msra.mxu1 %v370_v46 }
  0x94   :  { %v1056_v49 = vpop.permute.xlu0 %1055  ;;  %v5734_v50 = vpop.permute.xlu1 %1057 }
  0x95   :  { %v1093_v51 = vsel %vm1091_vm5, %v1056_v49, %v5734_v50 }
  0x96   :  { %543 = vrot.lane.b32.xlu0 %v5270_v32, %s5505_s29  ;;  %1946 = vmatprep.subr.bf16.mxu0 %v1093_v51 }
  0x97   :  { %545 = vrot.lane.b32.xlu1 %v5271_v33, %s5505_s29 }
  0x98   :  { %v1054_v52 = vpop.permute.xlu0 %1053  ;;  %v532_v54 = vpop.permute.xlu1 %531 }
  0x99   :  { %v1092_v53 = vsel %vm1091_vm5, %v1054_v52, %v1056_v49  ;;  %v568_v58 = vsel %vm565_vm3, %v530_v30, %v532_v54  ;;  %v5825_v30 = vld [vmem:[%s7536_s0 + $0x30] ss:$84 sps:$4 sm:$0xff]  }
  0x9a   :  { %1658 = vrot.lane.b32.xlu0 %v5267_v27, %s5510_s22  ;;  %1947 = vmatpush1.bf16.msra.mxu0 %v1092_v53 }
  0x9b   :  { %1660 = vrot.lane.b32.xlu1 %v5268_v28, %s5510_s22 }
  0x9c   :  { %v5743_v55 = vpop.permute.xlu0 %533  ;;  %v1251_v57 = vpop.permute.xlu1 %1250 }
  0x9d   :  { %v569_v56 = vsel %vm565_vm3, %v532_v54, %v5743_v55 }
  0x9e   :  { %741 = vrot.lane.b32.xlu0 %v5270_v32, %s5506_s30  ;;  %1983 = vmatprep.subr.bf16.mxu1 %v569_v56  ;;  %v5834_v32 = vld [vmem:[%s7536_s0 + $0x34] ss:$84 sps:$4 sm:$0xff]  }
  0x9f   :  { %743 = vrot.lane.b32.xlu1 %v5271_v33, %s5506_s30  ;;  %1984 = vmatpush1.bf16.msra.mxu1 %v568_v58  ;;  %v5511_v33 = vmov 0   ;;  %v5294_v58 = vld [vmem:[%s7536_s0 + $0x14] ss:$84 sps:$4 sm:$0xff]  }
  0xa0   :  { %v5756_v61 = vpop.permute.xlu0 %1252  ;;  %v1249_v63 = vpop.permute.xlu1 %1248  ;;  %2731 = vst [vmem:[#allocation3] sm:$0xff] %v5511_v33  ;;  %2750 = vst [vmem:[#allocation3 + $0x98] sm:$0xff] %v5511_v33  ;;  %5240 = vset.pattern.permute.xlu1 %v5511_v33  ;;  %5241 = vset.pattern.permute.xlu0 %v5511_v33 }
  0xa1   :  { %v1290_v62 = vsel %vm1288_vm6, %v1251_v57, %v5756_v61  ;;  %v1289_v0 = vsel %vm1288_vm6, %v1249_v63, %v1251_v57  ;;  %2751 = vst.msk [vmem:[#allocation3 + $0xa0] sm:$0xff] %vm7543_vm9, %v5511_v33 }
  0xa2   :  { %150 = vrot.lane.b32.xlu0 %v5273_v59, %s5503_s25  ;;  %1948 = vmatprep.subr.bf16.mxu0 %v1290_v62 }
  0xa3   :  { %152 = vrot.lane.b32.xlu1 %v5274_v60, %s5503_s25  ;;  %1949 = vmatpush1.bf16.msra.mxu0 %v1289_v0 }
  0xa4   :  { %v730_v1 = vpop.permute.xlu0 %729  ;;  %v5764_v3 = vpop.permute.xlu1 %731 }
  0xa5   :  { %v766_v2 = vsel %vm763_vm4, %v728_v37, %v730_v1  ;;  %v767_v4 = vsel %vm763_vm4, %v730_v1, %v5764_v3  ;;  %v5845_v37 = vld [vmem:[%s7536_s0 + $0x34] ss:$84 sps:$4 sm:$0xff]  }
  0xa6   :  { %349 = vrot.lane.b32.xlu0 %v5273_v59, %s5504_s28  ;;  %1985 = vmatprep.subr.bf16.mxu1 %v767_v4 }
  0xa7   :  { %351 = vrot.lane.b32.xlu1 %v5274_v60, %s5504_s28  ;;  %1986 = vmatpush1.bf16.msra.mxu1 %v766_v2 }
  0xa8   :  { %v1449_v10 = vpop.permute.xlu0 %1448  ;;  %v5776_v11 = vpop.permute.xlu1 %1450  ;;  %1987 = vmatprep.subr.bf16.mxu1 %v5631_v9 }
  0xa9   :  { %v1488_v12 = vsel %vm1486_vm7, %v1449_v10, %v5776_v11 }
  0xaa   :  { %1071 = vrot.lane.b32.xlu0 %v5277_v5, %s5507_s15  ;;  %1950 = vmatprep.subr.bf16.mxu0 %v1488_v12 }
  0xab   :  { %1073 = vrot.lane.b32.xlu1 %v5278_v7, %s5507_s15  ;;  %1988 = vmatpush1.bf16.msra.mxu1 %v5586_v6  ;;  %v5796_v6 = vld [vmem:[%s7537_s2] ss:$8 sps:$4 sm:$0xff]  }
  0xac   :  { %v1447_v13 = vpop.permute.xlu0 %1446  ;;  %v1647_v15 = vpop.permute.xlu1 %1646 }
  0xad   :  { %v1487_v14 = vsel %vm1486_vm7, %v1447_v13, %v1449_v10  ;;  %v5290_v10 = vld [vmem:[%s7536_s0 + $0x40] ss:$84 sps:$4 sm:$0xff]  }
  0xae   :  { %547 = vrot.lane.b32.xlu0 %v5273_v59, %s5505_s29  ;;  %1951 = vmatpush1.bf16.msra.mxu0 %v1487_v14 }
  0xaf   :  { %549 = vrot.lane.b32.xlu1 %v5274_v60, %s5505_s29 }
  0xb0   :  { %v5787_v9 = vpop.permute.xlu0 %1648  ;;  %v1645_v17 = vpop.permute.xlu1 %1644 }
  0xb1   :  { %v1686_v16 = vsel %vm1684_vm8, %v1647_v15, %v5787_v9  ;;  %v1685_v18 = vsel %vm1684_vm8, %v1645_v17, %v1647_v15  ;;  %v5285_v17 = vld [vmem:[%s7536_s0 + $0x38] ss:$84 sps:$4 sm:$0xff]  }
  0xb2   :  { %1266 = vrot.lane.b32.xlu0 %v5277_v5, %s5508_s18  ;;  %1952 = vmatprep.subr.bf16.mxu0 %v1686_v16 }
  0xb3   :  { %1268 = vrot.lane.b32.xlu1 %v5278_v7, %s5508_s18  ;;  %1953 = vmatpush1.bf16.msra.mxu0 %v1685_v18 }
  0xb4   :  { %v1060_v19 = vpop.permute.xlu0 %1059  ;;  %v5801_v21 = vpop.permute.xlu1 %1061 }
  0xb5   :  { %v1094_v20 = vsel %vm1091_vm5, %v5734_v50, %v1060_v19  ;;  %v1095_v22 = vsel %vm1091_vm5, %v1060_v19, %v5801_v21  ;;  %v5295_v19 = vld [vmem:[%s7536_s0 + $0x3c] ss:$84 sps:$4 sm:$0xff]  }
  0xb6   :  { %745 = vrot.lane.b32.xlu0 %v5273_v59, %s5506_s30  ;;  %1969 = vmatmul.mubr.bf16.vlgmr.msra.gmra.mrb[0].mxu0 %v5796_v6 }
  0xb7   :  { %747 = vrot.lane.b32.xlu1 %v5274_v60, %s5506_s30  ;;  %1989 = vmatprep.subr.bf16.mxu1 %v1095_v22 }
  0xb8   :  { %v139_v23 = vpop.permute.xlu0 %138  ;;  %1990 = vmatpush1.bf16.msra.mxu1 %v1094_v20  ;;  %5095 = vmatprep.mubr.msk.bf16.mxu0 %vm1932_vm0, %v5616_v8  ;;  %v5812_v25 = vpop.permute.xlu1 %140 }
  0xb9   :  { %v173_v24 = vsel %vm168_vm1, %v5720_v43, %v139_v23  ;;  %v174_v26 = vsel %vm168_vm1, %v139_v23, %v5812_v25  ;;  %v5297_v23 = vld [vmem:[%s7536_s0 + $0x20] ss:$84 sps:$4 sm:$0xff]  }
  0xba   :  { %1464 = vrot.lane.b32.xlu0 %v5277_v5, %s5509_s19  ;;  %2022 = vmatprep.subr.bf16.mxu0 %v174_v26  ;;  %v5299_v26 = vld [vmem:[%s7536_s0 + $0x1c] ss:$84 sps:$4 sm:$0xff]  }
  0xbb   :  { %1466 = vrot.lane.b32.xlu1 %v5278_v7, %s5509_s19  ;;  %2023 = vmatpush1.bf16.msra.mxu0 %v173_v24 }
  0xbc   :  { %v1255_v27 = vpop.permute.xlu0 %1254  ;;  %v5820_v29 = vpop.permute.xlu1 %1256 }
  0xbd   :  { %v1291_v28 = vsel %vm1288_vm6, %v5756_v61, %v1255_v27  ;;  %v1292_v31 = vsel %vm1288_vm6, %v1255_v27, %v5820_v29 }
  0xbe   :  { %1662 = vrot.lane.b32.xlu0 %v5277_v5, %s5510_s22  ;;  %1991 = vmatprep.subr.bf16.mxu1 %v1292_v31 }
  0xbf   :  { %1664 = vrot.lane.b32.xlu1 %v5278_v7, %s5510_s22  ;;  %1992 = vmatpush1.bf16.msra.mxu1 %v1291_v28  ;;  %v5289_v7 = vld [vmem:[%s7536_s0 + $0x3c] ss:$84 sps:$4 sm:$0xff]  }
  0xc0   :  { %v338_v34 = vpop.permute.xlu0 %337  ;;  %v340_v36 = vpop.permute.xlu1 %339 }
  0xc1   :  { %v372_v35 = vsel %vm367_vm2, %v5728_v47, %v338_v34  ;;  %v373_v38 = vsel %vm367_vm2, %v338_v34, %v340_v36 }
  0xc2   :  { %1075 = vrot.lane.b32.xlu0 %v5825_v30, %s5507_s15  ;;  %2024 = vmatprep.subr.bf16.mxu0 %v373_v38 }
  0xc3   :  { %1077 = vrot.lane.b32.xlu1 %v5834_v32, %s5507_s15  ;;  %2025 = vmatpush1.bf16.msra.mxu0 %v372_v35 }
  0xc4   :  { %v1453_v40 = vpop.permute.xlu0 %1452  ;;  %v5857_v42 = vpop.permute.xlu1 %1454 }
  0xc5   :  { %v1489_v41 = vsel %vm1486_vm7, %v5776_v11, %v1453_v40  ;;  %v1490_v43 = vsel %vm1486_vm7, %v1453_v40, %v5857_v42 }
  0xc6   :  { %154 = vrot.lane.b32.xlu0 %v5845_v37, %s5503_s25  ;;  %1993 = vmatprep.subr.bf16.mxu1 %v1490_v43 }
  0xc7   :  { %156 = vrot.lane.b32.xlu1 %v5287_v39, %s5503_s25  ;;  %1994 = vmatpush1.bf16.msra.mxu1 %v1489_v41 }
  0xc8   :  { %v536_v44 = vpop.permute.xlu0 %535  ;;  %v538_v46 = vpop.permute.xlu1 %537 }
  0xc9   :  { %v570_v45 = vsel %vm565_vm3, %v5743_v55, %v536_v44  ;;  %v571_v47 = vsel %vm565_vm3, %v536_v44, %v538_v46  ;;  %v5292_v55 = vld [vmem:[%s7536_s0 + $0x18] ss:$84 sps:$4 sm:$0xff]  }
  0xca   :  { %1270 = vrot.lane.b32.xlu0 %v5825_v30, %s5508_s18  ;;  %2026 = vmatprep.subr.bf16.mxu0 %v571_v47  ;;  %v5994_v47 = vld [vmem:[%s7536_s0 + $0x40] ss:$84 sps:$4 sm:$0xff]  }
  0xcb   :  { %1272 = vrot.lane.b32.xlu1 %v5834_v32, %s5508_s18  ;;  %2027 = vmatpush1.bf16.msra.mxu0 %v570_v45 }
  0xcc   :  { %v1651_v48 = vpop.permute.xlu0 %1650  ;;  %v5873_v50 = vpop.permute.xlu1 %1652 }
  0xcd   :  { %v1687_v49 = vsel %vm1684_vm8, %v5787_v9, %v1651_v48  ;;  %v1688_v51 = vsel %vm1684_vm8, %v1651_v48, %v5873_v50  ;;  %v6000_v48 = vld [vmem:[%s7536_s0 + $0x44] ss:$84 sps:$4 sm:$0xff]  }
  0xce   :  { %353 = vrot.lane.b32.xlu0 %v5845_v37, %s5504_s28  ;;  %1995 = vmatprep.subr.bf16.mxu1 %v1688_v51 }
  0xcf   :  { %355 = vrot.lane.b32.xlu1 %v5287_v39, %s5504_s28  ;;  %1996 = vmatpush1.bf16.msra.mxu1 %v1687_v49 }
  0xd0   :  { %v734_v52 = vpop.permute.xlu0 %733  ;;  %v736_v54 = vpop.permute.xlu1 %735 }
  0xd1   :  { %v768_v53 = vsel %vm763_vm4, %v5764_v3, %v734_v52  ;;  %v769_v56 = vsel %vm763_vm4, %v734_v52, %v736_v54 }
  0xd2   :  { %1468 = vrot.lane.b32.xlu0 %v5825_v30, %s5509_s19  ;;  %2028 = vmatprep.subr.bf16.mxu0 %v769_v56 }
  0xd3   :  { %1470 = vrot.lane.b32.xlu1 %v5834_v32, %s5509_s19  ;;  %2029 = vmatpush1.bf16.msra.mxu0 %v768_v53  ;;  %v6010_v53 = vld [vmem:[%s7536_s0 + $0x44] ss:$84 sps:$4 sm:$0xff]  }
  0xd4   :  { %v143_v57 = vpop.permute.xlu0 %142  ;;  %2012 = vmatmul.mubr.bf16.vlgmr.msra.gmra.mrb[0].mxu1 %v5796_v6  ;;  %v5896_v60 = vpop.permute.xlu1 %144  ;;  %2030 = vmatprep.subr.bf16.mxu0 %v5292_v55 }
  0xd5   :  { %v175_v59 = vsel %vm168_vm1, %v5812_v25, %v143_v57  ;;  %5096 = vmatprep.mubr.msk.bf16.mxu1 %vm1932_vm0, %v5616_v8  ;;  %v176_v61 = vsel %vm168_vm1, %v143_v57, %v5896_v60 }
  0xd6   :  { %551 = vrot.lane.b32.xlu0 %v5845_v37, %s5505_s29  ;;  %2065 = vmatprep.subr.bf16.mxu1 %v176_v61 }
  0xd7   :  { %553 = vrot.lane.b32.xlu1 %v5287_v39, %s5505_s29  ;;  %2066 = vmatpush1.bf16.msra.mxu1 %v175_v59 }
  0xd8   :  { %v342_v62 = vpop.permute.xlu0 %341  ;;  %2031 = vmatpush1.bf16.msra.mxu0 %v5294_v58  ;;  %v5906_v0 = vpop.permute.xlu1 %343 }
  0xd9   :  { %v374_v63 = vsel %vm367_vm2, %v340_v36, %v342_v62  ;;  %v375_v1 = vsel %vm367_vm2, %v342_v62, %v5906_v0 }
  0xda   :  { %1666 = vrot.lane.b32.xlu0 %v5825_v30, %s5510_s22  ;;  %2067 = vmatprep.subr.bf16.mxu1 %v375_v1 }
  0xdb   :  { %1668 = vrot.lane.b32.xlu1 %v5834_v32, %s5510_s22  ;;  %2068 = vmatpush1.bf16.msra.mxu1 %v374_v63 }
  0xdc   :  { %v1064_v2 = vpop.permute.xlu0 %1063  ;;  %v1066_v4 = vpop.permute.xlu1 %1065 }
  0xdd   :  { %v1096_v3 = vsel %vm1091_vm5, %v5801_v21, %v1064_v2  ;;  %v1097_v5 = vsel %vm1091_vm5, %v1064_v2, %v1066_v4 }
  0xde   :  { %749 = vrot.lane.b32.xlu0 %v5845_v37, %s5506_s30  ;;  %2032 = vmatprep.subr.bf16.mxu0 %v1097_v5 }
  0xdf   :  { %751 = vrot.lane.b32.xlu1 %v5287_v39, %s5506_s30  ;;  %2033 = vmatpush1.bf16.msra.mxu0 %v1096_v3 }
  0xe0   :  { %v540_v11 = vpop.permute.xlu0 %539  ;;  %v5927_v13 = vpop.permute.xlu1 %541 }
  0xe1   :  { %v572_v12 = vsel %vm565_vm3, %v538_v46, %v540_v11  ;;  %v573_v14 = vsel %vm565_vm3, %v540_v11, %v5927_v13 }
  0xe2   :  { %158 = vrot.lane.b32.xlu0 %v5289_v7, %s5503_s25  ;;  %2069 = vmatprep.subr.bf16.mxu1 %v573_v14  ;;  %v5310_v14 = vld [vmem:[%s7536_s0 + $0x24] ss:$84 sps:$4 sm:$0xff]  }
  0xe3   :  { %160 = vrot.lane.b32.xlu1 %v5290_v10, %s5503_s25  ;;  %2070 = vmatpush1.bf16.msra.mxu1 %v572_v12 }
  0xe4   :  { %v1259_v15 = vpop.permute.xlu0 %1258  ;;  %v1261_v16 = vpop.permute.xlu1 %1260 }
  0xe5   :  { %v1293_v9 = vsel %vm1288_vm6, %v5820_v29, %v1259_v15  ;;  %v1294_v18 = vsel %vm1288_vm6, %v1259_v15, %v1261_v16 }
  0xe6   :  { %357 = vrot.lane.b32.xlu0 %v5289_v7, %s5504_s28  ;;  %2034 = vmatprep.subr.bf16.mxu0 %v1294_v18 }
  0xe7   :  { %359 = vrot.lane.b32.xlu1 %v5290_v10, %s5504_s28  ;;  %2035 = vmatpush1.bf16.msra.mxu0 %v1293_v9 }
  0xe8   :  { %v738_v20 = vpop.permute.xlu0 %737  ;;  %v5945_v22 = vpop.permute.xlu1 %739 }
  0xe9   :  { %v770_v21 = vsel %vm763_vm4, %v736_v54, %v738_v20  ;;  %v771_v24 = vsel %vm763_vm4, %v738_v20, %v5945_v22  ;;  %v6017_v54 = vld [vmem:[%s7536_s0 + $0x48] ss:$84 sps:$4 sm:$0xff]  }
  0xea   :  { %1079 = vrot.lane.b32.xlu0 %v5285_v17, %s5507_s15  ;;  %2071 = vmatprep.subr.bf16.mxu1 %v771_v24  ;;  %v5307_v24 = vld [vmem:[%s7536_s0 + $0x48] ss:$84 sps:$4 sm:$0xff]  }
  0xeb   :  { %1081 = vrot.lane.b32.xlu1 %v5295_v19, %s5507_s15  ;;  %2072 = vmatpush1.bf16.msra.mxu1 %v770_v21 }
  0xec   :  { %v1457_v25 = vpop.permute.xlu0 %1456  ;;  %2073 = vmatprep.subr.bf16.mxu1 %v5297_v23  ;;  %v5306_v23 = vld [vmem:[%s7536_s0 + $0x4c] ss:$84 sps:$4 sm:$0xff]  }
  0xed   :  { %v1491_v27 = vsel %vm1486_vm7, %v5857_v42, %v1457_v25  ;;  %v1459_v28 = vpop.permute.xlu1 %1458 }
  0xee   :  { %v1492_v29 = vsel %vm1486_vm7, %v1457_v25, %v1459_v28  ;;  %555 = vrot.lane.b32.xlu0 %v5289_v7, %s5505_s29 }
  0xef   :  { %557 = vrot.lane.b32.xlu1 %v5290_v10, %s5505_s29  ;;  %2036 = vmatprep.subr.bf16.mxu0 %v1492_v29  ;;  %v5311_v29 = vld [vmem:[%s7536_s0 + $0x4c] ss:$84 sps:$4 sm:$0xff]  }
  0xf0   :  { %v1655_v30 = vpop.permute.xlu0 %1654  ;;  %2037 = vmatpush1.bf16.msra.mxu0 %v1491_v27  ;;  %2074 = vmatpush1.bf16.msra.mxu1 %v5299_v26 }
  0xf1   :  { %v1689_v31 = vsel %vm1684_vm8, %v5873_v50, %v1655_v30  ;;  %v1657_v32 = vpop.permute.xlu1 %1656 }
  0xf2   :  { %v1690_v34 = vsel %vm1684_vm8, %v1655_v30, %v1657_v32  ;;  %1274 = vrot.lane.b32.xlu0 %v5285_v17, %s5508_s18 }
  0xf3   :  { %1276 = vrot.lane.b32.xlu1 %v5295_v19, %s5508_s18  ;;  %2038 = vmatprep.subr.bf16.mxu0 %v1690_v34 }
  0xf4   :  { %v1068_v35 = vpop.permute.xlu0 %1067  ;;  %2039 = vmatpush1.bf16.msra.mxu0 %v1689_v31 }
  0xf5   :  { %v5967_v36 = vpop.permute.xlu1 %1069  ;;  %v1098_v37 = vsel %vm1091_vm5, %v1066_v4, %v1068_v35 }
  0xf6   :  { %v1099_v38 = vsel %vm1091_vm5, %v1068_v35, %v5967_v36  ;;  %753 = vrot.lane.b32.xlu0 %v5289_v7, %s5506_s30  ;;  %v5312_v35 = vld [vmem:[%s7536_s0 + $0x4c] ss:$84 sps:$4 sm:$0xff]  }
  0xf7   :  { %755 = vrot.lane.b32.xlu1 %v5290_v10, %s5506_s30  ;;  %2055 = vmatmul.mubr.bf16.vlgmr.msra.gmra.mrb[4].mxu0 %v5796_v6  ;;  %v5308_v10 = vld [vmem:[%s7536_s0 + $0x28] ss:$84 sps:$4 sm:$0xff]  }
  0xf8   :  { %v147_v39 = vpop.permute.xlu0 %146  ;;  %2075 = vmatprep.subr.bf16.mxu1 %v1099_v38  ;;  %5097 = vmatprep.mubr.msk.bf16.mxu0 %vm1932_vm0, %v5616_v8 }
  0xf9   :  { %v177_v40 = vsel %vm168_vm1, %v5896_v60, %v147_v39  ;;  %v5979_v41 = vpop.permute.xlu1 %148  ;;  %2076 = vmatpush1.bf16.msra.mxu1 %v1098_v37 }
  0xfa   :  { %v178_v42 = vsel %vm168_vm1, %v147_v39, %v5979_v41  ;;  %1472 = vrot.lane.b32.xlu0 %v5285_v17, %s5509_s19  ;;  %v5315_v39 = vld [vmem:[%s7536_s0 + $0x30] ss:$84 sps:$4 sm:$0xff]  }
  0xfb   :  { %1474 = vrot.lane.b32.xlu1 %v5295_v19, %s5509_s19  ;;  %2108 = vmatprep.subr.bf16.mxu0 %v178_v42 }
  0xfc   :  { %v1263_v43 = vpop.permute.xlu0 %1262  ;;  %2109 = vmatpush1.bf16.msra.mxu0 %v177_v40 }
  0xfd   :  { %v1295_v44 = vsel %vm1288_vm6, %v1261_v16, %v1263_v43  ;;  %v5986_v45 = vpop.permute.xlu1 %1264 }
  0xfe   :  { %v1296_v46 = vsel %vm1288_vm6, %v1263_v43, %v5986_v45  ;;  %1670 = vrot.lane.b32.xlu0 %v5285_v17, %s5510_s22  ;;  %v5317_v43 = vld [vmem:[%s7536_s0 + $0x2c] ss:$84 sps:$4 sm:$0xff]  }
  0xff   :  { %1672 = vrot.lane.b32.xlu1 %v5295_v19, %s5510_s22  ;;  %2077 = vmatprep.subr.bf16.mxu1 %v1296_v46 }
 0x100   :  { %v346_v49 = vpop.permute.xlu0 %345  ;;  %2078 = vmatpush1.bf16.msra.mxu1 %v1295_v44 }
 0x101   :  { %v376_v50 = vsel %vm367_vm2, %v5906_v0, %v346_v49  ;;  %v348_v51 = vpop.permute.xlu1 %347 }
 0x102   :  { %v377_v52 = vsel %vm367_vm2, %v346_v49, %v348_v51  ;;  %1083 = vrot.lane.b32.xlu0 %v5994_v47, %s5507_s15 }
 0x103   :  { %1085 = vrot.lane.b32.xlu1 %v6000_v48, %s5507_s15  ;;  %2110 = vmatprep.subr.bf16.mxu0 %v377_v52 }
 0x104   :  { %v1461_v55 = vpop.permute.xlu0 %1460  ;;  %2111 = vmatpush1.bf16.msra.mxu0 %v376_v50 }
 0x105   :  { %v1493_v56 = vsel %vm1486_vm7, %v1459_v28, %v1461_v55  ;;  %v6020_v57 = vpop.permute.xlu1 %1462 }
 0x106   :  { %v1494_v58 = vsel %vm1486_vm7, %v1461_v55, %v6020_v57  ;;  %162 = vrot.lane.b32.xlu0 %v6010_v53, %s5503_s25  ;;  %v5314_v55 = vld [vmem:[%s7536_s0 + $0x50] ss:$84 sps:$4 sm:$0xff]  }
 0x107   :  { %164 = vrot.lane.b32.xlu1 %v6017_v54, %s5503_s25  ;;  %2079 = vmatprep.subr.bf16.mxu1 %v1494_v58 }
 0x108   :  { %v544_v59 = vpop.permute.xlu0 %543  ;;  %2080 = vmatpush1.bf16.msra.mxu1 %v1493_v56 }
 0x109   :  { %v574_v60 = vsel %vm565_vm3, %v5927_v13, %v544_v59  ;;  %v546_v61 = vpop.permute.xlu1 %545 }
 0x10a   :  { %v575_v62 = vsel %vm565_vm3, %v544_v59, %v546_v61  ;;  %1278 = vrot.lane.b32.xlu0 %v5994_v47, %s5508_s18 }
 0x10b   :  { %1280 = vrot.lane.b32.xlu1 %v6000_v48, %s5508_s18  ;;  %2112 = vmatprep.subr.bf16.mxu0 %v575_v62 }
 0x10c   :  { %v1659_v63 = vpop.permute.xlu0 %1658  ;;  %2113 = vmatpush1.bf16.msra.mxu0 %v574_v60 }
 0x10d   :  { %v1691_v0 = vsel %vm1684_vm8, %v1657_v32, %v1659_v63  ;;  %v6036_v1 = vpop.permute.xlu1 %1660 }
 0x10e   :  { %v1692_v2 = vsel %vm1684_vm8, %v1659_v63, %v6036_v1  ;;  %361 = vrot.lane.b32.xlu0 %v6010_v53, %s5504_s28 }
 0x10f   :  { %363 = vrot.lane.b32.xlu1 %v6017_v54, %s5504_s28  ;;  %2081 = vmatprep.subr.bf16.mxu1 %v1692_v2 }
 0x110   :  { %v742_v3 = vpop.permute.xlu0 %741  ;;  %2082 = vmatpush1.bf16.msra.mxu1 %v1691_v0  ;;  %v27_v0 = vld [vmem:[%s7538_s3 + $0x8] sm:$0xff] }
 0x111   :  { %v744_v4 = vpop.permute.xlu1 %743  ;;  %v772_v5 = vsel %vm763_vm4, %v5945_v22, %v742_v3 }
 0x112   :  { %v773_v7 = vsel %vm763_vm4, %v742_v3, %v744_v4  ;;  %1476 = vrot.lane.b32.xlu0 %v5994_v47, %s5509_s19 }
 0x113   :  { %1478 = vrot.lane.b32.xlu1 %v6000_v48, %s5509_s19  ;;  %2098 = vmatmul.mubr.bf16.vlgmr.msra.gmra.mrb[4].mxu1 %v5796_v6 }
 0x114   :  { %v151_v11 = vpop.permute.xlu0 %150  ;;  %2114 = vmatprep.subr.bf16.mxu0 %v773_v7  ;;  %5098 = vmatprep.mubr.msk.bf16.mxu1 %vm1932_vm0, %v5616_v8 }
 0x115   :  { %v179_v12 = vsel %vm168_vm1, %v5979_v41, %v151_v11  ;;  %v6061_v13 = vpop.permute.xlu1 %152  ;;  %2115 = vmatpush1.bf16.msra.mxu0 %v772_v5  ;;  %v5327_v41 = vld [vmem:[%s7536_s0 + $0x4c] ss:$84 sps:$4 sm:$0xff]  }
 0x116   :  { %v180_v15 = vsel %vm168_vm1, %v151_v11, %v6061_v13  ;;  %559 = vrot.lane.b32.xlu0 %v6010_v53, %s5505_s29  ;;  %2116 = vmatprep.subr.bf16.mxu0 %v5308_v10  ;;  %955 = vst.msk [vmem:[#allocation2 + $0x2f0] sm:$0xff] %vm7543_vm9, %v5327_v41 }
 0x117   :  { %561 = vrot.lane.b32.xlu1 %v6017_v54, %s5505_s29  ;;  %2151 = vmatprep.subr.bf16.mxu1 %v180_v15 }
 0x118   :  { %v350_v9 = vpop.permute.xlu0 %349  ;;  %2152 = vmatpush1.bf16.msra.mxu1 %v179_v12 }
 0x119   :  { %v378_v16 = vsel %vm367_vm2, %v348_v51, %v350_v9  ;;  %v6073_v17 = vpop.permute.xlu1 %351  ;;  %2117 = vmatpush1.bf16.msra.mxu0 %v5310_v14 }
 0x11a   :  { %v379_v18 = vsel %vm367_vm2, %v350_v9, %v6073_v17  ;;  %1674 = vrot.lane.b32.xlu0 %v5994_v47, %s5510_s22 }
 0x11b   :  { %1676 = vrot.lane.b32.xlu1 %v6000_v48, %s5510_s22  ;;  %2153 = vmatprep.subr.bf16.mxu1 %v379_v18 }
 0x11c   :  { %v1072_v19 = vpop.permute.xlu0 %1071  ;;  %2154 = vmatpush1.bf16.msra.mxu1 %v378_v16 }
 0x11d   :  { %v1100_v20 = vsel %vm1091_vm5, %v5967_v36, %v1072_v19  ;;  %v1074_v21 = vpop.permute.xlu1 %1073 }
 0x11e   :  { %v1101_v22 = vsel %vm1091_vm5, %v1072_v19, %v1074_v21  ;;  %757 = vrot.lane.b32.xlu0 %v6010_v53, %s5506_s30 }
 0x11f   :  { %759 = vrot.lane.b32.xlu1 %v6017_v54, %s5506_s30  ;;  %2118 = vmatprep.subr.bf16.mxu0 %v1101_v22  ;;  %v5318_v22 = vld [vmem:[%s7536_s0 + $0x38] ss:$84 sps:$4 sm:$0xff]  }
 0x120   :  { %v548_v25 = vpop.permute.xlu0 %547  ;;  %2119 = vmatpush1.bf16.msra.mxu0 %v1100_v20 }
 0x121   :  { %v576_v26 = vsel %vm565_vm3, %v546_v61, %v548_v25  ;;  %v6095_v27 = vpop.permute.xlu1 %549  ;;  %v26_v61 = vld [vmem:[%s7538_s3] sm:$0xff] }
 0x122   :  { %v577_v28 = vsel %vm565_vm3, %v548_v25, %v6095_v27  ;;  %166 = vrot.lane.b32.xlu0 %v5306_v23, %s5503_s25  ;;  %v5320_v25 = vld [vmem:[%s7536_s0 + $0x34] ss:$84 sps:$4 sm:$0xff]  }
 0x123   :  { %1087 = vrot.lane.b32.xlu1 %v5307_v24, %s5507_s15  ;;  %2155 = vmatprep.subr.bf16.mxu1 %v577_v28 }
 0x124   :  { %v1267_v30 = vpop.permute.xlu0 %1266  ;;  %2156 = vmatpush1.bf16.msra.mxu1 %v576_v26  ;;  %v6206_v26 = vld [vmem:[%s7537_s2 + $0x4] ss:$8 sps:$4 sm:$0xff]  }
 0x125   :  { %v1297_v31 = vsel %vm1288_vm6, %v5986_v45, %v1267_v30  ;;  %v1269_v32 = vpop.permute.xlu1 %1268 }
 0x126   :  { %v1298_v34 = vsel %vm1288_vm6, %v1267_v30, %v1269_v32  ;;  %1089 = vrot.lane.b32.xlu0 %v5311_v29, %s5507_s15 }
 0x127   :  { %365 = vrot.lane.b32.xlu1 %v5306_v23, %s5504_s28  ;;  %2120 = vmatprep.subr.bf16.mxu0 %v1298_v34 }
 0x128   :  { %v746_v36 = vpop.permute.xlu0 %745  ;;  %2121 = vmatpush1.bf16.msra.mxu0 %v1297_v31 }
 0x129   :  { %v774_v37 = vsel %vm763_vm4, %v744_v4, %v746_v36  ;;  %v6113_v38 = vpop.permute.xlu1 %747 }
 0x12a   :  { %v775_v40 = vsel %vm763_vm4, %v746_v36, %v6113_v38  ;;  %1282 = vrot.lane.b32.xlu0 %v5307_v24, %s5508_s18 }
 0x12b   :  { %1284 = vrot.lane.b32.xlu1 %v5312_v35, %s5508_s18  ;;  %2157 = vmatprep.subr.bf16.mxu1 %v775_v40 }
 0x12c   :  { %v1465_v42 = vpop.permute.xlu0 %1464  ;;  %2158 = vmatpush1.bf16.msra.mxu1 %v774_v37 }
 0x12d   :  { %v1495_v44 = vsel %vm1486_vm7, %v6020_v57, %v1465_v42  ;;  %v1467_v45 = vpop.permute.xlu1 %1466  ;;  %2159 = vmatprep.subr.bf16.mxu1 %v5315_v39 }
 0x12e   :  { %v1496_v46 = vsel %vm1486_vm7, %v1465_v42, %v1467_v45  ;;  %563 = vrot.lane.b32.xlu0 %v5306_v23, %s5505_s29 }
 0x12f   :  { %1480 = vrot.lane.b32.xlu1 %v5307_v24, %s5509_s19  ;;  %2122 = vmatprep.subr.bf16.mxu0 %v1496_v46 }
 0x130   :  { %v1663_v47 = vpop.permute.xlu0 %1662  ;;  %2123 = vmatpush1.bf16.msra.mxu0 %v1495_v44  ;;  %2160 = vmatpush1.bf16.msra.mxu1 %v5317_v43 }
 0x131   :  { %v1693_v48 = vsel %vm1684_vm8, %v6036_v1, %v1663_v47  ;;  %v1665_v49 = vpop.permute.xlu1 %1664 }
 0x132   :  { %v1694_v50 = vsel %vm1684_vm8, %v1663_v47, %v1665_v49  ;;  %1482 = vrot.lane.b32.xlu0 %v5312_v35, %s5509_s19 }
 0x133   :  { %761 = vrot.lane.b32.xlu1 %v5306_v23, %s5506_s30  ;;  %2124 = vmatprep.subr.bf16.mxu0 %v1694_v50  ;;  %v5321_v50 = vld [vmem:[%s7536_s0 + $0x40] ss:$84 sps:$4 sm:$0xff]  }
 0x134   :  { %v1076_v51 = vpop.permute.xlu0 %1075  ;;  %2125 = vmatpush1.bf16.msra.mxu0 %v1693_v48 }
 0x135   :  { %v6139_v52 = vpop.permute.xlu1 %1077  ;;  %v1102_v53 = vsel %vm1091_vm5, %v1074_v21, %v1076_v51 }
 0x136   :  { %v1103_v54 = vsel %vm1091_vm5, %v1076_v51, %v6139_v52  ;;  %1678 = vrot.lane.b32.xlu0 %v5307_v24, %s5510_s22 }
 0x137   :  { %1680 = vrot.lane.b32.xlu1 %v5312_v35, %s5510_s22  ;;  %2141 = vmatmul.mubr.bf16.vlgmr.msra.gmra.mrb[8].mxu0 %v5796_v6 }
 0x138   :  { %v155_v56 = vpop.permute.xlu0 %154  ;;  %2161 = vmatprep.subr.bf16.mxu1 %v1103_v54  ;;  %5099 = vmatprep.mubr.msk.bf16.mxu0 %vm1932_vm0, %v5616_v8 }
 0x139   :  { %v181_v57 = vsel %vm168_vm1, %v6061_v13, %v155_v56  ;;  %v157_v58 = vpop.permute.xlu1 %156  ;;  %2162 = vmatpush1.bf16.msra.mxu1 %v1102_v53  ;;  %v5323_v53 = vld [vmem:[%s7536_s0 + $0x3c] ss:$84 sps:$4 sm:$0xff]  }
 0x13a   :  { %v182_v59 = vsel %vm168_vm1, %v155_v56, %v157_v58  ;;  %1286 = vrot.lane.b32.xlu0 %v5314_v55, %s5508_s18 }
 0x13b   :  { %1484 = vrot.lane.b32.xlu1 %v5314_v55, %s5509_s19  ;;  %2194 = vmatprep.subr.bf16.mxu0 %v182_v59 }
 0x13c   :  { %v1271_v60 = vpop.permute.xlu0 %1270  ;;  %2195 = vmatpush1.bf16.msra.mxu0 %v181_v57 }
 0x13d   :  { %v1299_v8 = vsel %vm1288_vm6, %v1269_v32, %v1271_v60  ;;  %v6161_v62 = vpop.permute.xlu1 %1272 }
 0x13e   :  { %v1300_v63 = vsel %vm1288_vm6, %v1271_v60, %v6161_v62  ;;  %1682 = vrot.lane.b32.xlu0 %v5314_v55, %s5510_s22 }
 0x13f   :  { %1915 = vperm.xlu1 %5240, %v26_v61   ;;  %2163 = vmatprep.subr.bf16.mxu1 %v1300_v63 }
 0x140   :  { %v354_v1 = vpop.permute.xlu0 %353  ;;  %2164 = vmatpush1.bf16.msra.mxu1 %v1299_v8 }
 0x141   :  { %v380_v2 = vsel %vm367_vm2, %v6073_v17, %v354_v1  ;;  %v356_v3 = vpop.permute.xlu1 %355 }
 0x142   :  { %v381_v4 = vsel %vm367_vm2, %v354_v1, %v356_v3  ;;  %1920 = vperm.xlu0 %5241, %v27_v0  }
 0x143   :  { %2196 = vmatprep.subr.bf16.mxu0 %v381_v4  ;;  %2971 = vrot.lane.b32.xlu1 %v5511_v33, %s5504_s28 }
 0x144   :  { %v1469_v5 = vpop.permute.xlu0 %1468  ;;  %2197 = vmatpush1.bf16.msra.mxu0 %v380_v2 }
 0x145   :  { %v1497_v7 = vsel %vm1486_vm7, %v1467_v45, %v1469_v5  ;;  %v6175_v10 = vpop.permute.xlu1 %1470 }
 0x146   :  { %v1498_v11 = vsel %vm1486_vm7, %v1469_v5, %v6175_v10  ;;  %2834 = vrot.lane.b32.xlu0 %v5511_v33, %s5503_s25 }
 0x147   :  { %2165 = vmatprep.subr.bf16.mxu1 %v1498_v11  ;;  %3245 = vrot.lane.b32.xlu1 %v5511_v33, %s5506_s30 }
 0x148   :  { %v552_v12 = vpop.permute.xlu0 %551  ;;  %2166 = vmatpush1.bf16.msra.mxu1 %v1497_v7 }
 0x149   :  { %v578_v13 = vsel %vm565_vm3, %v6095_v27, %v552_v12  ;;  %v554_v14 = vpop.permute.xlu1 %553 }
 0x14a   :  { %v579_v15 = vsel %vm565_vm3, %v552_v12, %v554_v14  ;;  %3108 = vrot.lane.b32.xlu0 %v5511_v33, %s5505_s29 }
 0x14b   :  { %2198 = vmatprep.subr.bf16.mxu0 %v579_v15 }
 0x14c   :  { %v1667_v9 = vpop.permute.xlu0 %1666  ;;  %2199 = vmatpush1.bf16.msra.mxu0 %v578_v13 }
 0x14d   :  { %v1695_v16 = vsel %vm1684_vm8, %v1665_v49, %v1667_v9  ;;  %v6189_v17 = vpop.permute.xlu1 %1668 }
 0x14e   :  { %v1696_v18 = vsel %vm1684_vm8, %v1667_v9, %v6189_v17 }
 0x14f   :  { %2167 = vmatprep.subr.bf16.mxu1 %v1696_v18 }
 0x150   :  { %v750_v19 = vpop.permute.xlu0 %749  ;;  %2168 = vmatpush1.bf16.msra.mxu1 %v1695_v16 }
 0x151   :  { %v776_v20 = vsel %vm763_vm4, %v6113_v38, %v750_v19  ;;  %v752_v21 = vpop.permute.xlu1 %751 }
 0x152   :  { %v777_v23 = vsel %vm763_vm4, %v750_v19, %v752_v21 }
 0x153   :  { %2184 = vmatmul.mubr.bf16.vlgmr.msra.gmra.mrb[8].mxu1 %v5796_v6  ;;  %2200 = vmatprep.subr.bf16.mxu0 %v777_v23 }
 0x154   :  { %v159_v24 = vpop.permute.xlu0 %158  ;;  %2201 = vmatpush1.bf16.msra.mxu0 %v776_v20  ;;  %5100 = vmatprep.mubr.msk.bf16.mxu1 %vm1932_vm0, %v6206_v26 }
 0x155   :  { %v183_v27 = vsel %vm168_vm1, %v157_v58, %v159_v24  ;;  %v161_v28 = vpop.permute.xlu1 %160  ;;  %2202 = vmatprep.subr.bf16.mxu0 %v5318_v22 }
 0x156   :  { %v184_v29 = vsel %vm168_vm1, %v159_v24, %v161_v28 }
 0x157   :  { %2237 = vmatprep.subr.bf16.mxu1 %v184_v29 }
 0x158   :  { %v358_v30 = vpop.permute.xlu0 %357  ;;  %2238 = vmatpush1.bf16.msra.mxu1 %v183_v27  ;;  %2203 = vmatpush1.bf16.msra.mxu0 %v5320_v25 }
 0x159   :  { %v382_v31 = vsel %vm367_vm2, %v356_v3, %v358_v30  ;;  %v6213_v32 = vpop.permute.xlu1 %359 }
 0x15a   :  { %v383_v34 = vsel %vm367_vm2, %v358_v30, %v6213_v32 }
 0x15b   :  { %2239 = vmatprep.subr.bf16.mxu1 %v383_v34 }
 0x15c   :  { %v1080_v35 = vpop.permute.xlu0 %1079  ;;  %2240 = vmatpush1.bf16.msra.mxu1 %v382_v31 }
 0x15d   :  { %v1104_v36 = vsel %vm1091_vm5, %v6139_v52, %v1080_v35  ;;  %v1082_v37 = vpop.permute.xlu1 %1081 }
 0x15e   :  { %v1105_v38 = vsel %vm1091_vm5, %v1080_v35, %v1082_v37  ;;  %v5324_v35 = vld [vmem:[%s7536_s0 + $0x48] ss:$84 sps:$4 sm:$0xff]  }
 0x15f   :  { %2204 = vmatprep.subr.bf16.mxu0 %v1105_v38  ;;  %v5326_v38 = vld [vmem:[%s7536_s0 + $0x44] ss:$84 sps:$4 sm:$0xff]  }
 0x160   :  { %v556_v39 = vpop.permute.xlu0 %555  ;;  %2205 = vmatpush1.bf16.msra.mxu0 %v1104_v36 }
 0x161   :  { %v580_v40 = vsel %vm565_vm3, %v554_v14, %v556_v39  ;;  %v6221_v41 = vpop.permute.xlu1 %557 }
 0x162   :  { %v581_v42 = vsel %vm565_vm3, %v556_v39, %v6221_v41 }
 0x163   :  { %2241 = vmatprep.subr.bf16.mxu1 %v581_v42 }
 0x164   :  { %v1275_v43 = vpop.permute.xlu0 %1274  ;;  %2242 = vmatpush1.bf16.msra.mxu1 %v580_v40 }
 0x165   :  { %v1301_v44 = vsel %vm1288_vm6, %v6161_v62, %v1275_v43  ;;  %v1277_v45 = vpop.permute.xlu1 %1276 }
 0x166   :  { %v1302_v46 = vsel %vm1288_vm6, %v1275_v43, %v1277_v45 }
 0x167   :  { %2206 = vmatprep.subr.bf16.mxu0 %v1302_v46 }
 0x168   :  { %v754_v47 = vpop.permute.xlu0 %753  ;;  %2207 = vmatpush1.bf16.msra.mxu0 %v1301_v44 }
 0x169   :  { %v778_v48 = vsel %vm763_vm4, %v752_v21, %v754_v47  ;;  %v6229_v49 = vpop.permute.xlu1 %755 }
 0x16a   :  { %v779_v51 = vsel %vm763_vm4, %v754_v47, %v6229_v49 }
 0x16b   :  { %2243 = vmatprep.subr.bf16.mxu1 %v779_v51 }
 0x16c   :  { %v1473_v52 = vpop.permute.xlu0 %1472  ;;  %2244 = vmatpush1.bf16.msra.mxu1 %v778_v48 }
 0x16d   :  { %v1499_v54 = vsel %vm1486_vm7, %v6175_v10, %v1473_v52  ;;  %v1475_v55 = vpop.permute.xlu1 %1474  ;;  %2245 = vmatprep.subr.bf16.mxu1 %v5321_v50 }
 0x16e   :  { %v1500_v56 = vsel %vm1486_vm7, %v1473_v52, %v1475_v55 }
 0x16f   :  { %2208 = vmatprep.subr.bf16.mxu0 %v1500_v56 }
 0x170   :  { %v1671_v57 = vpop.permute.xlu0 %1670  ;;  %2209 = vmatpush1.bf16.msra.mxu0 %v1499_v54  ;;  %2246 = vmatpush1.bf16.msra.mxu1 %v5323_v53 }
 0x171   :  { %v1697_v58 = vsel %vm1684_vm8, %v6189_v17, %v1671_v57  ;;  %v1673_v59 = vpop.permute.xlu1 %1672 }
 0x172   :  { %v1698_v60 = vsel %vm1684_vm8, %v1671_v57, %v1673_v59 }
 0x173   :  { %2210 = vmatprep.subr.bf16.mxu0 %v1698_v60 }
 0x174   :  { %v1084_v61 = vpop.permute.xlu0 %1083  ;;  %2211 = vmatpush1.bf16.msra.mxu0 %v1697_v58 }
 0x175   :  { %v1106_v8 = vsel %vm1091_vm5, %v1082_v37, %v1084_v61  ;;  %v6246_v62 = vpop.permute.xlu1 %1085 }
 0x176   :  { %v1107_v63 = vsel %vm1091_vm5, %v1084_v61, %v6246_v62 }
 0x177   :  { %2227 = vmatmul.mubr.bf16.vlgmr.msra.gmra.mrb[12].mxu0 %v5796_v6  ;;  %2247 = vmatprep.subr.bf16.mxu1 %v1107_v63 }
 0x178   :  { %v163_v0 = vpop.permute.xlu0 %162  ;;  %2248 = vmatpush1.bf16.msra.mxu1 %v1106_v8  ;;  %5101 = vmatprep.mubr.msk.bf16.mxu0 %vm1932_vm0, %v6206_v26 }
 0x179   :  { %v185_v1 = vsel %vm168_vm1, %v161_v28, %v163_v0  ;;  %v165_v2 = vpop.permute.xlu1 %164 }
 0x17a   :  { %v186_v3 = vsel %vm168_vm1, %v163_v0, %v165_v2 }
 0x17b   :  { %2280 = vmatprep.subr.bf16.mxu0 %v186_v3 }
 0x17c   :  { %v1279_v4 = vpop.permute.xlu0 %1278  ;;  %2281 = vmatpush1.bf16.msra.mxu0 %v185_v1 }
 0x17d   :  { %v1303_v5 = vsel %vm1288_vm6, %v1277_v45, %v1279_v4  ;;  %v1281_v7 = vpop.permute.xlu1 %1280 }
 0x17e   :  { %v1304_v10 = vsel %vm1288_vm6, %v1279_v4, %v1281_v7 }
 0x17f   :  { %2249 = vmatprep.subr.bf16.mxu1 %v1304_v10  ;;  %v5484_v10 = vld [vmem:[%s7537_s2] ss:$8 sps:$4 sm:$0xff]  }
 0x180   :  { %v362_v11 = vpop.permute.xlu0 %361  ;;  %2250 = vmatpush1.bf16.msra.mxu1 %v1303_v5 }
 0x181   :  { %v384_v12 = vsel %vm367_vm2, %v6213_v32, %v362_v11  ;;  %v364_v13 = vpop.permute.xlu1 %363 }
 0x182   :  { %v385_v14 = vsel %vm367_vm2, %v362_v11, %v364_v13  ;;  %v5485_v11 = vld [vmem:[#allocation3] sm:$0xff] }
 0x183   :  { %2282 = vmatprep.subr.bf16.mxu0 %v385_v14 }
 0x184   :  { %v1477_v15 = vpop.permute.xlu0 %1476  ;;  %2283 = vmatpush1.bf16.msra.mxu0 %v384_v12  ;;  %v1836_v12 = vld [vmem:[#allocation2 + $0x2f0] sm:$0xff] }
 0x185   :  { %v1501_v9 = vsel %vm1486_vm7, %v1475_v55, %v1477_v15  ;;  %v6261_v16 = vpop.permute.xlu1 %1478 }
 0x186   :  { %v1502_v17 = vsel %vm1486_vm7, %v1477_v15, %v6261_v16 }
 0x187   :  { %2251 = vmatprep.subr.bf16.mxu1 %v1502_v17 }
 0x188   :  { %v560_v18 = vpop.permute.xlu0 %559  ;;  %2252 = vmatpush1.bf16.msra.mxu1 %v1501_v9 }
 0x189   :  { %v582_v19 = vsel %vm565_vm3, %v6221_v41, %v560_v18  ;;  %v562_v20 = vpop.permute.xlu1 %561  ;;  %v6267_v21 = vpop.f32.mrb[0].mxu0 }
 0x18a   :  { %v583_v22 = vsel %vm565_vm3, %v560_v18, %v562_v20  ;;  %v6270_v23 = vpop.f32.mrb[1].mxu0 }
 0x18b   :  { %2284 = vmatprep.subr.bf16.mxu0 %v583_v22  ;;  %v6272_v24 = vpop.f32.mrb[2].mxu0 }
 0x18c   :  { %v1675_v25 = vpop.permute.xlu0 %1674  ;;  %2285 = vmatpush1.bf16.msra.mxu0 %v582_v19  ;;  %v6274_v27 = vpop.f32.mrb[3].mxu0 }
 0x18d   :  { %v1699_v28 = vsel %vm1684_vm8, %v1673_v59, %v1675_v25  ;;  %v1677_v29 = vpop.permute.xlu1 %1676 }
 0x18e   :  { %v1700_v30 = vsel %vm1684_vm8, %v1675_v25, %v1677_v29  ;;  %v2598_v25 = vlaneseq }
 0x18f   :  { %2253 = vmatprep.subr.bf16.mxu1 %v1700_v30 }
 0x190   :  { %v758_v31 = vpop.permute.xlu0 %757  ;;  %2254 = vmatpush1.bf16.msra.mxu1 %v1699_v28 }
 0x191   :  { %v780_v32 = vsel %vm763_vm4, %v6229_v49, %v758_v31  ;;  %v760_v34 = vpop.permute.xlu1 %759  ;;  %2323 = vmatprep.subr.bf16.mxu1 %v5511_v33 }
 0x192   :  { %v781_v36 = vsel %vm763_vm4, %v758_v31, %v760_v34 }
 0x193   :  { %2270 = vmatmul.mubr.bf16.vlgmr.msra.gmra.mrb[12].mxu1 %v5796_v6  ;;  %2286 = vmatprep.subr.bf16.mxu0 %v781_v36 }
 0x194   :  { %v167_v37 = vpop.permute.xlu0 %166  ;;  %2287 = vmatpush1.bf16.msra.mxu0 %v780_v32  ;;  %5102 = vmatprep.mubr.msk.bf16.mxu1 %vm1932_vm0, %v6206_v26 }
 0x195   :  { %v187_v39 = vsel %vm168_vm1, %v165_v2, %v167_v37  ;;  %v1088_v40 = vpop.permute.xlu1 %1087  ;;  %2288 = vmatprep.subr.bf16.mxu0 %v5324_v35 }
 0x196   :  { %226 = vst.msk [vmem:[#allocation2 + $0x90] sm:$0xff] %vm7543_vm9, %v187_v39  ;;  %v1108_v44 = vsel %vm1091_vm5, %v6246_v62, %v1088_v40 }
 0x198   :  { %v1090_v41 = vpop.permute.xlu0 %1089  ;;  %2289 = vmatpush1.bf16.msra.mxu0 %v5326_v38 }
 0x199   :  { %v1109_v6 = vsel %vm1091_vm5, %v1088_v40, %v1090_v41  ;;  %1147 = vst.msk [vmem:[#allocation2 + $0x388] sm:$0xff] %vm7543_vm9, %v1090_v41  ;;  %v366_v42 = vpop.permute.xlu1 %365 }
 0x19a   :  { %v386_v43 = vsel %vm367_vm2, %v364_v13, %v366_v42  ;;  %2290 = vmatprep.subr.bf16.mxu0 %v1109_v6 }
 0x19b   :  { %424 = vst.msk [vmem:[#allocation2 + $0x128] sm:$0xff] %vm7543_vm9, %v386_v43 }
 0x19c   :  { %v1283_v26 = vpop.permute.xlu0 %1282  ;;  %2291 = vmatpush1.bf16.msra.mxu0 %v1108_v44 }
 0x19d   :  { %v1305_v45 = vsel %vm1288_vm6, %v1281_v7, %v1283_v26  ;;  %v1285_v46 = vpop.permute.xlu1 %1284  ;;  %v1760_v47 = vld [vmem:[#allocation2 + $0x90] sm:$0xff] }
 0x19e   :  { %v1306_v48 = vsel %vm1288_vm6, %v1283_v26, %v1285_v46  ;;  %2324 = vmatpush1.bf16.msra.mxu1 %v1760_v47 }
 0x19f   :  { %2325 = vmatprep.subr.bf16.mxu1 %v5511_v33  ;;  %2292 = vmatprep.subr.bf16.mxu0 %v1306_v48 }
 0x1a0   :  { %v564_v49 = vpop.permute.xlu0 %563  ;;  %2293 = vmatpush1.bf16.msra.mxu0 %v1305_v45  ;;  %v1855_v14 = vld [vmem:[#allocation2 + $0x388] sm:$0xff] }
 0x1a1   :  { %v584_v50 = vsel %vm565_vm3, %v562_v20, %v564_v49  ;;  %v1481_v51 = vpop.permute.xlu1 %1480 }
 0x1a2   :  { %622 = vst.msk [vmem:[#allocation2 + $0x1c0] sm:$0xff] %vm7543_vm9, %v584_v50  ;;  %v1779_v52 = vld [vmem:[#allocation2 + $0x128] sm:$0xff]  ;;  %v1503_v56 = vsel %vm1486_vm7, %v6261_v16, %v1481_v51 }
 0x1a3   :  { %2326 = vmatpush1.bf16.msra.mxu1 %v1779_v52 }
 0x1a4   :  { %v1483_v53 = vpop.permute.xlu0 %1482  ;;  %2327 = vmatprep.subr.bf16.mxu1 %v5511_v33 }
 0x1a5   :  { %v1504_v54 = vsel %vm1486_vm7, %v1481_v51, %v1483_v53  ;;  %v762_v55 = vpop.permute.xlu1 %761 }
 0x1a6   :  { %v782_v57 = vsel %vm763_vm4, %v760_v34, %v762_v55  ;;  %2294 = vmatprep.subr.bf16.mxu0 %v1504_v54 }
 0x1a7   :  { %820 = vst.msk [vmem:[#allocation2 + $0x258] sm:$0xff] %vm7543_vm9, %v782_v57  ;;  %2295 = vmatpush1.bf16.msra.mxu0 %v1503_v56  ;;  %v2013_v58 = vpop.f32.mrb[0].mxu1 }
 0x1a8   :  { %v1679_v59 = vpop.permute.xlu0 %1678  ;;  %v2015_v60 = vpop.f32.mrb[1].mxu1 }
 0x1a9   :  { %v1701_v61 = vsel %vm1684_vm8, %v1677_v29, %v1679_v59  ;;  %v1681_v8 = vpop.permute.xlu1 %1680  ;;  %v1798_v62 = vld [vmem:[#allocation2 + $0x1c0] sm:$0xff]  ;;  %v2017_v63 = vpop.f32.mrb[2].mxu1 }
 0x1aa   :  { %v1702_v0 = vsel %vm1684_vm8, %v1679_v59, %v1681_v8  ;;  %2328 = vmatpush1.bf16.msra.mxu1 %v1798_v62  ;;  %v2019_v1 = vpop.f32.mrb[3].mxu1 }
 0x1ab   :  { %2329 = vmatprep.subr.bf16.mxu1 %v5511_v33  ;;  %2296 = vmatprep.subr.bf16.mxu0 %v1702_v0 }
 0x1ac   :  { %v1287_v2 = vpop.permute.xlu0 %1286  ;;  %2297 = vmatpush1.bf16.msra.mxu0 %v1701_v61 }
 0x1ad   :  { %v1307_v3 = vsel %vm1288_vm6, %v1285_v46, %v1287_v2  ;;  %v1485_v4 = vpop.permute.xlu1 %1484  ;;  %v6373_v46 = vld [vmem:[%s7539_s1] sm:$0xff] }
 0x1ae   :  { %1345 = vst.msk [vmem:[#allocation2 + $0x420] sm:$0xff] %vm7543_vm9, %v1307_v3  ;;  %v1505_v5 = vsel %vm1486_vm7, %v1483_v53, %v1485_v4  ;;  %v1817_v7 = vld [vmem:[#allocation2 + $0x258] sm:$0xff] }
 0x1af   :  { %1543 = vst.msk [vmem:[#allocation2 + $0x4b8] sm:$0xff] %vm7543_vm9, %v1505_v5  ;;  %2330 = vmatpush1.bf16.msra.mxu1 %v1817_v7  ;;  %2313 = vmatmul.mubr.bf16.vlgmr.msra.gmra.mrb[16].mxu0 %v5484_v10 }
 0x1b0   :  { %v1683_v33 = vpop.permute.xlu0 %1682  ;;  %2331 = vmatprep.subr.bf16.mxu1 %v5485_v11 }
 0x1b1   :  { %v1703_v13 = vsel %vm1684_vm8, %v1681_v8, %v1683_v33 }
 0x1b2   :  { %1741 = vst.msk [vmem:[#allocation2 + $0x550] sm:$0xff] %vm7543_vm9, %v1703_v13 }
 0x1b3   :  { %2332 = vmatpush1.bf16.msra.mxu1 %v1836_v12 }
 0x1b4   :  { %2333 = vmatprep.subr.bf16.mxu1 %v5485_v11 }
 0x1b5   :  { %v1874_v15 = vld [vmem:[#allocation2 + $0x420] sm:$0xff] }
 0x1b6   :  { %v1893_v16 = vld [vmem:[#allocation2 + $0x4b8] sm:$0xff] }
 0x1b7   :  { %2334 = vmatpush1.bf16.msra.mxu1 %v1855_v14 }
 0x1b8   :  { %2335 = vmatprep.subr.bf16.mxu1 %v5485_v11 }
 0x1b9   :  { %v1912_v30 = vld [vmem:[#allocation2 + $0x550] sm:$0xff] }
 0x1bb   :  { %2336 = vmatpush1.bf16.msra.mxu1 %v1874_v15 }
 0x1bc   :  { %2337 = vmatprep.subr.bf16.mxu1 %v5485_v11 }
 0x1be   :  { %v6322_v9 = vpop.permute.xlu1 %1915 }
 0x1bf   :  { %2338 = vmatpush1.bf16.msra.mxu1 %v1893_v16  ;;  %v6325_v17 = vadd.f32 %v2015_v60, %v6322_v9  ;;  %v6328_v18 = vadd.f32 %v2013_v58, %v6322_v9  ;;  %v6332_v19 = vadd.f32 %v6267_v21, %v6322_v9  ;;  %v6351_v36 = vadd.f32 %v6270_v23, %v6322_v9 }
 0x1c0   :  { %2339 = vmatprep.subr.bf16.mxu1 %v5485_v11 }
 0x1c1   :  { %v6334_v20 = vpop.permute.xlu0 %1920  ;;  %v2405_v22 = vmin.f32 %v6325_v17, 0.0  ;;  %v2404_v28 = vmin.f32 %v6328_v18, 0.0  ;;  %v2402_v35 = vmin.f32 %v6332_v19, 0.0  ;;  %v2403_v43 = vmin.f32 %v6351_v36, 0.0 }
 0x1c2   :  { %v6339_v29 = vadd.f32 %v2019_v1, %v6334_v20  ;;  %v6342_v31 = vadd.f32 %v2017_v63, %v6334_v20  ;;  %v6346_v32 = vadd.f32 %v6272_v24, %v6334_v20  ;;  %v6357_v39 = vadd.f32 %v6274_v27, %v6334_v20 }
 0x1c3   :  { %v2446_v21 = vmul.f32 1.442695, %v2405_v22  ;;  %2340 = vmatpush1.bf16.msra.mxu1 %v1912_v30  ;;  %v2444_v34 = vmul.f32 1.442695, %v2404_v28  ;;  %v6359_v24 = vshrl.u32 %v2598_v25, 7  ;;  %vm2367_vm10 = vcmp.gt.f32.partialorder %v6325_v17, 0.0 }
 0x1c4   :  { %v2424_v37 = vmin.f32 %v6339_v29, 0.0  ;;  %v2423_v38 = vmin.f32 %v6342_v31, 0.0  ;;  %v2421_v40 = vmin.f32 %v6346_v32, 0.0  ;;  %v2440_v41 = vmul.f32 1.442695, %v2402_v35 }
 0x1c5   :  { %5331 = vpow2.f32 %v2446_v21  ;;  %v2422_v44 = vmin.f32 %v6357_v39, 0.0  ;;  %v6365_v27 = vsub.s32 0, %v6359_v24  ;;  %v6368_v26 = vsub.s32 1, %v6359_v24 }
 0x1c6   :  { %v2484_v6 = vmul.f32 1.442695, %v2424_v37  ;;  %2356 = vmatmul.mubr.bf16.vlgmr.msra.gmra.mrb[16].mxu1 %v5484_v10  ;;  %5333 = vpow2.f32 %v2444_v34  ;;  %v2482_v42 = vmul.f32 1.442695, %v2423_v38  ;;  %v2478_v23 = vmul.f32 1.442695, %v2421_v40 }
 0x1c7   :  { %5335 = vpow2.f32 %v2440_v41  ;;  %v2442_v45 = vmul.f32 1.442695, %v2403_v43  ;;  %v6376_v47 = vsub.s32 2, %v6359_v24  ;;  %v2612_v48 = vsub.s32 3, %v6359_v24 }
 0x1c8   :  { %5337 = vpow2.f32 %v2484_v6  ;;  %v2480_v50 = vmul.f32 1.442695, %v2422_v44  ;;  %v2601_v55 = vrot.slane %v6373_v46, %v6365_v27  ;;  %v6389_v56 = vrot.slane %v6373_v46, %v6368_v26 }
 0x1c9   :  { %5339 = vpow2.f32 %v2482_v42  ;;  %v2609_v60 = vrot.slane %v6373_v46, %v6376_v47  ;;  %v2613_v61 = vrot.slane %v6373_v46, %v2612_v48  ;;  %vm2366_vm11 = vcmp.gt.f32.partialorder %v6328_v18, 0.0 }
 0x1ca   :  { %v2056_v49 = vpop.f32.mrb[4].mxu0  ;;  %5341 = vpow2.f32 %v2478_v23  ;;  %vm2364_vm12 = vcmp.gt.f32.partialorder %v6332_v19, 0.0  ;;  %vm2386_vm13 = vcmp.gt.f32.partialorder %v6339_v29, 0.0  ;;  %vm2385_vm14 = vcmp.gt.f32.partialorder %v6342_v31, 0.0 }
 0x1cb   :  { %v6380_v51 = vadd.f32 %v2056_v49, %v6322_v9  ;;  %v2058_v52 = vpop.f32.mrb[5].mxu0  ;;  %5343 = vpow2.f32 %v2442_v45  ;;  %vm2383_vm15 = vcmp.gt.f32.partialorder %v6346_v32, 0.0  ;;  %vm2365_vm9 = vcmp.gt.f32.partialorder %v6351_v36, 0.0 }
 0x1cc   :  { %v6383_v53 = vadd.f32 %v2058_v52, %v6322_v9  ;;  %v2060_v54 = vpop.f32.mrb[6].mxu0  ;;  %5345 = vpow2.f32 %v2480_v50  ;;  %v2616_v45 = vsub.s32 4, %v6359_v24 }
 0x1cd   :  { %v2406_v57 = vmin.f32 %v6380_v51, 0.0  ;;  %v6393_v58 = vadd.f32 %v2060_v54, %v6334_v20  ;;  %v2062_v59 = vpop.f32.mrb[7].mxu0 }
 0x1ce   :  { %v2407_v8 = vmin.f32 %v6383_v53, 0.0  ;;  %v6402_v62 = vadd.f32 %v2062_v59, %v6334_v20 }
 0x1cf   :  { %v5332_v63 = vpop.eup %5331  ;;  %v2448_v0 = vmul.f32 1.442695, %v2406_v57  ;;  %v2425_v1 = vmin.f32 %v6393_v58, 0.0 }
 0x1d0   :  { %v5334_v2 = vpop.eup %5333  ;;  %v5106_v3 = vadd.f32 -1.0, %v5332_v63  ;;  %v2450_v4 = vmul.f32 1.442695, %v2407_v8  ;;  %v2426_v5 = vmin.f32 %v6402_v62, 0.0 }
 0x1d1   :  { %v5336_v7 = vpop.eup %5335  ;;  %5347 = vpow2.f32 %v2448_v0  ;;  %v2486_v10 = vmul.f32 1.442695, %v2425_v1  ;;  %v5105_v33 = vadd.f32 -1.0, %v5334_v2 }
 0x1d2   :  { %v5338_v11 = vpop.eup %5337  ;;  %5349 = vpow2.f32 %v2450_v4  ;;  %v2488_v12 = vmul.f32 1.442695, %v2426_v5  ;;  %v5103_v13 = vadd.f32 -1.0, %v5336_v7  ;;  %v2557_v16 = vsel %vm2367_vm10, %v6325_v17, %v5106_v3 }
 0x1d3   :  { %v5340_v14 = vpop.eup %5339  ;;  %v5125_v15 = vadd.f32 -1.0, %v5338_v11  ;;  %5351 = vpow2.f32 %v2486_v10  ;;  %v2556_v28 = vsel %vm2366_vm11, %v6328_v18, %v5105_v33  ;;  %vm2384_vm10 = vcmp.gt.f32.partialorder %v6357_v39, 0.0 }
 0x1d4   :  { %v5342_v22 = vpop.eup %5341  ;;  %5353 = vpow2.f32 %v2488_v12  ;;  %v5124_v25 = vadd.f32 -1.0, %v5340_v14  ;;  %v2554_v17 = vsel %vm2364_vm12, %v6332_v19, %v5103_v13  ;;  %v2696_v37 = vmul.f32 %v2613_v61, %v2557_v16 }
 0x1d5   :  { %v5344_v30 = vpop.eup %5343  ;;  %v2576_v21 = vsel %vm2386_vm13, %v6339_v29, %v5125_v15  ;;  %v5122_v34 = vadd.f32 -1.0, %v5342_v22  ;;  %v2695_v41 = vmul.f32 %v2609_v60, %v2556_v28  ;;  %v2693_v19 = vmul.f32 %v2601_v55, %v2554_v17 }
 0x1d6   :  { %v5346_v35 = vpop.eup %5345  ;;  %v2715_v38 = vmul.f32 %v2613_v61, %v2576_v21  ;;  %v2575_v18 = vsel %vm2385_vm14, %v6342_v31, %v5124_v25  ;;  %v5104_v40 = vadd.f32 -1.0, %v5344_v30  ;;  %vm2369_vm11 = vcmp.gt.f32.partialorder %v6383_v53, 0.0 }
 0x1d7   :  { %v2714_v6 = vmul.f32 %v2609_v60, %v2575_v18  ;;  %v2573_v29 = vsel %vm2383_vm15, %v6346_v32, %v5122_v34  ;;  %v5123_v42 = vadd.f32 -1.0, %v5346_v35  ;;  %v2620_v32 = vsub.s32 5, %v6359_v24 }
 0x1d8   :  { %v6432_v23 = vpack.c.bf16 %v2715_v38, %v2696_v37  ;;  %v2712_v43 = vmul.f32 %v2601_v55, %v2573_v29  ;;  %v2555_v44 = vsel %vm2365_vm9, %v6351_v36, %v5104_v40  ;;  %vm2368_vm9 = vcmp.gt.f32.partialorder %v6380_v51, 0.0 }
 0x1d9   :  { %v6438_v49 = vpack.c.bf16 %v2714_v6, %v2695_v41  ;;  %v2574_v31 = vsel %vm2384_vm10, %v6357_v39, %v5123_v42  ;;  %v2694_v52 = vmul.f32 %v6389_v56, %v2555_v44  ;;  %v2621_v63 = vrot.slane %v6373_v46, %v2620_v32 }
 0x1da   :  { %2774 = vst [vmem:[#allocation3 + $0x20] sm:$0xff] %v6432_v23  ;;  %v6445_v50 = vpack.c.bf16 %v2712_v43, %v2693_v19  ;;  %v2713_v54 = vmul.f32 %v6389_v56, %v2574_v31  ;;  %v2617_v56 = vrot.slane %v6373_v46, %v2616_v45  ;;  %vm2387_vm12 = vcmp.gt.f32.partialorder %v6393_v58, 0.0 }
 0x1db   :  { %v5348_v55 = vpop.eup %5347  ;;  %2773 = vst [vmem:[#allocation3 + $0x18] sm:$0xff] %v6438_v49  ;;  %2977 = vrot.lane.b32.xlu0 %v6438_v49, %s5504_s28  ;;  %vm2388_vm13 = vcmp.gt.f32.partialorder %v6402_v62, 0.0  ;;  %v2624_v6 = vsub.s32 6, %v6359_v24  ;;  %v2628_v29 = vsub.s32 7, %v6359_v24 }
 0x1dc   :  { %v5350_v36 = vpop.eup %5349  ;;  %v5107_v57 = vadd.f32 -1.0, %v5348_v55  ;;  %2771 = vst [vmem:[#allocation3 + $0x8] sm:$0xff] %v6445_v50  ;;  %2836 = vrot.lane.b32.xlu1 %v6445_v50, %s5503_s25  ;;  %v6455_v39 = vpack.c.bf16 %v2713_v54, %v2694_v52 }
 0x1dd   :  { %v5352_v59 = vpop.eup %5351  ;;  %v5108_v60 = vadd.f32 -1.0, %v5350_v36  ;;  %v2625_v31 = vrot.slane %v6373_v46, %v2624_v6  ;;  %v2629_v36 = vrot.slane %v6373_v46, %v2628_v29 }
 0x1de   :  { %v5354_v61 = vpop.eup %5353  ;;  %v2558_v8 = vsel %vm2368_vm9, %v6380_v51, %v5107_v57  ;;  %v5126_v0 = vadd.f32 -1.0, %v5352_v59 }
 0x1df   :  { %v2559_v1 = vsel %vm2369_vm11, %v6383_v53, %v5108_v60  ;;  %v5127_v2 = vadd.f32 -1.0, %v5354_v61  ;;  %3110 = vrot.lane.b32.xlu0 %v6445_v50, %s5505_s29  ;;  %v2697_v51 = vmul.f32 %v2617_v56, %v2558_v8 }
 0x1e0   :  { %v2577_v3 = vsel %vm2387_vm12, %v6393_v58, %v5126_v0  ;;  %2840 = vrot.lane.b32.xlu1 %v6438_v49, %s5503_s25  ;;  %v2698_v53 = vmul.f32 %v2621_v63, %v2559_v1 }
 0x1e1   :  { %v2716_v4 = vmul.f32 %v2617_v56, %v2577_v3  ;;  %v2578_v5 = vsel %vm2388_vm13, %v6402_v62, %v5127_v2  ;;  %v6475_v7 = vld [vmem:[#allocation3 + $0x20] sm:$0xff] }
 0x1e2   :  { %v2717_v10 = vmul.f32 %v2621_v63, %v2578_v5  ;;  %v6477_v33 = vld [vmem:[#allocation3 + $0x18] sm:$0xff] }
 0x1e3   :  { %v6479_v11 = vpack.c.bf16 %v2716_v4, %v2697_v51  ;;  %3251 = vrot.lane.b32.xlu0 %v6438_v49, %s5506_s30  ;;  %v6483_v58 = vld [vmem:[#allocation3 + $0x8] sm:$0xff] }
 0x1e4   :  { %v6485_v12 = vpack.c.bf16 %v2717_v10, %v2698_v53  ;;  %2973 = vrot.lane.b32.xlu1 %v6445_v50, %s5504_s28 }
 0x1e5   :  { %2775 = vst [vmem:[#allocation3 + $0x28] sm:$0xff] %v6479_v11 }
 0x1e6   :  { %2776 = vst [vmem:[#allocation3 + $0x30] sm:$0xff] %v6485_v12  ;;  %v2099_v62 = vpop.f32.mrb[4].mxu1 }
 0x1e7   :  { %v2100_v13 = vadd.f32 %v2099_v62, %v6322_v9  ;;  %v2101_v14 = vpop.f32.mrb[5].mxu1  ;;  %3418 = vrot.lane.b32.xlu0 %v6445_v50, %s5507_s15 }
 0x1e8   :  { %v2102_v15 = vadd.f32 %v2101_v14, %v6322_v9  ;;  %3114 = vrot.lane.b32.xlu1 %v6438_v49, %s5505_s29  ;;  %v2103_v16 = vpop.f32.mrb[6].mxu1 }
 0x1e9   :  { %v2408_v22 = vmin.f32 %v2100_v13, 0.0  ;;  %v2104_v25 = vadd.f32 %v2103_v16, %v6334_v20  ;;  %v2105_v28 = vpop.f32.mrb[7].mxu1  ;;  %vm2370_vm14 = vcmp.gt.f32.partialorder %v2100_v13, 0.0 }
 0x1ea   :  { %v2409_v30 = vmin.f32 %v2102_v15, 0.0  ;;  %v2106_v21 = vadd.f32 %v2105_v28, %v6334_v20  ;;  %vm2371_vm15 = vcmp.gt.f32.partialorder %v2102_v15, 0.0 }
 0x1eb   :  { %v2452_v34 = vmul.f32 1.442695, %v2408_v22  ;;  %v2427_v17 = vmin.f32 %v2104_v25, 0.0  ;;  %3556 = vrot.lane.b32.xlu0 %v6438_v49, %s5508_s18  ;;  %vm2389_vm10 = vcmp.gt.f32.partialorder %v2104_v25, 0.0 }
 0x1ec   :  { %v2454_v35 = vmul.f32 1.442695, %v2409_v30  ;;  %v2428_v37 = vmin.f32 %v2106_v21, 0.0  ;;  %3247 = vrot.lane.b32.xlu1 %v6445_v50, %s5506_s30  ;;  %v3346_v38 = vld [vmem:[#allocation3 + $0x28] sm:$0xff]  ;;  %vm2390_vm9 = vcmp.gt.f32.partialorder %v2106_v21, 0.0 }
 0x1ed   :  { %5355 = vpow2.f32 %v2452_v34  ;;  %v2490_v18 = vmul.f32 1.442695, %v2427_v17  ;;  %v3347_v40 = vld [vmem:[#allocation3 + $0x30] sm:$0xff]  ;;  %3365 = vst [vmem:[#allocation2 + $0x280] sm:$0xff] %v3346_v38 }
 0x1ee   :  { %5357 = vpow2.f32 %v2454_v35  ;;  %v2492_v41 = vmul.f32 1.442695, %v2428_v37  ;;  %3366 = vst [vmem:[#allocation2 + $0x288] sm:$0xff] %v3347_v40  ;;  %v6568_v34 = vld [vmem:[%s7539_s1 + $0x8] sm:$0xff] }
 0x1ef   :  { %5359 = vpow2.f32 %v2490_v18  ;;  %3689 = vrot.lane.b32.xlu0 %v6445_v50, %s5509_s19  ;;  %v2633_v18 = vrot.slane %v6568_v34, %v6365_v27 }
 0x1f0   :  { %5361 = vpow2.f32 %v2492_v41  ;;  %3422 = vrot.lane.b32.xlu1 %v6438_v49, %s5507_s15 }
 0x1f3   :  { %3830 = vrot.lane.b32.xlu0 %v6438_v49, %s5510_s22 }
 0x1f4   :  { %3552 = vrot.lane.b32.xlu1 %v6445_v50, %s5508_s18 }
 0x1f7   :  { %v5356_v42 = vpop.eup %5355  ;;  %2842 = vrot.lane.b32.xlu0 %v6432_v23, %s5503_s25 }
 0x1f8   :  { %v5358_v19 = vpop.eup %5357  ;;  %v5109_v43 = vadd.f32 -1.0, %v5356_v42  ;;  %3693 = vrot.lane.b32.xlu1 %v6438_v49, %s5509_s19  ;;  %v2637_v42 = vrot.slane %v6568_v34, %v6368_v26 }
 0x1f9   :  { %v5360_v44 = vpop.eup %5359  ;;  %v5110_v52 = vadd.f32 -1.0, %v5358_v19 }
 0x1fa   :  { %v5362_v54 = vpop.eup %5361  ;;  %v2560_v55 = vsel %vm2370_vm14, %v2100_v13, %v5109_v43  ;;  %v5128_v57 = vadd.f32 -1.0, %v5360_v44 }
 0x1fb   :  { %v2561_v59 = vsel %vm2371_vm15, %v2102_v15, %v5110_v52  ;;  %v5129_v56 = vadd.f32 -1.0, %v5362_v54  ;;  %2975 = vrot.lane.b32.xlu0 %v6455_v39, %s5504_s28  ;;  %v2699_v60 = vmul.f32 %v2625_v31, %v2560_v55 }
 0x1fc   :  { %v2579_v49 = vsel %vm2389_vm10, %v2104_v25, %v5128_v57  ;;  %3826 = vrot.lane.b32.xlu1 %v6445_v50, %s5510_s22  ;;  %v2700_v63 = vmul.f32 %v2629_v36, %v2561_v59 }
 0x1fd   :  { %v2718_v61 = vmul.f32 %v2625_v31, %v2579_v49  ;;  %v2580_v8 = vsel %vm2390_vm9, %v2106_v21, %v5129_v56 }
 0x1fe   :  { %v2719_v0 = vmul.f32 %v2629_v36, %v2580_v8  ;;  %v6598_v8 = vld [vmem:[%s7540_s4 + $0x4] ss:$8 sps:$4 sm:$0xff]  }
 0x1ff   :  { %v6527_v1 = vpack.c.bf16 %v2718_v61, %v2699_v60  ;;  %3116 = vrot.lane.b32.xlu0 %v6432_v23, %s5505_s29  ;;  %5143 = vmatprep.mubr.msk.bf16.mxu0 %vm1932_vm0, %v6598_v8 }
 0x200   :  { %v6531_v46 = vpack.c.bf16 %v2719_v0, %v2700_v63  ;;  %2838 = vrot.lane.b32.xlu1 %v6455_v39, %s5503_s25  ;;  %5144 = vmatprep.mubr.msk.bf16.mxu1 %vm1932_vm0, %v6598_v8 }
 0x201   :  { %2777 = vst [vmem:[#allocation3 + $0x38] sm:$0xff] %v6527_v1 }
 0x202   :  { %2778 = vst [vmem:[#allocation3 + $0x40] sm:$0xff] %v6531_v46 }
 0x203   :  { %3249 = vrot.lane.b32.xlu0 %v6455_v39, %s5506_s30 }
 0x204   :  { %2979 = vrot.lane.b32.xlu1 %v6432_v23, %s5504_s28 }
 0x207   :  { %3420 = vrot.lane.b32.xlu0 %v6455_v39, %s5507_s15 }
 0x208   :  { %3112 = vrot.lane.b32.xlu1 %v6455_v39, %s5505_s29  ;;  %v3348_v50 = vld [vmem:[#allocation3 + $0x38] sm:$0xff] }
 0x209   :  { %v3349_v2 = vld [vmem:[#allocation3 + $0x40] sm:$0xff]  ;;  %3367 = vst [vmem:[#allocation2 + $0x290] sm:$0xff] %v3348_v50 }
 0x20a   :  { %v2142_v3 = vpop.f32.mrb[8].mxu0  ;;  %3368 = vst [vmem:[#allocation2 + $0x298] sm:$0xff] %v3349_v2 }
 0x20b   :  { %v2143_v51 = vadd.f32 %v2142_v3, %v6322_v9  ;;  %v2144_v4 = vpop.f32.mrb[9].mxu0  ;;  %3558 = vrot.lane.b32.xlu0 %v6432_v23, %s5508_s18 }
 0x20c   :  { %v2145_v5 = vadd.f32 %v2144_v4, %v6322_v9  ;;  %3253 = vrot.lane.b32.xlu1 %v6432_v23, %s5506_s30  ;;  %v2146_v53 = vpop.f32.mrb[10].mxu0 }
 0x20d   :  { %v2410_v10 = vmin.f32 %v2143_v51, 0.0  ;;  %v2147_v62 = vadd.f32 %v2146_v53, %v6334_v20  ;;  %v2148_v13 = vpop.f32.mrb[11].mxu0  ;;  %vm2372_vm11 = vcmp.gt.f32.partialorder %v2143_v51, 0.0 }
 0x20e   :  { %v2411_v14 = vmin.f32 %v2145_v5, 0.0  ;;  %v2149_v15 = vadd.f32 %v2148_v13, %v6334_v20  ;;  %vm2373_vm12 = vcmp.gt.f32.partialorder %v2145_v5, 0.0 }
 0x20f   :  { %v2456_v16 = vmul.f32 1.442695, %v2410_v10  ;;  %v2429_v22 = vmin.f32 %v2147_v62, 0.0  ;;  %3691 = vrot.lane.b32.xlu0 %v6455_v39, %s5509_s19  ;;  %vm2391_vm13 = vcmp.gt.f32.partialorder %v2147_v62, 0.0 }
 0x210   :  { %v2458_v25 = vmul.f32 1.442695, %v2411_v14  ;;  %v2430_v28 = vmin.f32 %v2149_v15, 0.0  ;;  %3424 = vrot.lane.b32.xlu1 %v6432_v23, %s5507_s15  ;;  %vm2392_vm14 = vcmp.gt.f32.partialorder %v2149_v15, 0.0 }
 0x211   :  { %5363 = vpow2.f32 %v2456_v16  ;;  %v2494_v30 = vmul.f32 1.442695, %v2429_v22 }
 0x212   :  { %5365 = vpow2.f32 %v2458_v25  ;;  %v2496_v21 = vmul.f32 1.442695, %v2430_v28 }
 0x213   :  { %5367 = vpow2.f32 %v2494_v30  ;;  %3832 = vrot.lane.b32.xlu0 %v6432_v23, %s5510_s22 }
 0x214   :  { %5369 = vpow2.f32 %v2496_v21  ;;  %3554 = vrot.lane.b32.xlu1 %v6455_v39, %s5508_s18  ;;  %v2641_v21 = vrot.slane %v6568_v34, %v6376_v47 }
 0x217   :  { %3426 = vrot.lane.b32.xlu0 %v6479_v11, %s5507_s15 }
 0x218   :  { %3695 = vrot.lane.b32.xlu1 %v6432_v23, %s5509_s19 }
 0x21b   :  { %v5364_v17 = vpop.eup %5363  ;;  %3697 = vrot.lane.b32.xlu0 %v6479_v11, %s5509_s19 }
 0x21c   :  { %v5366_v35 = vpop.eup %5365  ;;  %v5111_v37 = vadd.f32 -1.0, %v5364_v17  ;;  %3828 = vrot.lane.b32.xlu1 %v6455_v39, %s5510_s22 }
 0x21d   :  { %v5368_v38 = vpop.eup %5367  ;;  %v5112_v23 = vadd.f32 -1.0, %v5366_v35 }
 0x21e   :  { %v5370_v40 = vpop.eup %5369  ;;  %v2562_v41 = vsel %vm2372_vm11, %v2143_v51, %v5111_v37  ;;  %v5130_v19 = vadd.f32 -1.0, %v5368_v38  ;;  %v2645_v38 = vrot.slane %v6568_v34, %v2612_v48 }
 0x21f   :  { %v2563_v43 = vsel %vm2373_vm12, %v2145_v5, %v5112_v23  ;;  %v5131_v44 = vadd.f32 -1.0, %v5370_v40  ;;  %2844 = vrot.lane.b32.xlu0 %v6479_v11, %s5503_s25  ;;  %v2701_v52 = vmul.f32 %v2633_v18, %v2562_v41 }
 0x220   :  { %v2581_v31 = vsel %vm2391_vm13, %v2147_v62, %v5130_v19  ;;  %3560 = vrot.lane.b32.xlu1 %v6479_v11, %s5508_s18  ;;  %v2702_v36 = vmul.f32 %v2637_v42, %v2563_v43 }
 0x221   :  { %v2720_v54 = vmul.f32 %v2633_v18, %v2581_v31  ;;  %v2582_v55 = vsel %vm2392_vm14, %v2149_v15, %v5131_v44 }
 0x222   :  { %v2721_v57 = vmul.f32 %v2637_v42, %v2582_v55 }
 0x223   :  { %v6582_v59 = vpack.c.bf16 %v2720_v54, %v2701_v52  ;;  %2848 = vrot.lane.b32.xlu0 %v6527_v1, %s5503_s25  ;;  %v2835_v52 = vpop.permute.xlu0 %2834  ;;  %v2972_v54 = vpop.permute.xlu1 %2971 }
 0x224   :  { %v6586_v56 = vpack.c.bf16 %v2721_v57, %v2702_v36  ;;  %3834 = vrot.lane.b32.xlu1 %v6479_v11, %s5510_s22 }
 0x225   :  { %2779 = vst [vmem:[#allocation3 + $0x48] sm:$0xff] %v6582_v59 }
 0x226   :  { %2780 = vst [vmem:[#allocation3 + $0x50] sm:$0xff] %v6586_v56  ;;  %v2185_v49 = vpop.f32.mrb[8].mxu1 }
 0x227   :  { %v2186_v60 = vadd.f32 %v2185_v49, %v6322_v9  ;;  %v2187_v61 = vpop.f32.mrb[9].mxu1  ;;  %2981 = vrot.lane.b32.xlu0 %v6479_v11, %s5504_s28  ;;  %v3109_v55 = vpop.permute.xlu0 %3108 }
 0x228   :  { %v2188_v63 = vadd.f32 %v2187_v61, %v6322_v9  ;;  %3430 = vrot.lane.b32.xlu1 %v6527_v1, %s5507_s15  ;;  %v2189_v0 = vpop.f32.mrb[10].mxu1  ;;  %v6652_v36 = vpop.permute.xlu1 %3245 }
 0x229   :  { %v2412_v50 = vmin.f32 %v2186_v60, 0.0  ;;  %v2190_v2 = vadd.f32 %v2189_v0, %v6334_v20  ;;  %v2191_v3 = vpop.f32.mrb[11].mxu1  ;;  %vm2374_vm15 = vcmp.gt.f32.partialorder %v2186_v60, 0.0 }
 0x22a   :  { %v2413_v51 = vmin.f32 %v2188_v63, 0.0  ;;  %v2192_v4 = vadd.f32 %v2191_v3, %v6334_v20  ;;  %vm2375_vm10 = vcmp.gt.f32.partialorder %v2188_v63, 0.0 }
 0x22b   :  { %v2460_v5 = vmul.f32 1.442695, %v2412_v50  ;;  %v2431_v53 = vmin.f32 %v2190_v2, 0.0  ;;  %2985 = vrot.lane.b32.xlu0 %v6527_v1, %s5504_s28  ;;  %vm2393_vm9 = vcmp.gt.f32.partialorder %v2190_v2, 0.0 }
 0x22c   :  { %v2462_v10 = vmul.f32 1.442695, %v2413_v51  ;;  %v2432_v62 = vmin.f32 %v2192_v4, 0.0  ;;  %3564 = vrot.lane.b32.xlu1 %v6527_v1, %s5508_s18  ;;  %v3350_v13 = vld [vmem:[#allocation3 + $0x48] sm:$0xff]  ;;  %vm2394_vm11 = vcmp.gt.f32.partialorder %v2192_v4, 0.0 }
 0x22d   :  { %5371 = vpow2.f32 %v2460_v5  ;;  %v2498_v14 = vmul.f32 1.442695, %v2431_v53  ;;  %v3351_v15 = vld [vmem:[#allocation3 + $0x50] sm:$0xff]  ;;  %3369 = vst [vmem:[#allocation2 + $0x2a0] sm:$0xff] %v3350_v13 }
 0x22e   :  { %5373 = vpow2.f32 %v2462_v10  ;;  %v2500_v16 = vmul.f32 1.442695, %v2432_v62  ;;  %3370 = vst [vmem:[#allocation2 + $0x2a8] sm:$0xff] %v3351_v15 }
 0x22f   :  { %5375 = vpow2.f32 %v2498_v14  ;;  %3118 = vrot.lane.b32.xlu0 %v6479_v11, %s5505_s29 }
 0x230   :  { %5377 = vpow2.f32 %v2500_v16  ;;  %2846 = vrot.lane.b32.xlu1 %v6485_v12, %s5503_s25 }
 0x233   :  { %3122 = vrot.lane.b32.xlu0 %v6527_v1, %s5505_s29 }
 0x234   :  { %2850 = vrot.lane.b32.xlu1 %v6531_v46, %s5503_s25 }
 0x237   :  { %v5372_v22 = vpop.eup %5371  ;;  %3255 = vrot.lane.b32.xlu0 %v6479_v11, %s5506_s30 }
 0x238   :  { %v5374_v25 = vpop.eup %5373  ;;  %v5113_v28 = vadd.f32 -1.0, %v5372_v22  ;;  %2983 = vrot.lane.b32.xlu1 %v6485_v12, %s5504_s28 }
 0x239   :  { %v5376_v30 = vpop.eup %5375  ;;  %v5114_v17 = vadd.f32 -1.0, %v5374_v25 }
 0x23a   :  { %v5378_v35 = vpop.eup %5377  ;;  %v2564_v37 = vsel %vm2374_vm15, %v2186_v60, %v5113_v28  ;;  %v5132_v18 = vadd.f32 -1.0, %v5376_v30 }
 0x23b   :  { %v2565_v11 = vsel %vm2375_vm10, %v2188_v63, %v5114_v17  ;;  %v5133_v23 = vadd.f32 -1.0, %v5378_v35  ;;  %3259 = vrot.lane.b32.xlu0 %v6527_v1, %s5506_s30  ;;  %v2703_v41 = vmul.f32 %v2641_v21, %v2564_v37 }
 0x23c   :  { %v2583_v40 = vsel %vm2393_vm9, %v2190_v2, %v5132_v18  ;;  %2987 = vrot.lane.b32.xlu1 %v6531_v46, %s5504_s28  ;;  %v2704_v43 = vmul.f32 %v2645_v38, %v2565_v11 }
 0x23d   :  { %v2722_v42 = vmul.f32 %v2641_v21, %v2583_v40  ;;  %v2584_v19 = vsel %vm2394_vm11, %v2192_v4, %v5133_v23 }
 0x23e   :  { %v2723_v44 = vmul.f32 %v2645_v38, %v2584_v19 }
 0x23f   :  { %v6634_v31 = vpack.c.bf16 %v2722_v42, %v2703_v41  ;;  %3428 = vrot.lane.b32.xlu0 %v6485_v12, %s5507_s15 }
 0x240   :  { %v6638_v48 = vpack.c.bf16 %v2723_v44, %v2704_v43  ;;  %3120 = vrot.lane.b32.xlu1 %v6485_v12, %s5505_s29 }
 0x241   :  { %2781 = vst [vmem:[#allocation3 + $0x58] sm:$0xff] %v6634_v31 }
 0x242   :  { %2782 = vst [vmem:[#allocation3 + $0x60] sm:$0xff] %v6638_v48 }
 0x243   :  { %3432 = vrot.lane.b32.xlu0 %v6531_v46, %s5507_s15 }
 0x244   :  { %3124 = vrot.lane.b32.xlu1 %v6531_v46, %s5505_s29 }
 0x247   :  { %3562 = vrot.lane.b32.xlu0 %v6485_v12, %s5508_s18 }
 0x248   :  { %3257 = vrot.lane.b32.xlu1 %v6485_v12, %s5506_s30  ;;  %v3352_v57 = vld [vmem:[#allocation3 + $0x58] sm:$0xff] }
 0x249   :  { %v3353_v49 = vld [vmem:[#allocation3 + $0x60] sm:$0xff]  ;;  %3371 = vst [vmem:[#allocation2 + $0x2b0] sm:$0xff] %v3352_v57 }
 0x24a   :  { %v2228_v60 = vpop.f32.mrb[12].mxu0  ;;  %3372 = vst [vmem:[#allocation2 + $0x2b8] sm:$0xff] %v3353_v49 }
 0x24b   :  { %v2229_v61 = vadd.f32 %v2228_v60, %v6322_v9  ;;  %v2230_v63 = vpop.f32.mrb[13].mxu0  ;;  %3566 = vrot.lane.b32.xlu0 %v6531_v46, %s5508_s18 }
 0x24c   :  { %v2231_v0 = vadd.f32 %v2230_v63, %v6322_v9  ;;  %3261 = vrot.lane.b32.xlu1 %v6531_v46, %s5506_s30  ;;  %v2232_v50 = vpop.f32.mrb[14].mxu0 }
 0x24d   :  { %v2414_v2 = vmin.f32 %v2229_v61, 0.0  ;;  %v2233_v3 = vadd.f32 %v2232_v50, %v6334_v20  ;;  %v2234_v51 = vpop.f32.mrb[15].mxu0  ;;  %v6661_v4 = vpop.permute.xlu0 %2977  ;;  %vm2376_vm12 = vcmp.gt.f32.partialorder %v2229_v61, 0.0 }
 0x24e   :  { %v2415_v5 = vmin.f32 %v2231_v0, 0.0  ;;  %v2235_v53 = vadd.f32 %v2234_v51, %v6334_v20  ;;  %v6664_v10 = vpop.permute.xlu1 %2836  ;;  %vm2377_vm13 = vcmp.gt.f32.partialorder %v2231_v0, 0.0 }
 0x24f   :  { %v2464_v62 = vmul.f32 1.442695, %v2414_v2  ;;  %v2433_v13 = vmin.f32 %v2233_v3, 0.0  ;;  %v6668_v14 = vsel %vm168_vm1, %v2835_v52, %v6664_v10  ;;  %3699 = vrot.lane.b32.xlu0 %v6485_v12, %s5509_s19  ;;  %vm2395_vm14 = vcmp.gt.f32.partialorder %v2233_v3, 0.0 }
 0x250   :  { %v2466_v15 = vmul.f32 1.442695, %v2415_v5  ;;  %v2434_v16 = vmin.f32 %v2235_v53, 0.0  ;;  %3701 = vrot.lane.b32.xlu1 %v6527_v1, %s5509_s19  ;;  %vm2396_vm15 = vcmp.gt.f32.partialorder %v2235_v53, 0.0 }
 0x251   :  { %5379 = vpow2.f32 %v2464_v62  ;;  %v2502_v22 = vmul.f32 1.442695, %v2433_v13  ;;  %v6674_v25 = vpop.permute.xlu0 %3110 }
 0x252   :  { %5381 = vpow2.f32 %v2466_v15  ;;  %v2504_v28 = vmul.f32 1.442695, %v2434_v16  ;;  %v6678_v30 = vsel %vm565_vm3, %v3109_v55, %v6674_v25  ;;  %v6680_v21 = vpop.permute.xlu1 %2840 }
 0x253   :  { %5383 = vpow2.f32 %v2502_v22  ;;  %3703 = vrot.lane.b32.xlu0 %v6531_v46, %s5509_s19 }
 0x254   :  { %5385 = vpow2.f32 %v2504_v28  ;;  %3838 = vrot.lane.b32.xlu1 %v6527_v1, %s5510_s22 }
 0x255   :  { %v6686_v17 = vpop.permute.xlu0 %3251 }
 0x256   :  { %v6688_v35 = vpop.permute.xlu1 %2973 }
 0x257   :  { %v6692_v37 = vsel %vm367_vm2, %v2972_v54, %v6688_v35  ;;  %3836 = vrot.lane.b32.xlu0 %v6485_v12, %s5510_s22  ;;  %v2649_v12 = vrot.slane %v6568_v34, %v2616_v45 }
 0x258   :  { %3434 = vrot.lane.b32.xlu1 %v6582_v59, %s5507_s15 }
 0x259   :  { %v6698_v38 = vpop.permute.xlu0 %3418 }
 0x25a   :  { %v6700_v18 = vpop.permute.xlu1 %3114 }
 0x25b   :  { %v5380_v11 = vpop.eup %5379  ;;  %3840 = vrot.lane.b32.xlu0 %v6531_v46, %s5510_s22  ;;  %v2653_v46 = vrot.slane %v6568_v34, %v2620_v32 }
 0x25c   :  { %v5382_v1 = vpop.eup %5381  ;;  %v5115_v23 = vadd.f32 -1.0, %v5380_v11  ;;  %3568 = vrot.lane.b32.xlu1 %v6582_v59, %s5508_s18 }
 0x25d   :  { %v5384_v40 = vpop.eup %5383  ;;  %v5116_v41 = vadd.f32 -1.0, %v5382_v1  ;;  %v6709_v42 = vpop.permute.xlu0 %3556 }
 0x25e   :  { %v5386_v19 = vpop.eup %5385  ;;  %v2566_v43 = vsel %vm2376_vm12, %v2229_v61, %v5115_v23  ;;  %v5134_v44 = vadd.f32 -1.0, %v5384_v40  ;;  %v6714_v52 = vpop.permute.xlu1 %3247 }
 0x25f   :  { %v2567_v54 = vsel %vm2377_vm13, %v2231_v0, %v5116_v41  ;;  %v5135_v55 = vadd.f32 -1.0, %v5386_v19  ;;  %v6719_v45 = vsel %vm763_vm4, %v6652_v36, %v6714_v52  ;;  %2852 = vrot.lane.b32.xlu0 %v6582_v59, %s5503_s25  ;;  %v2705_v32 = vmul.f32 %v2649_v12, %v2566_v43 }
 0x260   :  { %v2585_v57 = vsel %vm2395_vm14, %v2233_v3, %v5134_v44  ;;  %3705 = vrot.lane.b32.xlu1 %v6582_v59, %s5509_s19  ;;  %v2706_v63 = vmul.f32 %v2653_v46, %v2567_v54 }
 0x261   :  { %v2724_v49 = vmul.f32 %v2649_v12, %v2585_v57  ;;  %v2586_v60 = vsel %vm2396_vm15, %v2235_v53, %v5135_v55  ;;  %v6725_v61 = vpop.permute.xlu0 %3689 }
 0x262   :  { %v2725_v0 = vmul.f32 %v2653_v46, %v2586_v60  ;;  %v6727_v50 = vpop.permute.xlu1 %3422 }
 0x263   :  { %v6729_v2 = vpack.c.bf16 %v2724_v49, %v2705_v32  ;;  %2856 = vrot.lane.b32.xlu0 %v6634_v31, %s5503_s25 }
 0x264   :  { %v6733_v36 = vpack.c.bf16 %v2725_v0, %v2706_v63  ;;  %3842 = vrot.lane.b32.xlu1 %v6582_v59, %s5510_s22 }
 0x265   :  { %2783 = vst [vmem:[#allocation3 + $0x68] sm:$0xff] %v6729_v2  ;;  %v6738_v3 = vpop.permute.xlu0 %3830 }
 0x266   :  { %2784 = vst [vmem:[#allocation3 + $0x70] sm:$0xff] %v6733_v36  ;;  %v6741_v51 = vpop.permute.xlu1 %3552  ;;  %v2271_v5 = vpop.f32.mrb[12].mxu1 }
 0x267   :  { %v6744_v53 = vadd.f32 %v2271_v5, %v6322_v9  ;;  %v2273_v62 = vpop.f32.mrb[13].mxu1  ;;  %2989 = vrot.lane.b32.xlu0 %v6582_v59, %s5504_s28 }
 0x268   :  { %v6749_v13 = vadd.f32 %v2273_v62, %v6322_v9  ;;  %2854 = vrot.lane.b32.xlu1 %v6586_v56, %s5503_s25  ;;  %v2275_v15 = vpop.f32.mrb[14].mxu1 }
 0x269   :  { %v2416_v16 = vmin.f32 %v6744_v53, 0.0  ;;  %v6755_v22 = vadd.f32 %v2275_v15, %v6334_v20  ;;  %v2277_v28 = vpop.f32.mrb[15].mxu1  ;;  %v6757_v11 = vpop.permute.xlu0 %2842  ;;  %vm2378_vm10 = vcmp.gt.f32.partialorder %v6744_v53, 0.0 }
 0x26a   :  { %v2417_v1 = vmin.f32 %v6749_v13, 0.0  ;;  %v6761_v23 = vadd.f32 %v2277_v28, %v6334_v20  ;;  %v2877_v40 = vsel %vm168_vm1, %v6680_v21, %v6757_v11  ;;  %v6766_v12 = vpop.permute.xlu1 %3693  ;;  %vm2379_vm9 = vcmp.gt.f32.partialorder %v6749_v13, 0.0 }
 0x26b   :  { %v2468_v41 = vmul.f32 1.442695, %v2416_v16  ;;  %v2435_v19 = vmin.f32 %v6755_v22, 0.0  ;;  %2993 = vrot.lane.b32.xlu0 %v6634_v31, %s5504_s28  ;;  %4159 = vmatprep.subr.bf16.mxu1 %v2877_v40  ;;  %vm2397_vm11 = vcmp.gt.f32.partialorder %v6755_v22, 0.0 }
 0x26c   :  { %v2470_v43 = vmul.f32 1.442695, %v2417_v1  ;;  %v2436_v46 = vmin.f32 %v6761_v23, 0.0  ;;  %2858 = vrot.lane.b32.xlu1 %v6638_v48, %s5503_s25  ;;  %v3354_v44 = vld [vmem:[#allocation3 + $0x68] sm:$0xff]  ;;  %vm2398_vm12 = vcmp.gt.f32.partialorder %v6761_v23, 0.0 }
 0x26d   :  { %5387 = vpow2.f32 %v2468_v41  ;;  %v2506_v54 = vmul.f32 1.442695, %v2435_v19  ;;  %v2976_v55 = vpop.permute.xlu0 %2975  ;;  %v6774_v57 = vld [vmem:[#allocation3 + $0x70] sm:$0xff]  ;;  %3373 = vst [vmem:[#allocation2 + $0x2c0] sm:$0xff] %v3354_v44 }
 0x26e   :  { %5389 = vpow2.f32 %v2470_v43  ;;  %v2508_v32 = vmul.f32 1.442695, %v2436_v46  ;;  %v3012_v49 = vsel %vm367_vm2, %v6688_v35, %v2976_v55  ;;  %v3013_v60 = vsel %vm367_vm2, %v2976_v55, %v6661_v4  ;;  %v6780_v63 = vpop.permute.xlu1 %3826  ;;  %3374 = vst [vmem:[#allocation2 + $0x2c8] sm:$0xff] %v6774_v57 }
 0x26f   :  { %5391 = vpow2.f32 %v2506_v54  ;;  %3126 = vrot.lane.b32.xlu0 %v6582_v59, %s5505_s29 }
 0x270   :  { %5393 = vpow2.f32 %v2508_v32  ;;  %2991 = vrot.lane.b32.xlu1 %v6586_v56, %s5504_s28 }
 0x271   :  { %v6787_v0 = vpop.permute.xlu0 %3116 }
 0x272   :  { %v3151_v35 = vsel %vm565_vm3, %v6700_v18, %v6787_v0  ;;  %v2839_v5 = vpop.permute.xlu1 %2838 }
 0x273   :  { %v2875_v62 = vsel %vm168_vm1, %v6664_v10, %v2839_v5  ;;  %v2876_v15 = vsel %vm168_vm1, %v2839_v5, %v6680_v21  ;;  %3130 = vrot.lane.b32.xlu0 %v6634_v31, %s5505_s29 }
 0x274   :  { %2995 = vrot.lane.b32.xlu1 %v6638_v48, %s5504_s28  ;;  %4116 = vmatprep.subr.bf16.mxu0 %v2875_v62 }
 0x275   :  { %v3250_v16 = vpop.permute.xlu0 %3249  ;;  %4160 = vmatpush1.bf16.msra.mxu1 %v2876_v15  ;;  %4117 = vmatpush1.bf16.msra.mxu0 %v6668_v14  ;;  %v2657_v14 = vrot.slane %v6568_v34, %v2624_v6 }
 0x276   :  { %v3286_v28 = vsel %vm763_vm4, %v6714_v52, %v3250_v16  ;;  %v3287_v10 = vsel %vm763_vm4, %v3250_v16, %v6686_v17  ;;  %v6805_v1 = vpop.permute.xlu1 %2979  ;;  %4118 = vmatprep.subr.bf16.mxu0 %v3012_v49 }
 0x277   :  { %v5388_v21 = vpop.eup %5387  ;;  %v3014_v40 = vsel %vm367_vm2, %v6661_v4, %v6805_v1  ;;  %3263 = vrot.lane.b32.xlu0 %v6582_v59, %s5506_s30  ;;  %v2661_v59 = vrot.slane %v6568_v34, %v2628_v29 }
 0x278   :  { %v5390_v41 = vpop.eup %5389  ;;  %v5117_v19 = vadd.f32 -1.0, %v5388_v21  ;;  %3128 = vrot.lane.b32.xlu1 %v6586_v56, %s5505_s29  ;;  %4161 = vmatprep.subr.bf16.mxu1 %v3014_v40 }
 0x279   :  { %v5392_v52 = vpop.eup %5391  ;;  %v5118_v43 = vadd.f32 -1.0, %v5390_v41  ;;  %v3421_v4 = vpop.permute.xlu0 %3420  ;;  %4119 = vmatpush1.bf16.msra.mxu0 %v6692_v37  ;;  %4162 = vmatpush1.bf16.msra.mxu1 %v3013_v60 }
 0x27a   :  { %v5394_v46 = vpop.eup %5393  ;;  %v2568_v6 = vsel %vm2378_vm10, %v6744_v53, %v5117_v19  ;;  %v5136_v44 = vadd.f32 -1.0, %v5392_v52  ;;  %v6826_v54 = vsel %vm1091_vm5, %v6698_v38, %v3421_v4  ;;  %v3457_v55 = vsel %vm1091_vm5, %v3421_v4, %v6727_v50  ;;  %v3113_v32 = vpop.permute.xlu1 %3112  ;;  %4163 = vmatprep.subr.bf16.mxu1 %v3151_v35 }
 0x27b   :  { %v2569_v24 = vsel %vm2379_vm9, %v6749_v13, %v5118_v43  ;;  %v5137_v29 = vadd.f32 -1.0, %v5394_v46  ;;  %v3149_v34 = vsel %vm565_vm3, %v6674_v25, %v3113_v32  ;;  %3267 = vrot.lane.b32.xlu0 %v6634_v31, %s5506_s30  ;;  %v3150_v38 = vsel %vm565_vm3, %v3113_v32, %v6700_v18 }
 0x27c   :  { %v2587_v37 = vsel %vm2397_vm11, %v6755_v22, %v5136_v44  ;;  %3132 = vrot.lane.b32.xlu1 %v6638_v48, %s5505_s29  ;;  %4120 = vmatprep.subr.bf16.mxu0 %v3149_v34  ;;  %v2707_v53 = vmul.f32 %v2657_v14, %v2568_v6  ;;  %v2708_v25 = vmul.f32 %v2661_v59, %v2569_v24 }
 0x27d   :  { %v2726_v13 = vmul.f32 %v2657_v14, %v2587_v37  ;;  %v2588_v49 = vsel %vm2398_vm12, %v6761_v23, %v5137_v29  ;;  %v6843_v60 = vpop.permute.xlu0 %3558  ;;  %4121 = vmatpush1.bf16.msra.mxu0 %v6678_v30  ;;  %4164 = vmatpush1.bf16.msra.mxu1 %v3150_v38  ;;  %vm7544_vm12 = vcmask 785408  }
 0x27e   :  { %v2727_v22 = vmul.f32 %v2661_v59, %v2588_v49  ;;  %v6849_v35 = vsel %vm1288_vm6, %v6709_v42, %v6843_v60  ;;  %v6851_v18 = vpop.permute.xlu1 %3253  ;;  %4122 = vmatprep.subr.bf16.mxu0 %v3286_v28  ;;  %v6946_v49 = vld [vmem:[%s7539_s1 + $0x10] sm:$0x7] }
 0x27f   :  { %v6853_v5 = vpack.c.bf16 %v2726_v13, %v2707_v53  ;;  %v3288_v23 = vsel %vm763_vm4, %v6686_v17, %v6851_v18  ;;  %3436 = vrot.lane.b32.xlu0 %v6586_v56, %s5507_s15 }
 0x280   :  { %v6860_v30 = vpack.c.bf16 %v2727_v22, %v2708_v25  ;;  %3265 = vrot.lane.b32.xlu1 %v6586_v56, %s5506_s30  ;;  %4165 = vmatprep.subr.bf16.mxu1 %v3288_v23 }
 0x281   :  { %2785 = vst [vmem:[#allocation3 + $0x78] sm:$0xff] %v6853_v5  ;;  %v3692_v62 = vpop.permute.xlu0 %3691  ;;  %4123 = vmatpush1.bf16.msra.mxu0 %v6719_v45  ;;  %4166 = vmatpush1.bf16.msra.mxu1 %v3287_v10 }
 0x282   :  { %2786 = vst [vmem:[#allocation3 + $0x80] sm:$0xff] %v6860_v30  ;;  %v3729_v17 = vsel %vm1486_vm7, %v6725_v61, %v3692_v62  ;;  %v3730_v15 = vsel %vm1486_vm7, %v3692_v62, %v6766_v12  ;;  %v3425_v16 = vpop.permute.xlu1 %3424  ;;  %v2314_v28 = vpop.f32.mrb[16].mxu0  ;;  %4124 = vmatprep.subr.bf16.mxu0 %v6455_v39  ;;  %4167 = vmatprep.subr.bf16.mxu1 %v6475_v7 }
 0x283   :  { %v3458_v21 = vsel %vm1091_vm5, %v6727_v50, %v3425_v16  ;;  %v6876_v45 = vadd.f32 %v2314_v28, %v6322_v9  ;;  %v2316_v10 = vpop.f32.mrb[17].mxu0  ;;  %3440 = vrot.lane.b32.xlu0 %v6638_v48, %s5507_s15 }
 0x284   :  { %v6881_v61 = vadd.f32 %v2316_v10, %v6322_v9  ;;  %3269 = vrot.lane.b32.xlu1 %v6638_v48, %s5506_s30  ;;  %v2318_v40 = vpop.f32.mrb[18].mxu0  ;;  %v2669_v10 = vrot.slane %v6946_v49, %v6368_v26 }
 0x285   :  { %v2418_v39 = vmin.f32 %v6876_v45, 0.0  ;;  %v6887_v7 = vadd.f32 %v2318_v40, %v6334_v20  ;;  %v2320_v50 = vpop.f32.mrb[19].mxu0  ;;  %v6889_v41 = vpop.permute.xlu0 %3832  ;;  %4125 = vmatpush1.bf16.msra.mxu0 %v6483_v58  ;;  %4168 = vmatpush1.bf16.msra.mxu1 %v6477_v33  ;;  %vm2380_vm13 = vcmp.gt.f32.partialorder %v6876_v45, 0.0 }
 0x286   :  { %v2419_v19 = vmin.f32 %v6881_v61, 0.0  ;;  %v6895_v14 = vadd.f32 %v2320_v50, %v6334_v20  ;;  %v6900_v52 = vsel %vm1684_vm8, %v6738_v3, %v6889_v41  ;;  %v3555_v43 = vpop.permute.xlu1 %3554  ;;  %4126 = vmatprep.subr.bf16.mxu0 %v3457_v55  ;;  %vm2381_vm14 = vcmp.gt.f32.partialorder %v6881_v61, 0.0 }
 0x287   :  { %v2472_v59 = vmul.f32 1.442695, %v2418_v39  ;;  %v2437_v4 = vmin.f32 %v6887_v7, 0.0  ;;  %v3592_v58 = vsel %vm1288_vm6, %v6741_v51, %v3555_v43  ;;  %3570 = vrot.lane.b32.xlu0 %v6586_v56, %s5508_s18  ;;  %v3593_v6 = vsel %vm1288_vm6, %v3555_v43, %v6709_v42 }
 0x288   :  { %v2474_v33 = vmul.f32 1.442695, %v2419_v19  ;;  %v2438_v46 = vmin.f32 %v6895_v14, 0.0  ;;  %3438 = vrot.lane.b32.xlu1 %v6634_v31, %s5507_s15  ;;  %v6912_v44 = vld [vmem:[#allocation3 + $0x78] sm:$0xff]  ;;  %vm2399_vm15 = vcmp.gt.f32.partialorder %v6887_v7, 0.0  ;;  %vm2400_vm10 = vcmp.gt.f32.partialorder %v6895_v14, 0.0 }
 0x289   :  { %5395 = vpow2.f32 %v2472_v59  ;;  %v2510_v55 = vmul.f32 1.442695, %v2437_v4  ;;  %v6914_v32 = vpop.permute.xlu0 %3426  ;;  %4127 = vmatpush1.bf16.msra.mxu0 %v6826_v54  ;;  %v6917_v51 = vld [vmem:[#allocation3 + $0x80] sm:$0xff]  ;;  %3375 = vst [vmem:[#allocation2 + $0x2d0] sm:$0xff] %v6912_v44 }
 0x28a   :  { %5397 = vpow2.f32 %v2474_v33  ;;  %v2512_v24 = vmul.f32 1.442695, %v2438_v46  ;;  %v3459_v42 = vsel %vm1091_vm5, %v3425_v16, %v6914_v32  ;;  %v3696_v29 = vpop.permute.xlu1 %3695  ;;  %4128 = vmatprep.subr.bf16.mxu0 %v3593_v6  ;;  %3376 = vst [vmem:[#allocation2 + $0x2d8] sm:$0xff] %v6917_v51 }
 0x28b   :  { %5399 = vpow2.f32 %v2510_v55  ;;  %v3731_v34 = vsel %vm1486_vm7, %v6766_v12, %v3696_v29  ;;  %3574 = vrot.lane.b32.xlu0 %v6638_v48, %s5508_s18  ;;  %4169 = vmatprep.subr.bf16.mxu1 %v3459_v42 }
 0x28c   :  { %5401 = vpow2.f32 %v2512_v24  ;;  %3572 = vrot.lane.b32.xlu1 %v6634_v31, %s5508_s18  ;;  %4170 = vmatpush1.bf16.msra.mxu1 %v3458_v21 }
 0x28d   :  { %v6929_v54 = vpop.permute.xlu0 %3697  ;;  %4129 = vmatpush1.bf16.msra.mxu0 %v3592_v58 }
 0x28e   :  { %v3732_v37 = vsel %vm1486_vm7, %v3696_v29, %v6929_v54  ;;  %v3829_v38 = vpop.permute.xlu1 %3828  ;;  %4130 = vmatprep.subr.bf16.mxu0 %v3730_v15 }
 0x28f   :  { %v3866_v12 = vsel %vm1684_vm8, %v6780_v63, %v3829_v38  ;;  %v3867_v53 = vsel %vm1684_vm8, %v3829_v38, %v6738_v3  ;;  %3707 = vrot.lane.b32.xlu0 %v6586_v56, %s5509_s19 }
 0x290   :  { %3709 = vrot.lane.b32.xlu1 %v6634_v31, %s5509_s19 }
 0x291   :  { %v6941_v13 = vpop.permute.xlu0 %2844  ;;  %4131 = vmatpush1.bf16.msra.mxu0 %v3729_v17 }
 0x292   :  { %v6951_v63 = vsel %vm168_vm1, %v6757_v11, %v6941_v13  ;;  %v6953_v3 = vpop.permute.xlu1 %3560  ;;  %4132 = vmatprep.subr.bf16.mxu0 %v3867_v53  ;;  %v6965_v11 = vld [vmem:[%s7540_s4] ss:$8 sps:$4 sm:$0xff]  }
 0x293   :  { %v5396_v25 = vpop.eup %5395  ;;  %v3595_v22 = vsel %vm1288_vm6, %v6843_v60, %v6953_v3  ;;  %3711 = vrot.lane.b32.xlu0 %v6638_v48, %s5509_s19  ;;  %v2665_v60 = vrot.slane %v6946_v49, %v6365_v27 }
 0x294   :  { %v5398_v23 = vpop.eup %5397  ;;  %v5119_v62 = vadd.f32 -1.0, %v5396_v25  ;;  %3442 = vrot.lane.b32.xlu1 %v6729_v2, %s5507_s15  ;;  %4171 = vmatprep.subr.bf16.mxu1 %v3595_v22 }
 0x295   :  { %v5400_v17 = vpop.eup %5399  ;;  %v5120_v15 = vadd.f32 -1.0, %v5398_v23  ;;  %v6970_v16 = vpop.permute.xlu0 %2848  ;;  %4133 = vmatpush1.bf16.msra.mxu0 %v3866_v12  ;;  %4172 = vmatpush1.bf16.msra.mxu1 %v6849_v35 }
 0x296   :  { %v5402_v28 = vpop.eup %5401  ;;  %v2570_v21 = vsel %vm2380_vm13, %v6876_v45, %v5119_v62  ;;  %v5138_v40 = vadd.f32 -1.0, %v5400_v17  ;;  %v6977_v39 = vpop.permute.xlu1 %3834  ;;  %4173 = vmatprep.subr.bf16.mxu1 %v3732_v37  ;;  %vm7545_vm13 = vmmov %vm7544_vm12 }
 0x297   :  { %v2571_v27 = vsel %vm2381_vm14, %v6881_v61, %v5120_v15  ;;  %v5139_v50 = vadd.f32 -1.0, %v5402_v28  ;;  %v3869_v35 = vsel %vm1684_vm8, %v6889_v41, %v6977_v39  ;;  %3844 = vrot.lane.b32.xlu0 %v6586_v56, %s5510_s22  ;;  %v2709_v26 = vmul.f32 %v2665_v60, %v2570_v21  ;;  %vm7546_vm14 = vmmov %vm7544_vm12 }
 0x298   :  { %v2589_v45 = vsel %vm2399_vm15, %v6887_v7, %v5138_v40  ;;  %3576 = vrot.lane.b32.xlu1 %v6729_v2, %s5508_s18  ;;  %4149 = vmatmul.mubr.bf16.vlgmr.msra.gmra.mrb[20].mxu0 %v6965_v11  ;;  %v2710_v56 = vmul.f32 %v2669_v10, %v2571_v27 }
 0x299   :  { %v2728_v61 = vmul.f32 %v2665_v60, %v2589_v45  ;;  %v2590_v19 = vsel %vm2400_vm10, %v6895_v14, %v5139_v50  ;;  %v2357_v43 = vpop.f32.mrb[16].mxu1  ;;  %v2982_v59 = vpop.permute.xlu0 %2981  ;;  %4174 = vmatpush1.bf16.msra.mxu1 %v3731_v34  ;;  %5145 = vmatprep.mubr.msk.bf16.mxu0 %vm1932_vm0, %v6598_v8 }
 0x29a   :  { %v2729_v41 = vmul.f32 %v2669_v10, %v2590_v19  ;;  %v2358_v7 = vadd.f32 %v2357_v43, %v6322_v9  ;;  %v2359_v4 = vpop.f32.mrb[17].mxu1  ;;  %v3015_v58 = vsel %vm367_vm2, %v6805_v1, %v2982_v59  ;;  %v6997_v33 = vpop.permute.xlu1 %3430  ;;  %4175 = vmatprep.subr.bf16.mxu1 %v3869_v35 }
 0x29b   :  { %v6999_v46 = vpack.c.bf16 %v2728_v61, %v2709_v26  ;;  %v2360_v14 = vpop.f32.mrb[18].mxu1  ;;  %3848 = vrot.lane.b32.xlu0 %v6638_v48, %s5510_s22 }
 0x29c   :  { %v7003_v6 = vpack.c.bf16 %v2729_v41, %v2710_v56  ;;  %v2420_v55 = vmin.f32 %v2358_v7, 0.0  ;;  %v2361_v24 = vadd.f32 %v2360_v14, %v6334_v20  ;;  %3713 = vrot.lane.b32.xlu1 %v6729_v2, %s5509_s19  ;;  %v2362_v9 = vpop.f32.mrb[19].mxu1  ;;  %vm2382_vm9 = vcmp.gt.f32.partialorder %v2358_v7, 0.0 }
 0x29d   :  { %2787 = vst [vmem:[#allocation3 + $0x88] sm:$0xff] %v6999_v46  ;;  %v2986_v1 = vpop.permute.xlu0 %2985  ;;  %4176 = vmatpush1.bf16.msra.mxu1 %v6900_v52 }
 0x29e   :  { %2788 = vst [vmem:[#allocation3 + $0x90] sm:$0xff] %v7003_v6  ;;  %v2476_v42 = vmul.f32 1.442695, %v2420_v55  ;;  %v2439_v29 = vmin.f32 %v2361_v24, 0.0  ;;  %v7011_v34 = vpop.permute.xlu1 %3564  ;;  %vm2401_vm11 = vcmp.gt.f32.partialorder %v2361_v24, 0.0 }
 0x29f   :  { %2860 = vrot.lane.b32.xlu0 %v6729_v2, %s5503_s25 }
 0x2a0   :  { %5403 = vpow2.f32 %v2476_v42  ;;  %v2514_v20 = vmul.f32 1.442695, %v2439_v29  ;;  %3846 = vrot.lane.b32.xlu1 %v6634_v31, %s5510_s22  ;;  %4192 = vmatmul.mubr.bf16.vlgmr.msra.gmra.mrb[20].mxu1 %v6965_v11 }
 0x2a1   :  { %v3119_v48 = vpop.permute.xlu0 %3118  ;;  %5146 = vmatprep.mubr.msk.bf16.mxu1 %vm1932_vm0, %v6598_v8 }
 0x2a2   :  { %5405 = vpow2.f32 %v2514_v20  ;;  %v3152_v52 = vsel %vm565_vm3, %v6787_v0, %v3119_v48  ;;  %v2847_v37 = vpop.permute.xlu1 %2846  ;;  %v5487_v20 = vld [vmem:[#allocation2 + $0x280] sm:$0xff] }
 0x2a3   :  { %v2879_v38 = vsel %vm168_vm1, %v6941_v13, %v2847_v37  ;;  %v2880_v12 = vsel %vm168_vm1, %v2847_v37, %v6970_v16  ;;  %2864 = vrot.lane.b32.xlu0 %v6853_v5, %s5503_s25 }
 0x2a4   :  { %3850 = vrot.lane.b32.xlu1 %v6729_v2, %s5510_s22  ;;  %4202 = vmatprep.subr.bf16.mxu0 %v2879_v38  ;;  %v3358_v31 = vld [vmem:[#allocation3 + $0x88] sm:$0xff]  ;;  %v5489_v38 = vld [vmem:[#allocation2 + $0x290] sm:$0xff] }
 0x2a5   :  { %v3123_v8 = vpop.permute.xlu0 %3122  ;;  %4203 = vmatpush1.bf16.msra.mxu0 %v6951_v63  ;;  %v7031_v53 = vld [vmem:[#allocation3 + $0x90] sm:$0xff]  ;;  %3377 = vst [vmem:[#allocation2 + $0x2e0] sm:$0xff] %v3358_v31 }
 0x2a6   :  { %v7033_v0 = vpop.permute.xlu1 %2850  ;;  %3378 = vst [vmem:[#allocation2 + $0x2e8] sm:$0xff] %v7031_v53 }
 0x2a7   :  { %v2881_v13 = vsel %vm168_vm1, %v6970_v16, %v7033_v0  ;;  %2997 = vrot.lane.b32.xlu0 %v6729_v2, %s5504_s28  ;;  %v2673_v16 = vrot.slane %v6946_v49, %v6376_v47 }
 0x2a8   :  { %2862 = vrot.lane.b32.xlu1 %v6733_v36, %s5503_s25  ;;  %4245 = vmatprep.subr.bf16.mxu1 %v2881_v13 }
 0x2a9   :  { %v3256_v25 = vpop.permute.xlu0 %3255  ;;  %4246 = vmatpush1.bf16.msra.mxu1 %v2880_v12 }
 0x2aa   :  { %v5404_v63 = vpop.eup %5403  ;;  %v3289_v22 = vsel %vm763_vm4, %v6851_v18, %v3256_v25  ;;  %v2984_v23 = vpop.permute.xlu1 %2983 }
 0x2ab   :  { %v5121_v62 = vadd.f32 -1.0, %v5404_v63  ;;  %v3016_v17 = vsel %vm367_vm2, %v2982_v59, %v2984_v23  ;;  %v3017_v60 = vsel %vm367_vm2, %v2984_v23, %v2986_v1  ;;  %3001 = vrot.lane.b32.xlu0 %v6853_v5, %s5504_s28 }
 0x2ac   :  { %v5406_v15 = vpop.eup %5405  ;;  %2866 = vrot.lane.b32.xlu1 %v6860_v30, %s5503_s25  ;;  %4204 = vmatprep.subr.bf16.mxu0 %v3016_v17 }
 0x2ad   :  { %v2572_v28 = vsel %vm2382_vm9, %v2358_v7, %v5121_v62  ;;  %v5140_v18 = vadd.f32 -1.0, %v5406_v15  ;;  %v3260_v21 = vpop.permute.xlu0 %3259  ;;  %4205 = vmatpush1.bf16.msra.mxu0 %v3015_v58 }
 0x2ae   :  { %v7053_v10 = vpop.permute.xlu1 %2987  ;;  %v2711_v50 = vmul.f32 %v2673_v16, %v2572_v28  ;;  %v7152_v28 = vld [vmem:[%s7540_s4 + $0x4] ss:$8 sps:$4 sm:$0xff]  }
 0x2af   :  { %v2591_v40 = vsel %vm2401_vm11, %v2361_v24, %v5140_v18  ;;  %v3018_v27 = vsel %vm367_vm2, %v2986_v1, %v7053_v10  ;;  %3134 = vrot.lane.b32.xlu0 %v6729_v2, %s5505_s29  ;;  %v5486_v1 = vld [vmem:[#allocation2 + $0x288] sm:$0xff] }
 0x2b0   :  { %v2730_v47 = vmul.f32 %v2673_v16, %v2591_v40  ;;  %2999 = vrot.lane.b32.xlu1 %v6733_v36, %s5504_s28  ;;  %4247 = vmatprep.subr.bf16.mxu1 %v3018_v27 }
 0x2b1   :  { %v3429_v49 = vpop.permute.xlu0 %3428  ;;  %4248 = vmatpush1.bf16.msra.mxu1 %v3017_v60 }
 0x2b2   :  { %v2770_v35 = vpack.c.bf16 %v2730_v47, %v2711_v50  ;;  %v3460_v45 = vsel %vm1091_vm5, %v6914_v32, %v3429_v49  ;;  %v3461_v26 = vsel %vm1091_vm5, %v3429_v49, %v6997_v33  ;;  %v3121_v61 = vpop.permute.xlu1 %3120 }
 0x2b3   :  { %v3153_v19 = vsel %vm565_vm3, %v3119_v48, %v3121_v61  ;;  %v3154_v43 = vsel %vm565_vm3, %v3121_v61, %v3123_v8  ;;  %3138 = vrot.lane.b32.xlu0 %v6853_v5, %s5505_s29 }
 0x2b4   :  { %2789 = vst.msk [vmem:[#allocation3 + $0x98] sm:$0xff] %vm7544_vm12, %v2770_v35  ;;  %3003 = vrot.lane.b32.xlu1 %v6860_v30, %s5504_s28  ;;  %4206 = vmatprep.subr.bf16.mxu0 %v3153_v19 }
 0x2b5   :  { %v3433_v59 = vpop.permute.xlu0 %3432  ;;  %4207 = vmatpush1.bf16.msra.mxu0 %v3152_v52  ;;  %v5488_v52 = vld [vmem:[#allocation2 + $0x298] sm:$0xff] }
 0x2b6   :  { %v3462_v32 = vsel %vm1091_vm5, %v6997_v33, %v3433_v59  ;;  %v7074_v56 = vpop.permute.xlu1 %3124 }
 0x2b7   :  { %v3155_v41 = vsel %vm565_vm3, %v3123_v8, %v7074_v56  ;;  %3271 = vrot.lane.b32.xlu0 %v6729_v2, %s5506_s30 }
 0x2b8   :  { %3136 = vrot.lane.b32.xlu1 %v6733_v36, %s5505_s29  ;;  %4249 = vmatprep.subr.bf16.mxu1 %v3155_v41 }
 0x2b9   :  { %v3563_v7 = vpop.permute.xlu0 %3562  ;;  %4250 = vmatpush1.bf16.msra.mxu1 %v3154_v43 }
 0x2ba   :  { %v3596_v4 = vsel %vm1288_vm6, %v6953_v3, %v3563_v7  ;;  %v3597_v58 = vsel %vm1288_vm6, %v3563_v7, %v7011_v34  ;;  %v3258_v33 = vpop.permute.xlu1 %3257 }
 0x2bb   :  { %v3290_v14 = vsel %vm763_vm4, %v3256_v25, %v3258_v33  ;;  %v3291_v55 = vsel %vm763_vm4, %v3258_v33, %v3260_v21  ;;  %3275 = vrot.lane.b32.xlu0 %v6853_v5, %s5506_s30  ;;  %v7090_v2 = vld [vmem:[#allocation3 + $0x98] sm:$0xff] }
 0x2bc   :  { %3140 = vrot.lane.b32.xlu1 %v6860_v30, %s5505_s29  ;;  %4208 = vmatprep.subr.bf16.mxu0 %v3290_v14  ;;  %3379 = vst.msk [vmem:[#allocation2 + $0x2f0] sm:$0xff] %vm7545_vm13, %v7090_v2 }
 0x2bd   :  { %v3567_v3 = vpop.permute.xlu0 %3566  ;;  %4209 = vmatpush1.bf16.msra.mxu0 %v3289_v22 }
 0x2be   :  { %v3598_v24 = vsel %vm1288_vm6, %v7011_v34, %v3567_v3  ;;  %v7098_v9 = vpop.permute.xlu1 %3261  ;;  %4210 = vmatprep.subr.bf16.mxu0 %v5486_v1 }
 0x2bf   :  { %v3292_v42 = vsel %vm763_vm4, %v3260_v21, %v7098_v9  ;;  %3444 = vrot.lane.b32.xlu0 %v6733_v36, %s5507_s15 }
 0x2c0   :  { %3273 = vrot.lane.b32.xlu1 %v6733_v36, %s5506_s30  ;;  %4251 = vmatprep.subr.bf16.mxu1 %v3292_v42  ;;  %v5491_v42 = vld [vmem:[#allocation2 + $0x2a8] sm:$0xff] }
 0x2c1   :  { %v3700_v29 = vpop.permute.xlu0 %3699  ;;  %4211 = vmatpush1.bf16.msra.mxu0 %v5487_v20  ;;  %4252 = vmatpush1.bf16.msra.mxu1 %v3291_v55 }
 0x2c2   :  { %v3733_v34 = vsel %vm1486_vm7, %v6929_v54, %v3700_v29  ;;  %v3702_v48 = vpop.permute.xlu1 %3701  ;;  %4212 = vmatprep.subr.bf16.mxu0 %v3461_v26  ;;  %4253 = vmatprep.subr.bf16.mxu1 %v5488_v52 }
 0x2c3   :  { %v3734_v37 = vsel %vm1486_vm7, %v3700_v29, %v3702_v48  ;;  %3448 = vrot.lane.b32.xlu0 %v6860_v30, %s5507_s15 }
 0x2c4   :  { %3277 = vrot.lane.b32.xlu1 %v6860_v30, %s5506_s30 }
 0x2c5   :  { %v3704_v36 = vpop.permute.xlu0 %3703  ;;  %4213 = vmatpush1.bf16.msra.mxu0 %v3460_v45  ;;  %4254 = vmatpush1.bf16.msra.mxu1 %v5489_v38 }
 0x2c6   :  { %v3735_v12 = vsel %vm1486_vm7, %v3702_v48, %v3704_v36  ;;  %v3839_v31 = vpop.permute.xlu1 %3838  ;;  %4214 = vmatprep.subr.bf16.mxu0 %v3597_v58 }
 0x2c7   :  { %3578 = vrot.lane.b32.xlu0 %v6774_v57, %s5508_s18 }
 0x2c8   :  { %3446 = vrot.lane.b32.xlu1 %v6853_v5, %s5507_s15 }
 0x2c9   :  { %v3837_v54 = vpop.permute.xlu0 %3836  ;;  %4215 = vmatpush1.bf16.msra.mxu0 %v3596_v4 }
 0x2ca   :  { %v3870_v8 = vsel %vm1684_vm8, %v6977_v39, %v3837_v54  ;;  %v3871_v13 = vsel %vm1684_vm8, %v3837_v54, %v3839_v31  ;;  %v7121_v25 = vpop.permute.xlu1 %3434  ;;  %4216 = vmatprep.subr.bf16.mxu0 %v3734_v37  ;;  %v5493_v37 = vld [vmem:[#allocation2 + $0x2b8] sm:$0xff] }
 0x2cb   :  { %v3463_v63 = vsel %vm1091_vm5, %v3433_v59, %v7121_v25  ;;  %3582 = vrot.lane.b32.xlu0 %v6860_v30, %s5508_s18 }
 0x2cc   :  { %3450 = vrot.lane.b32.xlu1 %v6999_v46, %s5507_s15  ;;  %4255 = vmatprep.subr.bf16.mxu1 %v3463_v63 }
 0x2cd   :  { %v3841_v22 = vpop.permute.xlu0 %3840  ;;  %4217 = vmatpush1.bf16.msra.mxu0 %v3733_v34  ;;  %4256 = vmatpush1.bf16.msra.mxu1 %v3462_v32  ;;  %v5492_v34 = vld [vmem:[#allocation2 + $0x2a0] sm:$0xff] }
 0x2ce   :  { %v3872_v39 = vsel %vm1684_vm8, %v3839_v31, %v3841_v22  ;;  %v7130_v23 = vpop.permute.xlu1 %3568  ;;  %4218 = vmatprep.subr.bf16.mxu0 %v3871_v13  ;;  %v5494_v31 = vld [vmem:[#allocation2 + $0x2b0] sm:$0xff] }
 0x2cf   :  { %v3599_v62 = vsel %vm1288_vm6, %v3567_v3, %v7130_v23  ;;  %3715 = vrot.lane.b32.xlu0 %v6774_v57, %s5509_s19 }
 0x2d0   :  { %3580 = vrot.lane.b32.xlu1 %v6853_v5, %s5508_s18  ;;  %4257 = vmatprep.subr.bf16.mxu1 %v3599_v62 }
 0x2d1   :  { %v2853_v17 = vpop.permute.xlu0 %2852  ;;  %4219 = vmatpush1.bf16.msra.mxu0 %v3870_v8  ;;  %4258 = vmatpush1.bf16.msra.mxu1 %v3598_v24 }
 0x2d2   :  { %v2882_v60 = vsel %vm168_vm1, %v7033_v0, %v2853_v17  ;;  %v7140_v15 = vpop.permute.xlu1 %3705 }
 0x2d3   :  { %v3736_v16 = vsel %vm1486_vm7, %v3704_v36, %v7140_v15  ;;  %3719 = vrot.lane.b32.xlu0 %v6860_v30, %s5509_s19 }
 0x2d4   :  { %3584 = vrot.lane.b32.xlu1 %v6999_v46, %s5508_s18  ;;  %4235 = vmatmul.mubr.bf16.vlgmr.msra.gmra.mrb[24].mxu0 %v6965_v11 }
 0x2d5   :  { %v2857_v5 = vpop.permute.xlu0 %2856  ;;  %4259 = vmatprep.subr.bf16.mxu1 %v3736_v16  ;;  %5147 = vmatprep.mubr.msk.bf16.mxu0 %vm1932_vm0, %v7152_v28 }
 0x2d6   :  { %v7156_v0 = vpop.permute.xlu1 %3842  ;;  %4260 = vmatpush1.bf16.msra.mxu1 %v3735_v12 }
 0x2d7   :  { %v3873_v30 = vsel %vm1684_vm8, %v3841_v22, %v7156_v0  ;;  %3852 = vrot.lane.b32.xlu0 %v6774_v57, %s5510_s22 }
 0x2d8   :  { %3717 = vrot.lane.b32.xlu1 %v6912_v44, %s5509_s19  ;;  %4261 = vmatprep.subr.bf16.mxu1 %v3873_v30  ;;  %v2793_v30 = vld [vmem:[%s7541_s5 + $0x8] sm:$0xff] }
 0x2d9   :  { %v2990_v18 = vpop.permute.xlu0 %2989 }
 0x2da   :  { %v3019_v21 = vsel %vm367_vm2, %v7053_v10, %v2990_v18  ;;  %v2855_v40 = vpop.permute.xlu1 %2854  ;;  %4262 = vmatpush1.bf16.msra.mxu1 %v3872_v39 }
 0x2db   :  { %v2883_v27 = vsel %vm168_vm1, %v2853_v17, %v2855_v40  ;;  %v2884_v50 = vsel %vm168_vm1, %v2855_v40, %v2857_v5  ;;  %3856 = vrot.lane.b32.xlu0 %v6917_v51, %s5510_s22  ;;  %v2792_v40 = vld [vmem:[%s7541_s5] sm:$0xff] }
 0x2dc   :  { %3721 = vrot.lane.b32.xlu1 %v6999_v46, %s5509_s19  ;;  %4288 = vmatprep.subr.bf16.mxu0 %v2883_v27 }
 0x2dd   :  { %v2994_v57 = vpop.permute.xlu0 %2993  ;;  %4278 = vmatmul.mubr.bf16.vlgmr.msra.gmra.mrb[24].mxu1 %v6965_v11  ;;  %4289 = vmatpush1.bf16.msra.mxu0 %v2882_v60 }
 0x2de   :  { %v7173_v47 = vpop.permute.xlu1 %2858  ;;  %5148 = vmatprep.mubr.msk.bf16.mxu1 %vm1932_vm0, %v7152_v28 }
 0x2df   :  { %v2885_v10 = vsel %vm168_vm1, %v2857_v5, %v7173_v47  ;;  %2868 = vrot.lane.b32.xlu0 %v6999_v46, %s5503_s25 }
 0x2e0   :  { %3854 = vrot.lane.b32.xlu1 %v6912_v44, %s5510_s22  ;;  %4331 = vmatprep.subr.bf16.mxu1 %v2885_v10 }
 0x2e1   :  { %v3127_v51 = vpop.permute.xlu0 %3126  ;;  %4332 = vmatpush1.bf16.msra.mxu1 %v2884_v50 }
 0x2e2   :  { %v3156_v49 = vsel %vm565_vm3, %v7074_v56, %v3127_v51  ;;  %v2992_v35 = vpop.permute.xlu1 %2991 }
 0x2e3   :  { %v3020_v45 = vsel %vm367_vm2, %v2990_v18, %v2992_v35  ;;  %v3021_v26 = vsel %vm367_vm2, %v2992_v35, %v2994_v57  ;;  %2872 = vrot.lane.b32.xlu0 %v7090_v2, %s5503_s25 }
 0x2e4   :  { %3858 = vrot.lane.b32.xlu1 %v6999_v46, %s5510_s22  ;;  %4290 = vmatprep.subr.bf16.mxu0 %v3020_v45 }
 0x2e5   :  { %v3131_v61 = vpop.permute.xlu0 %3130  ;;  %4291 = vmatpush1.bf16.msra.mxu0 %v3019_v21 }
 0x2e6   :  { %v7191_v44 = vpop.permute.xlu1 %2995 }
 0x2e7   :  { %v3022_v19 = vsel %vm367_vm2, %v2994_v57, %v7191_v44  ;;  %3007 = vrot.lane.b32.xlu0 %v7003_v6, %s5504_s28 }
 0x2e8   :  { %2870 = vrot.lane.b32.xlu1 %v7003_v6, %s5503_s25  ;;  %4333 = vmatprep.subr.bf16.mxu1 %v3022_v19 }
 0x2e9   :  { %v3264_v43 = vpop.permute.xlu0 %3263  ;;  %4334 = vmatpush1.bf16.msra.mxu1 %v3021_v26 }
 0x2ea   :  { %v3293_v59 = vsel %vm763_vm4, %v7098_v9, %v3264_v43  ;;  %v3129_v32 = vpop.permute.xlu1 %3128 }
 0x2eb   :  { %v3157_v56 = vsel %vm565_vm3, %v3127_v51, %v3129_v32  ;;  %v3158_v41 = vsel %vm565_vm3, %v3129_v32, %v3131_v61  ;;  %3142 = vrot.lane.b32.xlu0 %v6999_v46, %s5505_s29 }
 0x2ec   :  { %3005 = vrot.lane.b32.xlu1 %v6999_v46, %s5504_s28  ;;  %4292 = vmatprep.subr.bf16.mxu0 %v3157_v56 }
 0x2ed   :  { %v3268_v7 = vpop.permute.xlu0 %3267  ;;  %4293 = vmatpush1.bf16.msra.mxu0 %v3156_v49 }
 0x2ee   :  { %v7207_v4 = vpop.permute.xlu1 %3132 }
 0x2ef   :  { %v3159_v58 = vsel %vm565_vm3, %v3131_v61, %v7207_v4  ;;  %3146 = vrot.lane.b32.xlu0 %v7090_v2, %s5505_s29 }
 0x2f0   :  { %3009 = vrot.lane.b32.xlu1 %v7090_v2, %s5504_s28  ;;  %4335 = vmatprep.subr.bf16.mxu1 %v3159_v58 }
 0x2f1   :  { %v3437_v33 = vpop.permute.xlu0 %3436  ;;  %4336 = vmatpush1.bf16.msra.mxu1 %v3158_v41 }
 0x2f2   :  { %v3464_v14 = vsel %vm1091_vm5, %v7121_v25, %v3437_v33  ;;  %v3266_v55 = vpop.permute.xlu1 %3265 }
 0x2f3   :  { %v3294_v3 = vsel %vm763_vm4, %v3264_v43, %v3266_v55  ;;  %v3295_v24 = vsel %vm763_vm4, %v3266_v55, %v3268_v7  ;;  %3281 = vrot.lane.b32.xlu0 %v7003_v6, %s5506_s30 }
 0x2f4   :  { %3144 = vrot.lane.b32.xlu1 %v7003_v6, %s5505_s29  ;;  %4294 = vmatprep.subr.bf16.mxu0 %v3294_v3 }
 0x2f5   :  { %v3441_v9 = vpop.permute.xlu0 %3440  ;;  %4295 = vmatpush1.bf16.msra.mxu0 %v3293_v59 }
 0x2f6   :  { %v7223_v1 = vpop.permute.xlu1 %3269  ;;  %4296 = vmatprep.subr.bf16.mxu0 %v5491_v42 }
 0x2f7   :  { %v3296_v29 = vsel %vm763_vm4, %v3268_v7, %v7223_v1  ;;  %3452 = vrot.lane.b32.xlu0 %v7003_v6, %s5507_s15 }
 0x2f8   :  { %3279 = vrot.lane.b32.xlu1 %v6999_v46, %s5506_s30  ;;  %4337 = vmatprep.subr.bf16.mxu1 %v3296_v29  ;;  %v3531_v46 = vld [vmem:[#allocation3 + $0xa0] sm:$0xff] }
 0x2f9   :  { %v3571_v20 = vpop.permute.xlu0 %3570  ;;  %4297 = vmatpush1.bf16.msra.mxu0 %v5492_v34  ;;  %4338 = vmatpush1.bf16.msra.mxu1 %v3295_v24 }
 0x2fa   :  { %v3600_v48 = vsel %vm1288_vm6, %v7130_v23, %v3571_v20  ;;  %v3439_v52 = vpop.permute.xlu1 %3438  ;;  %4339 = vmatprep.subr.bf16.mxu1 %v5493_v37 }
 0x2fb   :  { %v3465_v36 = vsel %vm1091_vm5, %v3437_v33, %v3439_v52  ;;  %v3466_v38 = vsel %vm1091_vm5, %v3439_v52, %v3441_v9  ;;  %3586 = vrot.lane.b32.xlu0 %v7003_v6, %s5508_s18 }
 0x2fc   :  { %3283 = vrot.lane.b32.xlu1 %v7090_v2, %s5506_s30  ;;  %4298 = vmatprep.subr.bf16.mxu0 %v3465_v36 }
 0x2fd   :  { %v3575_v12 = vpop.permute.xlu0 %3574  ;;  %4299 = vmatpush1.bf16.msra.mxu0 %v3464_v14  ;;  %4340 = vmatpush1.bf16.msra.mxu1 %v5494_v31  ;;  %v5496_v31 = vld [vmem:[#allocation2 + $0x2c0] sm:$0xff] }
 0x2fe   :  { %v3573_v54 = vpop.permute.xlu1 %3572 }
 0x2ff   :  { %v3601_v8 = vsel %vm1288_vm6, %v3571_v20, %v3573_v54  ;;  %v3602_v13 = vsel %vm1288_vm6, %v3573_v54, %v3575_v12  ;;  %3590 = vrot.lane.b32.xlu0 %v3531_v46, %s5508_s18 }
 0x300   :  { %3454 = vrot.lane.b32.xlu1 %v7090_v2, %s5507_s15  ;;  %4300 = vmatprep.subr.bf16.mxu0 %v3601_v8 }
 0x301   :  { %v3708_v6 = vpop.permute.xlu0 %3707  ;;  %4301 = vmatpush1.bf16.msra.mxu0 %v3600_v48 }
 0x302   :  { %v3737_v25 = vsel %vm1486_vm7, %v7140_v15, %v3708_v6  ;;  %v3710_v63 = vpop.permute.xlu1 %3709 }
 0x303   :  { %v3738_v22 = vsel %vm1486_vm7, %v3708_v6, %v3710_v63  ;;  %3725 = vrot.lane.b32.xlu0 %v7090_v2, %s5509_s19 }
 0x304   :  { %3588 = vrot.lane.b32.xlu1 %v7090_v2, %s5508_s18  ;;  %4302 = vmatprep.subr.bf16.mxu0 %v3738_v22  ;;  %v5498_v22 = vld [vmem:[#allocation2 + $0x2d0] sm:$0xff] }
 0x305   :  { %v3712_v39 = vpop.permute.xlu0 %3711  ;;  %4303 = vmatpush1.bf16.msra.mxu0 %v3737_v25 }
 0x306   :  { %v3739_v23 = vsel %vm1486_vm7, %v3710_v63, %v3712_v39  ;;  %v7252_v62 = vpop.permute.xlu1 %3442 }
 0x307   :  { %v3467_v17 = vsel %vm1091_vm5, %v3441_v9, %v7252_v62  ;;  %3860 = vrot.lane.b32.xlu0 %v7031_v53, %s5510_s22 }
 0x308   :  { %3723 = vrot.lane.b32.xlu1 %v7031_v53, %s5509_s19  ;;  %4341 = vmatprep.subr.bf16.mxu1 %v3467_v17 }
 0x309   :  { %v3845_v60 = vpop.permute.xlu0 %3844  ;;  %4342 = vmatpush1.bf16.msra.mxu1 %v3466_v38  ;;  %v5495_v38 = vld [vmem:[#allocation2 + $0x2c8] sm:$0xff] }
 0x30a   :  { %v3874_v15 = vsel %vm1684_vm8, %v7156_v0, %v3845_v60  ;;  %v7262_v16 = vpop.permute.xlu1 %3576 }
 0x30b   :  { %v3603_v5 = vsel %vm1288_vm6, %v3575_v12, %v7262_v16  ;;  %3864 = vrot.lane.b32.xlu0 %v3531_v46, %s5510_s22 }
 0x30c   :  { %3727 = vrot.lane.b32.xlu1 %v3531_v46, %s5509_s19  ;;  %4343 = vmatprep.subr.bf16.mxu1 %v3603_v5 }
 0x30d   :  { %v3849_v53 = vpop.permute.xlu0 %3848  ;;  %4344 = vmatpush1.bf16.msra.mxu1 %v3602_v13  ;;  %v5497_v13 = vld [vmem:[#allocation2 + $0x2d8] sm:$0xff] }
 0x30e   :  { %v7271_v18 = vpop.permute.xlu1 %3713 }
 0x30f   :  { %v3740_v0 = vsel %vm1486_vm7, %v3712_v39, %v7271_v18  ;;  %4101 = vperm.xlu0 %5241, %v2793_v30  }
 0x310   :  { %3862 = vrot.lane.b32.xlu1 %v7090_v2, %s5510_s22  ;;  %4345 = vmatprep.subr.bf16.mxu1 %v3740_v0 }
 0x311   :  { %v2861_v21 = vpop.permute.xlu0 %2860  ;;  %4346 = vmatpush1.bf16.msra.mxu1 %v3739_v23 }
 0x312   :  { %v2886_v27 = vsel %vm168_vm1, %v7173_v47, %v2861_v21  ;;  %v3847_v50 = vpop.permute.xlu1 %3846 }
 0x313   :  { %v3875_v57 = vsel %vm1684_vm8, %v3845_v60, %v3847_v50  ;;  %v3876_v10 = vsel %vm1684_vm8, %v3847_v50, %v3849_v53 }
 0x314   :  { %4096 = vperm.xlu1 %5240, %v2792_v40   ;;  %4304 = vmatprep.subr.bf16.mxu0 %v3875_v57 }
 0x315   :  { %v2865_v51 = vpop.permute.xlu0 %2864  ;;  %4305 = vmatpush1.bf16.msra.mxu0 %v3874_v15 }
 0x316   :  { %v7284_v2 = vpop.permute.xlu1 %3850 }
 0x317   :  { %v3877_v49 = vsel %vm1684_vm8, %v3849_v53, %v7284_v2 }
 0x318   :  { %4321 = vmatmul.mubr.bf16.vlgmr.msra.gmra.mrb[28].mxu0 %v6965_v11  ;;  %4347 = vmatprep.subr.bf16.mxu1 %v3877_v49 }
 0x319   :  { %v2998_v35 = vpop.permute.xlu0 %2997  ;;  %4348 = vmatpush1.bf16.msra.mxu1 %v3876_v10  ;;  %5149 = vmatprep.mubr.msk.bf16.mxu0 %vm1932_vm0, %v7152_v28 }
 0x31a   :  { %v3023_v47 = vsel %vm367_vm2, %v7191_v44, %v2998_v35  ;;  %v2863_v45 = vpop.permute.xlu1 %2862 }
 0x31b   :  { %v2887_v26 = vsel %vm168_vm1, %v2861_v21, %v2863_v45  ;;  %v2888_v61 = vsel %vm168_vm1, %v2863_v45, %v2865_v51 }
 0x31c   :  { %4364 = vmatmul.mubr.bf16.vlgmr.msra.gmra.mrb[28].mxu1 %v6965_v11  ;;  %4374 = vmatprep.subr.bf16.mxu0 %v2887_v26 }
 0x31d   :  { %v3002_v19 = vpop.permute.xlu0 %3001  ;;  %4375 = vmatpush1.bf16.msra.mxu0 %v2886_v27  ;;  %5150 = vmatprep.mubr.msk.bf16.mxu1 %vm1932_vm0, %v7152_v28 }
 0x31e   :  { %v7298_v43 = vpop.permute.xlu1 %2866 }
 0x31f   :  { %v2889_v59 = vsel %vm168_vm1, %v2865_v51, %v7298_v43 }
 0x320   :  { %4417 = vmatprep.subr.bf16.mxu1 %v2889_v59 }
 0x321   :  { %v3135_v44 = vpop.permute.xlu0 %3134  ;;  %4418 = vmatpush1.bf16.msra.mxu1 %v2888_v61 }
 0x322   :  { %v3160_v32 = vsel %vm565_vm3, %v7207_v4, %v3135_v44  ;;  %v3000_v56 = vpop.permute.xlu1 %2999 }
 0x323   :  { %v3024_v11 = vsel %vm367_vm2, %v2998_v35, %v3000_v56  ;;  %v3025_v41 = vsel %vm367_vm2, %v3000_v56, %v3002_v19 }
 0x324   :  { %4376 = vmatprep.subr.bf16.mxu0 %v3024_v11 }
 0x325   :  { %v3139_v7 = vpop.permute.xlu0 %3138  ;;  %4377 = vmatpush1.bf16.msra.mxu0 %v3023_v47 }
 0x326   :  { %v7306_v58 = vpop.permute.xlu1 %3003 }
 0x327   :  { %v3026_v33 = vsel %vm367_vm2, %v3002_v19, %v7306_v58  ;;  %v7361_v19 = vld [vmem:[%s7540_s4] ss:$8 sps:$4 sm:$0xff]  }
 0x328   :  { %4419 = vmatprep.subr.bf16.mxu1 %v3026_v33 }
 0x329   :  { %v3272_v14 = vpop.permute.xlu0 %3271  ;;  %4420 = vmatpush1.bf16.msra.mxu1 %v3025_v41 }
 0x32a   :  { %v3297_v55 = vsel %vm763_vm4, %v7223_v1, %v3272_v14  ;;  %v3137_v4 = vpop.permute.xlu1 %3136 }
 0x32b   :  { %v3161_v3 = vsel %vm565_vm3, %v3135_v44, %v3137_v4  ;;  %v3162_v24 = vsel %vm565_vm3, %v3137_v4, %v3139_v7  ;;  %v7366_v44 = vld [vmem:[#allocation3] sm:$0xff] }
 0x32c   :  { %4378 = vmatprep.subr.bf16.mxu0 %v3161_v3 }
 0x32d   :  { %v3276_v9 = vpop.permute.xlu0 %3275  ;;  %4379 = vmatpush1.bf16.msra.mxu0 %v3160_v32 }
 0x32e   :  { %v7314_v42 = vpop.permute.xlu1 %3140 }
 0x32f   :  { %v3163_v29 = vsel %vm565_vm3, %v3139_v7, %v7314_v42 }
 0x330   :  { %4421 = vmatprep.subr.bf16.mxu1 %v3163_v29 }
 0x331   :  { %v3445_v20 = vpop.permute.xlu0 %3444  ;;  %4422 = vmatpush1.bf16.msra.mxu1 %v3162_v24 }
 0x332   :  { %v3468_v34 = vsel %vm1091_vm5, %v7252_v62, %v3445_v20  ;;  %v3274_v1 = vpop.permute.xlu1 %3273 }
 0x333   :  { %v3298_v48 = vsel %vm763_vm4, %v3272_v14, %v3274_v1  ;;  %v3299_v52 = vsel %vm763_vm4, %v3274_v1, %v3276_v9 }
 0x334   :  { %4380 = vmatprep.subr.bf16.mxu0 %v3298_v48 }
 0x335   :  { %v3449_v37 = vpop.permute.xlu0 %3448  ;;  %4381 = vmatpush1.bf16.msra.mxu0 %v3297_v55 }
 0x336   :  { %v7322_v36 = vpop.permute.xlu1 %3277  ;;  %4382 = vmatprep.subr.bf16.mxu0 %v5495_v38 }
 0x337   :  { %v3300_v46 = vsel %vm763_vm4, %v3276_v9, %v7322_v36 }
 0x338   :  { %4423 = vmatprep.subr.bf16.mxu1 %v3300_v46 }
 0x339   :  { %v3579_v12 = vpop.permute.xlu0 %3578  ;;  %4383 = vmatpush1.bf16.msra.mxu0 %v5496_v31  ;;  %4424 = vmatpush1.bf16.msra.mxu1 %v3299_v52 }
 0x33a   :  { %v3604_v54 = vsel %vm1288_vm6, %v7262_v16, %v3579_v12  ;;  %v3447_v8 = vpop.permute.xlu1 %3446  ;;  %4425 = vmatprep.subr.bf16.mxu1 %v5497_v13 }
 0x33b   :  { %v3469_v6 = vsel %vm1091_vm5, %v3445_v20, %v3447_v8  ;;  %v3470_v25 = vsel %vm1091_vm5, %v3447_v8, %v3449_v37 }
 0x33c   :  { %4384 = vmatprep.subr.bf16.mxu0 %v3469_v6 }
 0x33d   :  { %v3583_v63 = vpop.permute.xlu0 %3582  ;;  %4385 = vmatpush1.bf16.msra.mxu0 %v3468_v34  ;;  %4426 = vmatpush1.bf16.msra.mxu1 %v5498_v22 }
 0x33e   :  { %v7330_v39 = vpop.permute.xlu1 %3450 }
 0x33f   :  { %v3471_v23 = vsel %vm1091_vm5, %v3449_v37, %v7330_v39 }
 0x340   :  { %4427 = vmatprep.subr.bf16.mxu1 %v3471_v23 }
 0x341   :  { %v3716_v62 = vpop.permute.xlu0 %3715  ;;  %4428 = vmatpush1.bf16.msra.mxu1 %v3470_v25 }
 0x342   :  { %v3741_v17 = vsel %vm1486_vm7, %v7271_v18, %v3716_v62  ;;  %v3581_v60 = vpop.permute.xlu1 %3580 }
 0x343   :  { %v3605_v15 = vsel %vm1288_vm6, %v3579_v12, %v3581_v60  ;;  %v3606_v16 = vsel %vm1288_vm6, %v3581_v60, %v3583_v63 }
 0x344   :  { %4386 = vmatprep.subr.bf16.mxu0 %v3605_v15 }
 0x345   :  { %v3720_v5 = vpop.permute.xlu0 %3719  ;;  %4387 = vmatpush1.bf16.msra.mxu0 %v3604_v54 }
 0x346   :  { %v7338_v30 = vpop.permute.xlu1 %3584 }
 0x347   :  { %v3607_v53 = vsel %vm1288_vm6, %v3583_v63, %v7338_v30  ;;  %v5502_v63 = vld [vmem:[#allocation2 + $0x2e0] sm:$0xff] }
 0x348   :  { %4429 = vmatprep.subr.bf16.mxu1 %v3607_v53 }
 0x349   :  { %v3853_v0 = vpop.permute.xlu0 %3852  ;;  %4430 = vmatpush1.bf16.msra.mxu1 %v3606_v16 }
 0x34a   :  { %v3878_v21 = vsel %vm1684_vm8, %v7284_v2, %v3853_v0  ;;  %v3718_v18 = vpop.permute.xlu1 %3717 }
 0x34b   :  { %v3742_v40 = vsel %vm1486_vm7, %v3716_v62, %v3718_v18  ;;  %v3743_v27 = vsel %vm1486_vm7, %v3718_v18, %v3720_v5 }
 0x34c   :  { %4388 = vmatprep.subr.bf16.mxu0 %v3742_v40 }
 0x34d   :  { %v3857_v50 = vpop.permute.xlu0 %3856  ;;  %4389 = vmatpush1.bf16.msra.mxu0 %v3741_v17 }
 0x34e   :  { %v7346_v57 = vpop.permute.xlu1 %3721 }
 0x34f   :  { %v3744_v10 = vsel %vm1486_vm7, %v3720_v5, %v7346_v57 }
 0x350   :  { %4431 = vmatprep.subr.bf16.mxu1 %v3744_v10 }
 0x351   :  { %v2869_v51 = vpop.permute.xlu0 %2868  ;;  %4432 = vmatpush1.bf16.msra.mxu1 %v3743_v27 }
 0x352   :  { %v2890_v49 = vsel %vm168_vm1, %v7298_v43, %v2869_v51  ;;  %v3855_v2 = vpop.permute.xlu1 %3854 }
 0x353   :  { %v3879_v35 = vsel %vm1684_vm8, %v3853_v0, %v3855_v2  ;;  %v3880_v47 = vsel %vm1684_vm8, %v3855_v2, %v3857_v50 }
 0x354   :  { %4390 = vmatprep.subr.bf16.mxu0 %v3879_v35 }
 0x355   :  { %v2873_v45 = vpop.permute.xlu0 %2872  ;;  %4391 = vmatpush1.bf16.msra.mxu0 %v3878_v21 }
 0x356   :  { %v7354_v26 = vpop.permute.xlu1 %3858 }
 0x357   :  { %v3881_v61 = vsel %vm1684_vm8, %v3857_v50, %v7354_v26  ;;  %v4017_v50 = vld [vmem:[#allocation2 + $0x2f0] sm:$0xff] }
 0x358   :  { %4407 = vmatmul.mubr.bf16.vlgmr.msra.gmra.mrb[32].mxu0 %v7361_v19  ;;  %4433 = vmatprep.subr.bf16.mxu1 %v3881_v61 }
 0x359   :  { %v3008_v43 = vpop.permute.xlu0 %3007  ;;  %4434 = vmatpush1.bf16.msra.mxu1 %v3880_v47  ;;  %5151 = vmatprep.mubr.msk.bf16.mxu0 %vm1932_vm0, %v7152_v28 }
 0x35a   :  { %v2871_v59 = vpop.permute.xlu1 %2870  ;;  %4503 = vmatprep.subr.bf16.mxu1 %v7366_v44 }
 0x35b   :  { %v2891_v32 = vsel %vm168_vm1, %v2869_v51, %v2871_v59  ;;  %v2892_v56 = vsel %vm168_vm1, %v2871_v59, %v2873_v45  ;;  %vm7547_vm1 = vmmov %vm7544_vm12 }
 0x35c   :  { %2930 = vst.msk [vmem:[#allocation2 + $0x90] sm:$0xff] %vm7546_vm14, %v2892_v56  ;;  %4450 = vmatmul.mubr.bf16.vlgmr.msra.gmra.mrb[32].mxu1 %v7361_v19  ;;  %4460 = vmatprep.subr.bf16.mxu0 %v2891_v32 }
 0x35d   :  { %v3143_v11 = vpop.permute.xlu0 %3142  ;;  %4461 = vmatpush1.bf16.msra.mxu0 %v2890_v49  ;;  %5152 = vmatprep.mubr.msk.bf16.mxu1 %vm1932_vm0, %v7152_v28  ;;  %vm7548_vm0 = vmmov %vm7547_vm1 }
 0x35e   :  { %v3164_v41 = vsel %vm565_vm3, %v7314_v42, %v3143_v11  ;;  %v3006_v7 = vpop.permute.xlu1 %3005 }
 0x35f   :  { %v3027_v33 = vsel %vm367_vm2, %v7306_v58, %v3006_v7  ;;  %v3028_v14 = vsel %vm367_vm2, %v3006_v7, %v3008_v43 }
 0x360   :  { %4462 = vmatprep.subr.bf16.mxu0 %v3028_v14 }
 0x361   :  { %v3147_v55 = vpop.permute.xlu0 %3146  ;;  %4463 = vmatpush1.bf16.msra.mxu0 %v3027_v33 }
 0x362   :  { %v3010_v4 = vpop.permute.xlu1 %3009 }
 0x363   :  { %v3029_v3 = vsel %vm367_vm2, %v3008_v43, %v3010_v4  ;;  %v3941_v24 = vld [vmem:[#allocation2 + $0x90] sm:$0xff]  ;;  %vm7549_vm2 = vmmov %vm7548_vm0 }
 0x364   :  { %3067 = vst.msk [vmem:[#allocation2 + $0x128] sm:$0xff] %vm7547_vm1, %v3029_v3  ;;  %4504 = vmatpush1.bf16.msra.mxu1 %v3941_v24 }
 0x365   :  { %v3282_v28 = vpop.permute.xlu0 %3281  ;;  %4505 = vmatprep.subr.bf16.mxu1 %v7366_v44 }
 0x366   :  { %v3145_v9 = vpop.permute.xlu1 %3144 }
 0x367   :  { %v3165_v42 = vsel %vm565_vm3, %v3143_v11, %v3145_v9  ;;  %v3166_v58 = vsel %vm565_vm3, %v3145_v9, %v3147_v55  ;;  %vm7550_vm3 = vmmov %vm7548_vm0 }
 0x368   :  { %3204 = vst.msk [vmem:[#allocation2 + $0x1c0] sm:$0xff] %vm7548_vm0, %v3166_v58  ;;  %4464 = vmatprep.subr.bf16.mxu0 %v3165_v42 }
 0x369   :  { %v3453_v29 = vpop.permute.xlu0 %3452  ;;  %4465 = vmatpush1.bf16.msra.mxu0 %v3164_v41 }
 0x36a   :  { %v3472_v20 = vsel %vm1091_vm5, %v7330_v39, %v3453_v29  ;;  %v3280_v34 = vpop.permute.xlu1 %3279 }
 0x36b   :  { %v3301_v1 = vsel %vm763_vm4, %v7322_v36, %v3280_v34  ;;  %v3302_v48 = vsel %vm763_vm4, %v3280_v34, %v3282_v28  ;;  %v3960_v52 = vld [vmem:[#allocation2 + $0x128] sm:$0xff]  ;;  %v7391_v37 = vpop.f32.mrb[20].mxu0 }
 0x36c   :  { %4506 = vmatpush1.bf16.msra.mxu1 %v3960_v52  ;;  %4466 = vmatprep.subr.bf16.mxu0 %v3302_v48  ;;  %v7393_v38 = vpop.f32.mrb[21].mxu0  ;;  %v5501_v36 = vld [vmem:[#allocation2 + $0x2e8] sm:$0xff] }
 0x36d   :  { %v3587_v46 = vpop.permute.xlu0 %3586  ;;  %4507 = vmatprep.subr.bf16.mxu1 %v7366_v44  ;;  %4467 = vmatpush1.bf16.msra.mxu0 %v3301_v1  ;;  %v7396_v12 = vpop.f32.mrb[22].mxu0 }
 0x36e   :  { %v3608_v31 = vsel %vm1288_vm6, %v7338_v30, %v3587_v46  ;;  %v3284_v54 = vpop.permute.xlu1 %3283  ;;  %4468 = vmatprep.subr.bf16.mxu0 %v5501_v36  ;;  %v4156_v8 = vpop.f32.mrb[23].mxu0 }
 0x36f   :  { %v3303_v13 = vsel %vm763_vm4, %v3282_v28, %v3284_v54  ;;  %v3979_v6 = vld [vmem:[#allocation2 + $0x1c0] sm:$0xff]  ;;  %vm7551_vm4 = vmmov %vm7548_vm0 }
 0x370   :  { %3341 = vst.msk [vmem:[#allocation2 + $0x258] sm:$0xff] %vm7549_vm2, %v3303_v13  ;;  %4508 = vmatpush1.bf16.msra.mxu1 %v3979_v6 }
 0x371   :  { %v3591_v25 = vpop.permute.xlu0 %3590  ;;  %4509 = vmatprep.subr.bf16.mxu1 %v7366_v44  ;;  %4469 = vmatpush1.bf16.msra.mxu0 %v5502_v63 }
 0x372   :  { %v3455_v22 = vpop.permute.xlu1 %3454 }
 0x373   :  { %v3473_v39 = vsel %vm1091_vm5, %v3453_v29, %v3455_v22  ;;  %3511 = vst.msk [vmem:[#allocation2 + $0x388] sm:$0xff] %vm7550_vm3, %v3455_v22  ;;  %v7405_v23 = vpop.f32.mrb[20].mxu1  ;;  %vm7552_vm5 = vmmov %vm7548_vm0 }
 0x374   :  { %4470 = vmatprep.subr.bf16.mxu0 %v3473_v39  ;;  %v7407_v62 = vpop.f32.mrb[21].mxu1 }
 0x375   :  { %v3726_v17 = vpop.permute.xlu0 %3725  ;;  %4471 = vmatpush1.bf16.msra.mxu0 %v3472_v20  ;;  %v4197_v60 = vpop.f32.mrb[22].mxu1 }
 0x376   :  { %v3589_v15 = vpop.permute.xlu1 %3588  ;;  %v4199_v16 = vpop.f32.mrb[23].mxu1 }
 0x377   :  { %v3609_v5 = vsel %vm1288_vm6, %v3587_v46, %v3589_v15  ;;  %v3610_v30 = vsel %vm1288_vm6, %v3589_v15, %v3591_v25  ;;  %v3998_v53 = vld [vmem:[#allocation2 + $0x258] sm:$0xff]  ;;  %vm7553_vm6 = vmmov %vm7548_vm0 }
 0x378   :  { %3648 = vst.msk [vmem:[#allocation2 + $0x420] sm:$0xff] %vm7551_vm4, %v3610_v30  ;;  %4510 = vmatpush1.bf16.msra.mxu1 %v3998_v53  ;;  %4472 = vmatprep.subr.bf16.mxu0 %v3609_v5 }
 0x379   :  { %v3861_v0 = vpop.permute.xlu0 %3860  ;;  %4511 = vmatprep.subr.bf16.mxu1 %v7366_v44  ;;  %4473 = vmatpush1.bf16.msra.mxu0 %v3608_v31 }
 0x37a   :  { %v3882_v21 = vsel %vm1684_vm8, %v7354_v26, %v3861_v0  ;;  %v3724_v18 = vpop.permute.xlu1 %3723  ;;  %v4036_v49 = vld [vmem:[#allocation2 + $0x388] sm:$0xff] }
 0x37b   :  { %v3745_v40 = vsel %vm1486_vm7, %v7346_v57, %v3724_v18  ;;  %v3746_v27 = vsel %vm1486_vm7, %v3724_v18, %v3726_v17 }
 0x37c   :  { %4512 = vmatpush1.bf16.msra.mxu1 %v4017_v50  ;;  %4474 = vmatprep.subr.bf16.mxu0 %v3746_v27 }
 0x37d   :  { %4513 = vmatprep.subr.bf16.mxu1 %v7366_v44  ;;  %4475 = vmatpush1.bf16.msra.mxu0 %v3745_v40  ;;  %v3865_v2 = vpop.permute.xlu0 %3864 }
 0x37e   :  { %v3728_v10 = vpop.permute.xlu1 %3727 }
 0x37f   :  { %v3747_v51 = vsel %vm1486_vm7, %v3726_v17, %v3728_v10  ;;  %v4055_v45 = vld [vmem:[#allocation2 + $0x420] sm:$0xff] }
 0x380   :  { %3785 = vst.msk [vmem:[#allocation2 + $0x4b8] sm:$0xff] %vm7552_vm5, %v3747_v51  ;;  %4514 = vmatpush1.bf16.msra.mxu1 %v4036_v49 }
 0x381   :  { %4515 = vmatprep.subr.bf16.mxu1 %v7366_v44 }
 0x382   :  { %v3863_v35 = vpop.permute.xlu1 %3862 }
 0x383   :  { %v3883_v57 = vsel %vm1684_vm8, %v3861_v0, %v3863_v35  ;;  %v3884_v47 = vsel %vm1684_vm8, %v3863_v35, %v3865_v2 }
 0x384   :  { %3922 = vst.msk [vmem:[#allocation2 + $0x550] sm:$0xff] %vm7553_vm6, %v3884_v47  ;;  %4516 = vmatpush1.bf16.msra.mxu1 %v4055_v45  ;;  %4476 = vmatprep.subr.bf16.mxu0 %v3883_v57 }
 0x385   :  { %4517 = vmatprep.subr.bf16.mxu1 %v7366_v44  ;;  %4477 = vmatpush1.bf16.msra.mxu0 %v3882_v21 }
 0x387   :  { %v4074_v26 = vld [vmem:[#allocation2 + $0x4b8] sm:$0xff] }
 0x388   :  { %4518 = vmatpush1.bf16.msra.mxu1 %v4074_v26  ;;  %4493 = vmatmul.mubr.bf16.vlgmr.msra.gmra.mrb[36].mxu0 %v7361_v19 }
 0x389   :  { %4519 = vmatprep.subr.bf16.mxu1 %v7366_v44 }
 0x38b   :  { %v4093_v61 = vld [vmem:[#allocation2 + $0x550] sm:$0xff] }
 0x38c   :  { %4520 = vmatpush1.bf16.msra.mxu1 %v4093_v61 }
 0x38e   :  { %v7428_v43 = vpop.permute.xlu0 %4101 }
 0x38f   :  { %v4155_v59 = vadd.f32 %v7396_v12, %v7428_v43  ;;  %v4157_v32 = vadd.f32 %v4156_v8, %v7428_v43  ;;  %v4198_v56 = vadd.f32 %v4197_v60, %v7428_v43  ;;  %v4200_v11 = vadd.f32 %v4199_v16, %v7428_v43  ;;  %4536 = vmatmul.mubr.bf16.vlgmr.msra.gmra.mrb[36].mxu1 %v7361_v19 }
 0x391   :  { %v4601_v41 = vmin.f32 %v4155_v59, 0.0  ;;  %v4602_v7 = vmin.f32 %v4157_v32, 0.0  ;;  %v4603_v33 = vmin.f32 %v4198_v56, 0.0  ;;  %v4604_v14 = vmin.f32 %v4200_v11, 0.0 }
 0x392   :  { %vm4563_vm7 = vcmp.gt.f32.partialorder %v4155_v59, 0.0  ;;  %vm4564_vm8 = vcmp.gt.f32.partialorder %v4157_v32, 0.0  ;;  %vm4565_vm15 = vcmp.gt.f32.partialorder %v4198_v56, 0.0  ;;  %vm4566_vm10 = vcmp.gt.f32.partialorder %v4200_v11, 0.0 }
 0x393   :  { %v4658_v44 = vmul.f32 1.442695, %v4601_v41  ;;  %v4660_v55 = vmul.f32 1.442695, %v4602_v7  ;;  %v7436_v4 = vpop.permute.xlu1 %4096  ;;  %v4662_v3 = vmul.f32 1.442695, %v4603_v33 }
 0x394   :  { %v4664_v24 = vmul.f32 1.442695, %v4604_v14  ;;  %v4151_v28 = vadd.f32 %v7391_v37, %v7436_v4  ;;  %v4153_v9 = vadd.f32 %v7393_v38, %v7436_v4  ;;  %v4194_v19 = vadd.f32 %v7405_v23, %v7436_v4 }
 0x395   :  { %5407 = vpow2.f32 %v4658_v44  ;;  %v4196_v42 = vadd.f32 %v7407_v62, %v7436_v4 }
 0x396   :  { %5409 = vpow2.f32 %v4660_v55  ;;  %v4582_v58 = vmin.f32 %v4151_v28, 0.0  ;;  %v4583_v29 = vmin.f32 %v4153_v9, 0.0  ;;  %v4584_v20 = vmin.f32 %v4194_v19, 0.0 }
 0x397   :  { %5411 = vpow2.f32 %v4662_v3  ;;  %v4585_v34 = vmin.f32 %v4196_v42, 0.0  ;;  %vm4544_vm9 = vcmp.gt.f32.partialorder %v4151_v28, 0.0  ;;  %vm4545_vm11 = vcmp.gt.f32.partialorder %v4153_v9, 0.0 }
 0x398   :  { %5413 = vpow2.f32 %v4664_v24  ;;  %v4620_v1 = vmul.f32 1.442695, %v4582_v58  ;;  %v4622_v48 = vmul.f32 1.442695, %v4583_v29  ;;  %v4624_v52 = vmul.f32 1.442695, %v4584_v20 }
 0x399   :  { %v4626_v37 = vmul.f32 1.442695, %v4585_v34  ;;  %vm4546_vm12 = vcmp.gt.f32.partialorder %v4194_v19, 0.0  ;;  %vm4547_vm13 = vcmp.gt.f32.partialorder %v4196_v42, 0.0 }
 0x39a   :  { %5415 = vpow2.f32 %v4620_v1 }
 0x39b   :  { %5417 = vpow2.f32 %v4622_v48 }
 0x39c   :  { %5419 = vpow2.f32 %v4624_v52 }
 0x39d   :  { %5421 = vpow2.f32 %v4626_v37 }
 0x39f   :  { %v5408_v38 = vpop.eup %5407 }
 0x3a0   :  { %v5410_v46 = vpop.eup %5409  ;;  %v5172_v12 = vadd.f32 -1.0, %v5408_v38 }
 0x3a1   :  { %v5412_v31 = vpop.eup %5411  ;;  %v5173_v54 = vadd.f32 -1.0, %v5410_v46 }
 0x3a2   :  { %v5414_v36 = vpop.eup %5413  ;;  %v4753_v8 = vsel %vm4563_vm7, %v4155_v59, %v5172_v12  ;;  %v5174_v13 = vadd.f32 -1.0, %v5412_v31 }
 0x3a3   :  { %v4754_v6 = vsel %vm4564_vm8, %v4157_v32, %v5173_v54  ;;  %v5175_v25 = vadd.f32 -1.0, %v5414_v36 }
 0x3a4   :  { %v5416_v63 = vpop.eup %5415  ;;  %v5221_v22 = vpack.c.bf16 %v4754_v6, %v4753_v8  ;;  %v4755_v39 = vsel %vm4565_vm15, %v4198_v56, %v5174_v13 }
 0x3a5   :  { %v5418_v23 = vpop.eup %5417  ;;  %v4756_v62 = vsel %vm4566_vm10, %v4200_v11, %v5175_v25  ;;  %v5153_v17 = vadd.f32 -1.0, %v5416_v63 }
 0x3a6   :  { %v5420_v60 = vpop.eup %5419  ;;  %4899 = vst [vmem:[%s7542_s6 + $0x4c] sm:$0xff] %v5221_v22  ;;  %v5222_v15 = vpack.c.bf16 %v4756_v62, %v4755_v39  ;;  %v5154_v16 = vadd.f32 -1.0, %v5418_v23 }
 0x3a7   :  { %v5422_v5 = vpop.eup %5421  ;;  %v5155_v30 = vadd.f32 -1.0, %v5420_v60  ;;  %v4734_v53 = vsel %vm4544_vm9, %v4151_v28, %v5153_v17  ;;  %v4236_v0 = vpop.f32.mrb[24].mxu0 }
 0x3a8   :  { %4900 = vst [vmem:[%s7542_s6 + $0x54] sm:$0xff] %v5222_v15  ;;  %v5156_v21 = vadd.f32 -1.0, %v5422_v5  ;;  %v4735_v18 = vsel %vm4545_vm11, %v4153_v9, %v5154_v16  ;;  %v4237_v40 = vadd.f32 %v4236_v0, %v7436_v4  ;;  %v4238_v27 = vpop.f32.mrb[25].mxu0 }
 0x3a9   :  { %v4736_v50 = vsel %vm4546_vm12, %v4194_v19, %v5155_v30  ;;  %v5211_v10 = vpack.c.bf16 %v4735_v18, %v4734_v53  ;;  %v4239_v51 = vadd.f32 %v4238_v27, %v7436_v4  ;;  %v4240_v49 = vpop.f32.mrb[26].mxu0 }
 0x3aa   :  { %v4737_v2 = vsel %vm4547_vm13, %v4196_v42, %v5156_v21  ;;  %v4586_v35 = vmin.f32 %v4237_v40, 0.0  ;;  %v4241_v57 = vadd.f32 %v4240_v49, %v7428_v43  ;;  %v4242_v47 = vpop.f32.mrb[27].mxu0  ;;  %vm4548_vm14 = vcmp.gt.f32.partialorder %v4237_v40, 0.0 }
 0x3ab   :  { %v5212_v45 = vpack.c.bf16 %v4737_v2, %v4736_v50  ;;  %4888 = vst [vmem:[%s7542_s6] sm:$0xff] %v5211_v10  ;;  %v4587_v26 = vmin.f32 %v4239_v51, 0.0  ;;  %v4243_v61 = vadd.f32 %v4242_v47, %v7428_v43  ;;  %vm4549_vm1 = vcmp.gt.f32.partialorder %v4239_v51, 0.0 }
 0x3ac   :  { %v4628_v59 = vmul.f32 1.442695, %v4586_v35  ;;  %v4605_v32 = vmin.f32 %v4241_v57, 0.0  ;;  %vm4567_vm0 = vcmp.gt.f32.partialorder %v4241_v57, 0.0 }
 0x3ad   :  { %4889 = vst [vmem:[%s7542_s6 + $0x8] sm:$0xff] %v5212_v45  ;;  %v4630_v56 = vmul.f32 1.442695, %v4587_v26  ;;  %v4606_v11 = vmin.f32 %v4243_v61, 0.0  ;;  %vm4568_vm2 = vcmp.gt.f32.partialorder %v4243_v61, 0.0 }
 0x3ae   :  { %5423 = vpow2.f32 %v4628_v59  ;;  %v4666_v41 = vmul.f32 1.442695, %v4605_v32 }
 0x3af   :  { %5425 = vpow2.f32 %v4630_v56  ;;  %v4668_v7 = vmul.f32 1.442695, %v4606_v11 }
 0x3b0   :  { %5427 = vpow2.f32 %v4666_v41  ;;  %v4279_v33 = vpop.f32.mrb[24].mxu1 }
 0x3b1   :  { %5429 = vpow2.f32 %v4668_v7  ;;  %v4280_v14 = vadd.f32 %v4279_v33, %v7436_v4  ;;  %v4281_v44 = vpop.f32.mrb[25].mxu1 }
 0x3b2   :  { %v4282_v55 = vadd.f32 %v4281_v44, %v7436_v4  ;;  %v4283_v3 = vpop.f32.mrb[26].mxu1 }
 0x3b3   :  { %v4588_v24 = vmin.f32 %v4280_v14, 0.0  ;;  %v4284_v28 = vadd.f32 %v4283_v3, %v7428_v43  ;;  %v4285_v9 = vpop.f32.mrb[27].mxu1  ;;  %vm4550_vm3 = vcmp.gt.f32.partialorder %v4280_v14, 0.0 }
 0x3b4   :  { %v4589_v19 = vmin.f32 %v4282_v55, 0.0  ;;  %v4286_v42 = vadd.f32 %v4285_v9, %v7428_v43  ;;  %vm4551_vm4 = vcmp.gt.f32.partialorder %v4282_v55, 0.0 }
 0x3b5   :  { %v4632_v58 = vmul.f32 1.442695, %v4588_v24  ;;  %v4607_v29 = vmin.f32 %v4284_v28, 0.0  ;;  %vm4569_vm5 = vcmp.gt.f32.partialorder %v4284_v28, 0.0 }
 0x3b6   :  { %v4634_v20 = vmul.f32 1.442695, %v4589_v19  ;;  %v4608_v34 = vmin.f32 %v4286_v42, 0.0  ;;  %vm4570_vm6 = vcmp.gt.f32.partialorder %v4286_v42, 0.0 }
 0x3b7   :  { %5431 = vpow2.f32 %v4632_v58  ;;  %v4670_v1 = vmul.f32 1.442695, %v4607_v29 }
 0x3b8   :  { %v5424_v48 = vpop.eup %5423  ;;  %5433 = vpow2.f32 %v4634_v20  ;;  %v4672_v52 = vmul.f32 1.442695, %v4608_v34 }
 0x3b9   :  { %v5426_v37 = vpop.eup %5425  ;;  %v5157_v38 = vadd.f32 -1.0, %v5424_v48  ;;  %5435 = vpow2.f32 %v4670_v1 }
 0x3ba   :  { %v5428_v46 = vpop.eup %5427  ;;  %v5158_v12 = vadd.f32 -1.0, %v5426_v37  ;;  %5437 = vpow2.f32 %v4672_v52 }
 0x3bb   :  { %v5430_v31 = vpop.eup %5429  ;;  %v4738_v54 = vsel %vm4548_vm14, %v4237_v40, %v5157_v38  ;;  %v5176_v36 = vadd.f32 -1.0, %v5428_v46 }
 0x3bc   :  { %v4739_v8 = vsel %vm4549_vm1, %v4239_v51, %v5158_v12  ;;  %v5177_v13 = vadd.f32 -1.0, %v5430_v31 }
 0x3bd   :  { %v5213_v6 = vpack.c.bf16 %v4739_v8, %v4738_v54  ;;  %v4757_v25 = vsel %vm4567_vm0, %v4241_v57, %v5176_v36 }
 0x3be   :  { %v4758_v63 = vsel %vm4568_vm2, %v4243_v61, %v5177_v13 }
 0x3bf   :  { %4890 = vst [vmem:[%s7542_s6 + $0x10] sm:$0xff] %v5213_v6  ;;  %v5223_v22 = vpack.c.bf16 %v4758_v63, %v4757_v25 }
 0x3c1   :  { %v5432_v39 = vpop.eup %5431  ;;  %4901 = vst [vmem:[%s7542_s6 + $0x5c] sm:$0xff] %v5223_v22 }
 0x3c2   :  { %v5434_v23 = vpop.eup %5433  ;;  %v5159_v62 = vadd.f32 -1.0, %v5432_v39 }
 0x3c3   :  { %v5436_v17 = vpop.eup %5435  ;;  %v5160_v60 = vadd.f32 -1.0, %v5434_v23 }
 0x3c4   :  { %v5438_v15 = vpop.eup %5437  ;;  %v4740_v16 = vsel %vm4550_vm3, %v4280_v14, %v5159_v62  ;;  %v5178_v5 = vadd.f32 -1.0, %v5436_v17 }
 0x3c5   :  { %v4741_v30 = vsel %vm4551_vm4, %v4282_v55, %v5160_v60  ;;  %v5179_v53 = vadd.f32 -1.0, %v5438_v15 }
 0x3c6   :  { %v5214_v0 = vpack.c.bf16 %v4741_v30, %v4740_v16  ;;  %v4759_v21 = vsel %vm4569_vm5, %v4284_v28, %v5178_v5 }
 0x3c7   :  { %v4760_v18 = vsel %vm4570_vm6, %v4286_v42, %v5179_v53 }
 0x3c8   :  { %4891 = vst [vmem:[%s7542_s6 + $0x18] sm:$0xff] %v5214_v0  ;;  %v5224_v40 = vpack.c.bf16 %v4760_v18, %v4759_v21 }
 0x3ca   :  { %4902 = vst [vmem:[%s7542_s6 + $0x64] sm:$0xff] %v5224_v40 }
 0x3eb   :  { %v4322_v27 = vpop.f32.mrb[28].mxu0 }
 0x3ec   :  { %v4323_v50 = vadd.f32 %v4322_v27, %v7436_v4  ;;  %v4324_v10 = vpop.f32.mrb[29].mxu0 }
 0x3ed   :  { %v4325_v51 = vadd.f32 %v4324_v10, %v7436_v4  ;;  %v4326_v49 = vpop.f32.mrb[30].mxu0 }
 0x3ee   :  { %v4590_v2 = vmin.f32 %v4323_v50, 0.0  ;;  %v4327_v35 = vadd.f32 %v4326_v49, %v7428_v43  ;;  %v4328_v57 = vpop.f32.mrb[31].mxu0  ;;  %vm4552_vm7 = vcmp.gt.f32.partialorder %v4323_v50, 0.0 }
 0x3ef   :  { %v4591_v47 = vmin.f32 %v4325_v51, 0.0  ;;  %v4329_v45 = vadd.f32 %v4328_v57, %v7428_v43  ;;  %v4365_v26 = vpop.f32.mrb[28].mxu1  ;;  %vm4553_vm8 = vcmp.gt.f32.partialorder %v4325_v51, 0.0 }
 0x3f0   :  { %v4636_v61 = vmul.f32 1.442695, %v4590_v2  ;;  %v4609_v59 = vmin.f32 %v4327_v35, 0.0  ;;  %v4366_v32 = vadd.f32 %v4365_v26, %v7436_v4  ;;  %v4367_v56 = vpop.f32.mrb[29].mxu1  ;;  %vm4571_vm15 = vcmp.gt.f32.partialorder %v4327_v35, 0.0 }
 0x3f1   :  { %v4638_v11 = vmul.f32 1.442695, %v4591_v47  ;;  %v4610_v41 = vmin.f32 %v4329_v45, 0.0  ;;  %v4368_v7 = vadd.f32 %v4367_v56, %v7436_v4  ;;  %v4369_v33 = vpop.f32.mrb[30].mxu1  ;;  %vm4572_vm10 = vcmp.gt.f32.partialorder %v4329_v45, 0.0 }
 0x3f2   :  { %5439 = vpow2.f32 %v4636_v61  ;;  %v4674_v14 = vmul.f32 1.442695, %v4609_v59  ;;  %v4592_v44 = vmin.f32 %v4366_v32, 0.0  ;;  %v4371_v55 = vpop.f32.mrb[31].mxu1  ;;  %v4370_v9 = vadd.f32 %v4369_v33, %v7428_v43 }
 0x3f3   :  { %5441 = vpow2.f32 %v4638_v11  ;;  %v4676_v3 = vmul.f32 1.442695, %v4610_v41  ;;  %v4593_v24 = vmin.f32 %v4368_v7, 0.0  ;;  %v4372_v19 = vadd.f32 %v4371_v55, %v7428_v43 }
 0x3f4   :  { %5443 = vpow2.f32 %v4674_v14  ;;  %v4640_v28 = vmul.f32 1.442695, %v4592_v44  ;;  %v4611_v58 = vmin.f32 %v4370_v9, 0.0  ;;  %vm4554_vm9 = vcmp.gt.f32.partialorder %v4366_v32, 0.0 }
 0x3f5   :  { %5445 = vpow2.f32 %v4676_v3  ;;  %v4642_v42 = vmul.f32 1.442695, %v4593_v24  ;;  %v4612_v29 = vmin.f32 %v4372_v19, 0.0  ;;  %vm4555_vm11 = vcmp.gt.f32.partialorder %v4368_v7, 0.0 }
 0x3f6   :  { %5447 = vpow2.f32 %v4640_v28  ;;  %v4678_v20 = vmul.f32 1.442695, %v4611_v58  ;;  %vm4573_vm12 = vcmp.gt.f32.partialorder %v4370_v9, 0.0  ;;  %vm4574_vm13 = vcmp.gt.f32.partialorder %v4372_v19, 0.0 }
 0x3f7   :  { %5449 = vpow2.f32 %v4642_v42  ;;  %v4680_v34 = vmul.f32 1.442695, %v4612_v29 }
 0x3f8   :  { %5451 = vpow2.f32 %v4678_v20 }
 0x3f9   :  { %5453 = vpow2.f32 %v4680_v34 }
 0x3fc   :  { %v5440_v1 = vpop.eup %5439 }
 0x3fd   :  { %v5442_v48 = vpop.eup %5441  ;;  %v5161_v52 = vadd.f32 -1.0, %v5440_v1 }
 0x3fe   :  { %v5444_v37 = vpop.eup %5443  ;;  %v5162_v38 = vadd.f32 -1.0, %v5442_v48 }
 0x3ff   :  { %v5446_v46 = vpop.eup %5445  ;;  %v4742_v12 = vsel %vm4552_vm7, %v4323_v50, %v5161_v52  ;;  %v5180_v31 = vadd.f32 -1.0, %v5444_v37 }
 0x400   :  { %v5448_v54 = vpop.eup %5447  ;;  %v4743_v36 = vsel %vm4553_vm8, %v4325_v51, %v5162_v38  ;;  %v5181_v8 = vadd.f32 -1.0, %v5446_v46 }
 0x401   :  { %v5450_v13 = vpop.eup %5449  ;;  %v5215_v6 = vpack.c.bf16 %v4743_v36, %v4742_v12  ;;  %v4761_v25 = vsel %vm4571_vm15, %v4327_v35, %v5180_v31  ;;  %v5163_v63 = vadd.f32 -1.0, %v5448_v54 }
 0x402   :  { %v4762_v22 = vsel %vm4572_vm10, %v4329_v45, %v5181_v8  ;;  %v5164_v39 = vadd.f32 -1.0, %v5450_v13  ;;  %v5452_v17 = vpop.eup %5451 }
 0x403   :  { %4892 = vst [vmem:[%s7542_s6 + $0x20] sm:$0xff] %v5215_v6  ;;  %v5225_v23 = vpack.c.bf16 %v4762_v22, %v4761_v25  ;;  %v4744_v62 = vsel %vm4554_vm9, %v4366_v32, %v5163_v63  ;;  %v5454_v15 = vpop.eup %5453  ;;  %v5182_v5 = vadd.f32 -1.0, %v5452_v17 }
 0x404   :  { %v4745_v60 = vsel %vm4555_vm11, %v4368_v7, %v5164_v39  ;;  %v5183_v30 = vadd.f32 -1.0, %v5454_v15  ;;  %vm4897_vm11 = vcmask 781312  }
 0x405   :  { %4903 = vst [vmem:[%s7542_s6 + $0x6c] sm:$0xff] %v5225_v23  ;;  %v5216_v16 = vpack.c.bf16 %v4745_v60, %v4744_v62  ;;  %v4763_v53 = vsel %vm4573_vm12, %v4370_v9, %v5182_v5 }
 0x406   :  { %v4764_v0 = vsel %vm4574_vm13, %v4372_v19, %v5183_v30 }
 0x407   :  { %4893 = vst [vmem:[%s7542_s6 + $0x28] sm:$0xff] %v5216_v16  ;;  %v5226_v21 = vpack.c.bf16 %v4764_v0, %v4763_v53 }
 0x409   :  { %4904 = vst [vmem:[%s7542_s6 + $0x74] sm:$0xff] %v5226_v21 }
 0x42b   :  { %v4408_v18 = vpop.f32.mrb[32].mxu0 }
 0x42c   :  { %v4409_v40 = vadd.f32 %v4408_v18, %v7436_v4  ;;  %v4410_v27 = vpop.f32.mrb[33].mxu0 }
 0x42d   :  { %v4411_v50 = vadd.f32 %v4410_v27, %v7436_v4  ;;  %v4412_v10 = vpop.f32.mrb[34].mxu0 }
 0x42e   :  { %v4594_v51 = vmin.f32 %v4409_v40, 0.0  ;;  %v4413_v49 = vadd.f32 %v4412_v10, %v7428_v43  ;;  %v4414_v2 = vpop.f32.mrb[35].mxu0  ;;  %vm4556_vm14 = vcmp.gt.f32.partialorder %v4409_v40, 0.0 }
 0x42f   :  { %v4595_v35 = vmin.f32 %v4411_v50, 0.0  ;;  %v4415_v57 = vadd.f32 %v4414_v2, %v7428_v43  ;;  %v4451_v47 = vpop.f32.mrb[32].mxu1  ;;  %vm4557_vm1 = vcmp.gt.f32.partialorder %v4411_v50, 0.0 }
 0x430   :  { %v4644_v45 = vmul.f32 1.442695, %v4594_v51  ;;  %v4613_v26 = vmin.f32 %v4413_v49, 0.0  ;;  %v4452_v61 = vadd.f32 %v4451_v47, %v7436_v4  ;;  %v4453_v59 = vpop.f32.mrb[33].mxu1  ;;  %vm4575_vm0 = vcmp.gt.f32.partialorder %v4413_v49, 0.0 }
 0x431   :  { %v4646_v32 = vmul.f32 1.442695, %v4595_v35  ;;  %v4614_v56 = vmin.f32 %v4415_v57, 0.0  ;;  %v4454_v11 = vadd.f32 %v4453_v59, %v7436_v4  ;;  %v4455_v41 = vpop.f32.mrb[34].mxu1  ;;  %vm4576_vm2 = vcmp.gt.f32.partialorder %v4415_v57, 0.0 }
 0x432   :  { %5455 = vpow2.f32 %v4644_v45  ;;  %v4682_v7 = vmul.f32 1.442695, %v4613_v26  ;;  %v4596_v33 = vmin.f32 %v4452_v61, 0.0  ;;  %v4457_v14 = vpop.f32.mrb[35].mxu1  ;;  %v4456_v24 = vadd.f32 %v4455_v41, %v7428_v43 }
 0x433   :  { %5457 = vpow2.f32 %v4646_v32  ;;  %v4684_v44 = vmul.f32 1.442695, %v4614_v56  ;;  %v4597_v55 = vmin.f32 %v4454_v11, 0.0  ;;  %v4458_v28 = vadd.f32 %v4457_v14, %v7428_v43 }
 0x434   :  { %5459 = vpow2.f32 %v4682_v7  ;;  %v4648_v3 = vmul.f32 1.442695, %v4596_v33  ;;  %v4615_v19 = vmin.f32 %v4456_v24, 0.0  ;;  %vm4558_vm3 = vcmp.gt.f32.partialorder %v4452_v61, 0.0 }
 0x435   :  { %5461 = vpow2.f32 %v4684_v44  ;;  %v4650_v9 = vmul.f32 1.442695, %v4597_v55  ;;  %v4616_v42 = vmin.f32 %v4458_v28, 0.0  ;;  %vm4559_vm4 = vcmp.gt.f32.partialorder %v4454_v11, 0.0 }
 0x436   :  { %5463 = vpow2.f32 %v4648_v3  ;;  %v4686_v58 = vmul.f32 1.442695, %v4615_v19  ;;  %vm4577_vm5 = vcmp.gt.f32.partialorder %v4456_v24, 0.0  ;;  %vm4578_vm6 = vcmp.gt.f32.partialorder %v4458_v28, 0.0 }
 0x437   :  { %5465 = vpow2.f32 %v4650_v9  ;;  %v4688_v29 = vmul.f32 1.442695, %v4616_v42 }
 0x438   :  { %5467 = vpow2.f32 %v4686_v58 }
 0x439   :  { %5469 = vpow2.f32 %v4688_v29 }
 0x43c   :  { %v5456_v20 = vpop.eup %5455 }
 0x43d   :  { %v5458_v34 = vpop.eup %5457  ;;  %v5165_v1 = vadd.f32 -1.0, %v5456_v20 }
 0x43e   :  { %v5460_v48 = vpop.eup %5459  ;;  %v5166_v52 = vadd.f32 -1.0, %v5458_v34 }
 0x43f   :  { %v5462_v37 = vpop.eup %5461  ;;  %v4746_v38 = vsel %vm4556_vm14, %v4409_v40, %v5165_v1  ;;  %v5184_v46 = vadd.f32 -1.0, %v5460_v48 }
 0x440   :  { %v5464_v12 = vpop.eup %5463  ;;  %v4747_v31 = vsel %vm4557_vm1, %v4411_v50, %v5166_v52  ;;  %v5185_v54 = vadd.f32 -1.0, %v5462_v37 }
 0x441   :  { %v5466_v36 = vpop.eup %5465  ;;  %v5217_v8 = vpack.c.bf16 %v4747_v31, %v4746_v38  ;;  %v4765_v13 = vsel %vm4575_vm0, %v4413_v49, %v5184_v46  ;;  %v5167_v6 = vadd.f32 -1.0, %v5464_v12 }
 0x442   :  { %v4766_v25 = vsel %vm4576_vm2, %v4415_v57, %v5185_v54  ;;  %v5168_v63 = vadd.f32 -1.0, %v5466_v36  ;;  %v5468_v23 = vpop.eup %5467 }
 0x443   :  { %4894 = vst [vmem:[%s7542_s6 + $0x30] sm:$0xff] %v5217_v8  ;;  %v5227_v22 = vpack.c.bf16 %v4766_v25, %v4765_v13  ;;  %v4748_v39 = vsel %vm4558_vm3, %v4452_v61, %v5167_v6  ;;  %v5470_v17 = vpop.eup %5469  ;;  %v5186_v15 = vadd.f32 -1.0, %v5468_v23 }
 0x444   :  { %v4749_v62 = vsel %vm4559_vm4, %v4454_v11, %v5168_v63  ;;  %v5187_v16 = vadd.f32 -1.0, %v5470_v17 }
 0x445   :  { %4905 = vst [vmem:[%s7542_s6 + $0x7c] sm:$0xff] %v5227_v22  ;;  %v5218_v60 = vpack.c.bf16 %v4749_v62, %v4748_v39  ;;  %v4767_v5 = vsel %vm4577_vm5, %v4456_v24, %v5186_v15 }
 0x446   :  { %v4768_v30 = vsel %vm4578_vm6, %v4458_v28, %v5187_v16 }
 0x447   :  { %4895 = vst [vmem:[%s7542_s6 + $0x38] sm:$0xff] %v5218_v60  ;;  %v5228_v53 = vpack.c.bf16 %v4768_v30, %v4767_v5 }
 0x449   :  { %4906 = vst [vmem:[%s7542_s6 + $0x84] sm:$0xff] %v5228_v53 }
 0x45b   :  { %v4494_v0 = vpop.f32.mrb[36].mxu0 }
 0x45c   :  { %v4495_v21 = vadd.f32 %v4494_v0, %v7436_v4  ;;  %v4496_v18 = vpop.f32.mrb[37].mxu0 }
 0x45d   :  { %v4497_v40 = vadd.f32 %v4496_v18, %v7436_v4  ;;  %v4498_v27 = vpop.f32.mrb[38].mxu0 }
 0x45e   :  { %v4598_v50 = vmin.f32 %v4495_v21, 0.0  ;;  %v4499_v10 = vadd.f32 %v4498_v27, %v7428_v43  ;;  %v4500_v51 = vpop.f32.mrb[39].mxu0  ;;  %vm4560_vm7 = vcmp.gt.f32.partialorder %v4495_v21, 0.0 }
 0x45f   :  { %v4599_v49 = vmin.f32 %v4497_v40, 0.0  ;;  %v4501_v2 = vadd.f32 %v4500_v51, %v7428_v43  ;;  %vm4561_vm8 = vcmp.gt.f32.partialorder %v4497_v40, 0.0 }
 0x460   :  { %v4652_v35 = vmul.f32 1.442695, %v4598_v50  ;;  %v4617_v57 = vmin.f32 %v4499_v10, 0.0  ;;  %vm4579_vm15 = vcmp.gt.f32.partialorder %v4499_v10, 0.0 }
 0x461   :  { %v4654_v47 = vmul.f32 1.442695, %v4599_v49  ;;  %v4618_v45 = vmin.f32 %v4501_v2, 0.0  ;;  %vm4580_vm10 = vcmp.gt.f32.partialorder %v4501_v2, 0.0 }
 0x462   :  { %v4537_v26 = vpop.f32.mrb[36].mxu1  ;;  %5471 = vpow2.f32 %v4652_v35  ;;  %v4690_v61 = vmul.f32 1.442695, %v4617_v57 }
 0x463   :  { %v4538_v59 = vadd.f32 %v4537_v26, %v7436_v4  ;;  %v4539_v32 = vpop.f32.mrb[37].mxu1  ;;  %5473 = vpow2.f32 %v4654_v47  ;;  %v4692_v56 = vmul.f32 1.442695, %v4618_v45 }
 0x464   :  { %v4540_v11 = vpop.f32.mrb[38].mxu1  ;;  %5475 = vpow2.f32 %v4690_v61 }
 0x465   :  { %v4600_v41 = vmin.f32 %v4538_v59, 0.0  ;;  %v4541_v7 = vadd.f32 %v4540_v11, %v7428_v43  ;;  %v4542_v33 = vpop.f32.mrb[39].mxu1  ;;  %5477 = vpow2.f32 %v4692_v56  ;;  %vm4562_vm9 = vcmp.gt.f32.partialorder %v4538_v59, 0.0 }
 0x467   :  { %v4656_v14 = vmul.f32 1.442695, %v4600_v41  ;;  %v4619_v44 = vmin.f32 %v4541_v7, 0.0  ;;  %vm4581_vm12 = vcmp.gt.f32.partialorder %v4541_v7, 0.0 }
 0x469   :  { %5479 = vpow2.f32 %v4656_v14  ;;  %v4694_v55 = vmul.f32 1.442695, %v4619_v44 }
 0x46b   :  { %5481 = vpow2.f32 %v4694_v55 }
 0x46c   :  { %v5472_v3 = vpop.eup %5471 }
 0x46d   :  { %v5474_v24 = vpop.eup %5473  ;;  %v5169_v28 = vadd.f32 -1.0, %v5472_v3 }
 0x46e   :  { %v5476_v9 = vpop.eup %5475  ;;  %v5170_v4 = vadd.f32 -1.0, %v5474_v24 }
 0x46f   :  { %v5478_v19 = vpop.eup %5477  ;;  %v4750_v42 = vsel %vm4560_vm7, %v4495_v21, %v5169_v28  ;;  %v5188_v58 = vadd.f32 -1.0, %v5476_v9 }
 0x470   :  { %v4751_v29 = vsel %vm4561_vm8, %v4497_v40, %v5170_v4  ;;  %v5189_v43 = vadd.f32 -1.0, %v5478_v19 }
 0x471   :  { %v5219_v20 = vpack.c.bf16 %v4751_v29, %v4750_v42  ;;  %v4769_v34 = vsel %vm4579_vm15, %v4499_v10, %v5188_v58 }
 0x472   :  { %v4770_v1 = vsel %vm4580_vm10, %v4501_v2, %v5189_v43 }
 0x473   :  { %v5480_v48 = vpop.eup %5479  ;;  %4896 = vst [vmem:[%s7542_s6 + $0x40] sm:$0xff] %v5219_v20  ;;  %v5229_v52 = vpack.c.bf16 %v4770_v1, %v4769_v34 }
 0x474   :  { %v5171_v37 = vadd.f32 -1.0, %v5480_v48 }
 0x475   :  { %v5482_v38 = vpop.eup %5481  ;;  %4907 = vst [vmem:[%s7542_s6 + $0x8c] sm:$0xff] %v5229_v52 }
 0x476   :  { %v4752_v46 = vsel %vm4562_vm9, %v4538_v59, %v5171_v37  ;;  %v5190_v12 = vadd.f32 -1.0, %v5482_v38 }
 0x477   :  { %v5220_v31 = vpack.c.bf16 %v4752_v46, %v4752_v46 }
 0x478   :  { %v4771_v54 = vsel %vm4581_vm12, %v4541_v7, %v5190_v12 }
 0x479   :  { %4898 = vst.msk [vmem:[%s7542_s6 + $0x48] sm:$0xf] %vm4897_vm11, %v5220_v31  ;;  %v5230_v36 = vpack.c.bf16 %v4771_v54, %v4771_v54 }
 0x47b   :  { %4908 = vst.msk [vmem:[%s7542_s6 + $0x94] sm:$0xf] %vm4897_vm11, %v5230_v36 }

// kernel: net_final_forward.5
= control target key start
LH: loop header
LB: loop body
LE: loop exit
PB: predicated region body
PF: predicated region fallthrough
CT: control target
= control target key end

     0   :  { %s1506_s16 = smov 26   ;;  %s1507_s8 = smov 24   ;;  %vm776_vm0 = vcmask 130048   ;;  %v1514_v15 = vmov 0   ;;  %vm100_vm1 = vcmask 785408   ;;  %vm79_vm2 = vcmask 211968   ;;  %s2089_s0 = inlined_call_operand.vmem [shape: bf16[16,1120], index: 0, kind: input, shape index: {}]   ;;  %s2090_s1 = inlined_call_operand.vmem [shape: bf16[32,144], index: 1, kind: input, shape index: {}]   ;;  %s2091_s2 = inlined_call_operand.vmem [shape: f32[32,1], index: 2, kind: input, shape index: {}]   ;;  %s2092_s3 = inlined_call_operand.vmem [shape: bf16[32,864], index: 3, kind: output, shape index: {}]  }
   0x1   :  { %v1418_v0 = vld [vmem:[%s2089_s0 + $0x4] ss:$36 sps:$4 sm:$0xff]   ;;  %v1423_v3 = vld [vmem:[%s2089_s0 + $0xc] ss:$36 sps:$4 sm:$0xff]   ;;  %v1577_v9 = vld [vmem:[%s2089_s0 + $0x14] ss:$36 sps:$4 sm:$0xff]   ;;  %1417 = vset.pattern.permute.xlu1 %v1514_v15  ;;  %1416 = vset.pattern.permute.xlu0 %v1514_v15 }
   0x2   :  { %v1420_v1 = vld [vmem:[%s2089_s0] ss:$36 sps:$4 sm:$0xff]   ;;  %65 = vrot.lane.b32.xlu0 %v1418_v0, %s1506_s16  ;;  %v1421_v2 = vld [vmem:[%s2089_s0 + $0x8] ss:$36 sps:$4 sm:$0xff]   ;;  %v1424_v4 = vld [vmem:[%s2089_s0 + $0x10] ss:$36 sps:$4 sm:$0xff]  }
   0x3   :  { %63 = vrot.lane.b32.xlu1 %v1420_v1, %s1506_s16  ;;  %v1555_v5 = vld [vmem:[%s2089_s0 + $0x8] ss:$36 sps:$4 sm:$0xff]   ;;  %v1571_v8 = vld [vmem:[%s2089_s0 + $0x10] ss:$36 sps:$4 sm:$0xff]   ;;  %v1582_v10 = vld [vmem:[%s2089_s0 + $0x18] ss:$36 sps:$4 sm:$0xff]  }
   0x4   :  { %v1560_v6 = vld [vmem:[%s2089_s0 + $0xc] ss:$36 sps:$4 sm:$0xff]   ;;  %v1565_v7 = vld [vmem:[%s2089_s0 + $0x4] ss:$36 sps:$4 sm:$0xff]   ;;  %s1508_s9 = smov 22   ;;  %s1509_s10 = smov 2  }
   0x5   :  { %s1510_s11 = smov 126   ;;  %s1511_s12 = smov 106   ;;  %v1627_v11 = vld [vmem:[%s2090_s1 + $0x4] ss:$8 sps:$4 sm:$0xff]   ;;  %v1434_v12 = vld [vmem:[%s2089_s0 + $0x14] ss:$36 sps:$4 sm:$0xff]  }
   0x6   :  { %67 = vrot.lane.b32.xlu0 %v1421_v2, %s1506_s16  ;;  %s1512_s13 = smov 104   ;;  %1339 = vmatprep.mubr.msk.bf16.mxu0 %vm776_vm0, %v1627_v11  ;;  %s1513_s17 = smov 102   ;;  %v1435_v13 = vld [vmem:[%s2089_s0 + $0x18] ss:$36 sps:$4 sm:$0xff]   ;;  %vm158_vm3 = vcmask 195584   ;;  %v19_v35 = vld [vmem:[%s2091_s2] sm:$0xff] }
   0x7   :  { %69 = vrot.lane.b32.xlu1 %v1423_v3, %s1506_s16  ;;  %1341 = vmatprep.mubr.msk.bf16.mxu1 %vm776_vm0, %v1627_v11  ;;  %v1437_v14 = vld [vmem:[%s2089_s0 + $0x1c] ss:$36 sps:$4 sm:$0xff]   ;;  %v20_v36 = vld [vmem:[%s2091_s2 + $0x8] sm:$0xff]  ;;  %v21_v42 = vld [vmem:[%s2091_s2 + $0x10] sm:$0xff]  ;;  %vm236_vm4 = vcmask 179200   ;;  %vm314_vm5 = vcmask 15360  }
   0x8   :  { %v1449_v16 = vld [vmem:[%s2089_s0 + $0x1c] ss:$36 sps:$4 sm:$0xff]   ;;  %vm438_vm6 = vcmask 1031168   ;;  %vm510_vm7 = vcmask 867328   ;;  %vm582_vm8 = vcmask 850944   ;;  %vm654_vm9 = vcmask 834560  }
   0x9   :  { %386 = vst.msk [vmem:[#allocation2 + $0x110] sm:$0xff] %vm100_vm1, %v1449_v16  ;;  %v1439_v17 = vld [vmem:[%s2089_s0 + $0x1c] ss:$36 sps:$4 sm:$0xff]  }
   0xa   :  { %71 = vrot.lane.b32.xlu0 %v1424_v4, %s1506_s16  ;;  %v1440_v18 = vld [vmem:[%s2089_s0 + $0x1c] ss:$36 sps:$4 sm:$0xff]  }
   0xb   :  { %144 = vrot.lane.b32.xlu1 %v1418_v0, %s1507_s8  ;;  %v1441_v19 = vld [vmem:[%s2089_s0 + $0x1c] ss:$36 sps:$4 sm:$0xff]  }
   0xc   :  { %v1442_v20 = vld [vmem:[%s2089_s0 + $0x1c] ss:$36 sps:$4 sm:$0xff]  }
   0xd   :  { %v22_v40 = vld [vmem:[%s2091_s2 + $0x18] sm:$0xff] }
   0xe   :  { %146 = vrot.lane.b32.xlu0 %v1421_v2, %s1507_s8 }
   0xf   :  { %142 = vrot.lane.b32.xlu1 %v1420_v1, %s1507_s8 }
  0x12   :  { %148 = vrot.lane.b32.xlu0 %v1423_v3, %s1507_s8 }
  0x13   :  { %150 = vrot.lane.b32.xlu1 %v1424_v4, %s1507_s8 }
  0x16   :  { %222 = vrot.lane.b32.xlu0 %v1418_v0, %s1508_s9 }
  0x17   :  { %224 = vrot.lane.b32.xlu1 %v1421_v2, %s1508_s9 }
  0x1a   :  { %220 = vrot.lane.b32.xlu0 %v1420_v1, %s1508_s9 }
  0x1b   :  { %226 = vrot.lane.b32.xlu1 %v1423_v3, %s1508_s9 }
  0x1e   :  { %228 = vrot.lane.b32.xlu0 %v1424_v4, %s1508_s9 }
  0x1f   :  { %300 = vrot.lane.b32.xlu1 %v1418_v0, %s1509_s10 }
  0x22   :  { %302 = vrot.lane.b32.xlu0 %v1421_v2, %s1509_s10 }
  0x23   :  { %298 = vrot.lane.b32.xlu1 %v1420_v1, %s1509_s10 }
  0x26   :  { %304 = vrot.lane.b32.xlu0 %v1423_v3, %s1509_s10 }
  0x27   :  { %306 = vrot.lane.b32.xlu1 %v1424_v4, %s1509_s10 }
  0x2a   :  { %426 = vrot.lane.b32.xlu0 %v1555_v5, %s1510_s11 }
  0x2b   :  { %428 = vrot.lane.b32.xlu1 %v1560_v6, %s1510_s11 }
  0x2e   :  { %424 = vrot.lane.b32.xlu0 %v1565_v7, %s1510_s11 }
  0x2f   :  { %430 = vrot.lane.b32.xlu1 %v1571_v8, %s1510_s11 }
  0x32   :  { %432 = vrot.lane.b32.xlu0 %v1577_v9, %s1510_s11 }
  0x33   :  { %498 = vrot.lane.b32.xlu1 %v1555_v5, %s1511_s12 }
  0x36   :  { %500 = vrot.lane.b32.xlu0 %v1560_v6, %s1511_s12 }
  0x37   :  { %496 = vrot.lane.b32.xlu1 %v1565_v7, %s1511_s12 }
  0x3a   :  { %502 = vrot.lane.b32.xlu0 %v1571_v8, %s1511_s12 }
  0x3b   :  { %504 = vrot.lane.b32.xlu1 %v1577_v9, %s1511_s12 }
  0x3e   :  { %570 = vrot.lane.b32.xlu0 %v1555_v5, %s1512_s13 }
  0x3f   :  { %572 = vrot.lane.b32.xlu1 %v1560_v6, %s1512_s13 }
  0x42   :  { %568 = vrot.lane.b32.xlu0 %v1565_v7, %s1512_s13 }
  0x43   :  { %574 = vrot.lane.b32.xlu1 %v1571_v8, %s1512_s13 }
  0x46   :  { %576 = vrot.lane.b32.xlu0 %v1577_v9, %s1512_s13 }
  0x47   :  { %642 = vrot.lane.b32.xlu1 %v1555_v5, %s1513_s17 }
  0x4a   :  { %644 = vrot.lane.b32.xlu0 %v1560_v6, %s1513_s17 }
  0x4b   :  { %640 = vrot.lane.b32.xlu1 %v1565_v7, %s1513_s17 }
  0x4e   :  { %646 = vrot.lane.b32.xlu0 %v1571_v8, %s1513_s17 }
  0x4f   :  { %648 = vrot.lane.b32.xlu1 %v1577_v9, %s1513_s17 }
  0x52   :  { %73 = vrot.lane.b32.xlu0 %v1434_v12, %s1506_s16 }
  0x53   :  { %75 = vrot.lane.b32.xlu1 %v1435_v13, %s1506_s16 }
  0x56   :  { %77 = vrot.lane.b32.xlu0 %v1437_v14, %s1506_s16 }
  0x57   :  { %152 = vrot.lane.b32.xlu1 %v1434_v12, %s1507_s8 }
  0x5a   :  { %154 = vrot.lane.b32.xlu0 %v1435_v13, %s1507_s8 }
  0x5b   :  { %156 = vrot.lane.b32.xlu1 %v1437_v14, %s1507_s8 }
  0x5e   :  { %230 = vrot.lane.b32.xlu0 %v1434_v12, %s1508_s9 }
  0x5f   :  { %232 = vrot.lane.b32.xlu1 %v1435_v13, %s1508_s9 }
  0x62   :  { %234 = vrot.lane.b32.xlu0 %v1437_v14, %s1508_s9 }
  0x63   :  { %308 = vrot.lane.b32.xlu1 %v1434_v12, %s1509_s10 }
  0x66   :  { %310 = vrot.lane.b32.xlu0 %v1435_v13, %s1509_s10 }
  0x67   :  { %312 = vrot.lane.b32.xlu1 %v1437_v14, %s1509_s10 }
  0x6a   :  { %434 = vrot.lane.b32.xlu0 %v1582_v10, %s1510_s11 }
  0x6b   :  { %436 = vrot.lane.b32.xlu1 %v1439_v17, %s1510_s11 }
  0x6e   :  { %506 = vrot.lane.b32.xlu0 %v1582_v10, %s1511_s12 }
  0x6f   :  { %508 = vrot.lane.b32.xlu1 %v1440_v18, %s1511_s12 }
  0x72   :  { %578 = vrot.lane.b32.xlu0 %v1582_v10, %s1512_s13 }
  0x73   :  { %580 = vrot.lane.b32.xlu1 %v1441_v19, %s1512_s13 }
  0x74   :  { %v66_v21 = vpop.permute.xlu0 %65 }
  0x75   :  { %v64_v22 = vpop.permute.xlu1 %63 }
  0x76   :  { %v80_v23 = vsel %vm79_vm2, %v64_v22, %v66_v21  ;;  %650 = vrot.lane.b32.xlu0 %v1582_v10, %s1513_s17 }
  0x77   :  { %652 = vrot.lane.b32.xlu1 %v1442_v20, %s1513_s17 }
  0x78   :  { %v68_v24 = vpop.permute.xlu0 %67 }
  0x79   :  { %v81_v25 = vsel %vm79_vm2, %v66_v21, %v68_v24  ;;  %v70_v26 = vpop.permute.xlu1 %69 }
  0x7a   :  { %v82_v27 = vsel %vm79_vm2, %v68_v24, %v70_v26  ;;  %783 = vmatprep.subr.bf16.mxu0 %v81_v25  ;;  %740 = vperm.xlu0 %1416, %v19_v35   ;;  %v1775_v35 = vld [vmem:[%s2090_s1 + $0x14] ss:$8 sps:$4 sm:$0xff]  }
  0x7b   :  { %784 = vmatpush1.bf16.msra.mxu0 %v80_v23  ;;  %745 = vperm.xlu1 %1417, %v20_v36  }
  0x7c   :  { %v1703_v28 = vpop.permute.xlu0 %71 }
  0x7d   :  { %v83_v29 = vsel %vm79_vm2, %v70_v26, %v1703_v28  ;;  %v145_v30 = vpop.permute.xlu1 %144 }
  0x7e   :  { %836 = vmatprep.subr.bf16.mxu1 %v83_v29  ;;  %755 = vperm.xlu0 %1416, %v22_v40  }
  0x7f   :  { %837 = vmatpush1.bf16.msra.mxu1 %v82_v27  ;;  %750 = vperm.xlu1 %1417, %v21_v42  }
  0x80   :  { %v147_v31 = vpop.permute.xlu0 %146 }
  0x81   :  { %v160_v32 = vsel %vm158_vm3, %v145_v30, %v147_v31  ;;  %v143_v33 = vpop.permute.xlu1 %142 }
  0x82   :  { %v159_v34 = vsel %vm158_vm3, %v143_v33, %v145_v30  ;;  %785 = vmatprep.subr.bf16.mxu0 %v160_v32 }
  0x83   :  { %786 = vmatpush1.bf16.msra.mxu0 %v159_v34  ;;  %v1770_v34 = vld [vmem:[%s2090_s1] ss:$8 sps:$4 sm:$0xff]  }
  0x84   :  { %v149_v37 = vpop.permute.xlu0 %148 }
  0x85   :  { %v161_v38 = vsel %vm158_vm3, %v147_v31, %v149_v37  ;;  %v1716_v39 = vpop.permute.xlu1 %150 }
  0x86   :  { %v162_v41 = vsel %vm158_vm3, %v149_v37, %v1716_v39 }
  0x87   :  { %838 = vmatprep.subr.bf16.mxu1 %v162_v41 }
  0x88   :  { %v223_v43 = vpop.permute.xlu0 %222  ;;  %839 = vmatpush1.bf16.msra.mxu1 %v161_v38 }
  0x89   :  { %v225_v44 = vpop.permute.xlu1 %224 }
  0x8a   :  { %v238_v45 = vsel %vm236_vm4, %v223_v43, %v225_v44 }
  0x8b   :  { %787 = vmatprep.subr.bf16.mxu0 %v238_v45  ;;  %v1792_v45 = vld [vmem:[%s2090_s1 + $0x10] ss:$8 sps:$4 sm:$0xff]  }
  0x8c   :  { %v221_v46 = vpop.permute.xlu0 %220 }
  0x8d   :  { %v237_v47 = vsel %vm236_vm4, %v221_v46, %v223_v43  ;;  %v227_v48 = vpop.permute.xlu1 %226 }
  0x8e   :  { %v239_v49 = vsel %vm236_vm4, %v225_v44, %v227_v48  ;;  %788 = vmatpush1.bf16.msra.mxu0 %v237_v47 }
  0x90   :  { %v1729_v50 = vpop.permute.xlu0 %228 }
  0x91   :  { %v240_v51 = vsel %vm236_vm4, %v227_v48, %v1729_v50  ;;  %v301_v52 = vpop.permute.xlu1 %300 }
  0x92   :  { %840 = vmatprep.subr.bf16.mxu1 %v240_v51 }
  0x93   :  { %841 = vmatpush1.bf16.msra.mxu1 %v239_v49 }
  0x94   :  { %v303_v53 = vpop.permute.xlu0 %302 }
  0x95   :  { %v316_v54 = vsel %vm314_vm5, %v301_v52, %v303_v53  ;;  %v299_v55 = vpop.permute.xlu1 %298 }
  0x96   :  { %v315_v56 = vsel %vm314_vm5, %v299_v55, %v301_v52  ;;  %789 = vmatprep.subr.bf16.mxu0 %v316_v54 }
  0x97   :  { %790 = vmatpush1.bf16.msra.mxu0 %v315_v56 }
  0x98   :  { %v305_v57 = vpop.permute.xlu0 %304  ;;  %791 = vmatprep.subr.bf16.mxu0 %v1555_v5 }
  0x99   :  { %v317_v58 = vsel %vm314_vm5, %v303_v53, %v305_v57  ;;  %v1737_v59 = vpop.permute.xlu1 %306 }
  0x9a   :  { %v318_v60 = vsel %vm314_vm5, %v305_v57, %v1737_v59 }
  0x9b   :  { %842 = vmatprep.subr.bf16.mxu1 %v318_v60  ;;  %792 = vmatpush1.bf16.msra.mxu0 %v1565_v7 }
  0x9c   :  { %v427_v61 = vpop.permute.xlu0 %426  ;;  %843 = vmatpush1.bf16.msra.mxu1 %v317_v58 }
  0x9d   :  { %v429_v62 = vpop.permute.xlu1 %428  ;;  %844 = vmatprep.subr.bf16.mxu1 %v1571_v8 }
  0x9e   :  { %v440_v63 = vsel %vm438_vm6, %v427_v61, %v429_v62 }
  0x9f   :  { %793 = vmatprep.subr.bf16.mxu0 %v440_v63 }
  0xa0   :  { %v425_v0 = vpop.permute.xlu0 %424  ;;  %845 = vmatpush1.bf16.msra.mxu1 %v1560_v6 }
  0xa1   :  { %v439_v1 = vsel %vm438_vm6, %v425_v0, %v427_v61  ;;  %v431_v2 = vpop.permute.xlu1 %430 }
  0xa2   :  { %v441_v3 = vsel %vm438_vm6, %v429_v62, %v431_v2  ;;  %794 = vmatpush1.bf16.msra.mxu0 %v439_v1 }
  0xa4   :  { %v1747_v4 = vpop.permute.xlu0 %432 }
  0xa5   :  { %v442_v5 = vsel %vm438_vm6, %v431_v2, %v1747_v4  ;;  %v499_v7 = vpop.permute.xlu1 %498 }
  0xa6   :  { %846 = vmatprep.subr.bf16.mxu1 %v442_v5 }
  0xa7   :  { %847 = vmatpush1.bf16.msra.mxu1 %v441_v3 }
  0xa8   :  { %v501_v8 = vpop.permute.xlu0 %500 }
  0xa9   :  { %v512_v12 = vsel %vm510_vm7, %v499_v7, %v501_v8  ;;  %v497_v13 = vpop.permute.xlu1 %496 }
  0xaa   :  { %v511_v6 = vsel %vm510_vm7, %v497_v13, %v499_v7  ;;  %795 = vmatprep.subr.bf16.mxu0 %v512_v12 }
  0xab   :  { %796 = vmatpush1.bf16.msra.mxu0 %v511_v6 }
  0xac   :  { %v503_v14 = vpop.permute.xlu0 %502 }
  0xad   :  { %v513_v16 = vsel %vm510_vm7, %v501_v8, %v503_v14  ;;  %v1754_v17 = vpop.permute.xlu1 %504 }
  0xae   :  { %v514_v18 = vsel %vm510_vm7, %v503_v14, %v1754_v17  ;;  %v709_v14 = vld [vmem:[#allocation2 + $0x110] sm:$0xff] }
  0xaf   :  { %848 = vmatprep.subr.bf16.mxu1 %v514_v18 }
  0xb0   :  { %v571_v19 = vpop.permute.xlu0 %570  ;;  %849 = vmatpush1.bf16.msra.mxu1 %v513_v16 }
  0xb1   :  { %v573_v20 = vpop.permute.xlu1 %572 }
  0xb2   :  { %v584_v21 = vsel %vm582_vm8, %v571_v19, %v573_v20 }
  0xb3   :  { %797 = vmatprep.subr.bf16.mxu0 %v584_v21 }
  0xb4   :  { %v569_v22 = vpop.permute.xlu0 %568 }
  0xb5   :  { %v583_v23 = vsel %vm582_vm8, %v569_v22, %v571_v19  ;;  %v575_v24 = vpop.permute.xlu1 %574 }
  0xb6   :  { %v585_v25 = vsel %vm582_vm8, %v573_v20, %v575_v24  ;;  %798 = vmatpush1.bf16.msra.mxu0 %v583_v23 }
  0xb8   :  { %v1761_v26 = vpop.permute.xlu0 %576 }
  0xb9   :  { %v586_v27 = vsel %vm582_vm8, %v575_v24, %v1761_v26  ;;  %v643_v29 = vpop.permute.xlu1 %642 }
  0xba   :  { %850 = vmatprep.subr.bf16.mxu1 %v586_v27 }
  0xbb   :  { %851 = vmatpush1.bf16.msra.mxu1 %v585_v25 }
  0xbc   :  { %v645_v30 = vpop.permute.xlu0 %644 }
  0xbd   :  { %v656_v31 = vsel %vm654_vm9, %v643_v29, %v645_v30  ;;  %v641_v32 = vpop.permute.xlu1 %640 }
  0xbe   :  { %v655_v33 = vsel %vm654_vm9, %v641_v32, %v643_v29  ;;  %799 = vmatprep.subr.bf16.mxu0 %v656_v31 }
  0xbf   :  { %800 = vmatpush1.bf16.msra.mxu0 %v655_v33 }
  0xc0   :  { %v647_v36 = vpop.permute.xlu0 %646 }
  0xc1   :  { %v657_v37 = vsel %vm654_vm9, %v645_v30, %v647_v36  ;;  %v1778_v38 = vpop.permute.xlu1 %648 }
  0xc2   :  { %v658_v40 = vsel %vm654_vm9, %v647_v36, %v1778_v38  ;;  %816 = vmatmul.mubr.bf16.vlgmr.msra.gmra.mrb[0].mxu0 %v1770_v34 }
  0xc3   :  { %852 = vmatprep.subr.bf16.mxu1 %v658_v40  ;;  %1340 = vmatprep.mubr.msk.bf16.mxu0 %vm776_vm0, %v1775_v35 }
  0xc4   :  { %v74_v41 = vpop.permute.xlu0 %73  ;;  %853 = vmatpush1.bf16.msra.mxu1 %v657_v37 }
  0xc5   :  { %v84_v42 = vsel %vm79_vm2, %v1703_v28, %v74_v41  ;;  %v76_v43 = vpop.permute.xlu1 %75  ;;  %942 = vmatprep.subr.bf16.mxu1 %v1514_v15 }
  0xc6   :  { %v85_v44 = vsel %vm79_vm2, %v74_v41, %v76_v43 }
  0xc7   :  { %869 = vmatmul.mubr.bf16.vlgmr.msra.gmra.mrb[0].mxu1 %v1770_v34  ;;  %889 = vmatprep.subr.bf16.mxu0 %v85_v44 }
  0xc8   :  { %v78_v46 = vpop.permute.xlu0 %77  ;;  %890 = vmatpush1.bf16.msra.mxu0 %v84_v42  ;;  %1342 = vmatprep.mubr.msk.bf16.mxu1 %vm776_vm0, %v1775_v35 }
  0xc9   :  { %v86_v28 = vsel %vm79_vm2, %v76_v43, %v78_v46  ;;  %v153_v47 = vpop.permute.xlu1 %152 }
  0xca   :  { %101 = vst.msk [vmem:[#allocation2 + $0x30] sm:$0xff] %vm100_vm1, %v86_v28  ;;  %v163_v48 = vsel %vm158_vm3, %v1716_v39, %v153_v47  ;;  %826 = vmatmul.mubr.bf16.gmra.mrb[4].mxu0 %v1792_v45 }
  0xcb   :  { %1343 = vmatprep.mubr.msk.bf16.mxu0 %vm776_vm0, %v1627_v11 }
  0xcc   :  { %v155_v49 = vpop.permute.xlu0 %154 }
  0xcd   :  { %v164_v51 = vsel %vm158_vm3, %v153_v47, %v155_v49  ;;  %v157_v52 = vpop.permute.xlu1 %156 }
  0xce   :  { %v165_v53 = vsel %vm158_vm3, %v155_v49, %v157_v52  ;;  %891 = vmatprep.subr.bf16.mxu0 %v164_v51 }
  0xcf   :  { %179 = vst.msk [vmem:[#allocation2 + $0x68] sm:$0xff] %vm100_vm1, %v165_v53  ;;  %892 = vmatpush1.bf16.msra.mxu0 %v163_v48  ;;  %879 = vmatmul.mubr.bf16.gmra.mrb[4].mxu1 %v1792_v45 }
  0xd0   :  { %v231_v54 = vpop.permute.xlu0 %230  ;;  %1345 = vmatprep.mubr.msk.bf16.mxu1 %vm776_vm0, %v1627_v11 }
  0xd1   :  { %v241_v39 = vsel %vm236_vm4, %v1729_v50, %v231_v54  ;;  %v233_v55 = vpop.permute.xlu1 %232  ;;  %v681_v56 = vld [vmem:[#allocation2 + $0x30] sm:$0xff] }
  0xd2   :  { %v242_v57 = vsel %vm236_vm4, %v231_v54, %v233_v55  ;;  %943 = vmatpush1.bf16.msra.mxu1 %v681_v56 }
  0xd3   :  { %944 = vmatprep.subr.bf16.mxu1 %v1514_v15  ;;  %893 = vmatprep.subr.bf16.mxu0 %v242_v57 }
  0xd4   :  { %v235_v58 = vpop.permute.xlu0 %234  ;;  %894 = vmatpush1.bf16.msra.mxu0 %v241_v39 }
  0xd5   :  { %v243_v60 = vsel %vm236_vm4, %v233_v55, %v235_v58  ;;  %v309_v61 = vpop.permute.xlu1 %308 }
  0xd6   :  { %257 = vst.msk [vmem:[#allocation2 + $0xa0] sm:$0xff] %vm100_vm1, %v243_v60  ;;  %v319_v11 = vsel %vm314_vm5, %v1737_v59, %v309_v61  ;;  %v688_v62 = vld [vmem:[#allocation2 + $0x68] sm:$0xff] }
  0xd7   :  { %945 = vmatpush1.bf16.msra.mxu1 %v688_v62 }
  0xd8   :  { %v311_v50 = vpop.permute.xlu0 %310  ;;  %946 = vmatprep.subr.bf16.mxu1 %v1514_v15 }
  0xd9   :  { %v320_v63 = vsel %vm314_vm5, %v309_v61, %v311_v50  ;;  %v313_v0 = vpop.permute.xlu1 %312 }
  0xda   :  { %v321_v1 = vsel %vm314_vm5, %v311_v50, %v313_v0  ;;  %895 = vmatprep.subr.bf16.mxu0 %v320_v63 }
  0xdb   :  { %335 = vst.msk [vmem:[#allocation2 + $0xd8] sm:$0xff] %vm100_vm1, %v321_v1  ;;  %896 = vmatpush1.bf16.msra.mxu0 %v319_v11 }
  0xdc   :  { %v435_v2 = vpop.permute.xlu0 %434  ;;  %897 = vmatprep.subr.bf16.mxu0 %v1582_v10 }
  0xdd   :  { %v443_v59 = vsel %vm438_vm6, %v1747_v4, %v435_v2  ;;  %v695_v3 = vld [vmem:[#allocation2 + $0xa0] sm:$0xff]  ;;  %v437_v5 = vpop.permute.xlu1 %436 }
  0xde   :  { %947 = vmatpush1.bf16.msra.mxu1 %v695_v3  ;;  %v444_v7 = vsel %vm438_vm6, %v435_v2, %v437_v5  ;;  %458 = vst.msk [vmem:[#allocation2 + $0x148] sm:$0xff] %vm100_vm1, %v437_v5 }
  0xdf   :  { %948 = vmatprep.subr.bf16.mxu1 %v1514_v15  ;;  %898 = vmatpush1.bf16.msra.mxu0 %v1577_v9 }
  0xe0   :  { %v507_v8 = vpop.permute.xlu0 %506  ;;  %899 = vmatprep.subr.bf16.mxu0 %v444_v7 }
  0xe1   :  { %v515_v12 = vsel %vm510_vm7, %v1754_v17, %v507_v8  ;;  %v509_v10 = vpop.permute.xlu1 %508 }
  0xe2   :  { %v702_v13 = vld [vmem:[#allocation2 + $0xd8] sm:$0xff]  ;;  %v516_v4 = vsel %vm510_vm7, %v507_v8, %v509_v10  ;;  %530 = vst.msk [vmem:[#allocation2 + $0x180] sm:$0xff] %vm100_vm1, %v509_v10 }
  0xe3   :  { %949 = vmatpush1.bf16.msra.mxu1 %v702_v13  ;;  %900 = vmatpush1.bf16.msra.mxu0 %v443_v59 }
  0xe4   :  { %v579_v6 = vpop.permute.xlu0 %578  ;;  %950 = vmatprep.subr.bf16.mxu1 %v1514_v15  ;;  %901 = vmatprep.subr.bf16.mxu0 %v516_v4 }
  0xe5   :  { %v587_v9 = vsel %vm582_vm8, %v1761_v26, %v579_v6  ;;  %v581_v16 = vpop.permute.xlu1 %580  ;;  %v716_v19 = vld [vmem:[#allocation2 + $0x148] sm:$0xff] }
  0xe6   :  { %v588_v18 = vsel %vm582_vm8, %v579_v6, %v581_v16  ;;  %602 = vst.msk [vmem:[#allocation2 + $0x1b8] sm:$0xff] %vm100_vm1, %v581_v16 }
  0xe7   :  { %951 = vmatpush1.bf16.msra.mxu1 %v709_v14  ;;  %902 = vmatpush1.bf16.msra.mxu0 %v515_v12 }
  0xe8   :  { %v651_v17 = vpop.permute.xlu0 %650  ;;  %952 = vmatprep.subr.bf16.mxu1 %v1514_v15  ;;  %903 = vmatprep.subr.bf16.mxu0 %v588_v18 }
  0xe9   :  { %v659_v20 = vsel %vm654_vm9, %v1778_v38, %v651_v17  ;;  %v653_v21 = vpop.permute.xlu1 %652  ;;  %v723_v23 = vld [vmem:[#allocation2 + $0x180] sm:$0xff] }
  0xea   :  { %v660_v22 = vsel %vm654_vm9, %v651_v17, %v653_v21  ;;  %674 = vst.msk [vmem:[#allocation2 + $0x1f0] sm:$0xff] %vm100_vm1, %v653_v21 }
  0xeb   :  { %953 = vmatpush1.bf16.msra.mxu1 %v716_v19  ;;  %904 = vmatpush1.bf16.msra.mxu0 %v587_v9 }
  0xec   :  { %954 = vmatprep.subr.bf16.mxu1 %v1514_v15  ;;  %905 = vmatprep.subr.bf16.mxu0 %v660_v22 }
  0xed   :  { %v730_v24 = vld [vmem:[#allocation2 + $0x1b8] sm:$0xff] }
  0xef   :  { %955 = vmatpush1.bf16.msra.mxu1 %v723_v23  ;;  %906 = vmatpush1.bf16.msra.mxu0 %v659_v20 }
  0xf0   :  { %956 = vmatprep.subr.bf16.mxu1 %v1514_v15 }
  0xf1   :  { %v737_v25 = vld [vmem:[#allocation2 + $0x1f0] sm:$0xff] }
  0xf2   :  { %922 = vmatmul.mubr.bf16.vlgmr.msra.gmra.mrb[8].mxu0 %v1770_v34 }
  0xf3   :  { %957 = vmatpush1.bf16.msra.mxu1 %v730_v24  ;;  %1344 = vmatprep.mubr.msk.bf16.mxu0 %vm776_vm0, %v1775_v35 }
  0xf4   :  { %958 = vmatprep.subr.bf16.mxu1 %v1514_v15 }
  0xf7   :  { %959 = vmatpush1.bf16.msra.mxu1 %v737_v25 }
  0xf9   :  { %v1854_v26 = vpop.permute.xlu0 %740 }
  0xfa   :  { %975 = vmatmul.mubr.bf16.vlgmr.msra.gmra.mrb[8].mxu1 %v1770_v34  ;;  %932 = vmatmul.mubr.bf16.gmra.mrb[12].mxu0 %v1792_v45  ;;  %v1856_v29 = vpop.permute.xlu1 %745 }
  0xfb   :  { %1346 = vmatprep.mubr.msk.bf16.mxu1 %vm776_vm0, %v1775_v35 }
  0xfd   :  { %v1880_v48 = vpop.permute.xlu0 %755 }
  0xfe   :  { %v1894_v50 = vpop.permute.xlu1 %750 }
 0x102   :  { %983 = vmatmul.mubr.bf16.gmra.mrb[12].mxu1 %v1792_v45 }
 0x195   :  { %v817_v27 = vpop.f32.mrb[0].mxu0 }
 0x196   :  { %v1859_v30 = vadd.f32 %v817_v27, %v1854_v26  ;;  %v819_v15 = vpop.f32.mrb[1].mxu0 }
 0x197   :  { %v1862_v31 = vadd.f32 %v819_v15, %v1854_v26  ;;  %v821_v32 = vpop.f32.mrb[2].mxu0 }
 0x198   :  { %v1019_v33 = vmin.f32 %v1859_v30, 0.0  ;;  %v1866_v34 = vadd.f32 %v821_v32, %v1856_v29  ;;  %v823_v35 = vpop.f32.mrb[3].mxu0  ;;  %vm991_vm10 = vcmp.gt.f32.partialorder %v1859_v30, 0.0 }
 0x199   :  { %v1020_v36 = vmin.f32 %v1862_v31, 0.0  ;;  %v1870_v37 = vadd.f32 %v823_v35, %v1856_v29  ;;  %vm992_vm11 = vcmp.gt.f32.partialorder %v1862_v31, 0.0 }
 0x19a   :  { %v1047_v38 = vmul.f32 1.442695, %v1019_v33  ;;  %v1026_v40 = vmin.f32 %v1866_v34, 0.0  ;;  %v870_v41 = vpop.f32.mrb[0].mxu1  ;;  %vm998_vm12 = vcmp.gt.f32.partialorder %v1866_v34, 0.0 }
 0x19b   :  { %v1049_v42 = vmul.f32 1.442695, %v1020_v36  ;;  %v1027_v43 = vmin.f32 %v1870_v37, 0.0  ;;  %v1875_v44 = vadd.f32 %v870_v41, %v1854_v26  ;;  %v872_v45 = vpop.f32.mrb[1].mxu1  ;;  %vm999_vm13 = vcmp.gt.f32.partialorder %v1870_v37, 0.0 }
 0x19c   :  { %1450 = vpow2.f32 %v1047_v38  ;;  %v1061_v46 = vmul.f32 1.442695, %v1026_v40  ;;  %v1878_v28 = vadd.f32 %v872_v45, %v1854_v26  ;;  %v874_v47 = vpop.f32.mrb[2].mxu1 }
 0x19d   :  { %1452 = vpow2.f32 %v1049_v42  ;;  %v1063_v49 = vmul.f32 1.442695, %v1027_v43  ;;  %v1021_v51 = vmin.f32 %v1875_v44, 0.0  ;;  %v876_v52 = vpop.f32.mrb[3].mxu1  ;;  %v827_v53 = vpop.f32.mrb[4].mxu0  ;;  %v1885_v39 = vadd.f32 %v874_v47, %v1856_v29 }
 0x19e   :  { %1454 = vpow2.f32 %v1061_v46  ;;  %v1022_v54 = vmin.f32 %v1878_v28, 0.0  ;;  %v829_v55 = vpop.f32.mrb[5].mxu0  ;;  %v1888_v57 = vadd.f32 %v876_v52, %v1856_v29  ;;  %v1905_v8 = vadd.f32 %v827_v53, %v1894_v50 }
 0x19f   :  { %1456 = vpow2.f32 %v1063_v49  ;;  %v1051_v56 = vmul.f32 1.442695, %v1021_v51  ;;  %v831_v58 = vpop.f32.mrb[6].mxu0  ;;  %v1028_v61 = vmin.f32 %v1885_v39, 0.0  ;;  %v1908_v13 = vadd.f32 %v829_v55, %v1894_v50 }
 0x1a0   :  { %v1053_v60 = vmul.f32 1.442695, %v1022_v54  ;;  %v1892_v11 = vadd.f32 %v831_v58, %v1880_v48  ;;  %v833_v62 = vpop.f32.mrb[7].mxu0  ;;  %v1029_v63 = vmin.f32 %v1888_v57, 0.0  ;;  %vm993_vm14 = vcmp.gt.f32.partialorder %v1875_v44, 0.0 }
 0x1a1   :  { %1458 = vpow2.f32 %v1051_v56  ;;  %v1898_v0 = vadd.f32 %v833_v62, %v1880_v48  ;;  %v1065_v1 = vmul.f32 1.442695, %v1028_v61  ;;  %vm994_vm15 = vcmp.gt.f32.partialorder %v1878_v28, 0.0 }
 0x1a2   :  { %1460 = vpow2.f32 %v1053_v60  ;;  %v880_v2 = vpop.f32.mrb[4].mxu1  ;;  %v1040_v59 = vmin.f32 %v1892_v11, 0.0  ;;  %v1067_v3 = vmul.f32 1.442695, %v1029_v63  ;;  %v1033_v23 = vmin.f32 %v1905_v8, 0.0 }
 0x1a3   :  { %v882_v5 = vpop.f32.mrb[5].mxu1  ;;  %v1041_v7 = vmin.f32 %v1898_v0, 0.0  ;;  %1462 = vpow2.f32 %v1065_v1  ;;  %v1911_v4 = vadd.f32 %v880_v2, %v1894_v50  ;;  %v1034_v24 = vmin.f32 %v1908_v13, 0.0 }
 0x1a4   :  { %v1089_v12 = vmul.f32 1.442695, %v1040_v59  ;;  %v884_v10 = vpop.f32.mrb[6].mxu1  ;;  %1464 = vpow2.f32 %v1067_v3  ;;  %v1917_v9 = vadd.f32 %v882_v5, %v1894_v50  ;;  %v1075_v40 = vmul.f32 1.442695, %v1033_v23 }
 0x1a5   :  { %v1091_v6 = vmul.f32 1.442695, %v1041_v7  ;;  %v1914_v14 = vadd.f32 %v884_v10, %v1880_v48  ;;  %v886_v16 = vpop.f32.mrb[7].mxu1  ;;  %v1035_v25 = vmin.f32 %v1911_v4, 0.0  ;;  %v1077_v41 = vmul.f32 1.442695, %v1034_v24 }
 0x1a6   :  { %v1451_v18 = vpop.eup %1450  ;;  %1466 = vpow2.f32 %v1089_v12  ;;  %v1036_v35 = vmin.f32 %v1917_v9, 0.0  ;;  %v887_v53 = vadd.f32 %v886_v16, %v1880_v48  ;;  %vm1000_vm0 = vcmp.gt.f32.partialorder %v1885_v39, 0.0 }
 0x1a7   :  { %v1453_v17 = vpop.eup %1452  ;;  %v1347_v19 = vadd.f32 -1.0, %v1451_v18  ;;  %1468 = vpow2.f32 %v1091_v6  ;;  %v1042_v20 = vmin.f32 %v1914_v14, 0.0  ;;  %v1079_v46 = vmul.f32 1.442695, %v1035_v25 }
 0x1a8   :  { %v1455_v21 = vpop.eup %1454  ;;  %v1348_v22 = vadd.f32 -1.0, %v1453_v17  ;;  %v1081_v51 = vmul.f32 1.442695, %v1036_v35  ;;  %vm1012_vm1 = vcmp.gt.f32.partialorder %v1892_v11, 0.0  ;;  %vm1001_vm2 = vcmp.gt.f32.partialorder %v1888_v57, 0.0 }
 0x1a9   :  { %v1457_v27 = vpop.eup %1456  ;;  %v1131_v15 = vsel %vm991_vm10, %v1859_v30, %v1347_v19  ;;  %v1354_v32 = vadd.f32 -1.0, %v1455_v21  ;;  %v1093_v33 = vmul.f32 1.442695, %v1042_v20  ;;  %vm1013_vm3 = vcmp.gt.f32.partialorder %v1898_v0, 0.0 }
 0x1aa   :  { %v1132_v36 = vsel %vm992_vm11, %v1862_v31, %v1348_v22  ;;  %v1355_v38 = vadd.f32 -1.0, %v1457_v27  ;;  %vm1005_vm4 = vcmp.gt.f32.partialorder %v1905_v8, 0.0  ;;  %vm1006_vm5 = vcmp.gt.f32.partialorder %v1908_v13, 0.0 }
 0x1ab   :  { %v1459_v42 = vpop.eup %1458  ;;  %v1391_v43 = vpack.c.bf16 %v1132_v36, %v1131_v15  ;;  %v1138_v45 = vsel %vm998_vm12, %v1866_v34, %v1354_v32  ;;  %1470 = vpow2.f32 %v1093_v33  ;;  %vm1007_vm6 = vcmp.gt.f32.partialorder %v1911_v4, 0.0 }
 0x1ac   :  { %v1461_v30 = vpop.eup %1460  ;;  %v1139_v47 = vsel %vm999_vm13, %v1870_v37, %v1355_v38  ;;  %v1349_v49 = vadd.f32 -1.0, %v1459_v42  ;;  %1472 = vpow2.f32 %v1075_v40  ;;  %vm1008_vm7 = vcmp.gt.f32.partialorder %v1917_v9, 0.0 }
 0x1ad   :  { %1247 = vst [vmem:[%s2092_s3] sm:$0xff] %v1391_v43  ;;  %v1395_v31 = vpack.c.bf16 %v1139_v47, %v1138_v45  ;;  %v1350_v52 = vadd.f32 -1.0, %v1461_v30  ;;  %1474 = vpow2.f32 %v1077_v41  ;;  %v1463_v34 = vpop.eup %1462  ;;  %vm1014_vm8 = vcmp.gt.f32.partialorder %v1914_v14, 0.0 }
 0x1ae   :  { %v1133_v54 = vsel %vm993_vm14, %v1875_v44, %v1349_v49  ;;  %1476 = vpow2.f32 %v1079_v46  ;;  %v1465_v55 = vpop.eup %1464  ;;  %v1356_v56 = vadd.f32 -1.0, %v1463_v34  ;;  %v1043_v44 = vmin.f32 %v887_v53, 0.0 }
 0x1af   :  { %1252 = vst [vmem:[%s2092_s3 + $0x1c] sm:$0xff] %v1395_v31  ;;  %v1134_v37 = vsel %vm994_vm15, %v1878_v28, %v1350_v52  ;;  %1478 = vpow2.f32 %v1081_v51  ;;  %v1357_v61 = vadd.f32 -1.0, %v1465_v55  ;;  %vm1015_vm9 = vcmp.gt.f32.partialorder %v887_v53, 0.0 }
 0x1b0   :  { %v1467_v58 = vpop.eup %1466  ;;  %v1392_v60 = vpack.c.bf16 %v1134_v37, %v1133_v54  ;;  %v1140_v63 = vsel %vm1000_vm0, %v1885_v39, %v1356_v56  ;;  %v1095_v59 = vmul.f32 1.442695, %v1043_v44  ;;  %vm1250_vm15 = vcmask 781312  }
 0x1b1   :  { %v1469_v62 = vpop.eup %1468  ;;  %v1368_v1 = vadd.f32 -1.0, %v1467_v58  ;;  %v1141_v28 = vsel %vm1001_vm2, %v1888_v57, %v1357_v61 }
 0x1b2   :  { %1248 = vst [vmem:[%s2092_s3 + $0x8] sm:$0xff] %v1392_v60  ;;  %v1369_v2 = vadd.f32 -1.0, %v1469_v62  ;;  %v1396_v3 = vpack.c.bf16 %v1141_v28, %v1140_v63  ;;  %1480 = vpow2.f32 %v1095_v59 }
 0x1b3   :  { %v1152_v5 = vsel %vm1012_vm1, %v1892_v11, %v1368_v1 }
 0x1b4   :  { %v1153_v7 = vsel %vm1013_vm3, %v1898_v0, %v1369_v2  ;;  %1253 = vst [vmem:[%s2092_s3 + $0x24] sm:$0xff] %v1396_v3 }
 0x1b5   :  { %v1471_v39 = vpop.eup %1470  ;;  %v1403_v12 = vpack.c.bf16 %v1153_v7, %v1152_v5 }
 0x1b6   :  { %v1473_v10 = vpop.eup %1472  ;;  %v1370_v21 = vadd.f32 -1.0, %v1471_v39 }
 0x1b7   :  { %v1475_v6 = vpop.eup %1474  ;;  %1260 = vst [vmem:[%s2092_s3 + $0x54] sm:$0xff] %v1403_v12  ;;  %v1361_v57 = vadd.f32 -1.0, %v1473_v10 }
 0x1b8   :  { %v1477_v11 = vpop.eup %1476  ;;  %v1362_v0 = vadd.f32 -1.0, %v1475_v6 }
 0x1b9   :  { %v1479_v16 = vpop.eup %1478  ;;  %v1363_v18 = vadd.f32 -1.0, %v1477_v11  ;;  %v1145_v17 = vsel %vm1005_vm4, %v1905_v8, %v1361_v57  ;;  %v1154_v8 = vsel %vm1014_vm8, %v1914_v14, %v1370_v21 }
 0x1ba   :  { %v1364_v19 = vadd.f32 -1.0, %v1479_v16  ;;  %v1146_v20 = vsel %vm1006_vm5, %v1908_v13, %v1362_v0 }
 0x1bb   :  { %v1147_v22 = vsel %vm1007_vm6, %v1911_v4, %v1363_v18  ;;  %v1399_v23 = vpack.c.bf16 %v1146_v20, %v1145_v17 }
 0x1bc   :  { %v1148_v24 = vsel %vm1008_vm7, %v1917_v9, %v1364_v19  ;;  %v1481_v27 = vpop.eup %1480 }
 0x1bd   :  { %v1400_v25 = vpack.c.bf16 %v1148_v24, %v1147_v22  ;;  %1256 = vst [vmem:[%s2092_s3 + $0x38] sm:$0xff] %v1399_v23  ;;  %v1371_v13 = vadd.f32 -1.0, %v1481_v27 }
 0x1bf   :  { %1257 = vst [vmem:[%s2092_s3 + $0x40] sm:$0xff] %v1400_v25  ;;  %v1155_v4 = vsel %vm1015_vm9, %v887_v53, %v1371_v13 }
 0x1c0   :  { %v1404_v15 = vpack.c.bf16 %v1155_v4, %v1154_v8 }
 0x1c2   :  { %1261 = vst [vmem:[%s2092_s3 + $0x5c] sm:$0xff] %v1404_v15 }
 0x1c5   :  { %v923_v9 = vpop.f32.mrb[8].mxu0 }
 0x1c6   :  { %v1990_v32 = vadd.f32 %v923_v9, %v1854_v26  ;;  %v925_v33 = vpop.f32.mrb[9].mxu0 }
 0x1c7   :  { %v1993_v35 = vadd.f32 %v925_v33, %v1854_v26  ;;  %v927_v14 = vpop.f32.mrb[10].mxu0 }
 0x1c8   :  { %v1023_v36 = vmin.f32 %v1990_v32, 0.0  ;;  %v1997_v38 = vadd.f32 %v927_v14, %v1856_v29  ;;  %v929_v40 = vpop.f32.mrb[11].mxu0  ;;  %vm995_vm10 = vcmp.gt.f32.partialorder %v1990_v32, 0.0 }
 0x1c9   :  { %v1024_v41 = vmin.f32 %v1993_v35, 0.0  ;;  %v2001_v42 = vadd.f32 %v929_v40, %v1856_v29  ;;  %vm996_vm11 = vcmp.gt.f32.partialorder %v1993_v35, 0.0 }
 0x1ca   :  { %v1055_v43 = vmul.f32 1.442695, %v1023_v36  ;;  %v1030_v45 = vmin.f32 %v1997_v38, 0.0  ;;  %vm1002_vm12 = vcmp.gt.f32.partialorder %v1997_v38, 0.0 }
 0x1cb   :  { %v1057_v46 = vmul.f32 1.442695, %v1024_v41  ;;  %v1031_v30 = vmin.f32 %v2001_v42, 0.0  ;;  %vm1003_vm13 = vcmp.gt.f32.partialorder %v2001_v42, 0.0 }
 0x1cc   :  { %1482 = vpow2.f32 %v1055_v43  ;;  %v1069_v47 = vmul.f32 1.442695, %v1030_v45 }
 0x1cd   :  { %v976_v49 = vpop.f32.mrb[8].mxu1  ;;  %1484 = vpow2.f32 %v1057_v46  ;;  %v1071_v51 = vmul.f32 1.442695, %v1031_v30  ;;  %v933_v31 = vpop.f32.mrb[12].mxu0 }
 0x1ce   :  { %v2006_v52 = vadd.f32 %v976_v49, %v1854_v26  ;;  %v978_v53 = vpop.f32.mrb[9].mxu1  ;;  %1486 = vpow2.f32 %v1069_v47  ;;  %v2009_v34 = vadd.f32 %v933_v31, %v1894_v50  ;;  %v935_v54 = vpop.f32.mrb[13].mxu0 }
 0x1cf   :  { %v979_v55 = vpop.f32.mrb[10].mxu1  ;;  %1488 = vpow2.f32 %v1071_v51  ;;  %v2012_v37 = vadd.f32 %v935_v54, %v1894_v50  ;;  %v937_v56 = vpop.f32.mrb[14].mxu0 }
 0x1d0   :  { %v1025_v58 = vmin.f32 %v2006_v52, 0.0  ;;  %v2016_v60 = vadd.f32 %v979_v55, %v1856_v29  ;;  %v981_v61 = vpop.f32.mrb[11].mxu1  ;;  %v939_v26 = vpop.f32.mrb[15].mxu0  ;;  %v1037_v44 = vmin.f32 %v2009_v34, 0.0  ;;  %v2021_v63 = vadd.f32 %v937_v56, %v1880_v48 }
 0x1d1   :  { %v1038_v62 = vmin.f32 %v2012_v37, 0.0  ;;  %v2025_v2 = vadd.f32 %v939_v26, %v1880_v48  ;;  %vm997_vm14 = vcmp.gt.f32.partialorder %v2006_v52, 0.0  ;;  %vm1009_vm0 = vcmp.gt.f32.partialorder %v2009_v34, 0.0 }
 0x1d2   :  { %v1059_v1 = vmul.f32 1.442695, %v1025_v58  ;;  %v1032_v28 = vmin.f32 %v2016_v60, 0.0  ;;  %v1083_v59 = vmul.f32 1.442695, %v1037_v44  ;;  %v1044_v29 = vmin.f32 %v2021_v63, 0.0 }
 0x1d3   :  { %v1085_v3 = vmul.f32 1.442695, %v1038_v62  ;;  %v1045_v7 = vmin.f32 %v2025_v2, 0.0  ;;  %vm1004_vm1 = vcmp.gt.f32.partialorder %v2016_v60, 0.0  ;;  %vm1010_vm2 = vcmp.gt.f32.partialorder %v2012_v37, 0.0 }
 0x1d4   :  { %1490 = vpow2.f32 %v1059_v1  ;;  %v1073_v5 = vmul.f32 1.442695, %v1032_v28  ;;  %v1097_v12 = vmul.f32 1.442695, %v1044_v29  ;;  %vm1016_vm3 = vcmp.gt.f32.partialorder %v2021_v63, 0.0 }
 0x1d5   :  { %v984_v39 = vpop.f32.mrb[12].mxu1  ;;  %1492 = vpow2.f32 %v1083_v59  ;;  %v1099_v18 = vmul.f32 1.442695, %v1045_v7  ;;  %vm1017_vm4 = vcmp.gt.f32.partialorder %v2025_v2, 0.0 }
 0x1d6   :  { %v1483_v10 = vpop.eup %1482  ;;  %1494 = vpow2.f32 %v1073_v5  ;;  %v2030_v6 = vadd.f32 %v984_v39, %v1894_v50  ;;  %v986_v57 = vpop.f32.mrb[13].mxu1 }
 0x1d7   :  { %v1485_v11 = vpop.eup %1484  ;;  %v1351_v0 = vadd.f32 -1.0, %v1483_v10  ;;  %1496 = vpow2.f32 %v1085_v3  ;;  %v987_v16 = vpop.f32.mrb[14].mxu1 }
 0x1d8   :  { %v1487_v17 = vpop.eup %1486  ;;  %v1352_v19 = vadd.f32 -1.0, %v1485_v11  ;;  %v1039_v20 = vmin.f32 %v2030_v6, 0.0  ;;  %v2036_v21 = vadd.f32 %v987_v16, %v1880_v48  ;;  %v989_v22 = vpop.f32.mrb[15].mxu1  ;;  %1498 = vpow2.f32 %v1097_v12 }
 0x1d9   :  { %v1489_v50 = vpop.eup %1488  ;;  %v1135_v23 = vsel %vm995_vm10, %v1990_v32, %v1351_v0  ;;  %v1358_v24 = vadd.f32 -1.0, %v1487_v17  ;;  %1500 = vpow2.f32 %v1099_v18  ;;  %vm1011_vm5 = vcmp.gt.f32.partialorder %v2030_v6, 0.0 }
 0x1da   :  { %v1136_v25 = vsel %vm996_vm11, %v1993_v35, %v1352_v19  ;;  %v1359_v27 = vadd.f32 -1.0, %v1489_v50  ;;  %v1087_v8 = vmul.f32 1.442695, %v1039_v20  ;;  %v1046_v48 = vmin.f32 %v2036_v21, 0.0 }
 0x1db   :  { %v1393_v13 = vpack.c.bf16 %v1136_v25, %v1135_v23  ;;  %v1142_v4 = vsel %vm1002_vm12, %v1997_v38, %v1358_v24  ;;  %vm1018_vm6 = vcmp.gt.f32.partialorder %v2036_v21, 0.0 }
 0x1dc   :  { %v1143_v15 = vsel %vm1003_vm13, %v2001_v42, %v1359_v27  ;;  %1502 = vpow2.f32 %v1087_v8  ;;  %v1101_v32 = vmul.f32 1.442695, %v1046_v48 }
 0x1dd   :  { %1249 = vst [vmem:[%s2092_s3 + $0x10] sm:$0xff] %v1393_v13  ;;  %v1397_v9 = vpack.c.bf16 %v1143_v15, %v1142_v4 }
 0x1de   :  { %v1491_v33 = vpop.eup %1490  ;;  %1504 = vpow2.f32 %v1101_v32 }
 0x1df   :  { %v1493_v35 = vpop.eup %1492  ;;  %v1353_v14 = vadd.f32 -1.0, %v1491_v33  ;;  %1254 = vst [vmem:[%s2092_s3 + $0x2c] sm:$0xff] %v1397_v9 }
 0x1e0   :  { %v1495_v36 = vpop.eup %1494  ;;  %v1365_v38 = vadd.f32 -1.0, %v1493_v35 }
 0x1e1   :  { %v1497_v40 = vpop.eup %1496  ;;  %v1137_v41 = vsel %vm997_vm14, %v2006_v52, %v1353_v14  ;;  %v1360_v42 = vadd.f32 -1.0, %v1495_v36 }
 0x1e2   :  { %v1394_v43 = vpack.c.bf16 %v1137_v41, %v1137_v41  ;;  %v1149_v45 = vsel %vm1009_vm0, %v2009_v34, %v1365_v38  ;;  %v1366_v46 = vadd.f32 -1.0, %v1497_v40  ;;  %v1499_v30 = vpop.eup %1498 }
 0x1e3   :  { %v1144_v47 = vsel %vm1004_vm1, %v2016_v60, %v1360_v42  ;;  %v1372_v31 = vadd.f32 -1.0, %v1499_v30  ;;  %v1501_v52 = vpop.eup %1500 }
 0x1e4   :  { %1251 = vst.msk [vmem:[%s2092_s3 + $0x18] sm:$0xf] %vm1250_vm15, %v1394_v43  ;;  %v1398_v49 = vpack.c.bf16 %v1144_v47, %v1144_v47  ;;  %v1150_v51 = vsel %vm1010_vm2, %v2012_v37, %v1366_v46  ;;  %v1373_v55 = vadd.f32 -1.0, %v1501_v52 }
 0x1e5   :  { %v1401_v53 = vpack.c.bf16 %v1150_v51, %v1149_v45  ;;  %v1156_v54 = vsel %vm1016_vm3, %v2021_v63, %v1372_v31 }
 0x1e6   :  { %v1503_v34 = vpop.eup %1502  ;;  %1255 = vst.msk [vmem:[%s2092_s3 + $0x34] sm:$0xf] %vm1250_vm15, %v1398_v49  ;;  %v1157_v37 = vsel %vm1017_vm4, %v2025_v2, %v1373_v55 }
 0x1e7   :  { %v1367_v56 = vadd.f32 -1.0, %v1503_v34  ;;  %1258 = vst [vmem:[%s2092_s3 + $0x48] sm:$0xff] %v1401_v53  ;;  %v1405_v61 = vpack.c.bf16 %v1157_v37, %v1156_v54 }
 0x1e8   :  { %v1505_v58 = vpop.eup %1504 }
 0x1e9   :  { %v1151_v60 = vsel %vm1011_vm5, %v2030_v6, %v1367_v56  ;;  %v1374_v44 = vadd.f32 -1.0, %v1505_v58  ;;  %1262 = vst [vmem:[%s2092_s3 + $0x64] sm:$0xff] %v1405_v61 }
 0x1ea   :  { %v1402_v26 = vpack.c.bf16 %v1151_v60, %v1151_v60 }
 0x1eb   :  { %v1158_v62 = vsel %vm1018_vm6, %v2036_v21, %v1374_v44 }
 0x1ec   :  { %1259 = vst.msk [vmem:[%s2092_s3 + $0x50] sm:$0xf] %vm1250_vm15, %v1402_v26  ;;  %v1406_v63 = vpack.c.bf16 %v1158_v62, %v1158_v62 }
 0x1ee   :  { %1263 = vst.msk [vmem:[%s2092_s3 + $0x6c] sm:$0xf] %vm1250_vm15, %v1406_v63 }

// kernel: net_final_forward.6
= control target key start
LH: loop header
LB: loop body
LE: loop exit
PB: predicated region body
PF: predicated region fallthrough
CT: control target
= control target key end

     0   :  { %s1345_s16 = smov 18   ;;  %s1346_s25 = smov 16   ;;  %v1349_v12 = vmov 0   ;;  %vm83_vm0 = vcmask 146432   ;;  %vm158_vm1 = vcmask 130048   ;;  %vm233_vm2 = vcmask 113664   ;;  %s1732_s0 = inlined_call_operand.vmem [shape: bf16[32,640], index: 0, kind: input, shape index: {}]   ;;  %s1733_s1 = inlined_call_operand.vmem [shape: bf16[32,288], index: 1, kind: input, shape index: {}]   ;;  %s1734_s2 = inlined_call_operand.vmem [shape: f32[32,1], index: 2, kind: input, shape index: {}]   ;;  %s1735_s3 = inlined_call_operand.vmem [shape: bf16[32,384], index: 3, kind: output, shape index: {}]  }
   0x1   :  { %v1287_v0 = vld [vmem:[%s1732_s0 + $0x4] ss:$20 sps:$4 sm:$0xff]   ;;  %v1289_v1 = vld [vmem:[%s1732_s0] ss:$20 sps:$4 sm:$0xff]   ;;  %v1290_v2 = vld [vmem:[%s1732_s0 + $0x8] ss:$20 sps:$4 sm:$0xff]   ;;  %869 = vmatprep.mubr.bf16.mxu1 %v1349_v12  ;;  %1285 = vset.pattern.permute.xlu0 %v1349_v12 }
   0x2   :  { %69 = vrot.lane.b32.xlu0 %v1287_v0, %s1345_s16  ;;  %67 = vrot.lane.b32.xlu1 %v1289_v1, %s1345_s16  ;;  %v1292_v3 = vld [vmem:[%s1732_s0 + $0x2c] ss:$20 sps:$4 sm:$0xff]   ;;  %v1294_v4 = vld [vmem:[%s1732_s0 + $0x30] ss:$20 sps:$4 sm:$0xff]   ;;  %s1347_s26 = smov 14   ;;  %s1348_s4 = smov 110  }
   0x3   :  { %v1296_v5 = vld [vmem:[%s1732_s0 + $0x28] ss:$20 sps:$4 sm:$0xff]   ;;  %v1299_v7 = vld [vmem:[%s1732_s0 + $0xc] ss:$20 sps:$4 sm:$0xff]   ;;  %v1420_v8 = vld [vmem:[%s1732_s0 + $0x4] ss:$20 sps:$4 sm:$0xff]   ;;  %1286 = vset.pattern.permute.xlu1 %v1349_v12 }
   0x4   :  { %v1409_v6 = vld [vmem:[%s1732_s0 + $0x8] ss:$20 sps:$4 sm:$0xff]   ;;  %v1430_v9 = vld [vmem:[%s1732_s0 + $0x30] ss:$20 sps:$4 sm:$0xff]   ;;  %v1439_v11 = vld [vmem:[%s1732_s0 + $0x2c] ss:$20 sps:$4 sm:$0xff]  }
   0x5   :  { %v1304_v10 = vld [vmem:[%s1732_s0 + $0x34] ss:$20 sps:$4 sm:$0xff]   ;;  %s1350_s13 = smov 2   ;;  %v1307_v13 = vld [vmem:[%s1732_s0 + $0xc] ss:$20 sps:$4 sm:$0xff]   ;;  %s1351_s21 = smov 126  }
   0x6   :  { %71 = vrot.lane.b32.xlu0 %v1290_v2, %s1345_s16  ;;  %77 = vrot.lane.b32.xlu1 %v1292_v3, %s1345_s16  ;;  %v1308_v14 = vld [vmem:[%s1732_s0 + $0x34] ss:$20 sps:$4 sm:$0xff]   ;;  %v1309_v15 = vld [vmem:[%s1732_s0 + $0x10] ss:$20 sps:$4 sm:$0xff]   ;;  %s1353_s24 = smov 112   ;;  %vm654_vm3 = vcmask 900096  }
   0x7   :  { %v1310_v16 = vld [vmem:[%s1732_s0 + $0x38] ss:$20 sps:$4 sm:$0xff]   ;;  %v1482_v17 = vld [vmem:[%s1733_s1 + $0x4] ss:$12 sps:$4 sm:$0xff]   ;;  %v1553_v63 = vld [vmem:[%s1733_s1 + $0x8] ss:$12 sps:$4 sm:$0xff]  }
   0x8   :  { %816 = vmatprep.mubr.bf16.mxu0 %v1482_v17  ;;  %v23_v28 = vld [vmem:[%s1734_s2] sm:$0xff]  ;;  %v24_v30 = vld [vmem:[%s1734_s2 + $0x8] sm:$0xff]  ;;  %v26_v33 = vld [vmem:[%s1734_s2 + $0x18] sm:$0xff]  ;;  %vm308_vm4 = vcmask 15360   ;;  %vm777_vm5 = vcmask 261120   ;;  %vm429_vm6 = vcmask 1031168  }
   0x9   :  { %v25_v35 = vld [vmem:[%s1734_s2 + $0x10] sm:$0xff]  ;;  %v1311_v59 = vld [vmem:[%s1732_s0 + $0xc] ss:$20 sps:$4 sm:$0xff]   ;;  %vm504_vm7 = vcmask 932864   ;;  %vm579_vm8 = vcmask 916480  }
   0xa   :  { %79 = vrot.lane.b32.xlu0 %v1294_v4, %s1345_s16  ;;  %75 = vrot.lane.b32.xlu1 %v1296_v5, %s1345_s16 }
   0xe   :  { %144 = vrot.lane.b32.xlu0 %v1287_v0, %s1346_s25  ;;  %146 = vrot.lane.b32.xlu1 %v1290_v2, %s1346_s25 }
  0x12   :  { %142 = vrot.lane.b32.xlu0 %v1289_v1, %s1346_s25  ;;  %152 = vrot.lane.b32.xlu1 %v1292_v3, %s1346_s25 }
  0x16   :  { %154 = vrot.lane.b32.xlu0 %v1294_v4, %s1346_s25  ;;  %150 = vrot.lane.b32.xlu1 %v1296_v5, %s1346_s25 }
  0x1a   :  { %219 = vrot.lane.b32.xlu0 %v1287_v0, %s1347_s26  ;;  %221 = vrot.lane.b32.xlu1 %v1290_v2, %s1347_s26 }
  0x1e   :  { %217 = vrot.lane.b32.xlu0 %v1289_v1, %s1347_s26  ;;  %640 = vrot.lane.b32.xlu1 %v1409_v6, %s1348_s4 }
  0x22   :  { %642 = vrot.lane.b32.xlu0 %v1299_v7, %s1348_s4  ;;  %638 = vrot.lane.b32.xlu1 %v1420_v8, %s1348_s4 }
  0x26   :  { %227 = vrot.lane.b32.xlu0 %v1292_v3, %s1347_s26  ;;  %229 = vrot.lane.b32.xlu1 %v1294_v4, %s1347_s26 }
  0x2a   :  { %225 = vrot.lane.b32.xlu0 %v1296_v5, %s1347_s26  ;;  %648 = vrot.lane.b32.xlu1 %v1430_v9, %s1348_s4 }
  0x2e   :  { %650 = vrot.lane.b32.xlu0 %v1304_v10, %s1348_s4  ;;  %646 = vrot.lane.b32.xlu1 %v1439_v11, %s1348_s4 }
  0x32   :  { %294 = vrot.lane.b32.xlu0 %v1287_v0, %s1350_s13  ;;  %296 = vrot.lane.b32.xlu1 %v1290_v2, %s1350_s13 }
  0x36   :  { %292 = vrot.lane.b32.xlu0 %v1289_v1, %s1350_s13  ;;  %73 = vrot.lane.b32.xlu1 %v1307_v13, %s1345_s16 }
  0x3a   :  { %302 = vrot.lane.b32.xlu0 %v1292_v3, %s1350_s13  ;;  %304 = vrot.lane.b32.xlu1 %v1294_v4, %s1350_s13  ;;  %v1313_v4 = vld [vmem:[%s1732_s0 + $0x34] ss:$20 sps:$4 sm:$0xff]  }
  0x3e   :  { %300 = vrot.lane.b32.xlu0 %v1296_v5, %s1350_s13  ;;  %81 = vrot.lane.b32.xlu1 %v1308_v14, %s1345_s16  ;;  %s1352_s16 = smov 114  }
  0x42   :  { %417 = vrot.lane.b32.xlu0 %v1299_v7, %s1351_s21  ;;  %419 = vrot.lane.b32.xlu1 %v1309_v15, %s1351_s21 }
  0x46   :  { %148 = vrot.lane.b32.xlu0 %v1307_v13, %s1346_s25  ;;  %425 = vrot.lane.b32.xlu1 %v1304_v10, %s1351_s21 }
  0x4a   :  { %427 = vrot.lane.b32.xlu0 %v1310_v16, %s1351_s21  ;;  %156 = vrot.lane.b32.xlu1 %v1308_v14, %s1346_s25 }
  0x4e   :  { %415 = vrot.lane.b32.xlu0 %v1409_v6, %s1351_s21  ;;  %413 = vrot.lane.b32.xlu1 %v1420_v8, %s1351_s21 }
  0x52   :  { %492 = vrot.lane.b32.xlu0 %v1299_v7, %s1352_s16  ;;  %494 = vrot.lane.b32.xlu1 %v1309_v15, %s1352_s16 }
  0x56   :  { %223 = vrot.lane.b32.xlu0 %v1307_v13, %s1347_s26  ;;  %423 = vrot.lane.b32.xlu1 %v1430_v9, %s1351_s21 }
  0x5a   :  { %421 = vrot.lane.b32.xlu0 %v1439_v11, %s1351_s21  ;;  %500 = vrot.lane.b32.xlu1 %v1304_v10, %s1352_s16 }
  0x5e   :  { %502 = vrot.lane.b32.xlu0 %v1310_v16, %s1352_s16  ;;  %231 = vrot.lane.b32.xlu1 %v1308_v14, %s1347_s26 }
  0x62   :  { %490 = vrot.lane.b32.xlu0 %v1409_v6, %s1352_s16  ;;  %488 = vrot.lane.b32.xlu1 %v1420_v8, %s1352_s16 }
  0x66   :  { %567 = vrot.lane.b32.xlu0 %v1299_v7, %s1353_s24  ;;  %569 = vrot.lane.b32.xlu1 %v1309_v15, %s1353_s24 }
  0x6a   :  { %298 = vrot.lane.b32.xlu0 %v1307_v13, %s1350_s13  ;;  %498 = vrot.lane.b32.xlu1 %v1430_v9, %s1352_s16  ;;  %v1571_v13 = vld [vmem:[%s1733_s1 + $0x20] ss:$12 sps:$4 sm:$0xff]  }
  0x6e   :  { %496 = vrot.lane.b32.xlu0 %v1439_v11, %s1352_s16  ;;  %575 = vrot.lane.b32.xlu1 %v1304_v10, %s1353_s24 }
  0x72   :  { %577 = vrot.lane.b32.xlu0 %v1310_v16, %s1353_s24  ;;  %306 = vrot.lane.b32.xlu1 %v1308_v14, %s1350_s13 }
  0x74   :  { %v70_v18 = vpop.permute.xlu0 %69  ;;  %v68_v19 = vpop.permute.xlu1 %67 }
  0x75   :  { %v84_v23 = vsel %vm83_vm0, %v68_v19, %v70_v18 }
  0x76   :  { %565 = vrot.lane.b32.xlu0 %v1409_v6, %s1353_s24  ;;  %563 = vrot.lane.b32.xlu1 %v1420_v8, %s1353_s24 }
  0x78   :  { %v1491_v20 = vpop.permute.xlu0 %71  ;;  %v78_v21 = vpop.permute.xlu1 %77 }
  0x79   :  { %v85_v22 = vsel %vm83_vm0, %v70_v18, %v1491_v20 }
  0x7a   :  { %573 = vrot.lane.b32.xlu0 %v1430_v9, %s1353_s24  ;;  %784 = vmatprep.subr.bf16.mxu0 %v85_v22 }
  0x7b   :  { %571 = vrot.lane.b32.xlu1 %v1439_v11, %s1353_s24  ;;  %785 = vmatpush1.bf16.msra.mxu0 %v84_v23 }
  0x7c   :  { %v1498_v24 = vpop.permute.xlu0 %79  ;;  %v76_v25 = vpop.permute.xlu1 %75 }
  0x7d   :  { %v88_v26 = vsel %vm83_vm0, %v78_v21, %v1498_v24  ;;  %v87_v27 = vsel %vm83_vm0, %v76_v25, %v78_v21 }
  0x7e   :  { %644 = vrot.lane.b32.xlu0 %v1309_v15, %s1348_s4  ;;  %786 = vmatprep.subr.bf16.mxu0 %v88_v26 }
  0x7f   :  { %652 = vrot.lane.b32.xlu1 %v1310_v16, %s1348_s4  ;;  %787 = vmatpush1.bf16.msra.mxu0 %v87_v27 }
  0x80   :  { %v145_v29 = vpop.permute.xlu0 %144  ;;  %v1511_v31 = vpop.permute.xlu1 %146 }
  0x81   :  { %v160_v32 = vsel %vm158_vm1, %v145_v29, %v1511_v31 }
  0x82   :  { %729 = vperm.xlu0 %1285, %v23_v28   ;;  %788 = vmatprep.subr.bf16.mxu0 %v160_v32 }
  0x83   :  { %734 = vperm.xlu1 %1286, %v24_v30  }
  0x84   :  { %v143_v34 = vpop.permute.xlu0 %142  ;;  %v153_v36 = vpop.permute.xlu1 %152 }
  0x85   :  { %v159_v37 = vsel %vm158_vm1, %v143_v34, %v145_v29 }
  0x86   :  { %789 = vmatpush1.bf16.msra.mxu0 %v159_v37  ;;  %744 = vperm.xlu0 %1285, %v26_v33  }
  0x87   :  { %739 = vperm.xlu1 %1286, %v25_v35  }
  0x88   :  { %v1522_v38 = vpop.permute.xlu0 %154  ;;  %v151_v39 = vpop.permute.xlu1 %150 }
  0x89   :  { %v163_v40 = vsel %vm158_vm1, %v153_v36, %v1522_v38  ;;  %v162_v41 = vsel %vm158_vm1, %v151_v39, %v153_v36 }
  0x8a   :  { %790 = vmatprep.subr.bf16.mxu0 %v163_v40 }
  0x8b   :  { %791 = vmatpush1.bf16.msra.mxu0 %v162_v41 }
  0x8c   :  { %v220_v42 = vpop.permute.xlu0 %219  ;;  %v1527_v43 = vpop.permute.xlu1 %221 }
  0x8d   :  { %v235_v44 = vsel %vm233_vm2, %v220_v42, %v1527_v43 }
  0x8e   :  { %792 = vmatprep.subr.bf16.mxu0 %v235_v44 }
  0x90   :  { %v218_v45 = vpop.permute.xlu0 %217  ;;  %v641_v46 = vpop.permute.xlu1 %640 }
  0x91   :  { %v234_v47 = vsel %vm233_vm2, %v218_v45, %v220_v42 }
  0x92   :  { %793 = vmatpush1.bf16.msra.mxu0 %v234_v47 }
  0x94   :  { %v1532_v48 = vpop.permute.xlu0 %642  ;;  %v639_v49 = vpop.permute.xlu1 %638 }
  0x95   :  { %v656_v50 = vsel %vm654_vm3, %v641_v46, %v1532_v48  ;;  %v655_v51 = vsel %vm654_vm3, %v639_v49, %v641_v46 }
  0x96   :  { %837 = vmatprep.subr.bf16.mxu1 %v656_v50 }
  0x97   :  { %838 = vmatpush1.bf16.msra.mxu1 %v655_v51 }
  0x98   :  { %v228_v52 = vpop.permute.xlu0 %227  ;;  %v1537_v53 = vpop.permute.xlu1 %229 }
  0x99   :  { %v238_v54 = vsel %vm233_vm2, %v228_v52, %v1537_v53 }
  0x9a   :  { %794 = vmatprep.subr.bf16.mxu0 %v238_v54 }
  0x9c   :  { %v226_v55 = vpop.permute.xlu0 %225  ;;  %v649_v56 = vpop.permute.xlu1 %648 }
  0x9d   :  { %v237_v57 = vsel %vm233_vm2, %v226_v55, %v228_v52 }
  0x9e   :  { %795 = vmatpush1.bf16.msra.mxu0 %v237_v57 }
  0xa0   :  { %v1542_v58 = vpop.permute.xlu0 %650  ;;  %v647_v60 = vpop.permute.xlu1 %646 }
  0xa1   :  { %v659_v61 = vsel %vm654_vm3, %v649_v56, %v1542_v58  ;;  %v658_v62 = vsel %vm654_vm3, %v647_v60, %v649_v56 }
  0xa2   :  { %839 = vmatprep.subr.bf16.mxu1 %v659_v61 }
  0xa3   :  { %840 = vmatpush1.bf16.msra.mxu1 %v658_v62 }
  0xa4   :  { %v295_v0 = vpop.permute.xlu0 %294  ;;  %1220 = vmatprep.subr.bf16.mxu1 %v1311_v59  ;;  %v1555_v1 = vpop.permute.xlu1 %296 }
  0xa5   :  { %v310_v2 = vsel %vm308_vm4, %v295_v0, %v1555_v1 }
  0xa6   :  { %1188 = vmatmul.mubr.msk.bf16.vlgmr.msra.gmra.mrb[0].mxu1 %vm777_vm5, %v1553_v63  ;;  %796 = vmatprep.subr.bf16.mxu0 %v310_v2  ;;  %v1318_v2 = vld [vmem:[%s1733_s1 + $0x1c] ss:$12 sps:$4 sm:$0xff]  }
  0xa7   :  { %879 = vmatprep.mubr.bf16.mxu1 %v1349_v12 }
  0xa8   :  { %v293_v3 = vpop.permute.xlu0 %292  ;;  %v74_v5 = vpop.permute.xlu1 %73 }
  0xa9   :  { %v309_v7 = vsel %vm308_vm4, %v293_v3, %v295_v0  ;;  %v86_v10 = vsel %vm83_vm0, %v1491_v20, %v74_v5 }
  0xaa   :  { %797 = vmatpush1.bf16.msra.mxu0 %v309_v7  ;;  %1221 = vmatpush3.bf16.msra.mxu1 %v86_v10 }
  0xab   :  { %1222 = vmatprep.subr.bf16.mxu1 %v1313_v4 }
  0xac   :  { %v303_v14 = vpop.permute.xlu0 %302  ;;  %v1573_v12 = vpop.permute.xlu1 %304 }
  0xad   :  { %v313_v15 = vsel %vm308_vm4, %v303_v14, %v1573_v12 }
  0xae   :  { %1189 = vmatmul.mubr.msk.bf16.gmra.mrb[4].mxu1 %vm777_vm5, %v1571_v13  ;;  %798 = vmatprep.subr.bf16.mxu0 %v313_v15 }
  0xaf   :  { %922 = vmatprep.mubr.bf16.mxu1 %v1482_v17 }
  0xb0   :  { %v301_v16 = vpop.permute.xlu0 %300  ;;  %v82_v18 = vpop.permute.xlu1 %81 }
  0xb1   :  { %v312_v19 = vsel %vm308_vm4, %v301_v16, %v303_v14  ;;  %v89_v20 = vsel %vm83_vm0, %v1498_v24, %v82_v18  ;;  %v1320_v16 = vld [vmem:[%s1733_s1 + $0x18] ss:$12 sps:$4 sm:$0xff]  }
  0xb2   :  { %799 = vmatpush1.bf16.msra.mxu0 %v312_v19  ;;  %1223 = vmatpush3.bf16.msra.mxu1 %v89_v20 }
  0xb3   :  { %800 = vmatprep.subr.bf16.mxu0 %v1409_v6 }
  0xb4   :  { %v418_v21 = vpop.permute.xlu0 %417  ;;  %v420_v22 = vpop.permute.xlu1 %419 }
  0xb5   :  { %v432_v23 = vsel %vm429_vm6, %v418_v21, %v420_v22 }
  0xb6   :  { %801 = vmatpush1.bf16.msra.mxu0 %v1420_v8  ;;  %1224 = vmatprep.subr.bf16.mxu1 %v432_v23 }
  0xb7   :  { %802 = vmatprep.subr.bf16.mxu0 %v1430_v9 }
  0xb8   :  { %v149_v17 = vpop.permute.xlu0 %148  ;;  %v426_v26 = vpop.permute.xlu1 %425 }
  0xb9   :  { %v161_v25 = vsel %vm158_vm1, %v1511_v31, %v149_v17 }
  0xba   :  { %1225 = vmatpush3.bf16.msra.mxu1 %v161_v25  ;;  %803 = vmatpush1.bf16.msra.mxu0 %v1439_v11 }
  0xbc   :  { %v428_v24 = vpop.permute.xlu0 %427  ;;  %v157_v27 = vpop.permute.xlu1 %156 }
  0xbd   :  { %v435_v6 = vsel %vm429_vm6, %v426_v26, %v428_v24  ;;  %v164_v28 = vsel %vm158_vm1, %v1522_v38, %v157_v27 }
  0xbe   :  { %1226 = vmatprep.subr.bf16.mxu1 %v435_v6 }
  0xbf   :  { %1227 = vmatpush3.bf16.msra.mxu1 %v164_v28 }
  0xc0   :  { %v416_v8 = vpop.permute.xlu0 %415  ;;  %v414_v29 = vpop.permute.xlu1 %413 }
  0xc1   :  { %v431_v9 = vsel %vm429_vm6, %v416_v8, %v418_v21  ;;  %v430_v30 = vsel %vm429_vm6, %v414_v29, %v416_v8 }
  0xc2   :  { %804 = vmatprep.subr.bf16.mxu0 %v431_v9 }
  0xc3   :  { %805 = vmatpush1.bf16.msra.mxu0 %v430_v30 }
  0xc4   :  { %v493_v31 = vpop.permute.xlu0 %492  ;;  %v495_v11 = vpop.permute.xlu1 %494 }
  0xc5   :  { %v507_v32 = vsel %vm504_vm7, %v493_v31, %v495_v11 }
  0xc6   :  { %1228 = vmatprep.subr.bf16.mxu1 %v507_v32 }
  0xc8   :  { %v224_v33 = vpop.permute.xlu0 %223  ;;  %v424_v35 = vpop.permute.xlu1 %423 }
  0xc9   :  { %v236_v34 = vsel %vm233_vm2, %v1527_v43, %v224_v33  ;;  %v434_v36 = vsel %vm429_vm6, %v424_v35, %v426_v26 }
  0xca   :  { %1229 = vmatpush3.bf16.msra.mxu1 %v236_v34  ;;  %806 = vmatprep.subr.bf16.mxu0 %v434_v36 }
  0xcc   :  { %v422_v37 = vpop.permute.xlu0 %421  ;;  %v501_v38 = vpop.permute.xlu1 %500 }
  0xcd   :  { %v433_v39 = vsel %vm429_vm6, %v422_v37, %v424_v35 }
  0xce   :  { %807 = vmatpush1.bf16.msra.mxu0 %v433_v39 }
  0xd0   :  { %v503_v40 = vpop.permute.xlu0 %502  ;;  %v232_v41 = vpop.permute.xlu1 %231 }
  0xd1   :  { %v510_v42 = vsel %vm504_vm7, %v501_v38, %v503_v40  ;;  %v239_v44 = vsel %vm233_vm2, %v1537_v53, %v232_v41 }
  0xd2   :  { %1230 = vmatprep.subr.bf16.mxu1 %v510_v42 }
  0xd3   :  { %1231 = vmatpush3.bf16.msra.mxu1 %v239_v44 }
  0xd4   :  { %v491_v43 = vpop.permute.xlu0 %490  ;;  %v489_v45 = vpop.permute.xlu1 %488 }
  0xd5   :  { %v506_v46 = vsel %vm504_vm7, %v491_v43, %v493_v31  ;;  %v505_v47 = vsel %vm504_vm7, %v489_v45, %v491_v43 }
  0xd6   :  { %808 = vmatprep.subr.bf16.mxu0 %v506_v46 }
  0xd7   :  { %809 = vmatpush1.bf16.msra.mxu0 %v505_v47 }
  0xd8   :  { %v568_v49 = vpop.permute.xlu0 %567  ;;  %v570_v50 = vpop.permute.xlu1 %569 }
  0xd9   :  { %v582_v51 = vsel %vm579_vm8, %v568_v49, %v570_v50 }
  0xda   :  { %1232 = vmatprep.subr.bf16.mxu1 %v582_v51 }
  0xdc   :  { %v299_v52 = vpop.permute.xlu0 %298  ;;  %v499_v54 = vpop.permute.xlu1 %498 }
  0xdd   :  { %v311_v53 = vsel %vm308_vm4, %v1555_v1, %v299_v52  ;;  %v509_v55 = vsel %vm504_vm7, %v499_v54, %v501_v38  ;;  %v1315_v1 = vld [vmem:[%s1733_s1] ss:$12 sps:$4 sm:$0xff]  }
  0xde   :  { %1233 = vmatpush3.bf16.msra.mxu1 %v311_v53  ;;  %810 = vmatprep.subr.bf16.mxu0 %v509_v55 }
  0xe0   :  { %v497_v56 = vpop.permute.xlu0 %496  ;;  %v576_v57 = vpop.permute.xlu1 %575 }
  0xe1   :  { %v508_v59 = vsel %vm504_vm7, %v497_v56, %v499_v54 }
  0xe2   :  { %811 = vmatpush1.bf16.msra.mxu0 %v508_v59 }
  0xe4   :  { %v578_v60 = vpop.permute.xlu0 %577  ;;  %v307_v61 = vpop.permute.xlu1 %306 }
  0xe5   :  { %v585_v62 = vsel %vm579_vm8, %v576_v57, %v578_v60  ;;  %v314_v0 = vsel %vm308_vm4, %v1573_v12, %v307_v61 }
  0xe6   :  { %1234 = vmatprep.subr.bf16.mxu1 %v585_v62 }
  0xe7   :  { %1235 = vmatpush3.bf16.msra.mxu1 %v314_v0 }
  0xe8   :  { %v566_v3 = vpop.permute.xlu0 %565  ;;  %v564_v4 = vpop.permute.xlu1 %563 }
  0xe9   :  { %v581_v5 = vsel %vm579_vm8, %v566_v3, %v568_v49  ;;  %v580_v7 = vsel %vm579_vm8, %v564_v4, %v566_v3 }
  0xea   :  { %812 = vmatprep.subr.bf16.mxu0 %v581_v5  ;;  %923 = vmatmul.mubr.bf16.vlgmr.msra.gmra.mrb[8].mxu1 %v1315_v1 }
  0xeb   :  { %813 = vmatpush1.bf16.msra.mxu0 %v580_v7  ;;  %930 = vmatprep.mubr.bf16.mxu1 %v1318_v2 }
  0xec   :  { %v574_v10 = vpop.permute.xlu0 %573 }
  0xed   :  { %v572_v14 = vpop.permute.xlu1 %571  ;;  %v584_v12 = vsel %vm579_vm8, %v574_v10, %v576_v57 }
  0xee   :  { %814 = vmatprep.subr.bf16.mxu0 %v584_v12  ;;  %v583_v15 = vsel %vm579_vm8, %v572_v14, %v574_v10 }
  0xef   :  { %815 = vmatpush1.bf16.msra.mxu0 %v583_v15 }
  0xf0   :  { %v645_v18 = vpop.permute.xlu0 %644 }
  0xf1   :  { %v653_v19 = vpop.permute.xlu1 %652  ;;  %v657_v20 = vsel %vm654_vm3, %v1532_v48, %v645_v18 }
  0xf2   :  { %817 = vmatmul.mubr.bf16.vlgmr.msra.gmra.mrb[0].mxu0 %v1315_v1  ;;  %931 = vmatmul.mubr.bf16.gmra.mrb[12].mxu1 %v1320_v16  ;;  %v660_v21 = vsel %vm654_vm3, %v1542_v58, %v653_v19 }
  0xf3   :  { %1252 = vmatprep.subr.bf16.mxu1 %v657_v20  ;;  %826 = vmatprep.mubr.bf16.mxu0 %v1318_v2 }
  0xf4   :  { %1253 = vmatpush3.bf16.msra.mxu1 %v657_v20  ;;  %1256 = vmatprep.mubr.msk.bf16.mxu1 %vm777_vm5, %v1553_v63 }
  0xf5   :  { %1254 = vmatprep.subr.bf16.mxu1 %v660_v21 }
  0xf8   :  { %1255 = vmatpush3.bf16.msra.mxu1 %v660_v21 }
  0xfa   :  { %827 = vmatmul.mubr.bf16.gmra.mrb[4].mxu0 %v1320_v16 }
  0xfb   :  { %1257 = vmatmul.mubr.msk.bf16.vlgmr.msra.gmra.mrb[16].mxu1 %vm777_vm5, %v1571_v13 }
 0x101   :  { %v730_v9 = vpop.permute.xlu0 %729 }
 0x102   :  { %v1640_v30 = vpop.permute.xlu1 %734 }
 0x105   :  { %v745_v56 = vpop.permute.xlu0 %744 }
 0x106   :  { %v740_v47 = vpop.permute.xlu1 %739 }
 0x179   :  { %v871_v22 = vpop.f32.mrb[0].mxu1 }
 0x17a   :  { %v873_v23 = vpop.f32.mrb[1].mxu1 }
 0x17b   :  { %v875_v48 = vpop.f32.mrb[2].mxu1 }
 0x17c   :  { %v877_v17 = vpop.f32.mrb[3].mxu1 }
 0x181   :  { %v881_v25 = vpop.f32.mrb[4].mxu1 }
 0x182   :  { %v883_v26 = vpop.f32.mrb[5].mxu1 }
 0x183   :  { %v1634_v24 = vpop.f32.mrb[6].mxu1 }
 0x184   :  { %v1636_v27 = vpop.f32.mrb[7].mxu1 }
 0x1bd   :  { %v1236_v58 = vpop.f32.mrb[8].mxu1 }
 0x1be   :  { %v1237_v6 = vpop.f32.mrb[9].mxu1 }
 0x1bf   :  { %v1238_v28 = vadd.f32 %v1237_v6, %v1236_v58  ;;  %v1239_v63 = vpop.f32.mrb[10].mxu1 }
 0x1c0   :  { %v1240_v8 = vpop.f32.mrb[11].mxu1 }
 0x1c1   :  { %v1638_v29 = vadd.f32 %v1240_v8, %v1239_v63  ;;  %v925_v0 = vadd.f32 %v1238_v28, %v730_v9 }
 0x1c3   :  { %v928_v8 = vadd.f32 %v1638_v29, %v1640_v30 }
 0x1c5   :  { %v818_v13 = vpop.f32.mrb[0].mxu0  ;;  %v1242_v31 = vpop.f32.mrb[12].mxu1 }
 0x1c6   :  { %v819_v11 = vadd.f32 %v818_v13, %v730_v9  ;;  %v820_v32 = vpop.f32.mrb[1].mxu0  ;;  %v1243_v33 = vpop.f32.mrb[13].mxu1 }
 0x1c7   :  { %v821_v34 = vadd.f32 %v820_v32, %v730_v9  ;;  %v822_v35 = vpop.f32.mrb[2].mxu0  ;;  %v1244_v36 = vadd.f32 %v1243_v33, %v1242_v31  ;;  %v1245_v37 = vpop.f32.mrb[14].mxu1 }
 0x1c8   :  { %v1642_v38 = vadd.f32 %v871_v22, %v819_v11  ;;  %v823_v39 = vadd.f32 %v822_v35, %v1640_v30  ;;  %v824_v40 = vpop.f32.mrb[3].mxu0  ;;  %v1246_v41 = vpop.f32.mrb[15].mxu1 }
 0x1c9   :  { %v1645_v42 = vadd.f32 %v873_v23, %v821_v34  ;;  %v825_v44 = vadd.f32 %v824_v40, %v1640_v30  ;;  %v1247_v43 = vadd.f32 %v1246_v41, %v1245_v37  ;;  %v933_v55 = vadd.f32 %v1244_v36, %v740_v47 }
 0x1ca   :  { %v1000_v45 = vmin.f32 %v1642_v38, 0.0  ;;  %v1649_v46 = vadd.f32 %v875_v48, %v823_v39  ;;  %vm988_vm9 = vcmp.gt.f32.partialorder %v1642_v38, 0.0 }
 0x1cb   :  { %v1001_v49 = vmin.f32 %v1645_v42, 0.0  ;;  %v1652_v50 = vadd.f32 %v877_v17, %v825_v44  ;;  %v936_v20 = vadd.f32 %v1247_v43, %v745_v56  ;;  %vm989_vm10 = vcmp.gt.f32.partialorder %v1645_v42, 0.0 }
 0x1cc   :  { %v1012_v51 = vmul.f32 1.442695, %v1000_v45  ;;  %v1003_v52 = vmin.f32 %v1649_v46, 0.0  ;;  %vm991_vm11 = vcmp.gt.f32.partialorder %v1649_v46, 0.0 }
 0x1cd   :  { %v1014_v53 = vmul.f32 1.442695, %v1001_v49  ;;  %v1004_v54 = vmin.f32 %v1652_v50, 0.0  ;;  %v828_v57 = vpop.f32.mrb[4].mxu0  ;;  %vm992_vm12 = vcmp.gt.f32.partialorder %v1652_v50, 0.0 }
 0x1ce   :  { %1321 = vpow2.f32 %v1012_v51  ;;  %v1018_v59 = vmul.f32 1.442695, %v1003_v52  ;;  %v829_v60 = vadd.f32 %v828_v57, %v740_v47  ;;  %v1258_v61 = vpop.f32.mrb[16].mxu1  ;;  %v830_v62 = vpop.f32.mrb[5].mxu0 }
 0x1cf   :  { %1323 = vpow2.f32 %v1014_v53  ;;  %v1020_v1 = vmul.f32 1.442695, %v1004_v54  ;;  %v1656_v2 = vadd.f32 %v1258_v61, %v933_v55  ;;  %v831_v3 = vadd.f32 %v830_v62, %v740_v47  ;;  %v973_v4 = vpop.f32.mrb[17].mxu1  ;;  %v832_v5 = vpop.f32.mrb[6].mxu0 }
 0x1d0   :  { %1325 = vpow2.f32 %v1018_v59  ;;  %v1658_v7 = vadd.f32 %v881_v25, %v829_v60  ;;  %v1660_v10 = vadd.f32 %v973_v4, %v925_v0  ;;  %v833_v14 = vadd.f32 %v832_v5, %v745_v56  ;;  %v1259_v12 = vpop.f32.mrb[18].mxu1  ;;  %v834_v15 = vpop.f32.mrb[7].mxu0 }
 0x1d1   :  { %1327 = vpow2.f32 %v1020_v1  ;;  %v1008_v16 = vmin.f32 %v1656_v2, 0.0  ;;  %v1663_v18 = vadd.f32 %v883_v26, %v831_v3  ;;  %v976_v19 = vpop.f32.mrb[19].mxu1  ;;  %v1671_v6 = vadd.f32 %v1259_v12, %v936_v20 }
 0x1d2   :  { %v1006_v21 = vmin.f32 %v1658_v7, 0.0  ;;  %v1002_v22 = vmin.f32 %v1660_v10, 0.0  ;;  %v1669_v17 = vadd.f32 %v1634_v24, %v833_v14  ;;  %v835_v28 = vadd.f32 %v834_v15, %v745_v56 }
 0x1d3   :  { %v1028_v23 = vmul.f32 1.442695, %v1008_v16  ;;  %v1007_v48 = vmin.f32 %v1663_v18, 0.0  ;;  %v1011_v9 = vmin.f32 %v1671_v6, 0.0  ;;  %v1680_v31 = vadd.f32 %v976_v19, %v928_v8 }
 0x1d4   :  { %v1024_v25 = vmul.f32 1.442695, %v1006_v21  ;;  %v1016_v58 = vmul.f32 1.442695, %v1002_v22  ;;  %v1009_v63 = vmin.f32 %v1669_v17, 0.0  ;;  %v1678_v13 = vadd.f32 %v1636_v27, %v835_v28 }
 0x1d5   :  { %1329 = vpow2.f32 %v1028_v23  ;;  %v1026_v26 = vmul.f32 1.442695, %v1007_v48  ;;  %v1034_v32 = vmul.f32 1.442695, %v1011_v9  ;;  %v1005_v29 = vmin.f32 %v1680_v31, 0.0 }
 0x1d6   :  { %1331 = vpow2.f32 %v1024_v25  ;;  %v1030_v24 = vmul.f32 1.442695, %v1009_v63  ;;  %v1010_v33 = vmin.f32 %v1678_v13, 0.0  ;;  %vm996_vm13 = vcmp.gt.f32.partialorder %v1656_v2, 0.0 }
 0x1d7   :  { %1333 = vpow2.f32 %v1026_v26  ;;  %v1022_v41 = vmul.f32 1.442695, %v1005_v29  ;;  %vm994_vm14 = vcmp.gt.f32.partialorder %v1658_v7, 0.0  ;;  %vm995_vm15 = vcmp.gt.f32.partialorder %v1663_v18, 0.0 }
 0x1d8   :  { %v1322_v11 = vpop.eup %1321  ;;  %1335 = vpow2.f32 %v1016_v58  ;;  %v1032_v27 = vmul.f32 1.442695, %v1010_v33  ;;  %vm990_vm0 = vcmp.gt.f32.partialorder %v1660_v10, 0.0  ;;  %vm997_vm1 = vcmp.gt.f32.partialorder %v1669_v17, 0.0 }
 0x1d9   :  { %v1324_v34 = vpop.eup %1323  ;;  %v1192_v35 = vadd.f32 -1.0, %v1322_v11  ;;  %1337 = vpow2.f32 %v1030_v24  ;;  %vm999_vm2 = vcmp.gt.f32.partialorder %v1671_v6, 0.0  ;;  %vm998_vm3 = vcmp.gt.f32.partialorder %v1678_v13, 0.0 }
 0x1da   :  { %v1326_v30 = vpop.eup %1325  ;;  %v1193_v36 = vadd.f32 -1.0, %v1324_v34  ;;  %1339 = vpow2.f32 %v1034_v32  ;;  %vm993_vm4 = vcmp.gt.f32.partialorder %v1680_v31, 0.0 }
 0x1db   :  { %v1328_v37 = vpop.eup %1327  ;;  %v1048_v39 = vsel %vm988_vm9, %v1642_v38, %v1192_v35  ;;  %v1195_v40 = vadd.f32 -1.0, %v1326_v30  ;;  %1341 = vpow2.f32 %v1032_v27 }
 0x1dc   :  { %v1049_v44 = vsel %vm989_vm10, %v1645_v42, %v1193_v36  ;;  %v1196_v43 = vadd.f32 -1.0, %v1328_v37  ;;  %1343 = vpow2.f32 %v1022_v41 }
 0x1dd   :  { %v1212_v45 = vpack.c.bf16 %v1049_v44, %v1048_v39  ;;  %v1051_v47 = vsel %vm991_vm11, %v1649_v46, %v1195_v40 }
 0x1de   :  { %v1052_v49 = vsel %vm992_vm12, %v1652_v50, %v1196_v43 }
 0x1df   :  { %v1330_v51 = vpop.eup %1329  ;;  %1100 = vst [vmem:[%s1735_s3] sm:$0xff] %v1212_v45  ;;  %v1214_v38 = vpack.c.bf16 %v1052_v49, %v1051_v47 }
 0x1e0   :  { %v1332_v52 = vpop.eup %1331  ;;  %v1200_v42 = vadd.f32 -1.0, %v1330_v51 }
 0x1e1   :  { %v1334_v53 = vpop.eup %1333  ;;  %1102 = vst [vmem:[%s1735_s3 + $0xc] sm:$0xff] %v1214_v38  ;;  %v1198_v54 = vadd.f32 -1.0, %v1332_v52 }
 0x1e2   :  { %v1336_v46 = vpop.eup %1335  ;;  %v1056_v50 = vsel %vm996_vm13, %v1656_v2, %v1200_v42  ;;  %v1199_v55 = vadd.f32 -1.0, %v1334_v53 }
 0x1e3   :  { %v1338_v56 = vpop.eup %1337  ;;  %v1054_v57 = vsel %vm994_vm14, %v1658_v7, %v1198_v54  ;;  %v1217_v59 = vpack.c.bf16 %v1056_v50, %v1056_v50  ;;  %v1194_v60 = vadd.f32 -1.0, %v1336_v46 }
 0x1e4   :  { %v1340_v61 = vpop.eup %1339  ;;  %v1055_v62 = vsel %vm995_vm15, %v1663_v18, %v1199_v55  ;;  %v1201_v0 = vadd.f32 -1.0, %v1338_v56 }
 0x1e5   :  { %1105 = vst [vmem:[%s1735_s3 + $0x20] sm:$0xf] %v1217_v59  ;;  %v1216_v1 = vpack.c.bf16 %v1055_v62, %v1054_v57  ;;  %v1050_v2 = vsel %vm990_vm0, %v1660_v10, %v1194_v60  ;;  %v1203_v3 = vadd.f32 -1.0, %v1340_v61  ;;  %v1342_v4 = vpop.eup %1341 }
 0x1e6   :  { %v1213_v5 = vpack.c.bf16 %v1050_v2, %v1050_v2  ;;  %v1344_v7 = vpop.eup %1343  ;;  %v1057_v14 = vsel %vm997_vm1, %v1669_v17, %v1201_v0  ;;  %v1202_v15 = vadd.f32 -1.0, %v1342_v4 }
 0x1e7   :  { %1104 = vst [vmem:[%s1735_s3 + $0x18] sm:$0xff] %v1216_v1  ;;  %v1059_v12 = vsel %vm999_vm2, %v1671_v6, %v1203_v3  ;;  %v1197_v16 = vadd.f32 -1.0, %v1344_v7 }
 0x1e8   :  { %1101 = vst [vmem:[%s1735_s3 + $0x8] sm:$0xf] %v1213_v5  ;;  %v1219_v10 = vpack.c.bf16 %v1059_v12, %v1059_v12  ;;  %v1058_v18 = vsel %vm998_vm3, %v1678_v13, %v1202_v15 }
 0x1e9   :  { %v1218_v19 = vpack.c.bf16 %v1058_v18, %v1057_v14  ;;  %v1053_v20 = vsel %vm993_vm4, %v1680_v31, %v1197_v16 }
 0x1ea   :  { %1107 = vst [vmem:[%s1735_s3 + $0x2c] sm:$0xf] %v1219_v10  ;;  %v1215_v21 = vpack.c.bf16 %v1053_v20, %v1053_v20 }
 0x1eb   :  { %1106 = vst [vmem:[%s1735_s3 + $0x24] sm:$0xff] %v1218_v19 }
 0x1ec   :  { %1103 = vst [vmem:[%s1735_s3 + $0x14] sm:$0xf] %v1215_v21 }

// kernel: net_final_forward.7
= control target key start
LH: loop header
LB: loop body
LE: loop exit
PB: predicated region body
PF: predicated region fallthrough
CT: control target
= control target key end

     0   :  { %s1058_s16 = smov 14   ;;  %vm95_vm0 = vcmask 719872   ;;  %s1059_s8 = smov 12   ;;  %v1066_v16 = vmov 0   ;;  %vm85_vm1 = vcmask 113664   ;;  %vm145_vm2 = vcmask 97280   ;;  %s1378_s0 = inlined_call_operand.vmem [shape: bf16[32,472], index: 0, kind: input, shape index: {}]   ;;  %s1379_s1 = inlined_call_operand.vmem [shape: bf16[64,288], index: 1, kind: input, shape index: {}]   ;;  %s1380_s2 = inlined_call_operand.vmem [shape: f32[64,1], index: 2, kind: input, shape index: {}]   ;;  %s1381_s3 = inlined_call_operand.vmem [shape: f32[64,216], index: 3, kind: output, shape index: {}]  }
   0x1   :  { %v990_v0 = vld [vmem:[%s1378_s0 + $0x4] ss:$16 sps:$4 sm:$0xff]   ;;  %v992_v1 = vld [vmem:[%s1378_s0] ss:$16 sps:$4 sm:$0xff]   ;;  %v993_v2 = vld [vmem:[%s1378_s0 + $0x8] ss:$16 sps:$4 sm:$0xff]   ;;  %714 = vmatprep.mubr.bf16.mxu0 %v1066_v16  ;;  %988 = vset.pattern.permute.xlu0 %v1066_v16 }
   0x2   :  { %75 = vrot.lane.b32.xlu0 %v990_v0, %s1058_s16  ;;  %73 = vrot.lane.b32.xlu1 %v992_v1, %s1058_s16  ;;  %v994_v3 = vld [vmem:[%s1378_s0 + $0x24] ss:$16 sps:$4 sm:$0xff]   ;;  %v996_v4 = vld [vmem:[%s1378_s0 + $0x28] ss:$16 sps:$4 sm:$0xff]   ;;  %s1060_s13 = smov 10   ;;  %s1061_s18 = smov 2  }
   0x3   :  { %v997_v5 = vld [vmem:[%s1378_s0 + $0x20] ss:$16 sps:$4 sm:$0xff]   ;;  %v998_v6 = vld [vmem:[%s1378_s0 + $0x8] ss:$16 sps:$4 sm:$0xff]   ;;  %v1111_v7 = vld [vmem:[%s1378_s0 + $0x4] ss:$16 sps:$4 sm:$0xff]   ;;  %989 = vset.pattern.permute.xlu1 %v1066_v16 }
   0x4   :  { %v1006_v8 = vld [vmem:[%s1378_s0 + $0x8] ss:$16 sps:$4 sm:$0xff]   ;;  %v1119_v9 = vld [vmem:[%s1378_s0 + $0x24] ss:$16 sps:$4 sm:$0xff]   ;;  %s1062_s21 = smov 126   ;;  %s1063_s22 = smov 118  }
   0x5   :  { %v1009_v10 = vld [vmem:[%s1378_s0 + $0x28] ss:$16 sps:$4 sm:$0xff]   ;;  %301 = vst.msk [vmem:[#allocation2 + $0x88] sm:$0xff] %vm95_vm0, %v1006_v8  ;;  %s1064_s23 = smov 116   ;;  %v1012_v17 = vld [vmem:[%s1379_s1 + $0x4] ss:$12 sps:$4 sm:$0xff]  }
   0x6   :  { %77 = vrot.lane.b32.xlu0 %v993_v2, %s1058_s16  ;;  %81 = vrot.lane.b32.xlu1 %v994_v3, %s1058_s16  ;;  %303 = vst.msk [vmem:[#allocation2 + $0x98] sm:$0xff] %vm95_vm0, %v1009_v10  ;;  %v999_v11 = vld [vmem:[%s1378_s0 + $0x28] ss:$16 sps:$4 sm:$0xff]   ;;  %v31_v18 = vld [vmem:[%s1380_s2] sm:$0xff]  ;;  %vm204_vm3 = vcmask 80896   ;;  %vm263_vm4 = vcmask 15360  }
   0x7   :  { %v1000_v12 = vld [vmem:[%s1378_s0 + $0x8] ss:$16 sps:$4 sm:$0xff]   ;;  %641 = vmatprep.mubr.bf16.mxu1 %v1012_v17  ;;  %v33_v21 = vld [vmem:[%s1380_s2 + $0x10] sm:$0xff]  ;;  %v35_v23 = vld [vmem:[%s1380_s2 + $0x20] sm:$0xff]  ;;  %vm332_vm5 = vcmask 1031168   ;;  %vm371_vm6 = vcmask 965632  }
   0x8   :  { %v1001_v13 = vld [vmem:[%s1378_s0 + $0x28] ss:$16 sps:$4 sm:$0xff]   ;;  %v37_v25 = vld [vmem:[%s1380_s2 + $0x30] sm:$0xff]  ;;  %vm410_vm7 = vcmask 949248   ;;  %vm449_vm8 = vcmask 932864   ;;  %vm596_vm9 = vcmask 261120  }
   0x9   :  { %v1002_v14 = vld [vmem:[%s1378_s0 + $0x8] ss:$16 sps:$4 sm:$0xff]  }
   0xa   :  { %83 = vrot.lane.b32.xlu0 %v996_v4, %s1058_s16  ;;  %79 = vrot.lane.b32.xlu1 %v997_v5, %s1058_s16  ;;  %v1003_v15 = vld [vmem:[%s1378_s0 + $0x28] ss:$16 sps:$4 sm:$0xff]   ;;  %s1065_s0 = smov 114  }
   0xb   :  { %v32_v19 = vld [vmem:[%s1380_s2 + $0x8] sm:$0xff]  ;;  %v34_v20 = vld [vmem:[%s1380_s2 + $0x18] sm:$0xff] }
   0xc   :  { %v36_v22 = vld [vmem:[%s1380_s2 + $0x28] sm:$0xff]  ;;  %v38_v24 = vld [vmem:[%s1380_s2 + $0x38] sm:$0xff] }
   0xe   :  { %135 = vrot.lane.b32.xlu0 %v990_v0, %s1059_s8  ;;  %137 = vrot.lane.b32.xlu1 %v998_v6, %s1059_s8 }
  0x12   :  { %133 = vrot.lane.b32.xlu0 %v992_v1, %s1059_s8  ;;  %141 = vrot.lane.b32.xlu1 %v994_v3, %s1059_s8 }
  0x16   :  { %143 = vrot.lane.b32.xlu0 %v999_v11, %s1059_s8  ;;  %139 = vrot.lane.b32.xlu1 %v997_v5, %s1059_s8 }
  0x1a   :  { %194 = vrot.lane.b32.xlu0 %v990_v0, %s1060_s13  ;;  %196 = vrot.lane.b32.xlu1 %v1000_v12, %s1060_s13 }
  0x1e   :  { %192 = vrot.lane.b32.xlu0 %v992_v1, %s1060_s13  ;;  %200 = vrot.lane.b32.xlu1 %v994_v3, %s1060_s13 }
  0x22   :  { %202 = vrot.lane.b32.xlu0 %v1001_v13, %s1060_s13  ;;  %198 = vrot.lane.b32.xlu1 %v997_v5, %s1060_s13 }
  0x26   :  { %253 = vrot.lane.b32.xlu0 %v990_v0, %s1061_s18  ;;  %255 = vrot.lane.b32.xlu1 %v1002_v14, %s1061_s18 }
  0x2a   :  { %251 = vrot.lane.b32.xlu0 %v992_v1, %s1061_s18  ;;  %259 = vrot.lane.b32.xlu1 %v994_v3, %s1061_s18 }
  0x2e   :  { %261 = vrot.lane.b32.xlu0 %v1003_v15, %s1061_s18  ;;  %257 = vrot.lane.b32.xlu1 %v997_v5, %s1061_s18 }
  0x32   :  { %324 = vrot.lane.b32.xlu0 %v1111_v7, %s1062_s21  ;;  %326 = vrot.lane.b32.xlu1 %v1006_v8, %s1062_s21 }
  0x36   :  { %328 = vrot.lane.b32.xlu0 %v1119_v9, %s1062_s21  ;;  %330 = vrot.lane.b32.xlu1 %v1009_v10, %s1062_s21 }
  0x3a   :  { %363 = vrot.lane.b32.xlu0 %v1111_v7, %s1063_s22  ;;  %365 = vrot.lane.b32.xlu1 %v1006_v8, %s1063_s22 }
  0x3e   :  { %367 = vrot.lane.b32.xlu0 %v1119_v9, %s1063_s22  ;;  %369 = vrot.lane.b32.xlu1 %v1009_v10, %s1063_s22 }
  0x42   :  { %402 = vrot.lane.b32.xlu0 %v1111_v7, %s1064_s23  ;;  %404 = vrot.lane.b32.xlu1 %v1006_v8, %s1064_s23 }
  0x46   :  { %441 = vrot.lane.b32.xlu0 %v1111_v7, %s1065_s0  ;;  %443 = vrot.lane.b32.xlu1 %v1006_v8, %s1065_s0 }
  0x4a   :  { %406 = vrot.lane.b32.xlu0 %v1119_v9, %s1064_s23  ;;  %408 = vrot.lane.b32.xlu1 %v1009_v10, %s1064_s23 }
  0x4e   :  { %445 = vrot.lane.b32.xlu0 %v1119_v9, %s1065_s0  ;;  %447 = vrot.lane.b32.xlu1 %v1009_v10, %s1065_s0 }
  0x52   :  { %498 = vperm.xlu0 %988, %v31_v18   ;;  %503 = vperm.xlu1 %989, %v32_v19   ;;  %v477_v18 = vld [vmem:[#allocation2 + $0x88] sm:$0xff] }
  0x56   :  { %513 = vperm.xlu0 %988, %v34_v20   ;;  %508 = vperm.xlu1 %989, %v33_v21  }
  0x5a   :  { %523 = vperm.xlu0 %988, %v36_v22   ;;  %518 = vperm.xlu1 %989, %v35_v23   ;;  %v479_v22 = vld [vmem:[#allocation2 + $0x98] sm:$0xff] }
  0x5e   :  { %533 = vperm.xlu0 %988, %v38_v24   ;;  %528 = vperm.xlu1 %989, %v37_v25  }
  0x74   :  { %v76_v26 = vpop.permute.xlu0 %75  ;;  %v74_v27 = vpop.permute.xlu1 %73 }
  0x75   :  { %v86_v28 = vsel %vm85_vm1, %v74_v27, %v76_v26 }
  0x78   :  { %v78_v29 = vpop.permute.xlu0 %77  ;;  %v82_v31 = vpop.permute.xlu1 %81 }
  0x79   :  { %v87_v30 = vsel %vm85_vm1, %v76_v26, %v78_v29 }
  0x7a   :  { %96 = vst.msk [vmem:[#allocation2 + $0x8] sm:$0xff] %vm95_vm0, %v87_v30 }
  0x7c   :  { %v84_v32 = vpop.permute.xlu0 %83  ;;  %v80_v34 = vpop.permute.xlu1 %79 }
  0x7d   :  { %v89_v33 = vsel %vm85_vm1, %v82_v31, %v84_v32  ;;  %v88_v35 = vsel %vm85_vm1, %v80_v34, %v82_v31 }
  0x7e   :  { %98 = vst.msk [vmem:[#allocation2 + $0x18] sm:$0xff] %vm95_vm0, %v89_v33 }
  0x80   :  { %v136_v36 = vpop.permute.xlu0 %135  ;;  %v138_v37 = vpop.permute.xlu1 %137 }
  0x81   :  { %v461_v38 = vld [vmem:[#allocation2 + $0x8] sm:$0xff]  ;;  %v147_v39 = vsel %vm145_vm2, %v136_v36, %v138_v37 }
  0x82   :  { %609 = vmatprep.subr.bf16.mxu1 %v461_v38  ;;  %155 = vst.msk [vmem:[#allocation2 + $0x28] sm:$0xff] %vm95_vm0, %v147_v39 }
  0x83   :  { %610 = vmatpush1.bf16.msra.mxu1 %v86_v28 }
  0x84   :  { %v134_v40 = vpop.permute.xlu0 %133  ;;  %v142_v42 = vpop.permute.xlu1 %141 }
  0x85   :  { %v146_v41 = vsel %vm145_vm2, %v134_v40, %v136_v36  ;;  %v463_v43 = vld [vmem:[#allocation2 + $0x18] sm:$0xff] }
  0x86   :  { %611 = vmatprep.subr.bf16.mxu1 %v463_v43 }
  0x87   :  { %612 = vmatpush1.bf16.msra.mxu1 %v88_v35 }
  0x88   :  { %v144_v44 = vpop.permute.xlu0 %143  ;;  %v140_v46 = vpop.permute.xlu1 %139 }
  0x89   :  { %v149_v45 = vsel %vm145_vm2, %v142_v42, %v144_v44  ;;  %v148_v47 = vsel %vm145_vm2, %v140_v46, %v142_v42  ;;  %v465_v48 = vld [vmem:[#allocation2 + $0x28] sm:$0xff] }
  0x8a   :  { %157 = vst.msk [vmem:[#allocation2 + $0x38] sm:$0xff] %vm95_vm0, %v149_v45  ;;  %613 = vmatprep.subr.bf16.mxu1 %v465_v48  ;;  %v1010_v45 = vld [vmem:[%s1379_s1] ss:$12 sps:$4 sm:$0xff]   ;;  %v1013_v46 = vld [vmem:[%s1379_s1 + $0x8] ss:$12 sps:$4 sm:$0xff]  }
  0x8b   :  { %614 = vmatpush1.bf16.msra.mxu1 %v146_v41  ;;  %v1016_v48 = vld [vmem:[%s1379_s1 + $0x20] ss:$12 sps:$4 sm:$0xff]  }
  0x8c   :  { %v195_v49 = vpop.permute.xlu0 %194  ;;  %v197_v50 = vpop.permute.xlu1 %196 }
  0x8d   :  { %v206_v51 = vsel %vm204_vm3, %v195_v49, %v197_v50  ;;  %v1018_v50 = vld [vmem:[%s1379_s1 + $0x34] ss:$12 sps:$4 sm:$0xff]  }
  0x8e   :  { %214 = vst.msk [vmem:[#allocation2 + $0x48] sm:$0xff] %vm95_vm0, %v206_v51  ;;  %v1020_v51 = vld [vmem:[%s1379_s1 + $0x38] ss:$12 sps:$4 sm:$0xff]  }
  0x90   :  { %v193_v52 = vpop.permute.xlu0 %192  ;;  %v201_v54 = vpop.permute.xlu1 %200 }
  0x91   :  { %v205_v53 = vsel %vm204_vm3, %v193_v52, %v195_v49  ;;  %v467_v55 = vld [vmem:[#allocation2 + $0x38] sm:$0xff] }
  0x92   :  { %615 = vmatprep.subr.bf16.mxu1 %v467_v55  ;;  %v1017_v49 = vld [vmem:[%s1379_s1 + $0x18] ss:$12 sps:$4 sm:$0xff]   ;;  %v1021_v52 = vld [vmem:[%s1379_s1 + $0x30] ss:$12 sps:$4 sm:$0xff]   ;;  %v1025_v55 = vld [vmem:[%s1379_s1 + $0x48] ss:$12 sps:$4 sm:$0xff]  }
  0x93   :  { %616 = vmatpush1.bf16.msra.mxu1 %v148_v47  ;;  %v1014_v47 = vld [vmem:[%s1379_s1 + $0x1c] ss:$12 sps:$4 sm:$0xff]  }
  0x94   :  { %v203_v56 = vpop.permute.xlu0 %202  ;;  %v199_v58 = vpop.permute.xlu1 %198 }
  0x95   :  { %v208_v57 = vsel %vm204_vm3, %v201_v54, %v203_v56  ;;  %v207_v59 = vsel %vm204_vm3, %v199_v58, %v201_v54  ;;  %v469_v60 = vld [vmem:[#allocation2 + $0x48] sm:$0xff]  ;;  %v1024_v54 = vld [vmem:[%s1379_s1 + $0x50] ss:$12 sps:$4 sm:$0xff]  }
  0x96   :  { %216 = vst.msk [vmem:[#allocation2 + $0x58] sm:$0xff] %vm95_vm0, %v208_v57  ;;  %617 = vmatprep.subr.bf16.mxu1 %v469_v60 }
  0x97   :  { %618 = vmatpush1.bf16.msra.mxu1 %v205_v53  ;;  %v1022_v53 = vld [vmem:[%s1379_s1 + $0x4c] ss:$12 sps:$4 sm:$0xff]  }
  0x98   :  { %v254_v61 = vpop.permute.xlu0 %253  ;;  %v256_v62 = vpop.permute.xlu1 %255 }
  0x99   :  { %v265_v63 = vsel %vm263_vm4, %v254_v61, %v256_v62 }
  0x9a   :  { %273 = vst.msk [vmem:[#allocation2 + $0x68] sm:$0xff] %vm95_vm0, %v265_v63 }
  0x9c   :  { %v252_v0 = vpop.permute.xlu0 %251  ;;  %v260_v2 = vpop.permute.xlu1 %259 }
  0x9d   :  { %v264_v1 = vsel %vm263_vm4, %v252_v0, %v254_v61  ;;  %v471_v3 = vld [vmem:[#allocation2 + $0x58] sm:$0xff] }
  0x9e   :  { %619 = vmatprep.subr.bf16.mxu1 %v471_v3 }
  0x9f   :  { %620 = vmatpush1.bf16.msra.mxu1 %v207_v59 }
  0xa0   :  { %v262_v4 = vpop.permute.xlu0 %261  ;;  %v258_v6 = vpop.permute.xlu1 %257 }
  0xa1   :  { %v267_v5 = vsel %vm263_vm4, %v260_v2, %v262_v4  ;;  %v266_v8 = vsel %vm263_vm4, %v258_v6, %v260_v2  ;;  %v473_v10 = vld [vmem:[#allocation2 + $0x68] sm:$0xff] }
  0xa2   :  { %275 = vst.msk [vmem:[#allocation2 + $0x78] sm:$0xff] %vm95_vm0, %v267_v5  ;;  %621 = vmatprep.subr.bf16.mxu1 %v473_v10 }
  0xa3   :  { %622 = vmatpush1.bf16.msra.mxu1 %v264_v1 }
  0xa4   :  { %v325_v11 = vpop.permute.xlu0 %324  ;;  %v327_v12 = vpop.permute.xlu1 %326 }
  0xa5   :  { %v333_v13 = vsel %vm332_vm5, %v325_v11, %v327_v12  ;;  %340 = vst.msk [vmem:[#allocation2 + $0xa8] sm:$0xff] %vm95_vm0, %v327_v12 }
  0xa8   :  { %v329_v14 = vpop.permute.xlu0 %328  ;;  %v331_v15 = vpop.permute.xlu1 %330 }
  0xa9   :  { %v475_v17 = vld [vmem:[#allocation2 + $0x78] sm:$0xff]  ;;  %v334_v19 = vsel %vm332_vm5, %v329_v14, %v331_v15  ;;  %342 = vst.msk [vmem:[#allocation2 + $0xb8] sm:$0xff] %vm95_vm0, %v331_v15 }
  0xaa   :  { %623 = vmatprep.subr.bf16.mxu1 %v475_v17 }
  0xab   :  { %624 = vmatpush1.bf16.msra.mxu1 %v266_v8 }
  0xac   :  { %v364_v20 = vpop.permute.xlu0 %363  ;;  %625 = vmatprep.subr.bf16.mxu1 %v477_v18  ;;  %v366_v21 = vpop.permute.xlu1 %365  ;;  %v481_v27 = vld [vmem:[#allocation2 + $0xa8] sm:$0xff] }
  0xad   :  { %v372_v23 = vsel %vm371_vm6, %v364_v20, %v366_v21  ;;  %379 = vst.msk [vmem:[#allocation2 + $0xc8] sm:$0xff] %vm95_vm0, %v366_v21 }
  0xaf   :  { %626 = vmatpush1.bf16.msra.mxu1 %v1111_v7 }
  0xb0   :  { %v368_v24 = vpop.permute.xlu0 %367  ;;  %627 = vmatprep.subr.bf16.mxu1 %v479_v22  ;;  %v370_v25 = vpop.permute.xlu1 %369  ;;  %v483_v31 = vld [vmem:[#allocation2 + $0xb8] sm:$0xff] }
  0xb1   :  { %v373_v26 = vsel %vm371_vm6, %v368_v24, %v370_v25  ;;  %381 = vst.msk [vmem:[#allocation2 + $0xd8] sm:$0xff] %vm95_vm0, %v370_v25 }
  0xb3   :  { %628 = vmatpush1.bf16.msra.mxu1 %v1119_v9 }
  0xb4   :  { %v403_v28 = vpop.permute.xlu0 %402  ;;  %629 = vmatprep.subr.bf16.mxu1 %v481_v27  ;;  %v405_v29 = vpop.permute.xlu1 %404  ;;  %v485_v9 = vld [vmem:[#allocation2 + $0xc8] sm:$0xff] }
  0xb5   :  { %v411_v30 = vsel %vm410_vm7, %v403_v28, %v405_v29  ;;  %418 = vst.msk [vmem:[#allocation2 + $0xe8] sm:$0xff] %vm95_vm0, %v405_v29 }
  0xb7   :  { %630 = vmatpush1.bf16.msra.mxu1 %v333_v13 }
  0xb8   :  { %v442_v7 = vpop.permute.xlu0 %441  ;;  %631 = vmatprep.subr.bf16.mxu1 %v483_v31  ;;  %v444_v32 = vpop.permute.xlu1 %443  ;;  %v487_v37 = vld [vmem:[#allocation2 + $0xd8] sm:$0xff] }
  0xb9   :  { %v450_v33 = vsel %vm449_vm8, %v442_v7, %v444_v32  ;;  %457 = vst.msk [vmem:[#allocation2 + $0x108] sm:$0xff] %vm95_vm0, %v444_v32 }
  0xbb   :  { %632 = vmatpush1.bf16.msra.mxu1 %v334_v19 }
  0xbc   :  { %v407_v34 = vpop.permute.xlu0 %406  ;;  %633 = vmatprep.subr.bf16.mxu1 %v485_v9  ;;  %v409_v35 = vpop.permute.xlu1 %408  ;;  %v489_v42 = vld [vmem:[#allocation2 + $0xe8] sm:$0xff] }
  0xbd   :  { %v412_v36 = vsel %vm410_vm7, %v407_v34, %v409_v35  ;;  %420 = vst.msk [vmem:[#allocation2 + $0xf8] sm:$0xff] %vm95_vm0, %v409_v35 }
  0xbf   :  { %634 = vmatpush1.bf16.msra.mxu1 %v372_v23 }
  0xc0   :  { %v446_v38 = vpop.permute.xlu0 %445  ;;  %635 = vmatprep.subr.bf16.mxu1 %v487_v37  ;;  %v448_v39 = vpop.permute.xlu1 %447  ;;  %v493_v40 = vld [vmem:[#allocation2 + $0x108] sm:$0xff] }
  0xc1   :  { %v451_v41 = vsel %vm449_vm8, %v446_v38, %v448_v39  ;;  %459 = vst.msk [vmem:[#allocation2 + $0x118] sm:$0xff] %vm95_vm0, %v448_v39  ;;  %682 = vmatprep.subr.bf16.mxu0 %v493_v40 }
  0xc2   :  { %683 = vmatpush1.bf16.msra.mxu0 %v450_v33 }
  0xc3   :  { %636 = vmatpush1.bf16.msra.mxu1 %v373_v26 }
  0xc4   :  { %637 = vmatprep.subr.bf16.mxu1 %v489_v42  ;;  %v491_v43 = vld [vmem:[#allocation2 + $0xf8] sm:$0xff] }
  0xc7   :  { %638 = vmatpush1.bf16.msra.mxu1 %v411_v30 }
  0xc8   :  { %639 = vmatprep.subr.bf16.mxu1 %v491_v43  ;;  %v495_v44 = vld [vmem:[#allocation2 + $0x118] sm:$0xff] }
  0xc9   :  { %684 = vmatprep.subr.bf16.mxu0 %v495_v44 }
  0xca   :  { %685 = vmatpush1.bf16.msra.mxu0 %v451_v41 }
  0xcb   :  { %640 = vmatpush1.bf16.msra.mxu1 %v412_v36 }
  0xcd   :  { %927 = vmatmul.mubr.msk.bf16.vlgmr.msra.gmra.mrb[0].mxu0 %vm596_vm9, %v1013_v46 }
  0xce   :  { %642 = vmatmul.mubr.bf16.vlgmr.msra.gmra.mrb[0].mxu1 %v1010_v45  ;;  %724 = vmatprep.mubr.bf16.mxu0 %v1066_v16 }
  0xcf   :  { %651 = vmatprep.mubr.bf16.mxu1 %v1014_v47 }
  0xd1   :  { %v499_v56 = vpop.permute.xlu0 %498  ;;  %v504_v57 = vpop.permute.xlu1 %503 }
  0xd5   :  { %928 = vmatmul.mubr.msk.bf16.gmra.mrb[4].mxu0 %vm596_vm9, %v1016_v48  ;;  %v509_v13 = vpop.permute.xlu1 %508  ;;  %v514_v17 = vpop.permute.xlu0 %513 }
  0xd6   :  { %652 = vmatmul.mubr.bf16.gmra.mrb[4].mxu1 %v1017_v49  ;;  %734 = vmatprep.mubr.bf16.mxu0 %v1066_v16 }
  0xd7   :  { %661 = vmatprep.mubr.bf16.mxu1 %v1018_v50 }
  0xd9   :  { %v524_v40 = vpop.permute.xlu0 %523  ;;  %v519_v41 = vpop.permute.xlu1 %518 }
  0xdd   :  { %929 = vmatmul.mubr.msk.bf16.gmra.mrb[8].mxu0 %vm596_vm9, %v1020_v51 }
  0xde   :  { %662 = vmatmul.mubr.bf16.gmra.mrb[8].mxu1 %v1021_v52  ;;  %744 = vmatprep.mubr.bf16.mxu0 %v1066_v16 }
  0xdf   :  { %671 = vmatprep.mubr.bf16.mxu1 %v1022_v53 }
  0xe5   :  { %930 = vmatmul.mubr.msk.bf16.gmra.mrb[12].mxu0 %vm596_vm9, %v1024_v54 }
  0xe6   :  { %672 = vmatmul.mubr.bf16.gmra.mrb[12].mxu1 %v1025_v55 }
 0x1a0   :  { %v716_v58 = vpop.f32.mrb[0].mxu0 }
 0x1a1   :  { %v643_v59 = vpop.f32.mrb[0].mxu1  ;;  %v718_v61 = vpop.f32.mrb[1].mxu0 }
 0x1a2   :  { %v644_v60 = vadd.f32 %v643_v59, %v499_v56  ;;  %v645_v62 = vpop.f32.mrb[1].mxu1  ;;  %v720_v63 = vpop.f32.mrb[2].mxu0 }
 0x1a3   :  { %v646_v16 = vadd.f32 %v645_v62, %v499_v56  ;;  %v647_v0 = vpop.f32.mrb[2].mxu1  ;;  %v722_v2 = vpop.f32.mrb[3].mxu0 }
 0x1a4   :  { %v1253_v1 = vadd.f32 %v716_v58, %v644_v60  ;;  %v648_v3 = vadd.f32 %v647_v0, %v504_v57  ;;  %v649_v4 = vpop.f32.mrb[3].mxu1 }
 0x1a5   :  { %v1255_v5 = vadd.f32 %v718_v61, %v646_v16  ;;  %v650_v6 = vadd.f32 %v649_v4, %v504_v57 }
 0x1a6   :  { %v771_v8 = vmin.f32 %v1253_v1, 0.0  ;;  %v1258_v10 = vadd.f32 %v720_v63, %v648_v3  ;;  %vm755_vm10 = vcmp.gt.f32.partialorder %v1253_v1, 0.0 }
 0x1a7   :  { %v772_v11 = vmin.f32 %v1255_v5, 0.0  ;;  %v1261_v12 = vadd.f32 %v722_v2, %v650_v6  ;;  %vm756_vm11 = vcmp.gt.f32.partialorder %v1255_v5, 0.0 }
 0x1a8   :  { %v787_v14 = vmul.f32 1.442695, %v771_v8  ;;  %v773_v15 = vmin.f32 %v1258_v10, 0.0  ;;  %v726_v20 = vpop.f32.mrb[4].mxu0  ;;  %vm757_vm12 = vcmp.gt.f32.partialorder %v1258_v10, 0.0 }
 0x1a9   :  { %v789_v18 = vmul.f32 1.442695, %v772_v11  ;;  %v774_v19 = vmin.f32 %v1261_v12, 0.0  ;;  %v653_v21 = vpop.f32.mrb[4].mxu1  ;;  %v728_v24 = vpop.f32.mrb[5].mxu0  ;;  %vm758_vm13 = vcmp.gt.f32.partialorder %v1261_v12, 0.0 }
 0x1aa   :  { %1026 = vpow2.f32 %v787_v14  ;;  %v791_v22 = vmul.f32 1.442695, %v773_v15  ;;  %v654_v23 = vadd.f32 %v653_v21, %v509_v13  ;;  %v655_v25 = vpop.f32.mrb[5].mxu1  ;;  %v730_v28 = vpop.f32.mrb[6].mxu0 }
 0x1ab   :  { %1028 = vpow2.f32 %v789_v18  ;;  %v793_v26 = vmul.f32 1.442695, %v774_v19  ;;  %v656_v27 = vadd.f32 %v655_v25, %v509_v13  ;;  %v657_v29 = vpop.f32.mrb[6].mxu1  ;;  %v732_v7 = vpop.f32.mrb[7].mxu0 }
 0x1ac   :  { %1030 = vpow2.f32 %v791_v22  ;;  %v1265_v30 = vadd.f32 %v726_v20, %v654_v23  ;;  %v658_v31 = vadd.f32 %v657_v29, %v514_v17  ;;  %v659_v32 = vpop.f32.mrb[7].mxu1  ;;  %v534_v14 = vpop.permute.xlu0 %533 }
 0x1ad   :  { %1032 = vpow2.f32 %v793_v26  ;;  %v1267_v33 = vadd.f32 %v728_v24, %v656_v27  ;;  %v660_v9 = vadd.f32 %v659_v32, %v514_v17  ;;  %v529_v15 = vpop.permute.xlu1 %528 }
 0x1ae   :  { %v775_v34 = vmin.f32 %v1265_v30, 0.0  ;;  %v1270_v35 = vadd.f32 %v730_v28, %v658_v31  ;;  %vm759_vm14 = vcmp.gt.f32.partialorder %v1265_v30, 0.0 }
 0x1af   :  { %v776_v36 = vmin.f32 %v1267_v33, 0.0  ;;  %v1273_v37 = vadd.f32 %v732_v7, %v660_v9  ;;  %vm760_vm15 = vcmp.gt.f32.partialorder %v1267_v33, 0.0 }
 0x1b0   :  { %v795_v38 = vmul.f32 1.442695, %v775_v34  ;;  %v777_v39 = vmin.f32 %v1270_v35, 0.0  ;;  %v736_v44 = vpop.f32.mrb[8].mxu0  ;;  %vm761_vm1 = vcmp.gt.f32.partialorder %v1270_v35, 0.0 }
 0x1b1   :  { %v797_v42 = vmul.f32 1.442695, %v776_v36  ;;  %v778_v43 = vmin.f32 %v1273_v37, 0.0  ;;  %v663_v45 = vpop.f32.mrb[8].mxu1  ;;  %v738_v48 = vpop.f32.mrb[9].mxu0  ;;  %vm762_vm2 = vcmp.gt.f32.partialorder %v1273_v37, 0.0 }
 0x1b2   :  { %1034 = vpow2.f32 %v795_v38  ;;  %v799_v46 = vmul.f32 1.442695, %v777_v39  ;;  %v664_v47 = vadd.f32 %v663_v45, %v519_v41  ;;  %v665_v49 = vpop.f32.mrb[9].mxu1  ;;  %v740_v52 = vpop.f32.mrb[10].mxu0 }
 0x1b3   :  { %1036 = vpow2.f32 %v797_v42  ;;  %v801_v50 = vmul.f32 1.442695, %v778_v43  ;;  %v666_v51 = vadd.f32 %v665_v49, %v519_v41  ;;  %v667_v53 = vpop.f32.mrb[10].mxu1  ;;  %v742_v57 = vpop.f32.mrb[11].mxu0 }
 0x1b4   :  { %v1027_v54 = vpop.eup %1026  ;;  %1038 = vpow2.f32 %v799_v46  ;;  %v1278_v55 = vadd.f32 %v736_v44, %v664_v47  ;;  %v668_v56 = vadd.f32 %v667_v53, %v524_v40  ;;  %v669_v58 = vpop.f32.mrb[11].mxu1 }
 0x1b5   :  { %v1029_v59 = vpop.eup %1028  ;;  %v931_v60 = vadd.f32 -1.0, %v1027_v54  ;;  %1040 = vpow2.f32 %v801_v50  ;;  %v1280_v61 = vadd.f32 %v738_v48, %v666_v51  ;;  %v670_v62 = vadd.f32 %v669_v58, %v524_v40 }
 0x1b6   :  { %v1031_v16 = vpop.eup %1030  ;;  %v932_v63 = vadd.f32 -1.0, %v1029_v59  ;;  %v779_v0 = vmin.f32 %v1278_v55, 0.0  ;;  %v1284_v2 = vadd.f32 %v740_v52, %v668_v56  ;;  %vm763_vm3 = vcmp.gt.f32.partialorder %v1278_v55, 0.0 }
 0x1b7   :  { %v1033_v3 = vpop.eup %1032  ;;  %v835_v4 = vsel %vm755_vm10, %v1253_v1, %v931_v60  ;;  %v933_v6 = vadd.f32 -1.0, %v1031_v16  ;;  %v780_v8 = vmin.f32 %v1280_v61, 0.0  ;;  %v1302_v20 = vadd.f32 %v742_v57, %v670_v62 }
 0x1b8   :  { %851 = vst [vmem:[%s1381_s3] sm:$0xff] %v835_v4  ;;  %v836_v11 = vsel %vm756_vm11, %v1255_v5, %v932_v63  ;;  %v934_v13 = vadd.f32 -1.0, %v1033_v3  ;;  %v803_v17 = vmul.f32 1.442695, %v779_v0  ;;  %v781_v19 = vmin.f32 %v1284_v2, 0.0  ;;  %v746_v21 = vpop.f32.mrb[12].mxu0 }
 0x1b9   :  { %852 = vst.msk [vmem:[%s1381_s3 + $0x8] sm:$0xff] %vm95_vm0, %v836_v11  ;;  %v837_v1 = vsel %vm757_vm12, %v1258_v10, %v933_v6  ;;  %v805_v18 = vmul.f32 1.442695, %v780_v8  ;;  %v673_v5 = vpop.f32.mrb[12].mxu1  ;;  %v748_v24 = vpop.f32.mrb[13].mxu0  ;;  %v782_v26 = vmin.f32 %v1302_v20, 0.0 }
 0x1ba   :  { %853 = vst [vmem:[%s1381_s3 + $0x10] sm:$0xff] %v837_v1  ;;  %v838_v22 = vsel %vm758_vm13, %v1261_v12, %v934_v13  ;;  %1042 = vpow2.f32 %v803_v17  ;;  %v674_v23 = vadd.f32 %v673_v5, %v529_v15  ;;  %v675_v25 = vpop.f32.mrb[13].mxu1  ;;  %v807_v10 = vmul.f32 1.442695, %v781_v19  ;;  %v750_v27 = vpop.f32.mrb[14].mxu0 }
 0x1bb   :  { %854 = vst.msk [vmem:[%s1381_s3 + $0x18] sm:$0xff] %vm95_vm0, %v838_v22  ;;  %1044 = vpow2.f32 %v805_v18  ;;  %v677_v28 = vpop.f32.mrb[14].mxu1  ;;  %v676_v12 = vadd.f32 %v675_v25, %v529_v15  ;;  %v752_v32 = vpop.f32.mrb[15].mxu0  ;;  %v809_v38 = vmul.f32 1.442695, %v782_v26  ;;  %vm764_vm4 = vcmp.gt.f32.partialorder %v1280_v61, 0.0 }
 0x1bc   :  { %v1035_v29 = vpop.eup %1034  ;;  %v1314_v31 = vadd.f32 %v746_v21, %v674_v23  ;;  %v678_v7 = vadd.f32 %v677_v28, %v534_v14  ;;  %v679_v9 = vpop.f32.mrb[15].mxu1  ;;  %1046 = vpow2.f32 %v807_v10  ;;  %vm765_vm5 = vcmp.gt.f32.partialorder %v1284_v2, 0.0 }
 0x1bd   :  { %v1037_v34 = vpop.eup %1036  ;;  %v935_v36 = vadd.f32 -1.0, %v1035_v29  ;;  %v749_v42 = vadd.f32 %v748_v24, %v676_v12  ;;  %v680_v43 = vadd.f32 %v679_v9, %v534_v14  ;;  %1048 = vpow2.f32 %v809_v38 }
 0x1be   :  { %v1039_v39 = vpop.eup %1038  ;;  %v936_v40 = vadd.f32 -1.0, %v1037_v34  ;;  %v783_v41 = vmin.f32 %v1314_v31, 0.0  ;;  %v751_v47 = vadd.f32 %v750_v27, %v678_v7  ;;  %vm766_vm6 = vcmp.gt.f32.partialorder %v1302_v20, 0.0 }
 0x1bf   :  { %v1041_v44 = vpop.eup %1040  ;;  %v839_v45 = vsel %vm759_vm14, %v1265_v30, %v935_v36  ;;  %v937_v46 = vadd.f32 -1.0, %v1039_v39  ;;  %v784_v51 = vmin.f32 %v749_v42, 0.0  ;;  %v753_v53 = vadd.f32 %v752_v32, %v680_v43 }
 0x1c0   :  { %855 = vst [vmem:[%s1381_s3 + $0x20] sm:$0xff] %v839_v45  ;;  %v840_v48 = vsel %vm760_vm15, %v1267_v33, %v936_v40  ;;  %v938_v49 = vadd.f32 -1.0, %v1041_v44  ;;  %v811_v50 = vmul.f32 1.442695, %v783_v41  ;;  %v785_v52 = vmin.f32 %v751_v47, 0.0 }
 0x1c1   :  { %856 = vst.msk [vmem:[%s1381_s3 + $0x28] sm:$0xff] %vm95_vm0, %v840_v48  ;;  %v841_v30 = vsel %vm761_vm1, %v1270_v35, %v937_v46  ;;  %v813_v54 = vmul.f32 1.442695, %v784_v51  ;;  %v786_v57 = vmin.f32 %v753_v53, 0.0  ;;  %vm767_vm7 = vcmp.gt.f32.partialorder %v1314_v31, 0.0 }
 0x1c2   :  { %857 = vst [vmem:[%s1381_s3 + $0x30] sm:$0xff] %v841_v30  ;;  %v842_v33 = vsel %vm762_vm2, %v1273_v37, %v938_v49  ;;  %1050 = vpow2.f32 %v811_v50  ;;  %v815_v56 = vmul.f32 1.442695, %v785_v52  ;;  %vm768_vm8 = vcmp.gt.f32.partialorder %v749_v42, 0.0 }
 0x1c3   :  { %858 = vst.msk [vmem:[%s1381_s3 + $0x38] sm:$0xff] %vm95_vm0, %v842_v33  ;;  %1052 = vpow2.f32 %v813_v54  ;;  %v817_v62 = vmul.f32 1.442695, %v786_v57  ;;  %vm769_vm9 = vcmp.gt.f32.partialorder %v751_v47, 0.0  ;;  %vm770_vm10 = vcmp.gt.f32.partialorder %v753_v53, 0.0 }
 0x1c4   :  { %v1043_v35 = vpop.eup %1042  ;;  %1054 = vpow2.f32 %v815_v56 }
 0x1c5   :  { %v1045_v58 = vpop.eup %1044  ;;  %v939_v59 = vadd.f32 -1.0, %v1043_v35  ;;  %1056 = vpow2.f32 %v817_v62 }
 0x1c6   :  { %v940_v60 = vadd.f32 -1.0, %v1045_v58  ;;  %v1047_v37 = vpop.eup %1046 }
 0x1c7   :  { %v843_v16 = vsel %vm763_vm3, %v1278_v55, %v939_v59  ;;  %v941_v0 = vadd.f32 -1.0, %v1047_v37  ;;  %v1049_v3 = vpop.eup %1048 }
 0x1c8   :  { %859 = vst [vmem:[%s1381_s3 + $0x40] sm:$0xff] %v843_v16  ;;  %v844_v63 = vsel %vm764_vm4, %v1280_v61, %v940_v60  ;;  %v942_v4 = vadd.f32 -1.0, %v1049_v3 }
 0x1c9   :  { %860 = vst.msk [vmem:[%s1381_s3 + $0x48] sm:$0xff] %vm95_vm0, %v844_v63  ;;  %v845_v55 = vsel %vm765_vm5, %v1284_v2, %v941_v0 }
 0x1ca   :  { %861 = vst [vmem:[%s1381_s3 + $0x50] sm:$0xff] %v845_v55  ;;  %v846_v6 = vsel %vm766_vm6, %v1302_v20, %v942_v4 }
 0x1cb   :  { %862 = vst.msk [vmem:[%s1381_s3 + $0x58] sm:$0xff] %vm95_vm0, %v846_v6 }
 0x1cc   :  { %v1051_v61 = vpop.eup %1050 }
 0x1cd   :  { %v943_v8 = vadd.f32 -1.0, %v1051_v61  ;;  %v1053_v11 = vpop.eup %1052 }
 0x1ce   :  { %v1055_v13 = vpop.eup %1054  ;;  %v944_v14 = vadd.f32 -1.0, %v1053_v11 }
 0x1cf   :  { %v847_v2 = vsel %vm767_vm7, %v1314_v31, %v943_v8  ;;  %v945_v15 = vadd.f32 -1.0, %v1055_v13  ;;  %v1057_v17 = vpop.eup %1056 }
 0x1d0   :  { %863 = vst [vmem:[%s1381_s3 + $0x60] sm:$0xff] %v847_v2  ;;  %v848_v1 = vsel %vm768_vm8, %v749_v42, %v944_v14  ;;  %v946_v19 = vadd.f32 -1.0, %v1057_v17 }
 0x1d1   :  { %864 = vst.msk [vmem:[%s1381_s3 + $0x68] sm:$0xff] %vm95_vm0, %v848_v1  ;;  %v849_v18 = vsel %vm769_vm9, %v751_v47, %v945_v15 }
 0x1d2   :  { %865 = vst [vmem:[%s1381_s3 + $0x70] sm:$0xff] %v849_v18  ;;  %v850_v20 = vsel %vm770_vm10, %v753_v53, %v946_v19 }
 0x1d3   :  { %866 = vst.msk [vmem:[%s1381_s3 + $0x78] sm:$0xff] %vm95_vm0, %v850_v20 }

</bundles_post_ra>
